<compile_context>
chip_gen: v7x
topology: tpu7x:2x2x1
jax: 0.10.0
libtpu: 0.0.40
codegen_flags: <defaults>
</compile_context>

<pallas_src>
import math

import jax
import jax.numpy as jnp
from jax.experimental import pallas as pl
from jax.experimental.pallas import tpu as pltpu

# ----------------------------- small-model config ---------------------------
BATCH      = 2
N_SAMPLES  = 1280          # pad_or_trim target (stand-in for 480000)
N_FFT      = 64
HOP        = 16
N_MELS     = 16
D_MODEL    = 32
N_HEADS    = 4
HEAD_DIM   = D_MODEL // N_HEADS
N_LAYERS   = 2
FFN_DIM    = 4 * D_MODEL
N_CLUSTERS = 8

T_MEL    = N_SAMPLES // HOP                   # 80 mel frames
T_ENC    = (T_MEL + 2 - 3) // 2 + 1           # 40 frames after stride-2 conv
BT       = BATCH * T_ENC                      # 80 encoder rows
OUT_LEN  = (8 * T_ENC) // 5                   # 64 frames after x8 then x0.2 nearest
NF       = N_FFT // 2 + 1                     # 33 rfft bins
NF_PAD   = 64                                 # bins padded so [cos|sin] is 128 lanes
PADDED   = N_SAMPLES + N_FFT                  # reflect-padded length (1344)
N_CHUNKS = PADDED // HOP                      # 84 hop-sized chunks
N_SHIFTS = N_FFT // HOP                       # 4 chunk shifts per frame


# ================================ Pallas kernels =============================

def _logmel_kernel(chunks_ref, dft_ref, filt_ref, o_ref):
    """Fused STFT + power + mel filterbank + log/clamp/normalize.

    Framing is expressed as 4 shifted matmuls of the hop-chunked signal against
    row-blocks of the windowed DFT matrix, so the overlapping frame matrix is
    never materialized.  The DFT RHS is [cos | sin] (128 lanes) so one matmul
    produces re in lanes [0,64) and im in lanes [64,128).
    """
    ch = chunks_ref[...]                                   # (B, N_CHUNKS, HOP)
    dft = dft_ref[...]                                     # (N_FFT, 2*NF_PAD), window folded in
    spec = jnp.zeros((BATCH * T_MEL, 2 * NF_PAD), jnp.float32)
    for s in range(N_SHIFTS):
        xs = ch[:, s:s + T_MEL, :].reshape(BATCH * T_MEL, HOP)
        spec = spec + jnp.dot(xs, dft[s * HOP:(s + 1) * HOP, :],
                              preferred_element_type=jnp.float32)
    re = spec[:, :NF_PAD]
    im = spec[:, NF_PAD:]
    power = re * re + im * im                              # zero beyond bin NF
    mel = jnp.dot(power, filt_ref[...], preferred_element_type=jnp.float32)
    log_spec = jnp.log(jnp.maximum(mel, 1e-10)) * jnp.float32(1.0 / math.log(10.0))
    # whisper.log_mel_spectrogram normalizes with the max over the whole batched
    # tensor (the reference module calls it once on the batched wav).
    gmax = jnp.max(jnp.max(log_spec, axis=-1, keepdims=True), axis=0, keepdims=True)
    log_spec = jnp.maximum(log_spec, gmax - 8.0)
    o_ref[...] = ((log_spec + 4.0) * 0.25).reshape(BATCH, T_MEL, N_MELS)


def _conv_stem_kernel(mel_ref, w1_ref, b1_ref, w2_ref, b2_ref, sel_ref, pos_ref, o_ref):
    """conv1(k=3,s=1)+GELU -> conv2(k=3,s=2)+GELU -> + pos-emb, fully fused.

    Each conv is 3 shifted-tap matmuls (no im2col lane concat); the stride-2
    downsample + batch row selection is a constant 0/1 matmul; pos_emb is
    pre-tiled over batch so the add is a plain VPU add.
    """
    x = mel_ref[...]                                       # (B, T_MEL, N_MELS)
    z_in = jnp.zeros((BATCH, 1, N_MELS), jnp.float32)
    xp = jnp.concatenate([z_in, x, z_in], axis=1)          # (B, T_MEL+2, N_MELS)
    w1 = w1_ref[...]
    acc1 = jnp.zeros((BATCH * T_MEL, D_MODEL), jnp.float32)
    for j in range(3):
        xj = xp[:, j:j + T_MEL, :].reshape(BATCH * T_MEL, N_MELS)
        acc1 = acc1 + jnp.dot(xj, w1[j * N_MELS:(j + 1) * N_MELS, :],
                              preferred_element_type=jnp.float32)
    # TODO(synk): PyTorch nn.GELU default is exact erf; tanh approx used for TPU lowering.
    h1 = jax.nn.gelu(acc1 + b1_ref[...], approximate=True).reshape(BATCH, T_MEL, D_MODEL)

    z_d = jnp.zeros((BATCH, 1, D_MODEL), jnp.float32)
    hp = jnp.concatenate([z_d, h1, z_d], axis=1)           # (B, T_MEL+2, D)
    w2 = w2_ref[...]
    acc2 = jnp.zeros((BATCH * T_MEL, D_MODEL), jnp.float32)
    for j in range(3):
        hj = hp[:, j:j + T_MEL, :].reshape(BATCH * T_MEL, D_MODEL)
        acc2 = acc2 + jnp.dot(hj, w2[j * D_MODEL:(j + 1) * D_MODEL, :],
                              preferred_element_type=jnp.float32)
    c2 = acc2 + b2_ref[...]                                # stride-1 conv2, all rows
    # stride-2 + per-batch row selection (constant 0/1 matmul), then GELU + pos.
    ds = jnp.dot(sel_ref[...], c2, preferred_element_type=jnp.float32)   # (BT, D)
    o_ref[...] = jax.nn.gelu(ds, approximate=True) + pos_ref[...]


def _encoder_kmeans_kernel(x_ref, mask_ref,
                           ln1g_ref, ln1b_ref, wqkv_ref, bqkv_ref, wo_ref, bo_ref,
                           ln2g_ref, ln2b_ref, fc1w_ref, fc1b_ref, fc2w_ref, fc2b_ref,
                           lnfg_ref, lnfb_ref, rs_ref, ct_ref, c_ref,
                           clusters_ref, quant_ref, res_ref):
    """One fused pre-LN transformer block per grid step (grid axis = layers).

    The residual stream lives in VMEM scratch `res_ref` across grid steps.  On
    the last step the final LayerNorm, the nearest-neighbor resample (constant
    selection matmul) and the kmeans argmax + embedding lookup run in place.
    """
    layer = pl.program_id(0)

    @pl.when(layer == 0)
    def _():
        res_ref[...] = x_ref[...]

    x = res_ref[...]                                       # (BT, D)

    def layernorm(z, g, b):
        mu = jnp.mean(z, axis=-1, keepdims=True)
        zc = z - mu
        var = jnp.mean(zc * zc, axis=-1, keepdims=True)
        return zc * jax.lax.rsqrt(var + 1e-5) * g + b

    # ---- self-attention (pre-LN), fused QKV projection ----
    h = layernorm(x, ln1g_ref[0], ln1b_ref[0])
    qkv = jnp.dot(h, wqkv_ref[0], preferred_element_type=jnp.float32) + bqkv_ref[0]
    q = qkv[:, 0 * D_MODEL:1 * D_MODEL]
    k = qkv[:, 1 * D_MODEL:2 * D_MODEL]
    v = qkv[:, 2 * D_MODEL:3 * D_MODEL]

    scale = 1.0 / math.sqrt(HEAD_DIM)
    bmask = mask_ref[...]                                  # (BT, BT): 0 same-batch, -1e30 cross
    lane = jax.lax.broadcasted_iota(jnp.int32, (1, D_MODEL), 1)

    # Batch folded into ONE QK^T / PV matmul per head via the additive
    # block-diagonal mask; heads handled with lane masks on one operand
    # (no reshape/transpose, and only one side of the contraction masked).
    attn = jnp.zeros((BT, D_MODEL), jnp.float32)
    for hh in range(N_HEADS):
        hmask = ((lane >= hh * HEAD_DIM) &
                 (lane < (hh + 1) * HEAD_DIM)).astype(jnp.float32)
        s = jax.lax.dot_general(q * hmask, k, (((1,), (1,)), ((), ())),
                                preferred_element_type=jnp.float32) * scale + bmask
        s = s - jnp.max(s, axis=-1, keepdims=True)
        p = jnp.exp(s)
        p = p * pl.reciprocal(jnp.sum(p, axis=-1, keepdims=True), approx=True)
        attn = attn + jnp.dot(p, v * hmask, preferred_element_type=jnp.float32)

    x = x + jnp.dot(attn, wo_ref[0], preferred_element_type=jnp.float32) + bo_ref[0]

    # ---- MLP (pre-LN) ----
    h = layernorm(x, ln2g_ref[0], ln2b_ref[0])
    h = jnp.dot(h, fc1w_ref[0], preferred_element_type=jnp.float32) + fc1b_ref[0]
    h = jax.nn.gelu(h, approximate=True)
    x = x + jnp.dot(h, fc2w_ref[0], preferred_element_type=jnp.float32) + fc2b_ref[0]

    res_ref[...] = x

    # ---- last layer: final LN + nearest resample + kmeans, fused in-call ----
    @pl.when(layer == pl.num_programs(0) - 1)
    def _():
        y = layernorm(x, lnfg_ref[...], lnfb_ref[...])                       # (BT, D)
        # F.interpolate(x8,'nearest') then (x0.2,'nearest') == gather at the
        # compile-time-constant indices src = (5*i)//8 -> 0/1 selection matmul.
        embed = jnp.dot(rs_ref[...], y, preferred_element_type=jnp.float32)  # (B*OUT_LEN, D)
        ct = ct_ref[...]                                                     # (D, C)
        xc = jnp.dot(embed, ct, preferred_element_type=jnp.float32)          # (M, C)
        c2 = jnp.sum(ct * ct, axis=0, keepdims=True)                         # (1, C)
        score = 2.0 * xc - c2            # argmax(score) == argmin ||x-c|| (sqrt,|x|^2 dropped)
        mx = jnp.max(score, axis=-1, keepdims=True)
        col = jax.lax.broadcasted_iota(jnp.int32, score.shape, 1)
        cand = jnp.where(score >= mx, col, N_CLUSTERS)                       # sentinel
        cl = jnp.min(cand, axis=-1, keepdims=True)                           # first argmax
        clusters_ref[...] = cl
        onehot = (col == cl).astype(jnp.float32)
        quant_ref[...] = jnp.dot(onehot, c_ref[...], preferred_element_type=jnp.float32)


# ================================ wrappers ===================================

def pad_or_trim(wav, length):
    n = wav.shape[-1]
    if n > length:
        return wav[..., :length]
    if n < length:
        return jnp.pad(wav, ((0, 0), (0, length - n)))
    return wav


def log_mel_spectrogram(wav, p):
    """whisper.log_mel_spectrogram (scaled down).  Returns (B, T_MEL, N_MELS)."""
    wav = pad_or_trim(wav, N_SAMPLES)
    padded = jnp.pad(wav, ((0, 0), (N_FFT // 2, N_FFT // 2)), mode="reflect")
    # Hop-sized chunks only (no overlap inflation); framing happens in-kernel.
    chunks = padded.reshape(BATCH, N_CHUNKS, HOP).astype(jnp.float32)
    return pl.pallas_call(
        _logmel_kernel,
        out_shape=jax.ShapeDtypeStruct((BATCH, T_MEL, N_MELS), jnp.float32),
        grid=(1,),
        in_specs=[pl.BlockSpec((BATCH, N_CHUNKS, HOP), lambda i: (0, 0, 0)),
                  pl.BlockSpec((N_FFT, 2 * NF_PAD), lambda i: (0, 0)),
                  pl.BlockSpec((NF_PAD, N_MELS), lambda i: (0, 0))],
        out_specs=pl.BlockSpec((BATCH, T_MEL, N_MELS), lambda i: (0, 0, 0)),
    )(chunks, p["dft"], p["mel_filt"])


def conv_stem(mel, p):
    """Both convs + GELUs + pos-emb add in a single pallas_call -> (BT, D)."""
    return pl.pallas_call(
        _conv_stem_kernel,
        out_shape=jax.ShapeDtypeStruct((BT, D_MODEL), jnp.float32),
        grid=(1,),
        in_specs=[pl.BlockSpec((BATCH, T_MEL, N_MELS), lambda i: (0, 0, 0)),
                  pl.BlockSpec((3 * N_MELS, D_MODEL), lambda i: (0, 0)),
                  pl.BlockSpec((1, D_MODEL), lambda i: (0, 0)),
                  pl.BlockSpec((3 * D_MODEL, D_MODEL), lambda i: (0, 0)),
                  pl.BlockSpec((1, D_MODEL), lambda i: (0, 0)),
                  pl.BlockSpec((BT, BATCH * T_MEL), lambda i: (0, 0)),
                  pl.BlockSpec((BT, D_MODEL), lambda i: (0, 0))],
        out_specs=pl.BlockSpec((BT, D_MODEL), lambda i: (0, 0)),
    )(mel, p["conv1_w"], p["conv1_b"], p["conv2_w"], p["conv2_b"],
      p["conv2_sel"], p["pos_emb"])


def encoder_kmeans(x0, p):
    """All transformer layers + final LN + resample + kmeans in one pallas_call."""
    L = p["wqkv"].shape[0]
    M = BATCH * OUT_LEN
    D = D_MODEL
    clusters, quant = pl.pallas_call(
        _encoder_kmeans_kernel,
        out_shape=(jax.ShapeDtypeStruct((M, 1), jnp.int32),
                   jax.ShapeDtypeStruct((M, D), jnp.float32)),
        grid=(L,),
        in_specs=[
            pl.BlockSpec((BT, D), lambda i: (0, 0)),                    # x0 (layer 0 only)
            pl.BlockSpec((BT, BT), lambda i: (0, 0)),                   # block-diag batch mask
            pl.BlockSpec((1, 1, D), lambda i: (i, 0, 0)),               # ln1_g
            pl.BlockSpec((1, 1, D), lambda i: (i, 0, 0)),               # ln1_b
            pl.BlockSpec((1, D, 3 * D), lambda i: (i, 0, 0)),           # wqkv (fused)
            pl.BlockSpec((1, 1, 3 * D), lambda i: (i, 0, 0)),           # bqkv
            pl.BlockSpec((1, D, D), lambda i: (i, 0, 0)),               # wo
            pl.BlockSpec((1, 1, D), lambda i: (i, 0, 0)),               # bo
            pl.BlockSpec((1, 1, D), lambda i: (i, 0, 0)),               # ln2_g
            pl.BlockSpec((1, 1, D), lambda i: (i, 0, 0)),               # ln2_b
            pl.BlockSpec((1, D, FFN_DIM), lambda i: (i, 0, 0)),         # fc1_w
            pl.BlockSpec((1, 1, FFN_DIM), lambda i: (i, 0, 0)),         # fc1_b
            pl.BlockSpec((1, FFN_DIM, D), lambda i: (i, 0, 0)),         # fc2_w
            pl.BlockSpec((1, 1, D), lambda i: (i, 0, 0)),               # fc2_b
            pl.BlockSpec((1, D), lambda i: (0, 0)),                     # ln_f_g
            pl.BlockSpec((1, D), lambda i: (0, 0)),                     # ln_f_b
            pl.BlockSpec((M, BT), lambda i: (0, 0)),                    # resample selection
            pl.BlockSpec((D, N_CLUSTERS), lambda i: (0, 0)),            # centers^T
            pl.BlockSpec((N_CLUSTERS, D), lambda i: (0, 0)),            # centers
        ],
        out_specs=(pl.BlockSpec((M, 1), lambda i: (0, 0)),
                   pl.BlockSpec((M, D), lambda i: (0, 0))),
        scratch_shapes=[pltpu.VMEM((BT, D), jnp.float32)],
        # TODO(synk): on v7x add a leading "parallel" batch/row axis (per-core residual
        # scratch) for the 2nd TensorCore; at real scale stream bf16 weights, tile FFN/KV
        # with f32 accumulators, and set vmem_limit_bytes explicitly.
        compiler_params=pltpu.CompilerParams(dimension_semantics=("arbitrary",)),
    )(x0, p["attn_mask"],
      p["ln1_g"], p["ln1_b"], p["wqkv"], p["bqkv"], p["wo"], p["bo"],
      p["ln2_g"], p["ln2_b"], p["fc1_w"], p["fc1_b"], p["fc2_w"], p["fc2_b"],
      p["ln_f_g"], p["ln_f_b"], p["resample_sel"],
      p["cluster_centers_t"], p["cluster_centers"])
    return clusters[:, 0], quant


def whisper_kmeans_forward(wav, params):
    """Equivalent of WhisperWithKmeans.forward(wav, flatten=True) — 3 launches."""
    mel = log_mel_spectrogram(wav, params)                   # (B, 80, 16)
    x0 = conv_stem(mel, params)                              # (BT, 32)
    clusters_flat, quant_flat = encoder_kmeans(x0, params)   # (B*64,), (B*64, 32)
    clusters = clusters_flat.reshape(BATCH, OUT_LEN)
    quantize = quant_flat.reshape(BATCH, OUT_LEN, D_MODEL)
    return clusters, quantize


# ========================= constants & parameter init ========================

def sinusoids(length, channels, max_timescale=10000.0):
    half = channels // 2
    inc = math.log(max_timescale) / (half - 1)
    inv_ts = jnp.exp(-inc * jnp.arange(half, dtype=jnp.float32))
    t = jnp.arange(length, dtype=jnp.float32)[:, None] * inv_ts[None, :]
    return jnp.concatenate([jnp.sin(t), jnp.cos(t)], axis=1).astype(jnp.float32)


def mel_filterbank(n_mels, n_freqs):
    # Synthetic triangular filterbank (deterministic stand-in for librosa mel).
    peaks = jnp.linspace(0.0, n_freqs - 1.0, n_mels + 2)
    f = jnp.arange(n_freqs, dtype=jnp.float32)[None, :]
    lo, ce, hi = peaks[:-2][:, None], peaks[1:-1][:, None], peaks[2:][:, None]
    up = (f - lo) / jnp.maximum(ce - lo, 1e-6)
    dn = (hi - f) / jnp.maximum(hi - ce, 1e-6)
    return jnp.clip(jnp.minimum(up, dn), 0.0, None).astype(jnp.float32)  # (n_mels, n_freqs)


def _dft_matrix():
    """Windowed [cos | sin] DFT matrix, (N_FFT, 2*NF_PAD); bins >= NF zeroed."""
    window = (0.5 - 0.5 * jnp.cos(2.0 * jnp.pi * jnp.arange(N_FFT) / N_FFT)).astype(jnp.float32)
    n = jnp.arange(N_FFT, dtype=jnp.float32)[:, None]
    f = jnp.arange(NF_PAD, dtype=jnp.float32)[None, :]
    ang = 2.0 * jnp.pi * n * f / N_FFT
    valid = (jnp.arange(NF_PAD) < NF)[None, :]
    cos_m = jnp.where(valid, jnp.cos(ang), 0.0)
    sin_m = jnp.where(valid, -jnp.sin(ang), 0.0)
    return (jnp.concatenate([cos_m, sin_m], axis=1) * window[:, None]).astype(jnp.float32)


def _mel_filt_padded():
    filt = mel_filterbank(N_MELS, NF).T                      # (NF, N_MELS)
    return jnp.pad(filt, ((0, NF_PAD - NF), (0, 0))).astype(jnp.float32)


def _conv2_sel():
    """(BT, B*T_MEL) 0/1 matrix: stride-2 + per-batch row selection."""
    r = jnp.arange(BT)
    col = (r // T_ENC) * T_MEL + 2 * (r % T_ENC)
    return (jnp.arange(BATCH * T_MEL)[None, :] == col[:, None]).astype(jnp.float32)


def _resample_sel():
    """(B*OUT_LEN, BT) 0/1 matrix: nearest x8 then x0.2 == gather at (5*i)//8."""
    src = (5 * jnp.arange(OUT_LEN)) // 8
    r = jnp.arange(BATCH * OUT_LEN)
    col = (r // OUT_LEN) * T_ENC + src[r % OUT_LEN]
    return (jnp.arange(BT)[None, :] == col[:, None]).astype(jnp.float32)


def _attn_mask():
    """(BT, BT) additive mask: 0 within a batch item, -1e30 across items."""
    b = jnp.arange(BT) // T_ENC
    return jnp.where(b[:, None] == b[None, :], 0.0, -1e30).astype(jnp.float32)


def init_params(key):
    keys = iter(jax.random.split(key, 16))

    def nrm(shape, scale=0.02):
        return scale * jax.random.normal(next(keys), shape, dtype=jnp.float32)

    L, D = N_LAYERS, D_MODEL
    centers = jax.random.normal(next(keys), (N_CLUSTERS, D), dtype=jnp.float32)

    return dict(
        # constants consumed by the kernels (built once)
        dft=_dft_matrix(), mel_filt=_mel_filt_padded(),
        conv2_sel=_conv2_sel(), resample_sel=_resample_sel(), attn_mask=_attn_mask(),
        pos_emb=jnp.tile(sinusoids(T_ENC, D), (BATCH, 1)),   # pre-tiled over batch
        # conv stem
        conv1_w=nrm((3 * N_MELS, D)), conv1_b=jnp.zeros((1, D), jnp.float32),
        conv2_w=nrm((3 * D, D)),      conv2_b=jnp.zeros((1, D), jnp.float32),
        # per-layer weights stacked on a leading layer axis (one DMA per grid step)
        ln1_g=jnp.ones((L, 1, D), jnp.float32), ln1_b=jnp.zeros((L, 1, D), jnp.float32),
        wqkv=nrm((L, D, 3 * D)),                bqkv=jnp.zeros((L, 1, 3 * D), jnp.float32),
        wo=nrm((L, D, D)),                      bo=jnp.zeros((L, 1, D), jnp.float32),
        ln2_g=jnp.ones((L, 1, D), jnp.float32), ln2_b=jnp.zeros((L, 1, D), jnp.float32),
        fc1_w=nrm((L, D, FFN_DIM)),             fc1_b=jnp.zeros((L, 1, FFN_DIM), jnp.float32),
        fc2_w=nrm((L, FFN_DIM, D)),             fc2_b=jnp.zeros((L, 1, D), jnp.float32),
        ln_f_g=jnp.ones((1, D), jnp.float32),   ln_f_b=jnp.zeros((1, D), jnp.float32),
        cluster_centers=centers,
        cluster_centers_t=centers.T,
    )


# ==================================== main ===================================

if __name__ == "__main__":
    key = jax.random.PRNGKey(0)
    k_wav, k_param = jax.random.split(key)
    wav = 0.5 * jax.random.normal(k_wav, (BATCH, 1000), dtype=jnp.float32)
    params = init_params(k_param)

    fwd = jax.jit(whisper_kmeans_forward)
    clusters, quantize = jax.block_until_ready(fwd(wav, params))

    assert clusters.shape == (BATCH, OUT_LEN) and clusters.dtype == jnp.int32
    assert quantize.shape == (BATCH, OUT_LEN, D_MODEL)
    # quantize rows must equal the selected cluster centers
    ref_q = params["cluster_centers"][clusters]
    assert bool(jnp.allclose(quantize, ref_q, atol=1e-5))

    print("KERNEL_OK")
</pallas_src>

<mosaic_0001>
module attributes {stable_mosaic.version = 11 : i64} {
  func.func @_logmel_kernel(%arg0: i32, %arg1: memref<2x84x16xf32, #tpu.memory_space<vmem>>, %arg2: memref<64x128xf32, #tpu.memory_space<vmem>>, %arg3: memref<64x16xf32, #tpu.memory_space<vmem>>, %arg4: memref<2x80x16xf32, #tpu.memory_space<vmem>>) attributes {dimension_semantics = [#tpu.dimension_semantics<arbitrary>], iteration_bounds = array<i64: 1>, scalar_prefetch = 0 : i64, scratch_operands = 0 : i64, tpu.core_type = #tpu.core_type<tc>, window_params = [{pipeline_mode = #tpu.pipeline_mode<synchronous>, transform_indices = @transform_0, window_bounds = array<i64: 2, 84, 16>}, {pipeline_mode = #tpu.pipeline_mode<synchronous>, transform_indices = @transform_1, window_bounds = array<i64: 64, 128>}, {pipeline_mode = #tpu.pipeline_mode<synchronous>, transform_indices = @transform_2, window_bounds = array<i64: 64, 16>}, {pipeline_mode = #tpu.pipeline_mode<synchronous>, transform_indices = @transform_3, window_bounds = array<i64: 2, 80, 16>}]} {
    %c0 = arith.constant 0 : index
    %c0_0 = arith.constant 0 : index
    %c0_1 = arith.constant 0 : index
    %0 = vector.load %arg1[%c0, %c0_0, %c0_1] : memref<2x84x16xf32, #tpu.memory_space<vmem>>, vector<2x84x16xf32>
    %c0_2 = arith.constant 0 : index
    %c0_3 = arith.constant 0 : index
    %1 = vector.load %arg2[%c0_2, %c0_3] : memref<64x128xf32, #tpu.memory_space<vmem>>, vector<64x128xf32>
    %cst = arith.constant 0.000000e+00 : f32
    %2 = vector.broadcast %cst : f32 to vector<160x128xf32>
    %3 = vector.extract_strided_slice %0 {offsets = [0, 0, 0], sizes = [2, 80, 16], strides = [1, 1, 1]} : vector<2x84x16xf32> to vector<2x80x16xf32>
    %4 = vector.shape_cast %3 : vector<2x80x16xf32> to vector<160x16xf32>
    %5 = vector.extract_strided_slice %1 {offsets = [0, 0], sizes = [16, 128], strides = [1, 1]} : vector<64x128xf32> to vector<16x128xf32>
    %cst_4 = arith.constant dense<0.000000e+00> : vector<160x128xf32>
    %6 = tpu.matmul %4, %5, %cst_4 {dimension_numbers = #tpu.dot_dimension_numbers<[1], [0], [0], [1], [0, 0, 1, 1], [], []>} : vector<160x16xf32>, vector<16x128xf32>, vector<160x128xf32> -> vector<160x128xf32>
    %7 = arith.addf %2, %6 : vector<160x128xf32>
    %8 = vector.extract_strided_slice %0 {offsets = [0, 1, 0], sizes = [2, 80, 16], strides = [1, 1, 1]} : vector<2x84x16xf32> to vector<2x80x16xf32>
    %9 = vector.shape_cast %8 : vector<2x80x16xf32> to vector<160x16xf32>
    %10 = vector.extract_strided_slice %1 {offsets = [16, 0], sizes = [16, 128], strides = [1, 1]} : vector<64x128xf32> to vector<16x128xf32>
    %cst_5 = arith.constant dense<0.000000e+00> : vector<160x128xf32>
    %11 = tpu.matmul %9, %10, %cst_5 {dimension_numbers = #tpu.dot_dimension_numbers<[1], [0], [0], [1], [0, 0, 1, 1], [], []>} : vector<160x16xf32>, vector<16x128xf32>, vector<160x128xf32> -> vector<160x128xf32>
    %12 = arith.addf %7, %11 : vector<160x128xf32>
    %13 = vector.extract_strided_slice %0 {offsets = [0, 2, 0], sizes = [2, 80, 16], strides = [1, 1, 1]} : vector<2x84x16xf32> to vector<2x80x16xf32>
    %14 = vector.shape_cast %13 : vector<2x80x16xf32> to vector<160x16xf32>
    %15 = vector.extract_strided_slice %1 {offsets = [32, 0], sizes = [16, 128], strides = [1, 1]} : vector<64x128xf32> to vector<16x128xf32>
    %cst_6 = arith.constant dense<0.000000e+00> : vector<160x128xf32>
    %16 = tpu.matmul %14, %15, %cst_6 {dimension_numbers = #tpu.dot_dimension_numbers<[1], [0], [0], [1], [0, 0, 1, 1], [], []>} : vector<160x16xf32>, vector<16x128xf32>, vector<160x128xf32> -> vector<160x128xf32>
    %17 = arith.addf %12, %16 : vector<160x128xf32>
    %18 = vector.extract_strided_slice %0 {offsets = [0, 3, 0], sizes = [2, 80, 16], strides = [1, 1, 1]} : vector<2x84x16xf32> to vector<2x80x16xf32>
    %19 = vector.shape_cast %18 : vector<2x80x16xf32> to vector<160x16xf32>
    %20 = vector.extract_strided_slice %1 {offsets = [48, 0], sizes = [16, 128], strides = [1, 1]} : vector<64x128xf32> to vector<16x128xf32>
    %cst_7 = arith.constant dense<0.000000e+00> : vector<160x128xf32>
    %21 = tpu.matmul %19, %20, %cst_7 {dimension_numbers = #tpu.dot_dimension_numbers<[1], [0], [0], [1], [0, 0, 1, 1], [], []>} : vector<160x16xf32>, vector<16x128xf32>, vector<160x128xf32> -> vector<160x128xf32>
    %22 = arith.addf %17, %21 : vector<160x128xf32>
    %23 = vector.extract_strided_slice %22 {offsets = [0, 0], sizes = [160, 64], strides = [1, 1]} : vector<160x128xf32> to vector<160x64xf32>
    %24 = vector.extract_strided_slice %22 {offsets = [0, 64], sizes = [160, 64], strides = [1, 1]} : vector<160x128xf32> to vector<160x64xf32>
    %25 = arith.mulf %23, %23 : vector<160x64xf32>
    %26 = arith.mulf %24, %24 : vector<160x64xf32>
    %27 = arith.addf %25, %26 : vector<160x64xf32>
    %c0_8 = arith.constant 0 : index
    %c0_9 = arith.constant 0 : index
    %28 = vector.load %arg3[%c0_8, %c0_9] : memref<64x16xf32, #tpu.memory_space<vmem>>, vector<64x16xf32>
    %cst_10 = arith.constant dense<0.000000e+00> : vector<160x16xf32>
    %29 = tpu.matmul %27, %28, %cst_10 {dimension_numbers = #tpu.dot_dimension_numbers<[1], [0], [0], [1], [0, 0, 1, 1], [], []>} : vector<160x64xf32>, vector<64x16xf32>, vector<160x16xf32> -> vector<160x16xf32>
    %cst_11 = arith.constant 1.000000e-10 : f32
    %30 = vector.broadcast %cst_11 : f32 to vector<160x16xf32>
    %31 = arith.maximumf %29, %30 : vector<160x16xf32>
    %32 = math.log %31 : vector<160x16xf32>
    %cst_12 = arith.constant 0.434294492 : f32
    %33 = vector.broadcast %cst_12 : f32 to vector<160x16xf32>
    %34 = arith.mulf %32, %33 : vector<160x16xf32>
    %cst_13 = arith.constant dense<0xFF800000> : vector<160xf32>
    %35 = vector.multi_reduction <maximumf>, %34, %cst_13 [1] : vector<160x16xf32> to vector<160xf32>
    %36 = vector.shape_cast %35 : vector<160xf32> to vector<160x1xf32>
    %cst_14 = arith.constant dense<0xFF800000> : vector<1xf32>
    %37 = vector.multi_reduction <maximumf>, %36, %cst_14 [0] : vector<160x1xf32> to vector<1xf32>
    %38 = vector.shape_cast %37 : vector<1xf32> to vector<1x1xf32>
    %cst_15 = arith.constant 8.000000e+00 : f32
    %39 = vector.broadcast %cst_15 : f32 to vector<1x1xf32>
    %40 = arith.subf %38, %39 : vector<1x1xf32>
    %41 = vector.broadcast %40 : vector<1x1xf32> to vector<160x16xf32>
    %42 = arith.maximumf %34, %41 : vector<160x16xf32>
    %cst_16 = arith.constant 4.000000e+00 : f32
    %43 = vector.broadcast %cst_16 : f32 to vector<160x16xf32>
    %44 = arith.addf %42, %43 : vector<160x16xf32>
    %cst_17 = arith.constant 2.500000e-01 : f32
    %45 = vector.broadcast %cst_17 : f32 to vector<160x16xf32>
    %46 = arith.mulf %44, %45 : vector<160x16xf32>
    %47 = vector.shape_cast %46 : vector<160x16xf32> to vector<2x80x16xf32>
    %c0_18 = arith.constant 0 : index
    %c0_19 = arith.constant 0 : index
    %c0_20 = arith.constant 0 : index
    %48 = vector.load %arg4[%c0_18, %c0_19, %c0_20] : memref<2x80x16xf32, #tpu.memory_space<vmem>>, vector<2x80x16xf32>
    tpu.vector_store %arg4[%c0_18, %c0_19, %c0_20], %47 {strides = array<i32>} : memref<2x80x16xf32, #tpu.memory_space<vmem>>, vector<2x80x16xf32>,
    return
  }
  func.func @transform_0(%arg0: i32) -> (i32, i32, i32) {
    %c0_i32 = arith.constant 0 : i32
    %c0_i32_0 = arith.constant 0 : i32
    %c0_i32_1 = arith.constant 0 : i32
    %c0_i32_2 = arith.constant 0 : i32
    return %c0_i32, %c0_i32_0, %c0_i32_1 : i32, i32, i32
  }
  func.func @transform_1(%arg0: i32) -> (i32, i32) {
    %c0_i32 = arith.constant 0 : i32
    %c0_i32_0 = arith.constant 0 : i32
    %c0_i32_1 = arith.constant 0 : i32
    return %c0_i32, %c0_i32_0 : i32, i32
  }
  func.func @transform_2(%arg0: i32) -> (i32, i32) {
    %c0_i32 = arith.constant 0 : i32
    %c0_i32_0 = arith.constant 0 : i32
    %c0_i32_1 = arith.constant 0 : i32
    return %c0_i32, %c0_i32_0 : i32, i32
  }
  func.func @transform_3(%arg0: i32) -> (i32, i32, i32) {
    %c0_i32 = arith.constant 0 : i32
    %c0_i32_0 = arith.constant 0 : i32
    %c0_i32_1 = arith.constant 0 : i32
    %c0_i32_2 = arith.constant 0 : i32
    return %c0_i32, %c0_i32_0, %c0_i32_1 : i32, i32, i32
  }
}

module attributes {stable_mosaic.version = 11 : i64} {
  func.func @_conv_stem_kernel(%arg0: i32, %arg1: memref<2x80x16xf32, #tpu.memory_space<vmem>>, %arg2: memref<48x32xf32, #tpu.memory_space<vmem>>, %arg3: memref<1x32xf32, #tpu.memory_space<vmem>>, %arg4: memref<96x32xf32, #tpu.memory_space<vmem>>, %arg5: memref<1x32xf32, #tpu.memory_space<vmem>>, %arg6: memref<80x160xf32, #tpu.memory_space<vmem>>, %arg7: memref<80x32xf32, #tpu.memory_space<vmem>>, %arg8: memref<80x32xf32, #tpu.memory_space<vmem>>) attributes {dimension_semantics = [#tpu.dimension_semantics<arbitrary>], iteration_bounds = array<i64: 1>, scalar_prefetch = 0 : i64, scratch_operands = 0 : i64, tpu.core_type = #tpu.core_type<tc>, window_params = [{pipeline_mode = #tpu.pipeline_mode<synchronous>, transform_indices = @transform_0, window_bounds = array<i64: 2, 80, 16>}, {pipeline_mode = #tpu.pipeline_mode<synchronous>, transform_indices = @transform_1, window_bounds = array<i64: 48, 32>}, {pipeline_mode = #tpu.pipeline_mode<synchronous>, transform_indices = @transform_2, window_bounds = array<i64: 1, 32>}, {pipeline_mode = #tpu.pipeline_mode<synchronous>, transform_indices = @transform_3, window_bounds = array<i64: 96, 32>}, {pipeline_mode = #tpu.pipeline_mode<synchronous>, transform_indices = @transform_4, window_bounds = array<i64: 1, 32>}, {pipeline_mode = #tpu.pipeline_mode<synchronous>, transform_indices = @transform_5, window_bounds = array<i64: 80, 160>}, {pipeline_mode = #tpu.pipeline_mode<synchronous>, transform_indices = @transform_6, window_bounds = array<i64: 80, 32>}, {pipeline_mode = #tpu.pipeline_mode<synchronous>, transform_indices = @transform_7, window_bounds = array<i64: 80, 32>}]} {
    %c0 = arith.constant 0 : index
    %c0_0 = arith.constant 0 : index
    %c0_1 = arith.constant 0 : index
    %0 = vector.load %arg1[%c0, %c0_0, %c0_1] : memref<2x80x16xf32, #tpu.memory_space<vmem>>, vector<2x80x16xf32>
    %cst = arith.constant 0.000000e+00 : f32
    %1 = vector.broadcast %cst : f32 to vector<2x1x16xf32>
    %2 = tpu.concatenate %1, %0, %1 in 1 : vector<2x1x16xf32>, vector<2x80x16xf32>, vector<2x1x16xf32> -> vector<2x82x16xf32>
    %c0_2 = arith.constant 0 : index
    %c0_3 = arith.constant 0 : index
    %3 = vector.load %arg2[%c0_2, %c0_3] : memref<48x32xf32, #tpu.memory_space<vmem>>, vector<48x32xf32>
    %cst_4 = arith.constant 0.000000e+00 : f32
    %4 = vector.broadcast %cst_4 : f32 to vector<160x32xf32>
    %5 = vector.extract_strided_slice %2 {offsets = [0, 0, 0], sizes = [2, 80, 16], strides = [1, 1, 1]} : vector<2x82x16xf32> to vector<2x80x16xf32>
    %6 = vector.shape_cast %5 : vector<2x80x16xf32> to vector<160x16xf32>
    %7 = vector.extract_strided_slice %3 {offsets = [0, 0], sizes = [16, 32], strides = [1, 1]} : vector<48x32xf32> to vector<16x32xf32>
    %cst_5 = arith.constant dense<0.000000e+00> : vector<160x32xf32>
    %8 = tpu.matmul %6, %7, %cst_5 {dimension_numbers = #tpu.dot_dimension_numbers<[1], [0], [0], [1], [0, 0, 1, 1], [], []>} : vector<160x16xf32>, vector<16x32xf32>, vector<160x32xf32> -> vector<160x32xf32>
    %9 = arith.addf %4, %8 : vector<160x32xf32>
    %10 = vector.extract_strided_slice %2 {offsets = [0, 1, 0], sizes = [2, 80, 16], strides = [1, 1, 1]} : vector<2x82x16xf32> to vector<2x80x16xf32>
    %11 = vector.shape_cast %10 : vector<2x80x16xf32> to vector<160x16xf32>
    %12 = vector.extract_strided_slice %3 {offsets = [16, 0], sizes = [16, 32], strides = [1, 1]} : vector<48x32xf32> to vector<16x32xf32>
    %cst_6 = arith.constant dense<0.000000e+00> : vector<160x32xf32>
    %13 = tpu.matmul %11, %12, %cst_6 {dimension_numbers = #tpu.dot_dimension_numbers<[1], [0], [0], [1], [0, 0, 1, 1], [], []>} : vector<160x16xf32>, vector<16x32xf32>, vector<160x32xf32> -> vector<160x32xf32>
    %14 = arith.addf %9, %13 : vector<160x32xf32>
    %15 = vector.extract_strided_slice %2 {offsets = [0, 2, 0], sizes = [2, 80, 16], strides = [1, 1, 1]} : vector<2x82x16xf32> to vector<2x80x16xf32>
    %16 = vector.shape_cast %15 : vector<2x80x16xf32> to vector<160x16xf32>
    %17 = vector.extract_strided_slice %3 {offsets = [32, 0], sizes = [16, 32], strides = [1, 1]} : vector<48x32xf32> to vector<16x32xf32>
    %cst_7 = arith.constant dense<0.000000e+00> : vector<160x32xf32>
    %18 = tpu.matmul %16, %17, %cst_7 {dimension_numbers = #tpu.dot_dimension_numbers<[1], [0], [0], [1], [0, 0, 1, 1], [], []>} : vector<160x16xf32>, vector<16x32xf32>, vector<160x32xf32> -> vector<160x32xf32>
    %19 = arith.addf %14, %18 : vector<160x32xf32>
    %c0_8 = arith.constant 0 : index
    %c0_9 = arith.constant 0 : index
    %20 = vector.load %arg3[%c0_8, %c0_9] : memref<1x32xf32, #tpu.memory_space<vmem>>, vector<1x32xf32>
    %21 = vector.broadcast %20 : vector<1x32xf32> to vector<160x32xf32>
    %22 = arith.addf %19, %21 : vector<160x32xf32>
    %23 = arith.mulf %22, %22 : vector<160x32xf32>
    %24 = arith.mulf %22, %23 : vector<160x32xf32>
    %cst_10 = arith.constant 4.471500e-02 : f32
    %25 = vector.broadcast %cst_10 : f32 to vector<160x32xf32>
    %26 = arith.mulf %25, %24 : vector<160x32xf32>
    %27 = arith.addf %22, %26 : vector<160x32xf32>
    %cst_11 = arith.constant 0.797884583 : f32
    %28 = vector.broadcast %cst_11 : f32 to vector<160x32xf32>
    %29 = arith.mulf %28, %27 : vector<160x32xf32>
    %30 = math.tanh %29 : vector<160x32xf32>
    %cst_12 = arith.constant 1.000000e+00 : f32
    %31 = vector.broadcast %cst_12 : f32 to vector<160x32xf32>
    %32 = arith.addf %31, %30 : vector<160x32xf32>
    %cst_13 = arith.constant 5.000000e-01 : f32
    %33 = vector.broadcast %cst_13 : f32 to vector<160x32xf32>
    %34 = arith.mulf %33, %32 : vector<160x32xf32>
    %35 = arith.mulf %22, %34 : vector<160x32xf32>
    %36 = vector.shape_cast %35 : vector<160x32xf32> to vector<2x80x32xf32>
    %cst_14 = arith.constant 0.000000e+00 : f32
    %37 = vector.broadcast %cst_14 : f32 to vector<2x1x32xf32>
    %38 = tpu.concatenate %37, %36, %37 in 1 : vector<2x1x32xf32>, vector<2x80x32xf32>, vector<2x1x32xf32> -> vector<2x82x32xf32>
    %c0_15 = arith.constant 0 : index
    %c0_16 = arith.constant 0 : index
    %39 = vector.load %arg4[%c0_15, %c0_16] : memref<96x32xf32, #tpu.memory_space<vmem>>, vector<96x32xf32>
    %cst_17 = arith.constant 0.000000e+00 : f32
    %40 = vector.broadcast %cst_17 : f32 to vector<160x32xf32>
    %41 = vector.extract_strided_slice %38 {offsets = [0, 0, 0], sizes = [2, 80, 32], strides = [1, 1, 1]} : vector<2x82x32xf32> to vector<2x80x32xf32>
    %42 = vector.shape_cast %41 : vector<2x80x32xf32> to vector<160x32xf32>
    %43 = vector.extract_strided_slice %39 {offsets = [0, 0], sizes = [32, 32], strides = [1, 1]} : vector<96x32xf32> to vector<32x32xf32>
    %cst_18 = arith.constant dense<0.000000e+00> : vector<160x32xf32>
    %44 = tpu.matmul %42, %43, %cst_18 {dimension_numbers = #tpu.dot_dimension_numbers<[1], [0], [0], [1], [0, 0, 1, 1], [], []>} : vector<160x32xf32>, vector<32x32xf32>, vector<160x32xf32> -> vector<160x32xf32>
    %45 = arith.addf %40, %44 : vector<160x32xf32>
    %46 = vector.extract_strided_slice %38 {offsets = [0, 1, 0], sizes = [2, 80, 32], strides = [1, 1, 1]} : vector<2x82x32xf32> to vector<2x80x32xf32>
    %47 = vector.shape_cast %46 : vector<2x80x32xf32> to vector<160x32xf32>
    %48 = vector.extract_strided_slice %39 {offsets = [32, 0], sizes = [32, 32], strides = [1, 1]} : vector<96x32xf32> to vector<32x32xf32>
    %cst_19 = arith.constant dense<0.000000e+00> : vector<160x32xf32>
    %49 = tpu.matmul %47, %48, %cst_19 {dimension_numbers = #tpu.dot_dimension_numbers<[1], [0], [0], [1], [0, 0, 1, 1], [], []>} : vector<160x32xf32>, vector<32x32xf32>, vector<160x32xf32> -> vector<160x32xf32>
    %50 = arith.addf %45, %49 : vector<160x32xf32>
    %51 = vector.extract_strided_slice %38 {offsets = [0, 2, 0], sizes = [2, 80, 32], strides = [1, 1, 1]} : vector<2x82x32xf32> to vector<2x80x32xf32>
    %52 = vector.shape_cast %51 : vector<2x80x32xf32> to vector<160x32xf32>
    %53 = vector.extract_strided_slice %39 {offsets = [64, 0], sizes = [32, 32], strides = [1, 1]} : vector<96x32xf32> to vector<32x32xf32>
    %cst_20 = arith.constant dense<0.000000e+00> : vector<160x32xf32>
    %54 = tpu.matmul %52, %53, %cst_20 {dimension_numbers = #tpu.dot_dimension_numbers<[1], [0], [0], [1], [0, 0, 1, 1], [], []>} : vector<160x32xf32>, vector<32x32xf32>, vector<160x32xf32> -> vector<160x32xf32>
    %55 = arith.addf %50, %54 : vector<160x32xf32>
    %c0_21 = arith.constant 0 : index
    %c0_22 = arith.constant 0 : index
    %56 = vector.load %arg5[%c0_21, %c0_22] : memref<1x32xf32, #tpu.memory_space<vmem>>, vector<1x32xf32>
    %57 = vector.broadcast %56 : vector<1x32xf32> to vector<160x32xf32>
    %58 = arith.addf %55, %57 : vector<160x32xf32>
    %c0_23 = arith.constant 0 : index
    %c0_24 = arith.constant 0 : index
    %59 = vector.load %arg6[%c0_23, %c0_24] : memref<80x160xf32, #tpu.memory_space<vmem>>, vector<80x160xf32>
    %cst_25 = arith.constant dense<0.000000e+00> : vector<80x32xf32>
    %60 = tpu.matmul %59, %58, %cst_25 {dimension_numbers = #tpu.dot_dimension_numbers<[1], [0], [0], [1], [0, 0, 1, 1], [], []>} : vector<80x160xf32>, vector<160x32xf32>, vector<80x32xf32> -> vector<80x32xf32>
    %61 = arith.mulf %60, %60 : vector<80x32xf32>
    %62 = arith.mulf %60, %61 : vector<80x32xf32>
    %cst_26 = arith.constant 4.471500e-02 : f32
    %63 = vector.broadcast %cst_26 : f32 to vector<80x32xf32>
    %64 = arith.mulf %63, %62 : vector<80x32xf32>
    %65 = arith.addf %60, %64 : vector<80x32xf32>
    %cst_27 = arith.constant 0.797884583 : f32
    %66 = vector.broadcast %cst_27 : f32 to vector<80x32xf32>
    %67 = arith.mulf %66, %65 : vector<80x32xf32>
    %68 = math.tanh %67 : vector<80x32xf32>
    %cst_28 = arith.constant 1.000000e+00 : f32
    %69 = vector.broadcast %cst_28 : f32 to vector<80x32xf32>
    %70 = arith.addf %69, %68 : vector<80x32xf32>
    %cst_29 = arith.constant 5.000000e-01 : f32
    %71 = vector.broadcast %cst_29 : f32 to vector<80x32xf32>
    %72 = arith.mulf %71, %70 : vector<80x32xf32>
    %73 = arith.mulf %60, %72 : vector<80x32xf32>
    %c0_30 = arith.constant 0 : index
    %c0_31 = arith.constant 0 : index
    %74 = vector.load %arg7[%c0_30, %c0_31] : memref<80x32xf32, #tpu.memory_space<vmem>>, vector<80x32xf32>
    %75 = arith.addf %73, %74 : vector<80x32xf32>
    %c0_32 = arith.constant 0 : index
    %c0_33 = arith.constant 0 : index
    %76 = vector.load %arg8[%c0_32, %c0_33] : memref<80x32xf32, #tpu.memory_space<vmem>>, vector<80x32xf32>
    tpu.vector_store %arg8[%c0_32, %c0_33], %75 {strides = array<i32>} : memref<80x32xf32, #tpu.memory_space<vmem>>, vector<80x32xf32>,
    return
  }
  func.func @transform_0(%arg0: i32) -> (i32, i32, i32) {
    %c0_i32 = arith.constant 0 : i32
    %c0_i32_0 = arith.constant 0 : i32
    %c0_i32_1 = arith.constant 0 : i32
    %c0_i32_2 = arith.constant 0 : i32
    return %c0_i32, %c0_i32_0, %c0_i32_1 : i32, i32, i32
  }
  func.func @transform_1(%arg0: i32) -> (i32, i32) {
    %c0_i32 = arith.constant 0 : i32
    %c0_i32_0 = arith.constant 0 : i32
    %c0_i32_1 = arith.constant 0 : i32
    return %c0_i32, %c0_i32_0 : i32, i32
  }
  func.func @transform_2(%arg0: i32) -> (i32, i32) {
    %c0_i32 = arith.constant 0 : i32
    %c0_i32_0 = arith.constant 0 : i32
    %c0_i32_1 = arith.constant 0 : i32
    return %c0_i32, %c0_i32_0 : i32, i32
  }
  func.func @transform_3(%arg0: i32) -> (i32, i32) {
    %c0_i32 = arith.constant 0 : i32
    %c0_i32_0 = arith.constant 0 : i32
    %c0_i32_1 = arith.constant 0 : i32
    return %c0_i32, %c0_i32_0 : i32, i32
  }
  func.func @transform_4(%arg0: i32) -> (i32, i32) {
    %c0_i32 = arith.constant 0 : i32
    %c0_i32_0 = arith.constant 0 : i32
    %c0_i32_1 = arith.constant 0 : i32
    return %c0_i32, %c0_i32_0 : i32, i32
  }
  func.func @transform_5(%arg0: i32) -> (i32, i32) {
    %c0_i32 = arith.constant 0 : i32
    %c0_i32_0 = arith.constant 0 : i32
    %c0_i32_1 = arith.constant 0 : i32
    return %c0_i32, %c0_i32_0 : i32, i32
  }
  func.func @transform_6(%arg0: i32) -> (i32, i32) {
    %c0_i32 = arith.constant 0 : i32
    %c0_i32_0 = arith.constant 0 : i32
    %c0_i32_1 = arith.constant 0 : i32
    return %c0_i32, %c0_i32_0 : i32, i32
  }
  func.func @transform_7(%arg0: i32) -> (i32, i32) {
    %c0_i32 = arith.constant 0 : i32
    %c0_i32_0 = arith.constant 0 : i32
    %c0_i32_1 = arith.constant 0 : i32
    return %c0_i32, %c0_i32_0 : i32, i32
  }
}

module attributes {stable_mosaic.version = 11 : i64} {
  func.func @_encoder_kmeans_kernel(%arg0: i32, %arg1: memref<80x32xf32, #tpu.memory_space<vmem>>, %arg2: memref<80x80xf32, #tpu.memory_space<vmem>>, %arg3: memref<1x1x32xf32, #tpu.memory_space<vmem>>, %arg4: memref<1x1x32xf32, #tpu.memory_space<vmem>>, %arg5: memref<1x32x96xf32, #tpu.memory_space<vmem>>, %arg6: memref<1x1x96xf32, #tpu.memory_space<vmem>>, %arg7: memref<1x32x32xf32, #tpu.memory_space<vmem>>, %arg8: memref<1x1x32xf32, #tpu.memory_space<vmem>>, %arg9: memref<1x1x32xf32, #tpu.memory_space<vmem>>, %arg10: memref<1x1x32xf32, #tpu.memory_space<vmem>>, %arg11: memref<1x32x128xf32, #tpu.memory_space<vmem>>, %arg12: memref<1x1x128xf32, #tpu.memory_space<vmem>>, %arg13: memref<1x128x32xf32, #tpu.memory_space<vmem>>, %arg14: memref<1x1x32xf32, #tpu.memory_space<vmem>>, %arg15: memref<1x32xf32, #tpu.memory_space<vmem>>, %arg16: memref<1x32xf32, #tpu.memory_space<vmem>>, %arg17: memref<128x80xf32, #tpu.memory_space<vmem>>, %arg18: memref<32x8xf32, #tpu.memory_space<vmem>>, %arg19: memref<8x32xf32, #tpu.memory_space<vmem>>, %arg20: memref<128x1xi32, #tpu.memory_space<vmem>>, %arg21: memref<128x32xf32, #tpu.memory_space<vmem>>, %arg22: memref<80x32xf32, #tpu.memory_space<vmem>>) attributes {dimension_semantics = [#tpu.dimension_semantics<arbitrary>], iteration_bounds = array<i64: 2>, scalar_prefetch = 0 : i64, scratch_operands = 1 : i64, tpu.core_type = #tpu.core_type<tc>, window_params = [{pipeline_mode = #tpu.pipeline_mode<synchronous>, transform_indices = @transform_0, window_bounds = array<i64: 80, 32>}, {pipeline_mode = #tpu.pipeline_mode<synchronous>, transform_indices = @transform_1, window_bounds = array<i64: 80, 80>}, {transform_indices = @transform_2, window_bounds = array<i64: 1, 1, 32>}, {transform_indices = @transform_3, window_bounds = array<i64: 1, 1, 32>}, {transform_indices = @transform_4, window_bounds = array<i64: 1, 32, 96>}, {transform_indices = @transform_5, window_bounds = array<i64: 1, 1, 96>}, {transform_indices = @transform_6, window_bounds = array<i64: 1, 32, 32>}, {transform_indices = @transform_7, window_bounds = array<i64: 1, 1, 32>}, {transform_indices = @transform_8, window_bounds = array<i64: 1, 1, 32>}, {transform_indices = @transform_9, window_bounds = array<i64: 1, 1, 32>}, {transform_indices = @transform_10, window_bounds = array<i64: 1, 32, 128>}, {transform_indices = @transform_11, window_bounds = array<i64: 1, 1, 128>}, {transform_indices = @transform_12, window_bounds = array<i64: 1, 128, 32>}, {transform_indices = @transform_13, window_bounds = array<i64: 1, 1, 32>}, {pipeline_mode = #tpu.pipeline_mode<synchronous>, transform_indices = @transform_14, window_bounds = array<i64: 1, 32>}, {pipeline_mode = #tpu.pipeline_mode<synchronous>, transform_indices = @transform_15, window_bounds = array<i64: 1, 32>}, {pipeline_mode = #tpu.pipeline_mode<synchronous>, transform_indices = @transform_16, window_bounds = array<i64: 128, 80>}, {pipeline_mode = #tpu.pipeline_mode<synchronous>, transform_indices = @transform_17, window_bounds = array<i64: 32, 8>}, {pipeline_mode = #tpu.pipeline_mode<synchronous>, transform_indices = @transform_18, window_bounds = array<i64: 8, 32>}, {pipeline_mode = #tpu.pipeline_mode<synchronous>, transform_indices = @transform_19, window_bounds = array<i64: 128, 1>}, {pipeline_mode = #tpu.pipeline_mode<synchronous>, transform_indices = @transform_20, window_bounds = array<i64: 128, 32>}]} {
    %c0_i32 = arith.constant 0 : i32
    %0 = arith.cmpi eq, %arg0, %c0_i32 : i32
    %1 = arith.extui %0 : i1 to i32
    %c0_i32_0 = arith.constant 0 : i32
    %2 = arith.cmpi ne, %1, %c0_i32_0 : i32
    scf.if %2 {
      %c0_85 = arith.constant 0 : index
      %c0_86 = arith.constant 0 : index
      %213 = vector.load %arg1[%c0_85, %c0_86] : memref<80x32xf32, #tpu.memory_space<vmem>>, vector<80x32xf32>
      %c0_87 = arith.constant 0 : index
      %c0_88 = arith.constant 0 : index
      %214 = vector.load %arg22[%c0_87, %c0_88] : memref<80x32xf32, #tpu.memory_space<vmem>>, vector<80x32xf32>
      tpu.vector_store %arg22[%c0_87, %c0_88], %213 {strides = array<i32>} : memref<80x32xf32, #tpu.memory_space<vmem>>, vector<80x32xf32>,
    } else {
    }
    %c0 = arith.constant 0 : index
    %c0_1 = arith.constant 0 : index
    %3 = vector.load %arg22[%c0, %c0_1] : memref<80x32xf32, #tpu.memory_space<vmem>>, vector<80x32xf32>
    %c0_2 = arith.constant 0 : index
    %c0_3 = arith.constant 0 : index
    %c0_4 = arith.constant 0 : index
    %4 = vector.load %arg3[%c0_2, %c0_3, %c0_4] : memref<1x1x32xf32, #tpu.memory_space<vmem>>, vector<1x1x32xf32>
    %5 = vector.shape_cast %4 : vector<1x1x32xf32> to vector<1x32xf32>
    %c0_5 = arith.constant 0 : index
    %c0_6 = arith.constant 0 : index
    %c0_7 = arith.constant 0 : index
    %6 = vector.load %arg4[%c0_5, %c0_6, %c0_7] : memref<1x1x32xf32, #tpu.memory_space<vmem>>, vector<1x1x32xf32>
    %7 = vector.shape_cast %6 : vector<1x1x32xf32> to vector<1x32xf32>
    %cst = arith.constant dense<0.000000e+00> : vector<80xf32>
    %8 = vector.multi_reduction <add>, %3, %cst [1] : vector<80x32xf32> to vector<80xf32>
    %9 = vector.shape_cast %8 : vector<80xf32> to vector<80x1xf32>
    %cst_8 = arith.constant 3.200000e+01 : f32
    %10 = vector.broadcast %cst_8 : f32 to vector<80x1xf32>
    %11 = arith.divf %9, %10 : vector<80x1xf32>
    %12 = vector.broadcast %11 : vector<80x1xf32> to vector<80x32xf32>
    %13 = arith.subf %3, %12 : vector<80x32xf32>
    %14 = arith.mulf %13, %13 : vector<80x32xf32>
    %cst_9 = arith.constant dense<0.000000e+00> : vector<80xf32>
    %15 = vector.multi_reduction <add>, %14, %cst_9 [1] : vector<80x32xf32> to vector<80xf32>
    %16 = vector.shape_cast %15 : vector<80xf32> to vector<80x1xf32>
    %cst_10 = arith.constant 3.200000e+01 : f32
    %17 = vector.broadcast %cst_10 : f32 to vector<80x1xf32>
    %18 = arith.divf %16, %17 : vector<80x1xf32>
    %cst_11 = arith.constant 9.99999974E-6 : f32
    %19 = vector.broadcast %cst_11 : f32 to vector<80x1xf32>
    %20 = arith.addf %18, %19 : vector<80x1xf32>
    %21 = math.rsqrt %20 : vector<80x1xf32>
    %22 = vector.broadcast %21 : vector<80x1xf32> to vector<80x32xf32>
    %23 = arith.mulf %13, %22 : vector<80x32xf32>
    %24 = vector.broadcast %5 : vector<1x32xf32> to vector<80x32xf32>
    %25 = arith.mulf %23, %24 : vector<80x32xf32>
    %26 = vector.broadcast %7 : vector<1x32xf32> to vector<80x32xf32>
    %27 = arith.addf %25, %26 : vector<80x32xf32>
    %c0_12 = arith.constant 0 : index
    %c0_13 = arith.constant 0 : index
    %c0_14 = arith.constant 0 : index
    %28 = vector.load %arg5[%c0_12, %c0_13, %c0_14] : memref<1x32x96xf32, #tpu.memory_space<vmem>>, vector<1x32x96xf32>
    %29 = vector.shape_cast %28 : vector<1x32x96xf32> to vector<32x96xf32>
    %cst_15 = arith.constant dense<0.000000e+00> : vector<80x96xf32>
    %30 = tpu.matmul %27, %29, %cst_15 {dimension_numbers = #tpu.dot_dimension_numbers<[1], [0], [0], [1], [0, 0, 1, 1], [], []>} : vector<80x32xf32>, vector<32x96xf32>, vector<80x96xf32> -> vector<80x96xf32>
    %c0_16 = arith.constant 0 : index
    %c0_17 = arith.constant 0 : index
    %c0_18 = arith.constant 0 : index
    %31 = vector.load %arg6[%c0_16, %c0_17, %c0_18] : memref<1x1x96xf32, #tpu.memory_space<vmem>>, vector<1x1x96xf32>
    %32 = vector.shape_cast %31 : vector<1x1x96xf32> to vector<1x96xf32>
    %33 = vector.broadcast %32 : vector<1x96xf32> to vector<80x96xf32>
    %34 = arith.addf %30, %33 : vector<80x96xf32>
    %35 = vector.extract_strided_slice %34 {offsets = [0, 0], sizes = [80, 32], strides = [1, 1]} : vector<80x96xf32> to vector<80x32xf32>
    %36 = vector.extract_strided_slice %34 {offsets = [0, 32], sizes = [80, 32], strides = [1, 1]} : vector<80x96xf32> to vector<80x32xf32>
    %37 = vector.extract_strided_slice %34 {offsets = [0, 64], sizes = [80, 32], strides = [1, 1]} : vector<80x96xf32> to vector<80x32xf32>
    %c0_19 = arith.constant 0 : index
    %c0_20 = arith.constant 0 : index
    %38 = vector.load %arg2[%c0_19, %c0_20] : memref<80x80xf32, #tpu.memory_space<vmem>>, vector<80x80xf32>
    %39 = tpu.iota {dimensions = array<i32: 1>} : vector<1x32xi32>
    %cst_21 = arith.constant 0.000000e+00 : f32
    %40 = vector.broadcast %cst_21 : f32 to vector<80x32xf32>
    %c0_i32_22 = arith.constant 0 : i32
    %41 = vector.broadcast %c0_i32_22 : i32 to vector<1x32xi32>
    %42 = arith.cmpi sge, %39, %41 : vector<1x32xi32>
    %c8_i32 = arith.constant 8 : i32
    %43 = vector.broadcast %c8_i32 : i32 to vector<1x32xi32>
    %44 = arith.cmpi slt, %39, %43 : vector<1x32xi32>
    %45 = arith.andi %42, %44 : vector<1x32xi1>
    %46 = arith.extui %45 : vector<1x32xi1> to vector<1x32xi32>
    %47 = arith.sitofp %46 : vector<1x32xi32> to vector<1x32xf32>
    %48 = vector.broadcast %47 : vector<1x32xf32> to vector<80x32xf32>
    %49 = arith.mulf %35, %48 : vector<80x32xf32>
    %cst_23 = arith.constant dense<0.000000e+00> : vector<80x80xf32>
    %50 = tpu.matmul %49, %36, %cst_23 {dimension_numbers = #tpu.dot_dimension_numbers<[1], [1], [0], [0], [0, 0, 1, 0], [], []>} : vector<80x32xf32>, vector<80x32xf32>, vector<80x80xf32> -> vector<80x80xf32>
    %cst_24 = arith.constant 0.353553385 : f32
    %51 = vector.broadcast %cst_24 : f32 to vector<80x80xf32>
    %52 = arith.mulf %50, %51 : vector<80x80xf32>
    %53 = arith.addf %52, %38 : vector<80x80xf32>
    %cst_25 = arith.constant dense<0xFF800000> : vector<80xf32>
    %54 = vector.multi_reduction <maximumf>, %53, %cst_25 [1] : vector<80x80xf32> to vector<80xf32>
    %55 = vector.shape_cast %54 : vector<80xf32> to vector<80x1xf32>
    %56 = vector.broadcast %55 : vector<80x1xf32> to vector<80x80xf32>
    %57 = arith.subf %53, %56 : vector<80x80xf32>
    %58 = math.exp %57 : vector<80x80xf32>
    %cst_26 = arith.constant dense<0.000000e+00> : vector<80xf32>
    %59 = vector.multi_reduction <add>, %58, %cst_26 [1] : vector<80x80xf32> to vector<80xf32>
    %60 = vector.shape_cast %59 : vector<80xf32> to vector<80x1xf32>
    %61 = tpu.reciprocal %60 {approx = true} : vector<80x1xf32> -> vector<80x1xf32>
    %62 = vector.broadcast %61 : vector<80x1xf32> to vector<80x80xf32>
    %63 = arith.mulf %58, %62 : vector<80x80xf32>
    %64 = vector.broadcast %47 : vector<1x32xf32> to vector<80x32xf32>
    %65 = arith.mulf %37, %64 : vector<80x32xf32>
    %cst_27 = arith.constant dense<0.000000e+00> : vector<80x32xf32>
    %66 = tpu.matmul %63, %65, %cst_27 {dimension_numbers = #tpu.dot_dimension_numbers<[1], [0], [0], [1], [0, 0, 1, 1], [], []>} : vector<80x80xf32>, vector<80x32xf32>, vector<80x32xf32> -> vector<80x32xf32>
    %67 = arith.addf %40, %66 : vector<80x32xf32>
    %c8_i32_28 = arith.constant 8 : i32
    %68 = vector.broadcast %c8_i32_28 : i32 to vector<1x32xi32>
    %69 = arith.cmpi sge, %39, %68 : vector<1x32xi32>
    %c16_i32 = arith.constant 16 : i32
    %70 = vector.broadcast %c16_i32 : i32 to vector<1x32xi32>
    %71 = arith.cmpi slt, %39, %70 : vector<1x32xi32>
    %72 = arith.andi %69, %71 : vector<1x32xi1>
    %73 = arith.extui %72 : vector<1x32xi1> to vector<1x32xi32>
    %74 = arith.sitofp %73 : vector<1x32xi32> to vector<1x32xf32>
    %75 = vector.broadcast %74 : vector<1x32xf32> to vector<80x32xf32>
    %76 = arith.mulf %35, %75 : vector<80x32xf32>
    %cst_29 = arith.constant dense<0.000000e+00> : vector<80x80xf32>
    %77 = tpu.matmul %76, %36, %cst_29 {dimension_numbers = #tpu.dot_dimension_numbers<[1], [1], [0], [0], [0, 0, 1, 0], [], []>} : vector<80x32xf32>, vector<80x32xf32>, vector<80x80xf32> -> vector<80x80xf32>
    %cst_30 = arith.constant 0.353553385 : f32
    %78 = vector.broadcast %cst_30 : f32 to vector<80x80xf32>
    %79 = arith.mulf %77, %78 : vector<80x80xf32>
    %80 = arith.addf %79, %38 : vector<80x80xf32>
    %cst_31 = arith.constant dense<0xFF800000> : vector<80xf32>
    %81 = vector.multi_reduction <maximumf>, %80, %cst_31 [1] : vector<80x80xf32> to vector<80xf32>
    %82 = vector.shape_cast %81 : vector<80xf32> to vector<80x1xf32>
    %83 = vector.broadcast %82 : vector<80x1xf32> to vector<80x80xf32>
    %84 = arith.subf %80, %83 : vector<80x80xf32>
    %85 = math.exp %84 : vector<80x80xf32>
    %cst_32 = arith.constant dense<0.000000e+00> : vector<80xf32>
    %86 = vector.multi_reduction <add>, %85, %cst_32 [1] : vector<80x80xf32> to vector<80xf32>
    %87 = vector.shape_cast %86 : vector<80xf32> to vector<80x1xf32>
    %88 = tpu.reciprocal %87 {approx = true} : vector<80x1xf32> -> vector<80x1xf32>
    %89 = vector.broadcast %88 : vector<80x1xf32> to vector<80x80xf32>
    %90 = arith.mulf %85, %89 : vector<80x80xf32>
    %91 = vector.broadcast %74 : vector<1x32xf32> to vector<80x32xf32>
    %92 = arith.mulf %37, %91 : vector<80x32xf32>
    %cst_33 = arith.constant dense<0.000000e+00> : vector<80x32xf32>
    %93 = tpu.matmul %90, %92, %cst_33 {dimension_numbers = #tpu.dot_dimension_numbers<[1], [0], [0], [1], [0, 0, 1, 1], [], []>} : vector<80x80xf32>, vector<80x32xf32>, vector<80x32xf32> -> vector<80x32xf32>
    %94 = arith.addf %67, %93 : vector<80x32xf32>
    %c16_i32_34 = arith.constant 16 : i32
    %95 = vector.broadcast %c16_i32_34 : i32 to vector<1x32xi32>
    %96 = arith.cmpi sge, %39, %95 : vector<1x32xi32>
    %c24_i32 = arith.constant 24 : i32
    %97 = vector.broadcast %c24_i32 : i32 to vector<1x32xi32>
    %98 = arith.cmpi slt, %39, %97 : vector<1x32xi32>
    %99 = arith.andi %96, %98 : vector<1x32xi1>
    %100 = arith.extui %99 : vector<1x32xi1> to vector<1x32xi32>
    %101 = arith.sitofp %100 : vector<1x32xi32> to vector<1x32xf32>
    %102 = vector.broadcast %101 : vector<1x32xf32> to vector<80x32xf32>
    %103 = arith.mulf %35, %102 : vector<80x32xf32>
    %cst_35 = arith.constant dense<0.000000e+00> : vector<80x80xf32>
    %104 = tpu.matmul %103, %36, %cst_35 {dimension_numbers = #tpu.dot_dimension_numbers<[1], [1], [0], [0], [0, 0, 1, 0], [], []>} : vector<80x32xf32>, vector<80x32xf32>, vector<80x80xf32> -> vector<80x80xf32>
    %cst_36 = arith.constant 0.353553385 : f32
    %105 = vector.broadcast %cst_36 : f32 to vector<80x80xf32>
    %106 = arith.mulf %104, %105 : vector<80x80xf32>
    %107 = arith.addf %106, %38 : vector<80x80xf32>
    %cst_37 = arith.constant dense<0xFF800000> : vector<80xf32>
    %108 = vector.multi_reduction <maximumf>, %107, %cst_37 [1] : vector<80x80xf32> to vector<80xf32>
    %109 = vector.shape_cast %108 : vector<80xf32> to vector<80x1xf32>
    %110 = vector.broadcast %109 : vector<80x1xf32> to vector<80x80xf32>
    %111 = arith.subf %107, %110 : vector<80x80xf32>
    %112 = math.exp %111 : vector<80x80xf32>
    %cst_38 = arith.constant dense<0.000000e+00> : vector<80xf32>
    %113 = vector.multi_reduction <add>, %112, %cst_38 [1] : vector<80x80xf32> to vector<80xf32>
    %114 = vector.shape_cast %113 : vector<80xf32> to vector<80x1xf32>
    %115 = tpu.reciprocal %114 {approx = true} : vector<80x1xf32> -> vector<80x1xf32>
    %116 = vector.broadcast %115 : vector<80x1xf32> to vector<80x80xf32>
    %117 = arith.mulf %112, %116 : vector<80x80xf32>
    %118 = vector.broadcast %101 : vector<1x32xf32> to vector<80x32xf32>
    %119 = arith.mulf %37, %118 : vector<80x32xf32>
    %cst_39 = arith.constant dense<0.000000e+00> : vector<80x32xf32>
    %120 = tpu.matmul %117, %119, %cst_39 {dimension_numbers = #tpu.dot_dimension_numbers<[1], [0], [0], [1], [0, 0, 1, 1], [], []>} : vector<80x80xf32>, vector<80x32xf32>, vector<80x32xf32> -> vector<80x32xf32>
    %121 = arith.addf %94, %120 : vector<80x32xf32>
    %c24_i32_40 = arith.constant 24 : i32
    %122 = vector.broadcast %c24_i32_40 : i32 to vector<1x32xi32>
    %123 = arith.cmpi sge, %39, %122 : vector<1x32xi32>
    %c32_i32 = arith.constant 32 : i32
    %124 = vector.broadcast %c32_i32 : i32 to vector<1x32xi32>
    %125 = arith.cmpi slt, %39, %124 : vector<1x32xi32>
    %126 = arith.andi %123, %125 : vector<1x32xi1>
    %127 = arith.extui %126 : vector<1x32xi1> to vector<1x32xi32>
    %128 = arith.sitofp %127 : vector<1x32xi32> to vector<1x32xf32>
    %129 = vector.broadcast %128 : vector<1x32xf32> to vector<80x32xf32>
    %130 = arith.mulf %35, %129 : vector<80x32xf32>
    %cst_41 = arith.constant dense<0.000000e+00> : vector<80x80xf32>
    %131 = tpu.matmul %130, %36, %cst_41 {dimension_numbers = #tpu.dot_dimension_numbers<[1], [1], [0], [0], [0, 0, 1, 0], [], []>} : vector<80x32xf32>, vector<80x32xf32>, vector<80x80xf32> -> vector<80x80xf32>
    %cst_42 = arith.constant 0.353553385 : f32
    %132 = vector.broadcast %cst_42 : f32 to vector<80x80xf32>
    %133 = arith.mulf %131, %132 : vector<80x80xf32>
    %134 = arith.addf %133, %38 : vector<80x80xf32>
    %cst_43 = arith.constant dense<0xFF800000> : vector<80xf32>
    %135 = vector.multi_reduction <maximumf>, %134, %cst_43 [1] : vector<80x80xf32> to vector<80xf32>
    %136 = vector.shape_cast %135 : vector<80xf32> to vector<80x1xf32>
    %137 = vector.broadcast %136 : vector<80x1xf32> to vector<80x80xf32>
    %138 = arith.subf %134, %137 : vector<80x80xf32>
    %139 = math.exp %138 : vector<80x80xf32>
    %cst_44 = arith.constant dense<0.000000e+00> : vector<80xf32>
    %140 = vector.multi_reduction <add>, %139, %cst_44 [1] : vector<80x80xf32> to vector<80xf32>
    %141 = vector.shape_cast %140 : vector<80xf32> to vector<80x1xf32>
    %142 = tpu.reciprocal %141 {approx = true} : vector<80x1xf32> -> vector<80x1xf32>
    %143 = vector.broadcast %142 : vector<80x1xf32> to vector<80x80xf32>
    %144 = arith.mulf %139, %143 : vector<80x80xf32>
    %145 = vector.broadcast %128 : vector<1x32xf32> to vector<80x32xf32>
    %146 = arith.mulf %37, %145 : vector<80x32xf32>
    %cst_45 = arith.constant dense<0.000000e+00> : vector<80x32xf32>
    %147 = tpu.matmul %144, %146, %cst_45 {dimension_numbers = #tpu.dot_dimension_numbers<[1], [0], [0], [1], [0, 0, 1, 1], [], []>} : vector<80x80xf32>, vector<80x32xf32>, vector<80x32xf32> -> vector<80x32xf32>
    %148 = arith.addf %121, %147 : vector<80x32xf32>
    %c0_46 = arith.constant 0 : index
    %c0_47 = arith.constant 0 : index
    %c0_48 = arith.constant 0 : index
    %149 = vector.load %arg7[%c0_46, %c0_47, %c0_48] : memref<1x32x32xf32, #tpu.memory_space<vmem>>, vector<1x32x32xf32>
    %150 = vector.shape_cast %149 : vector<1x32x32xf32> to vector<32x32xf32>
    %cst_49 = arith.constant dense<0.000000e+00> : vector<80x32xf32>
    %151 = tpu.matmul %148, %150, %cst_49 {dimension_numbers = #tpu.dot_dimension_numbers<[1], [0], [0], [1], [0, 0, 1, 1], [], []>} : vector<80x32xf32>, vector<32x32xf32>, vector<80x32xf32> -> vector<80x32xf32>
    %152 = arith.addf %3, %151 : vector<80x32xf32>
    %c0_50 = arith.constant 0 : index
    %c0_51 = arith.constant 0 : index
    %c0_52 = arith.constant 0 : index
    %153 = vector.load %arg8[%c0_50, %c0_51, %c0_52] : memref<1x1x32xf32, #tpu.memory_space<vmem>>, vector<1x1x32xf32>
    %154 = vector.shape_cast %153 : vector<1x1x32xf32> to vector<1x32xf32>
    %155 = vector.broadcast %154 : vector<1x32xf32> to vector<80x32xf32>
    %156 = arith.addf %152, %155 : vector<80x32xf32>
    %c0_53 = arith.constant 0 : index
    %c0_54 = arith.constant 0 : index
    %c0_55 = arith.constant 0 : index
    %157 = vector.load %arg9[%c0_53, %c0_54, %c0_55] : memref<1x1x32xf32, #tpu.memory_space<vmem>>, vector<1x1x32xf32>
    %158 = vector.shape_cast %157 : vector<1x1x32xf32> to vector<1x32xf32>
    %c0_56 = arith.constant 0 : index
    %c0_57 = arith.constant 0 : index
    %c0_58 = arith.constant 0 : index
    %159 = vector.load %arg10[%c0_56, %c0_57, %c0_58] : memref<1x1x32xf32, #tpu.memory_space<vmem>>, vector<1x1x32xf32>
    %160 = vector.shape_cast %159 : vector<1x1x32xf32> to vector<1x32xf32>
    %cst_59 = arith.constant dense<0.000000e+00> : vector<80xf32>
    %161 = vector.multi_reduction <add>, %156, %cst_59 [1] : vector<80x32xf32> to vector<80xf32>
    %162 = vector.shape_cast %161 : vector<80xf32> to vector<80x1xf32>
    %cst_60 = arith.constant 3.200000e+01 : f32
    %163 = vector.broadcast %cst_60 : f32 to vector<80x1xf32>
    %164 = arith.divf %162, %163 : vector<80x1xf32>
    %165 = vector.broadcast %164 : vector<80x1xf32> to vector<80x32xf32>
    %166 = arith.subf %156, %165 : vector<80x32xf32>
    %167 = arith.mulf %166, %166 : vector<80x32xf32>
    %cst_61 = arith.constant dense<0.000000e+00> : vector<80xf32>
    %168 = vector.multi_reduction <add>, %167, %cst_61 [1] : vector<80x32xf32> to vector<80xf32>
    %169 = vector.shape_cast %168 : vector<80xf32> to vector<80x1xf32>
    %cst_62 = arith.constant 3.200000e+01 : f32
    %170 = vector.broadcast %cst_62 : f32 to vector<80x1xf32>
    %171 = arith.divf %169, %170 : vector<80x1xf32>
    %cst_63 = arith.constant 9.99999974E-6 : f32
    %172 = vector.broadcast %cst_63 : f32 to vector<80x1xf32>
    %173 = arith.addf %171, %172 : vector<80x1xf32>
    %174 = math.rsqrt %173 : vector<80x1xf32>
    %175 = vector.broadcast %174 : vector<80x1xf32> to vector<80x32xf32>
    %176 = arith.mulf %166, %175 : vector<80x32xf32>
    %177 = vector.broadcast %158 : vector<1x32xf32> to vector<80x32xf32>
    %178 = arith.mulf %176, %177 : vector<80x32xf32>
    %179 = vector.broadcast %160 : vector<1x32xf32> to vector<80x32xf32>
    %180 = arith.addf %178, %179 : vector<80x32xf32>
    %c0_64 = arith.constant 0 : index
    %c0_65 = arith.constant 0 : index
    %c0_66 = arith.constant 0 : index
    %181 = vector.load %arg11[%c0_64, %c0_65, %c0_66] : memref<1x32x128xf32, #tpu.memory_space<vmem>>, vector<1x32x128xf32>
    %182 = vector.shape_cast %181 : vector<1x32x128xf32> to vector<32x128xf32>
    %cst_67 = arith.constant dense<0.000000e+00> : vector<80x128xf32>
    %183 = tpu.matmul %180, %182, %cst_67 {dimension_numbers = #tpu.dot_dimension_numbers<[1], [0], [0], [1], [0, 0, 1, 1], [], []>} : vector<80x32xf32>, vector<32x128xf32>, vector<80x128xf32> -> vector<80x128xf32>
    %c0_68 = arith.constant 0 : index
    %c0_69 = arith.constant 0 : index
    %c0_70 = arith.constant 0 : index
    %184 = vector.load %arg12[%c0_68, %c0_69, %c0_70] : memref<1x1x128xf32, #tpu.memory_space<vmem>>, vector<1x1x128xf32>
    %185 = vector.shape_cast %184 : vector<1x1x128xf32> to vector<1x128xf32>
    %186 = vector.broadcast %185 : vector<1x128xf32> to vector<80x128xf32>
    %187 = arith.addf %183, %186 : vector<80x128xf32>
    %188 = arith.mulf %187, %187 : vector<80x128xf32>
    %189 = arith.mulf %187, %188 : vector<80x128xf32>
    %cst_71 = arith.constant 4.471500e-02 : f32
    %190 = vector.broadcast %cst_71 : f32 to vector<80x128xf32>
    %191 = arith.mulf %190, %189 : vector<80x128xf32>
    %192 = arith.addf %187, %191 : vector<80x128xf32>
    %cst_72 = arith.constant 0.797884583 : f32
    %193 = vector.broadcast %cst_72 : f32 to vector<80x128xf32>
    %194 = arith.mulf %193, %192 : vector<80x128xf32>
    %195 = math.tanh %194 : vector<80x128xf32>
    %cst_73 = arith.constant 1.000000e+00 : f32
    %196 = vector.broadcast %cst_73 : f32 to vector<80x128xf32>
    %197 = arith.addf %196, %195 : vector<80x128xf32>
    %cst_74 = arith.constant 5.000000e-01 : f32
    %198 = vector.broadcast %cst_74 : f32 to vector<80x128xf32>
    %199 = arith.mulf %198, %197 : vector<80x128xf32>
    %200 = arith.mulf %187, %199 : vector<80x128xf32>
    %c0_75 = arith.constant 0 : index
    %c0_76 = arith.constant 0 : index
    %c0_77 = arith.constant 0 : index
    %201 = vector.load %arg13[%c0_75, %c0_76, %c0_77] : memref<1x128x32xf32, #tpu.memory_space<vmem>>, vector<1x128x32xf32>
    %202 = vector.shape_cast %201 : vector<1x128x32xf32> to vector<128x32xf32>
    %cst_78 = arith.constant dense<0.000000e+00> : vector<80x32xf32>
    %203 = tpu.matmul %200, %202, %cst_78 {dimension_numbers = #tpu.dot_dimension_numbers<[1], [0], [0], [1], [0, 0, 1, 1], [], []>} : vector<80x128xf32>, vector<128x32xf32>, vector<80x32xf32> -> vector<80x32xf32>
    %204 = arith.addf %156, %203 : vector<80x32xf32>
    %c0_79 = arith.constant 0 : index
    %c0_80 = arith.constant 0 : index
    %c0_81 = arith.constant 0 : index
    %205 = vector.load %arg14[%c0_79, %c0_80, %c0_81] : memref<1x1x32xf32, #tpu.memory_space<vmem>>, vector<1x1x32xf32>
    %206 = vector.shape_cast %205 : vector<1x1x32xf32> to vector<1x32xf32>
    %207 = vector.broadcast %206 : vector<1x32xf32> to vector<80x32xf32>
    %208 = arith.addf %204, %207 : vector<80x32xf32>
    %c0_82 = arith.constant 0 : index
    %c0_83 = arith.constant 0 : index
    %209 = vector.load %arg22[%c0_82, %c0_83] : memref<80x32xf32, #tpu.memory_space<vmem>>, vector<80x32xf32>
    tpu.vector_store %arg22[%c0_82, %c0_83], %208 {strides = array<i32>} : memref<80x32xf32, #tpu.memory_space<vmem>>, vector<80x32xf32>,
    %c1_i32 = arith.constant 1 : i32
    %210 = arith.cmpi eq, %arg0, %c1_i32 : i32
    %211 = arith.extui %210 : i1 to i32
    %c0_i32_84 = arith.constant 0 : i32
    %212 = arith.cmpi ne, %211, %c0_i32_84 : i32
    scf.if %212 {
      %c0_85 = arith.constant 0 : index
      %c0_86 = arith.constant 0 : index
      %213 = vector.load %arg15[%c0_85, %c0_86] : memref<1x32xf32, #tpu.memory_space<vmem>>, vector<1x32xf32>
      %c0_87 = arith.constant 0 : index
      %c0_88 = arith.constant 0 : index
      %214 = vector.load %arg16[%c0_87, %c0_88] : memref<1x32xf32, #tpu.memory_space<vmem>>, vector<1x32xf32>
      %cst_89 = arith.constant dense<0.000000e+00> : vector<80xf32>
      %215 = vector.multi_reduction <add>, %208, %cst_89 [1] : vector<80x32xf32> to vector<80xf32>
      %216 = vector.shape_cast %215 : vector<80xf32> to vector<80x1xf32>
      %cst_90 = arith.constant 3.200000e+01 : f32
      %217 = vector.broadcast %cst_90 : f32 to vector<80x1xf32>
      %218 = arith.divf %216, %217 : vector<80x1xf32>
      %219 = vector.broadcast %218 : vector<80x1xf32> to vector<80x32xf32>
      %220 = arith.subf %208, %219 : vector<80x32xf32>
      %221 = arith.mulf %220, %220 : vector<80x32xf32>
      %cst_91 = arith.constant dense<0.000000e+00> : vector<80xf32>
      %222 = vector.multi_reduction <add>, %221, %cst_91 [1] : vector<80x32xf32> to vector<80xf32>
      %223 = vector.shape_cast %222 : vector<80xf32> to vector<80x1xf32>
      %cst_92 = arith.constant 3.200000e+01 : f32
      %224 = vector.broadcast %cst_92 : f32 to vector<80x1xf32>
      %225 = arith.divf %223, %224 : vector<80x1xf32>
      %cst_93 = arith.constant 9.99999974E-6 : f32
      %226 = vector.broadcast %cst_93 : f32 to vector<80x1xf32>
      %227 = arith.addf %225, %226 : vector<80x1xf32>
      %228 = math.rsqrt %227 : vector<80x1xf32>
      %229 = vector.broadcast %228 : vector<80x1xf32> to vector<80x32xf32>
      %230 = arith.mulf %220, %229 : vector<80x32xf32>
      %231 = vector.broadcast %213 : vector<1x32xf32> to vector<80x32xf32>
      %232 = arith.mulf %230, %231 : vector<80x32xf32>
      %233 = vector.broadcast %214 : vector<1x32xf32> to vector<80x32xf32>
      %234 = arith.addf %232, %233 : vector<80x32xf32>
      %c0_94 = arith.constant 0 : index
      %c0_95 = arith.constant 0 : index
      %235 = vector.load %arg17[%c0_94, %c0_95] : memref<128x80xf32, #tpu.memory_space<vmem>>, vector<128x80xf32>
      %cst_96 = arith.constant dense<0.000000e+00> : vector<128x32xf32>
      %236 = tpu.matmul %235, %234, %cst_96 {dimension_numbers = #tpu.dot_dimension_numbers<[1], [0], [0], [1], [0, 0, 1, 1], [], []>} : vector<128x80xf32>, vector<80x32xf32>, vector<128x32xf32> -> vector<128x32xf32>
      %c0_97 = arith.constant 0 : index
      %c0_98 = arith.constant 0 : index
      %237 = vector.load %arg18[%c0_97, %c0_98] : memref<32x8xf32, #tpu.memory_space<vmem>>, vector<32x8xf32>
      %cst_99 = arith.constant dense<0.000000e+00> : vector<128x8xf32>
      %238 = tpu.matmul %236, %237, %cst_99 {dimension_numbers = #tpu.dot_dimension_numbers<[1], [0], [0], [1], [0, 0, 1, 1], [], []>} : vector<128x32xf32>, vector<32x8xf32>, vector<128x8xf32> -> vector<128x8xf32>
      %239 = arith.mulf %237, %237 : vector<32x8xf32>
      %cst_100 = arith.constant dense<0.000000e+00> : vector<8xf32>
      %240 = vector.multi_reduction <add>, %239, %cst_100 [0] : vector<32x8xf32> to vector<8xf32>
      %241 = vector.shape_cast %240 : vector<8xf32> to vector<1x8xf32>
      %cst_101 = arith.constant 2.000000e+00 : f32
      %242 = vector.broadcast %cst_101 : f32 to vector<128x8xf32>
      %243 = arith.mulf %242, %238 : vector<128x8xf32>
      %244 = vector.broadcast %241 : vector<1x8xf32> to vector<128x8xf32>
      %245 = arith.subf %243, %244 : vector<128x8xf32>
      %cst_102 = arith.constant dense<0xFF800000> : vector<128xf32>
      %246 = vector.multi_reduction <maximumf>, %245, %cst_102 [1] : vector<128x8xf32> to vector<128xf32>
      %247 = vector.shape_cast %246 : vector<128xf32> to vector<128x1xf32>
      %248 = tpu.iota {dimensions = array<i32: 1>} : vector<128x8xi32>
      %249 = vector.broadcast %247 : vector<128x1xf32> to vector<128x8xf32>
      %250 = arith.cmpf oge, %245, %249 : vector<128x8xf32>
      %c8_i32_103 = arith.constant 8 : i32
      %251 = vector.broadcast %c8_i32_103 : i32 to vector<128x8xi32>
      %252 = arith.select %250, %248, %251 : vector<128x8xi1>, vector<128x8xi32>
      %cst_104 = arith.constant dense<2147483647> : vector<128xi32>
      %253 = vector.multi_reduction <minsi>, %252, %cst_104 [1] : vector<128x8xi32> to vector<128xi32>
      %254 = vector.shape_cast %253 : vector<128xi32> to vector<128x1xi32>
      %c0_105 = arith.constant 0 : index
      %c0_106 = arith.constant 0 : index
      %255 = vector.load %arg20[%c0_105, %c0_106] : memref<128x1xi32, #tpu.memory_space<vmem>>, vector<128x1xi32>
      tpu.vector_store %arg20[%c0_105, %c0_106], %254 {strides = array<i32>} : memref<128x1xi32, #tpu.memory_space<vmem>>, vector<128x1xi32>,
      %256 = vector.broadcast %254 : vector<128x1xi32> to vector<128x8xi32>
      %257 = arith.cmpi eq, %248, %256 : vector<128x8xi32>
      %258 = arith.extui %257 : vector<128x8xi1> to vector<128x8xi32>
      %259 = arith.sitofp %258 : vector<128x8xi32> to vector<128x8xf32>
      %c0_107 = arith.constant 0 : index
      %c0_108 = arith.constant 0 : index
      %260 = vector.load %arg19[%c0_107, %c0_108] : memref<8x32xf32, #tpu.memory_space<vmem>>, vector<8x32xf32>
      %cst_109 = arith.constant dense<0.000000e+00> : vector<128x32xf32>
      %261 = tpu.matmul %259, %260, %cst_109 {dimension_numbers = #tpu.dot_dimension_numbers<[1], [0], [0], [1], [0, 0, 1, 1], [], []>} : vector<128x8xf32>, vector<8x32xf32>, vector<128x32xf32> -> vector<128x32xf32>
      %c0_110 = arith.constant 0 : index
      %c0_111 = arith.constant 0 : index
      %262 = vector.load %arg21[%c0_110, %c0_111] : memref<128x32xf32, #tpu.memory_space<vmem>>, vector<128x32xf32>
      tpu.vector_store %arg21[%c0_110, %c0_111], %261 {strides = array<i32>} : memref<128x32xf32, #tpu.memory_space<vmem>>, vector<128x32xf32>,
    } else {
    }
    return
  }
  func.func @transform_0(%arg0: i32) -> (i32, i32) {
    %c0_i32 = arith.constant 0 : i32
    %c0_i32_0 = arith.constant 0 : i32
    %c0_i32_1 = arith.constant 0 : i32
    return %c0_i32, %c0_i32_0 : i32, i32
  }
  func.func @transform_1(%arg0: i32) -> (i32, i32) {
    %c0_i32 = arith.constant 0 : i32
    %c0_i32_0 = arith.constant 0 : i32
    %c0_i32_1 = arith.constant 0 : i32
    return %c0_i32, %c0_i32_0 : i32, i32
  }
  func.func @transform_2(%arg0: i32) -> (i32, i32, i32) {
    %c0_i32 = arith.constant 0 : i32
    %c0_i32_0 = arith.constant 0 : i32
    %c0_i32_1 = arith.constant 0 : i32
    return %arg0, %c0_i32, %c0_i32_0 : i32, i32, i32
  }
  func.func @transform_3(%arg0: i32) -> (i32, i32, i32) {
    %c0_i32 = arith.constant 0 : i32
    %c0_i32_0 = arith.constant 0 : i32
    %c0_i32_1 = arith.constant 0 : i32
    return %arg0, %c0_i32, %c0_i32_0 : i32, i32, i32
  }
  func.func @transform_4(%arg0: i32) -> (i32, i32, i32) {
    %c0_i32 = arith.constant 0 : i32
    %c0_i32_0 = arith.constant 0 : i32
    %c0_i32_1 = arith.constant 0 : i32
    return %arg0, %c0_i32, %c0_i32_0 : i32, i32, i32
  }
  func.func @transform_5(%arg0: i32) -> (i32, i32, i32) {
    %c0_i32 = arith.constant 0 : i32
    %c0_i32_0 = arith.constant 0 : i32
    %c0_i32_1 = arith.constant 0 : i32
    return %arg0, %c0_i32, %c0_i32_0 : i32, i32, i32
  }
  func.func @transform_6(%arg0: i32) -> (i32, i32, i32) {
    %c0_i32 = arith.constant 0 : i32
    %c0_i32_0 = arith.constant 0 : i32
    %c0_i32_1 = arith.constant 0 : i32
    return %arg0, %c0_i32, %c0_i32_0 : i32, i32, i32
  }
  func.func @transform_7(%arg0: i32) -> (i32, i32, i32) {
    %c0_i32 = arith.constant 0 : i32
    %c0_i32_0 = arith.constant 0 : i32
    %c0_i32_1 = arith.constant 0 : i32
    return %arg0, %c0_i32, %c0_i32_0 : i32, i32, i32
  }
  func.func @transform_8(%arg0: i32) -> (i32, i32, i32) {
    %c0_i32 = arith.constant 0 : i32
    %c0_i32_0 = arith.constant 0 : i32
    %c0_i32_1 = arith.constant 0 : i32
    return %arg0, %c0_i32, %c0_i32_0 : i32, i32, i32
  }
  func.func @transform_9(%arg0: i32) -> (i32, i32, i32) {
    %c0_i32 = arith.constant 0 : i32
    %c0_i32_0 = arith.constant 0 : i32
    %c0_i32_1 = arith.constant 0 : i32
    return %arg0, %c0_i32, %c0_i32_0 : i32, i32, i32
  }
  func.func @transform_10(%arg0: i32) -> (i32, i32, i32) {
    %c0_i32 = arith.constant 0 : i32
    %c0_i32_0 = arith.constant 0 : i32
    %c0_i32_1 = arith.constant 0 : i32
    return %arg0, %c0_i32, %c0_i32_0 : i32, i32, i32
  }
  func.func @transform_11(%arg0: i32) -> (i32, i32, i32) {
    %c0_i32 = arith.constant 0 : i32
    %c0_i32_0 = arith.constant 0 : i32
    %c0_i32_1 = arith.constant 0 : i32
    return %arg0, %c0_i32, %c0_i32_0 : i32, i32, i32
  }
  func.func @transform_12(%arg0: i32) -> (i32, i32, i32) {
    %c0_i32 = arith.constant 0 : i32
    %c0_i32_0 = arith.constant 0 : i32
    %c0_i32_1 = arith.constant 0 : i32
    return %arg0, %c0_i32, %c0_i32_0 : i32, i32, i32
  }
  func.func @transform_13(%arg0: i32) -> (i32, i32, i32) {
    %c0_i32 = arith.constant 0 : i32
    %c0_i32_0 = arith.constant 0 : i32
    %c0_i32_1 = arith.constant 0 : i32
    return %arg0, %c0_i32, %c0_i32_0 : i32, i32, i32
  }
  func.func @transform_14(%arg0: i32) -> (i32, i32) {
    %c0_i32 = arith.constant 0 : i32
    %c0_i32_0 = arith.constant 0 : i32
    %c0_i32_1 = arith.constant 0 : i32
    return %c0_i32, %c0_i32_0 : i32, i32
  }
  func.func @transform_15(%arg0: i32) -> (i32, i32) {
    %c0_i32 = arith.constant 0 : i32
    %c0_i32_0 = arith.constant 0 : i32
    %c0_i32_1 = arith.constant 0 : i32
    return %c0_i32, %c0_i32_0 : i32, i32
  }
  func.func @transform_16(%arg0: i32) -> (i32, i32) {
    %c0_i32 = arith.constant 0 : i32
    %c0_i32_0 = arith.constant 0 : i32
    %c0_i32_1 = arith.constant 0 : i32
    return %c0_i32, %c0_i32_0 : i32, i32
  }
  func.func @transform_17(%arg0: i32) -> (i32, i32) {
    %c0_i32 = arith.constant 0 : i32
    %c0_i32_0 = arith.constant 0 : i32
    %c0_i32_1 = arith.constant 0 : i32
    return %c0_i32, %c0_i32_0 : i32, i32
  }
  func.func @transform_18(%arg0: i32) -> (i32, i32) {
    %c0_i32 = arith.constant 0 : i32
    %c0_i32_0 = arith.constant 0 : i32
    %c0_i32_1 = arith.constant 0 : i32
    return %c0_i32, %c0_i32_0 : i32, i32
  }
  func.func @transform_19(%arg0: i32) -> (i32, i32) {
    %c0_i32 = arith.constant 0 : i32
    %c0_i32_0 = arith.constant 0 : i32
    %c0_i32_1 = arith.constant 0 : i32
    return %c0_i32, %c0_i32_0 : i32, i32
  }
  func.func @transform_20(%arg0: i32) -> (i32, i32) {
    %c0_i32 = arith.constant 0 : i32
    %c0_i32_0 = arith.constant 0 : i32
    %c0_i32_1 = arith.constant 0 : i32
    return %c0_i32, %c0_i32_0 : i32, i32
  }
}

</mosaic_0001>

<bundles_post_ra>
// kernel: squeeze.1
= control target key start
LH: loop header
LB: loop body
LE: loop exit
PB: predicated region body
PF: predicated region fallthrough
CT: control target
= control target key end

     0   :  { %s85_s0 = inlined_call_operand.vmem [shape: s32[128], index: 0, kind: input, shape index: {}]   ;;  %s86_s1 = inlined_call_operand.hbm [shape: s32[2,64], index: 1, kind: output, shape index: {}]  }
   0x1   :  { %v5_v0 = vld [vmem:[%s85_s0] sm:$0x1] }
   0x2   :  { %2 = vsyncpa [#allocation1], 0  ;;  %6 = vst [vmem:[#allocation3] sm:$0x1] %v5_v0  ;;  %vm8_vm0 = vcmask 523264   ;;  %s58_s0 = smov 64  }
   0x3   :  { %s59_s8 = smov [#allocation0]  }
   0x4   :  { %s26_s9 = sshll.u32 %s59_s8, 4  ;;  %s27_s9 = int_to_ptr.vmem [resolvable:$true] %s26_s9 }
   0x5   :  { %s34_s10 = scalar_lea.vmem %s27_s9, 32  ;;  %p39_p1 = scmp.lt.s32.totalorder %s27_s9, %s27_s9 }
   0x6   :  { %p35_p0 = scmp.ne.s32.totalorder %s27_s9, %s34_s10  ;;  %p40_p2 = scmp.lt.s32.totalorder %s34_s10, %s34_s10 }
   0x8   :  { %p41_p3 = por %p40_p2, %p39_p1 }
   0x9   :  { %v10_v1 = vld [vmem:[#allocation3] sm:$0x1]  }
   0xa   :  { %v7_v2 = vld [vmem:[#allocation3] sm:$0x1]   ;;  %11 = vrot.lane.b32.xlu0 %v10_v1, %s58_s0  ;;  %p42_p4 = pnand %p41_p3, %p35_p0 }
   0xb   :  { %9 = vst.msk [vmem:[#allocation2] sm:$0x1] %vm8_vm0, %v7_v2  }
  0x7c   :  { %v12_v3 = vpop.permute.xlu0 %11  }
  0x7d   :  { %15 = vst.msk [vmem:[#allocation2 + $0x1] sm:$0x1] %vm8_vm0, %v12_v3  }
  0x84   :  { %v19_v4 = vld [vmem:[#allocation2] sm:$0x3] }
  0x85   :  { %21 = vst [vmem:[#allocation0] sm:$0x3] %v19_v4 }
  0x86   :  { %45 = shalt.err (!%p42_p4)
}
  0x87   :  { %s46_s13 = scalar_lea.hbm %s86_s1, 32 }
  0x88   :  { %p47_p5 = scmp.ne.s32.totalorder %s86_s1, %s46_s13  ;;  %p50_p6 = scmp.lt.u32.totalorder %s46_s13, %s86_s1 }
  0x8a   :  { %p52_p7 = pnand %p50_p6, %p47_p5 }
  0x8c   :  { %55 = shalt.err (!%p52_p7)
}
  0x8d   :  { %29 = dma.vmem_to_hbm [thread:$0]  %s27_s9, 32, %s86_s1, [#allocation1]  }
  0x8e   :  { %56 = dma.done.wait [#allocation1], 32  }
  0x8f   :  { %57 = vsyncadd [#allocation1], 4294967264 }
  0x90   :  { %31 = vsyncpa [#allocation1], 1 }

// kernel: whisper_kmeans_forward.3
= control target key start
LH: loop header
LB: loop body
LE: loop exit
PB: predicated region body
PF: predicated region fallthrough
CT: control target
= control target key end

     0   :  { %vm109_vm0 = vcmask 130048   ;;  %vm66_vm1 = vcmask 1046528   ;;  %vm520_vm2 = vcmask 1045504   ;;  %vm788_vm3 = vcmask 1044480   ;;  %s2882_s1 = inlined_call_operand.vmem [shape: f32[64,128], index: 1, kind: input, shape index: {}]   ;;  %s2883_s0 = inlined_call_operand.vmem [shape: f32[2,84,16], index: 0, kind: input, shape index: {}]   ;;  %s2884_s2 = inlined_call_operand.vmem [shape: f32[64,16], index: 2, kind: input, shape index: {}]   ;;  %s2885_s3 = inlined_call_operand.vmem [shape: f32[2,80,16], index: 3, kind: output, shape index: {}]  }
   0x1   :  { %v36_v0 = vld [vmem:[%s2882_s1] sm:$0xff]  ;;  %v37_v1 = vld [vmem:[%s2882_s1 + $0x8] sm:$0xff]  ;;  %v2242_v8 = vld [vmem:[%s2883_s0 + $0x10] sm:$0xff]  ;;  %vm1184_vm4 = vcmask 523264  }
   0x2   :  { %v2224_v2 = vld [vmem:[%s2883_s0] sm:$0xff]  ;;  %v2063_v3 = vpack.c.bf16 %v37_v1, %v36_v0  ;;  %v41_v5 = vld [vmem:[%s2882_s1 + $0x28] sm:$0xff]  ;;  %v42_v9 = vld [vmem:[%s2882_s1 + $0x30] sm:$0xff]  ;;  %v70_v16 = vrot.slane %v2242_v8, 1  ;;  %v524_v36 = vrot.slane %v2242_v8, 2 }
   0x3   :  { %1915 = vmatprep.mubr.msk.f32.mxu0 %vm109_vm0, %v2224_v2  ;;  %v40_v4 = vld [vmem:[%s2882_s1 + $0x20] sm:$0xff]  ;;  %v2237_v7 = vld [vmem:[%s2883_s0 + $0x8] sm:$0xff]  ;;  %v43_v10 = vld [vmem:[%s2882_s1 + $0x38] sm:$0xff]  ;;  %v67_v12 = vrot.slane %v2224_v2, 1  ;;  %v521_v29 = vrot.slane %v2224_v2, 2 }
   0x4   :  { %v2067_v6 = vpack.c.bf16 %v41_v5, %v40_v4  ;;  %2064 = vmatprep.subr.bf16.mxu0 %v2063_v3  ;;  %v38_v11 = vld [vmem:[%s2882_s1 + $0x10] sm:$0xff]  ;;  %v68_v13 = vrot.slane %v2237_v7, 1  ;;  %v39_v14 = vld [vmem:[%s2882_s1 + $0x18] sm:$0xff]  ;;  %v2271_v17 = vld [vmem:[%s2883_s0 + $0x20] sm:$0xff]  ;;  %v2071_v18 = vpack.c.bf16 %v43_v10, %v42_v9  ;;  %v522_v30 = vrot.slane %v2237_v7, 2 }
   0x5   :  { %2066 = vmatpush3.bf16.msra.mxu0 %v2063_v3  ;;  %v2265_v15 = vld [vmem:[%s2883_s0 + $0x18] sm:$0xff]  ;;  %v2059_v19 = vpack.c.bf16 %v39_v14, %v38_v11  ;;  %v2282_v22 = vld [vmem:[%s2883_s0 + $0x28] sm:$0xff]  ;;  %v74_v23 = vrot.slane %v2271_v17, 1  ;;  %v2288_v24 = vld [vmem:[%s2883_s0 + $0x30] sm:$0xff]  ;;  %v528_v44 = vrot.slane %v2271_v17, 2 }
   0x6   :  { %2068 = vmatprep.subr.bf16.mxu0 %v2067_v6  ;;  %v72_v20 = vrot.slane %v2265_v15, 1  ;;  %v69_v21 = vsel %vm66_vm1, %v67_v12, %v68_v13  ;;  %v71_v25 = vsel %vm66_vm1, %v68_v13, %v70_v16  ;;  %v76_v26 = vrot.slane %v2282_v22, 1  ;;  %v2301_v28 = vld [vmem:[%s2883_s0 + $0x38] sm:$0xff]  ;;  %v2310_v32 = vld [vmem:[%s2883_s0 + $0x40] sm:$0xff]  ;;  %v2324_v37 = vld [vmem:[%s2883_s0 + $0x48] sm:$0xff] }
   0x7   :  { %2060 = vmatprep.subr.bf16.mxu1 %v2059_v19  ;;  %1881 = vmatprep.mubr.msk.f32.mxu1 %vm109_vm0, %v69_v21  ;;  %v78_v31 = vrot.slane %v2288_v24, 1  ;;  %v80_v34 = vrot.slane %v2301_v28, 1  ;;  %v526_v38 = vrot.slane %v2265_v15, 2  ;;  %v523_v39 = vsel %vm520_vm2, %v521_v29, %v522_v30  ;;  %v2345_v48 = vld [vmem:[%s2883_s0 + $0x50] sm:$0xf]  ;;  %v2352_v50 = vld [vmem:[%s2883_s0 + $0x58] sm:$0xff] }
   0x8   :  { %1916 = vmatmul.mubr.msk.f32.vlgmr.msra.gmra.mrb[0].mxu0 %vm109_vm0, %v2237_v7  ;;  %2062 = vmatpush3.bf16.msra.mxu1 %v2059_v19  ;;  %v73_v27 = vsel %vm66_vm1, %v70_v16, %v72_v20  ;;  %v75_v33 = vsel %vm66_vm1, %v72_v20, %v74_v23  ;;  %v77_v35 = vsel %vm66_vm1, %v74_v23, %v76_v26  ;;  %v82_v41 = vrot.slane %v2310_v32, 1  ;;  %v2357_v51 = vld [vmem:[%s2883_s0 + $0x60] sm:$0xff]  ;;  %v2373_v60 = vld [vmem:[%s2883_s0 + $0x68] sm:$0xff]  ;;  %v2380_v62 = vld [vmem:[%s2883_s0 + $0x70] sm:$0xff] }
   0x9   :  { %2070 = vmatpush3.bf16.msra.mxu0 %v2067_v6  ;;  %1918 = vmatprep.mubr.msk.f32.mxu0 %vm109_vm0, %v2242_v8  ;;  %v79_v40 = vsel %vm66_vm1, %v76_v26, %v78_v31  ;;  %v81_v42 = vsel %vm66_vm1, %v78_v31, %v80_v34  ;;  %v84_v43 = vrot.slane %v2324_v37, 1  ;;  %v525_v45 = vsel %vm520_vm2, %v522_v30, %v524_v36  ;;  %v2395_v9 = vld [vmem:[%s2883_s0 + $0x78] sm:$0xff]  ;;  %v2402_v11 = vld [vmem:[%s2883_s0 + $0x80] sm:$0xff]  ;;  %v2418_v23 = vld [vmem:[%s2883_s0 + $0x88] sm:$0xff] }
   0xa   :  { %2072 = vmatprep.subr.bf16.mxu0 %v2071_v18  ;;  %2091 = vmatprep.subr.bf16.mxu1 %v2063_v3  ;;  %v530_v46 = vrot.slane %v2282_v22, 2  ;;  %v527_v47 = vsel %vm520_vm2, %v524_v36, %v526_v38  ;;  %v83_v49 = vsel %vm66_vm1, %v80_v34, %v82_v41  ;;  %v86_v52 = vrot.slane %v2345_v48, 1  ;;  %v2425_v26 = vld [vmem:[%s2883_s0 + $0x90] sm:$0xff]  ;;  %v2440_v36 = vld [vmem:[%s2883_s0 + $0x98] sm:$0xff] }
   0xb   :  { %1882 = vmatmul.mubr.msk.f32.vlgmr.msra.gmra.mrb[0].mxu1 %vm109_vm0, %v71_v25  ;;  %v85_v53 = vsel %vm66_vm1, %v82_v41, %v84_v43  ;;  %v88_v54 = vrot.slane %v2352_v50, 1  ;;  %v89_v55 = vrot.slane %v2357_v51, 1  ;;  %v532_v56 = vrot.slane %v2288_v24, 2 }
   0xc   :  { %1919 = vmatmul.mubr.msk.f32.gmra.mrb[2].mxu0 %vm109_vm0, %v2265_v15  ;;  %1884 = vmatprep.mubr.msk.f32.mxu1 %vm109_vm0, %v73_v27  ;;  %v529_v57 = vsel %vm520_vm2, %v526_v38, %v528_v44  ;;  %v534_v58 = vrot.slane %v2301_v28, 2  ;;  %v531_v59 = vsel %vm520_vm2, %v528_v44, %v530_v46  ;;  %v87_v61 = vsel %vm66_vm1, %v84_v43, %v86_v52 }
   0xd   :  { %1921 = vmatprep.mubr.msk.f32.mxu0 %vm109_vm0, %v2271_v17  ;;  %2092 = vmatpush3.bf16.msra.mxu1 %v2063_v3  ;;  %v91_v63 = vrot.slane %v2373_v60, 1  ;;  %v90_v0 = vsel %vm66_vm1, %v88_v54, %v89_v55  ;;  %v93_v1 = vrot.slane %v2380_v62, 1  ;;  %v536_v3 = vrot.slane %v2310_v32, 2 }
   0xe   :  { %v533_v4 = vsel %vm520_vm2, %v530_v46, %v532_v56  ;;  %v538_v5 = vrot.slane %v2324_v37, 2  ;;  %v535_v6 = vsel %vm520_vm2, %v532_v56, %v534_v58  ;;  %v95_v12 = vrot.slane %v2395_v9, 1 }
   0xf   :  { %1885 = vmatmul.mubr.msk.f32.gmra.mrb[2].mxu1 %vm109_vm0, %v75_v33  ;;  %v92_v10 = vsel %vm66_vm1, %v89_v55, %v91_v63  ;;  %v94_v13 = vsel %vm66_vm1, %v91_v63, %v93_v1  ;;  %v97_v14 = vrot.slane %v2402_v11, 1  ;;  %v537_v16 = vsel %vm520_vm2, %v534_v58, %v536_v3 }
  0x10   :  { %1922 = vmatmul.mubr.msk.f32.gmra.mrb[4].mxu0 %vm109_vm0, %v2282_v22  ;;  %1887 = vmatprep.mubr.msk.f32.mxu1 %vm109_vm0, %v77_v35  ;;  %v539_v19 = vsel %vm520_vm2, %v536_v3, %v538_v5  ;;  %v542_v20 = vrot.slane %v2352_v50, 2  ;;  %v543_v21 = vrot.slane %v2357_v51, 2  ;;  %v96_v25 = vsel %vm66_vm1, %v93_v1, %v95_v12 }
  0x11   :  { %1924 = vmatprep.mubr.msk.f32.mxu0 %vm109_vm0, %v2288_v24  ;;  %v99_v27 = vrot.slane %v2418_v23, 1  ;;  %v98_v29 = vsel %vm66_vm1, %v95_v12, %v97_v14  ;;  %v101_v30 = vrot.slane %v2425_v26, 1  ;;  %v545_v33 = vrot.slane %v2373_v60, 2 }
  0x12   :  { %v544_v34 = vsel %vm520_vm2, %v542_v20, %v543_v21  ;;  %v547_v35 = vrot.slane %v2380_v62, 2  ;;  %v549_v44 = vrot.slane %v2395_v9, 2  ;;  %v551_v46 = vrot.slane %v2402_v11, 2 }
  0x13   :  { %1888 = vmatmul.mubr.msk.f32.gmra.mrb[4].mxu1 %vm109_vm0, %v79_v40  ;;  %v100_v38 = vsel %vm66_vm1, %v97_v14, %v99_v27  ;;  %v103_v40 = vrot.slane %v2440_v36, 1  ;;  %v102_v41 = vsel %vm66_vm1, %v99_v27, %v101_v30  ;;  %v546_v43 = vsel %vm520_vm2, %v543_v21, %v545_v33 }
  0x14   :  { %1925 = vmatmul.mubr.msk.f32.gmra.mrb[6].mxu0 %vm109_vm0, %v2301_v28  ;;  %1890 = vmatprep.mubr.msk.f32.mxu1 %vm109_vm0, %v81_v42  ;;  %v550_v54 = vsel %vm520_vm2, %v547_v35, %v549_v44  ;;  %v553_v55 = vrot.slane %v2418_v23, 2  ;;  %v552_v56 = vsel %vm520_vm2, %v549_v44, %v551_v46  ;;  %v798_v14 = vrot.slane %v2282_v22, 3  ;;  %v1178_v44 = vld [vmem:[%s2884_s2 + $0x10] sm:$0xff] }
  0x15   :  { %1927 = vmatprep.mubr.msk.f32.mxu0 %vm109_vm0, %v2310_v32  ;;  %v806_v20 = vrot.slane %v2324_v37, 3  ;;  %v810_v27 = vrot.slane %v2352_v50, 3 }
  0x17   :  { %1891 = vmatmul.mubr.msk.f32.gmra.mrb[6].mxu1 %vm109_vm0, %v83_v49  ;;  %v104_v49 = vsel %vm66_vm1, %v101_v30, %v103_v40  ;;  %v813_v30 = vrot.slane %v2373_v60, 3 }
  0x18   :  { %1928 = vmatmul.mubr.msk.f32.gmra.mrb[8].mxu0 %vm109_vm0, %v2324_v37  ;;  %1893 = vmatprep.mubr.msk.f32.mxu1 %vm109_vm0, %v85_v53 }
  0x19   :  { %1949 = vmatprep.mubr.msk.f32.mxu0 %vm109_vm0, %v523_v39  ;;  %v2447_v39 = vld [vmem:[%s2883_s0 + $0xa0] sm:$0xff] }
  0x1a   :  { %v105_v42 = vrot.slane %v2447_v39, 1 }
  0x1b   :  { %1894 = vmatmul.mubr.msk.f32.gmra.mrb[8].mxu1 %vm109_vm0, %v87_v61  ;;  %v557_v61 = vrot.slane %v2440_v36, 2 }
  0x1c   :  { %1950 = vmatmul.mubr.msk.f32.vlgmr.msra.gmra.mrb[0].mxu0 %vm109_vm0, %v525_v45  ;;  %1896 = vmatprep.mubr.msk.f32.mxu1 %vm109_vm0, %v90_v0  ;;  %v548_v45 = vsel %vm520_vm2, %v545_v33, %v547_v35  ;;  %v106_v53 = vsel %vm66_vm1, %v103_v40, %v105_v42  ;;  %v559_v0 = vrot.slane %v2447_v39, 2  ;;  %v815_v33 = vrot.slane %v2380_v62, 3 }
  0x1d   :  { %2074 = vmatpush3.bf16.msra.mxu0 %v2071_v18  ;;  %1952 = vmatprep.mubr.msk.f32.mxu0 %vm109_vm0, %v527_v47  ;;  %v540_v18 = vrot.slane %v2345_v48, 2  ;;  %v2462_v47 = vld [vmem:[%s2883_s0 + $0xa8] sm:$0xf] }
  0x1e   :  { %v107_v52 = vrot.slane %v2462_v47, 1  ;;  %v561_v3 = vrot.slane %v2462_v47, 2 }
  0x1f   :  { %1897 = vmatmul.mubr.msk.f32.gmra.mrb[10].mxu1 %vm109_vm0, %v92_v10  ;;  %v541_v31 = vsel %vm520_vm2, %v538_v5, %v540_v18  ;;  %v790_v5 = vrot.slane %v2237_v7, 3  ;;  %v792_v10 = vrot.slane %v2242_v8, 3  ;;  %v802_v18 = vrot.slane %v2301_v28, 3 }
  0x20   :  { %1953 = vmatmul.mubr.msk.f32.gmra.mrb[2].mxu0 %vm109_vm0, %v529_v57  ;;  %1899 = vmatprep.mubr.msk.f32.mxu1 %vm109_vm0, %v94_v13  ;;  %v555_v57 = vrot.slane %v2425_v26, 2  ;;  %v108_v58 = vsel %vm66_vm1, %v105_v42, %v107_v52  ;;  %v562_v12 = vsel %vm520_vm2, %v559_v0, %v561_v3  ;;  %v796_v13 = vrot.slane %v2271_v17, 3  ;;  %v1181_v52 = vld [vmem:[%s2884_s2 + $0x28] sm:$0xff] }
  0x21   :  { %1955 = vmatprep.mubr.msk.f32.mxu0 %vm109_vm0, %v531_v59  ;;  %v554_v59 = vsel %vm520_vm2, %v551_v46, %v553_v55  ;;  %v793_v8 = vsel %vm788_vm3, %v790_v5, %v792_v10  ;;  %v1179_v46 = vld [vmem:[%s2884_s2 + $0x18] sm:$0xff] }
  0x22   :  { %v556_v63 = vsel %vm520_vm2, %v553_v55, %v555_v57  ;;  %v558_v1 = vsel %vm520_vm2, %v555_v57, %v557_v61  ;;  %v799_v22 = vsel %vm788_vm3, %v796_v13, %v798_v14 }
  0x23   :  { %1900 = vmatmul.mubr.msk.f32.gmra.mrb[12].mxu1 %vm109_vm0, %v96_v25  ;;  %v808_v25 = vrot.slane %v2345_v48, 3 }
  0x24   :  { %1956 = vmatmul.mubr.msk.f32.gmra.mrb[4].mxu0 %vm109_vm0, %v533_v4  ;;  %1902 = vmatprep.mubr.msk.f32.mxu1 %vm109_vm0, %v98_v29  ;;  %v789_v4 = vrot.slane %v2224_v2, 3  ;;  %v794_v2 = vrot.slane %v2265_v15, 3  ;;  %v811_v29 = vrot.slane %v2357_v51, 3 }
  0x25   :  { %1958 = vmatprep.mubr.msk.f32.mxu0 %vm109_vm0, %v535_v6  ;;  %v560_v6 = vsel %vm520_vm2, %v557_v61, %v559_v0  ;;  %v809_v37 = vsel %vm788_vm3, %v806_v20, %v808_v25 }
  0x26   :  { %v791_v7 = vsel %vm788_vm3, %v789_v4, %v790_v5  ;;  %v795_v15 = vsel %vm788_vm3, %v792_v10, %v794_v2  ;;  %v797_v17 = vsel %vm788_vm3, %v794_v2, %v796_v13  ;;  %v814_v48 = vsel %vm788_vm3, %v811_v29, %v813_v30  ;;  %v1182_v5 = vld [vmem:[%s2884_s2 + $0x30] sm:$0xff] }
  0x27   :  { %1903 = vmatmul.mubr.msk.f32.gmra.mrb[14].mxu1 %vm109_vm0, %v100_v38  ;;  %v823_v38 = vrot.slane %v2425_v26, 3 }
  0x28   :  { %1959 = vmatmul.mubr.msk.f32.gmra.mrb[6].mxu0 %vm109_vm0, %v537_v16  ;;  %1905 = vmatprep.mubr.msk.f32.mxu1 %vm109_vm0, %v102_v41  ;;  %v800_v16 = vrot.slane %v2288_v24, 3  ;;  %v827_v41 = vrot.slane %v2447_v39, 3 }
  0x29   :  { %1961 = vmatprep.mubr.msk.f32.mxu0 %vm109_vm0, %v539_v19  ;;  %v804_v19 = vrot.slane %v2310_v32, 3 }
  0x2a   :  { %v801_v24 = vsel %vm788_vm3, %v798_v14, %v800_v16  ;;  %v803_v28 = vsel %vm788_vm3, %v800_v16, %v802_v18 }
  0x2b   :  { %1906 = vmatmul.mubr.msk.f32.gmra.mrb[16].mxu1 %vm109_vm0, %v104_v49  ;;  %v805_v21 = vsel %vm788_vm3, %v802_v18, %v804_v19  ;;  %v807_v32 = vsel %vm788_vm3, %v804_v19, %v806_v20  ;;  %v1180_v49 = vld [vmem:[%s2884_s2 + $0x20] sm:$0xff] }
  0x2c   :  { %1962 = vmatmul.mubr.msk.f32.gmra.mrb[8].mxu0 %vm109_vm0, %v541_v31  ;;  %1908 = vmatprep.mubr.msk.f32.mxu1 %vm109_vm0, %v106_v53  ;;  %v812_v31 = vsel %vm788_vm3, %v810_v27, %v811_v29  ;;  %v2083_v53 = vpack.c.bf16 %v1181_v52, %v1180_v49 }
  0x2d   :  { %1964 = vmatprep.mubr.msk.f32.mxu0 %vm109_vm0, %v544_v34  ;;  %v819_v34 = vrot.slane %v2402_v11, 3 }
  0x2f   :  { %1909 = vmatmul.mubr.msk.f32.gmra.mrb[18].mxu1 %vm109_vm0, %v108_v58 }
  0x30   :  { %1965 = vmatmul.mubr.msk.f32.gmra.mrb[10].mxu0 %vm109_vm0, %v546_v43  ;;  %1930 = vmatprep.mubr.msk.f32.mxu1 %vm109_vm0, %v2352_v50  ;;  %v817_v50 = vrot.slane %v2395_v9, 3  ;;  %v1177_v43 = vld [vmem:[%s2884_s2 + $0x8] sm:$0xff] }
  0x31   :  { %1967 = vmatprep.mubr.msk.f32.mxu0 %vm109_vm0, %v548_v45 }
  0x32   :  { %v820_v35 = vsel %vm788_vm3, %v817_v50, %v819_v34 }
  0x33   :  { %1931 = vmatmul.mubr.msk.f32.vlgmr.msra.gmra.mrb[10].mxu1 %vm109_vm0, %v2357_v51  ;;  %v816_v51 = vsel %vm788_vm3, %v813_v30, %v815_v33 }
  0x34   :  { %1968 = vmatmul.mubr.msk.f32.gmra.mrb[12].mxu0 %vm109_vm0, %v550_v54  ;;  %1933 = vmatprep.mubr.msk.f32.mxu1 %vm109_vm0, %v2373_v60  ;;  %v818_v60 = vsel %vm788_vm3, %v815_v33, %v817_v50 }
  0x35   :  { %1970 = vmatprep.mubr.msk.f32.mxu0 %vm109_vm0, %v552_v56 }
  0x37   :  { %1934 = vmatmul.mubr.msk.f32.gmra.mrb[12].mxu1 %vm109_vm0, %v2380_v62  ;;  %v821_v62 = vrot.slane %v2418_v23, 3 }
  0x38   :  { %1971 = vmatmul.mubr.msk.f32.gmra.mrb[14].mxu0 %vm109_vm0, %v554_v59  ;;  %1936 = vmatprep.mubr.msk.f32.mxu1 %vm109_vm0, %v2395_v9 }
  0x39   :  { %1973 = vmatprep.mubr.msk.f32.mxu0 %vm109_vm0, %v556_v63  ;;  %v822_v9 = vsel %vm788_vm3, %v819_v34, %v821_v62  ;;  %v824_v40 = vsel %vm788_vm3, %v821_v62, %v823_v38 }
  0x3b   :  { %1937 = vmatmul.mubr.msk.f32.gmra.mrb[14].mxu1 %vm109_vm0, %v2402_v11  ;;  %v825_v11 = vrot.slane %v2440_v36, 3 }
  0x3c   :  { %1974 = vmatmul.mubr.msk.f32.gmra.mrb[16].mxu0 %vm109_vm0, %v558_v1  ;;  %1939 = vmatprep.mubr.msk.f32.mxu1 %vm109_vm0, %v2418_v23 }
  0x3d   :  { %1976 = vmatprep.mubr.msk.f32.mxu0 %vm109_vm0, %v560_v6  ;;  %v826_v23 = vsel %vm788_vm3, %v823_v38, %v825_v11  ;;  %v828_v42 = vsel %vm788_vm3, %v825_v11, %v827_v41  ;;  %v1183_v6 = vld [vmem:[%s2884_s2 + $0x38] sm:$0xff] }
  0x3e   :  { %v2087_v10 = vpack.c.bf16 %v1183_v6, %v1182_v5 }
  0x3f   :  { %1940 = vmatmul.mubr.msk.f32.gmra.mrb[16].mxu1 %vm109_vm0, %v2425_v26  ;;  %v829_v26 = vrot.slane %v2462_v47, 3  ;;  %v2079_v47 = vpack.c.bf16 %v1179_v46, %v1178_v44 }
  0x40   :  { %1977 = vmatmul.mubr.msk.f32.gmra.mrb[18].mxu0 %vm109_vm0, %v562_v12  ;;  %1942 = vmatprep.mubr.msk.f32.mxu1 %vm109_vm0, %v2440_v36 }
  0x41   :  { %1983 = vmatprep.mubr.msk.f32.mxu0 %vm109_vm0, %v791_v7  ;;  %v830_v36 = vsel %vm788_vm3, %v827_v41, %v829_v26 }
  0x43   :  { %1943 = vmatmul.mubr.msk.f32.gmra.mrb[18].mxu1 %vm109_vm0, %v2447_v39  ;;  %v1176_v39 = vld [vmem:[%s2884_s2] sm:$0xff]  ;;  %s2194_s2 = smov 64  }
  0x44   :  { %1984 = vmatmul.mubr.msk.f32.vlgmr.msra.gmra.mrb[0].mxu0 %vm109_vm0, %v793_v8  ;;  %v2075_v45 = vpack.c.bf16 %v1177_v43, %v1176_v39 }
  0x45   :  { %1986 = vmatprep.mubr.msk.f32.mxu0 %vm109_vm0, %v795_v15 }
  0x46   :  { %2076 = vmatprep.subr.bf16.mxu1 %v2075_v45 }
  0x47   :  { %2078 = vmatpush3.bf16.msra.mxu1 %v2075_v45 }
  0x48   :  { %1987 = vmatmul.mubr.msk.f32.gmra.mrb[2].mxu0 %vm109_vm0, %v797_v17  ;;  %2080 = vmatprep.subr.bf16.mxu1 %v2079_v47 }
  0x49   :  { %1989 = vmatprep.mubr.msk.f32.mxu0 %vm109_vm0, %v799_v22 }
  0x4b   :  { %2082 = vmatpush3.bf16.msra.mxu1 %v2079_v47 }
  0x4c   :  { %1990 = vmatmul.mubr.msk.f32.gmra.mrb[4].mxu0 %vm109_vm0, %v801_v24  ;;  %2084 = vmatprep.subr.bf16.mxu1 %v2083_v53 }
  0x4d   :  { %1992 = vmatprep.mubr.msk.f32.mxu0 %vm109_vm0, %v803_v28 }
  0x4f   :  { %2086 = vmatpush3.bf16.msra.mxu1 %v2083_v53 }
  0x50   :  { %1993 = vmatmul.mubr.msk.f32.gmra.mrb[6].mxu0 %vm109_vm0, %v805_v21  ;;  %2088 = vmatprep.subr.bf16.mxu1 %v2087_v10 }
  0x51   :  { %1995 = vmatprep.mubr.msk.f32.mxu0 %vm109_vm0, %v807_v32 }
  0x53   :  { %2090 = vmatpush3.bf16.msra.mxu1 %v2087_v10 }
  0x54   :  { %1996 = vmatmul.mubr.msk.f32.gmra.mrb[8].mxu0 %vm109_vm0, %v809_v37 }
  0x55   :  { %1998 = vmatprep.mubr.msk.f32.mxu0 %vm109_vm0, %v812_v31 }
  0x58   :  { %1999 = vmatmul.mubr.msk.f32.gmra.mrb[10].mxu0 %vm109_vm0, %v814_v48 }
  0x59   :  { %2001 = vmatprep.mubr.msk.f32.mxu0 %vm109_vm0, %v816_v51 }
  0x5c   :  { %2002 = vmatmul.mubr.msk.f32.gmra.mrb[12].mxu0 %vm109_vm0, %v818_v60 }
  0x5d   :  { %2004 = vmatprep.mubr.msk.f32.mxu0 %vm109_vm0, %v820_v35 }
  0x60   :  { %2005 = vmatmul.mubr.msk.f32.gmra.mrb[14].mxu0 %vm109_vm0, %v822_v9 }
  0x61   :  { %2007 = vmatprep.mubr.msk.f32.mxu0 %vm109_vm0, %v824_v40 }
  0x64   :  { %2008 = vmatmul.mubr.msk.f32.gmra.mrb[16].mxu0 %vm109_vm0, %v826_v23 }
  0x65   :  { %2010 = vmatprep.mubr.msk.f32.mxu0 %vm109_vm0, %v828_v42 }
  0x68   :  { %2011 = vmatmul.mubr.msk.f32.gmra.mrb[18].mxu0 %vm109_vm0, %v830_v36 }
  0xde   :  { %v1883_v54 = vpop.f32.mrb[0].mxu1 }
  0xdf   :  { %v216_v55 = vpop.f32.mrb[1].mxu1 }
  0xe2   :  { %v1886_v56 = vpop.f32.mrb[2].mxu1 }
  0xe3   :  { %v226_v57 = vpop.f32.mrb[3].mxu1 }
  0xe6   :  { %v1889_v58 = vpop.f32.mrb[4].mxu1 }
  0xe7   :  { %v236_v59 = vpop.f32.mrb[5].mxu1 }
  0xea   :  { %v1892_v61 = vpop.f32.mrb[6].mxu1 }
  0xeb   :  { %v246_v63 = vpop.f32.mrb[7].mxu1 }
  0xee   :  { %v1895_v0 = vpop.f32.mrb[8].mxu1 }
  0xef   :  { %v256_v1 = vpop.f32.mrb[9].mxu1 }
 0x106   :  { %v1932_v3 = vpop.f32.mrb[10].mxu1 }
 0x107   :  { %v471_v4 = vpop.f32.mrb[11].mxu1 }
 0x10a   :  { %v1935_v12 = vpop.f32.mrb[12].mxu1 }
 0x10b   :  { %v481_v2 = vpop.f32.mrb[13].mxu1 }
 0x10e   :  { %v1938_v7 = vpop.f32.mrb[14].mxu1 }
 0x10f   :  { %v491_v13 = vpop.f32.mrb[15].mxu1 }
 0x112   :  { %v1941_v17 = vpop.f32.mrb[16].mxu1 }
 0x113   :  { %v2599_v18 = vpop.f32.mrb[17].mxu1 }
 0x116   :  { %v1944_v21 = vpop.f32.mrb[18].mxu1 }
 0x117   :  { %v1985_v8 = vpop.f32.mrb[0].mxu0  ;;  %v511_v25 = vpop.f32.mrb[19].mxu1 }
 0x118   :  { %v2093_v14 = vadd.f32 %v1985_v8, %v1883_v54  ;;  %v937_v15 = vpop.f32.mrb[1].mxu0 }
 0x119   :  { %v2094_v16 = vadd.f32 %v937_v15, %v216_v55 }
 0x11a   :  { %v2605_v32 = vmul.f32 %v2093_v14, %v2093_v14 }
 0x11b   :  { %v2601_v22 = vmul.f32 %v2094_v16, %v2094_v16  ;;  %v1988_v19 = vpop.f32.mrb[2].mxu0 }
 0x11c   :  { %v2095_v24 = vadd.f32 %v1988_v19, %v1886_v56  ;;  %v947_v20 = vpop.f32.mrb[3].mxu0 }
 0x11d   :  { %v2096_v28 = vadd.f32 %v947_v20, %v226_v57  ;;  %1096 = vrot.lane.b32.xlu0 %v2601_v22, %s2194_s2 }
 0x11e   :  { %v2613_v33 = vmul.f32 %v2095_v24, %v2095_v24 }
 0x11f   :  { %v2607_v27 = vmul.f32 %v2096_v28, %v2096_v28  ;;  %v1991_v29 = vpop.f32.mrb[4].mxu0 }
 0x120   :  { %v2097_v37 = vadd.f32 %v1991_v29, %v1889_v58  ;;  %v957_v30 = vpop.f32.mrb[5].mxu0 }
 0x121   :  { %v2098_v31 = vadd.f32 %v957_v30, %v236_v59  ;;  %1098 = vrot.lane.b32.xlu0 %v2605_v32, %s2194_s2  ;;  %1100 = vrot.lane.b32.xlu1 %v2607_v27, %s2194_s2 }
 0x122   :  { %v2621_v62 = vmul.f32 %v2097_v37, %v2097_v37 }
 0x123   :  { %v2615_v48 = vmul.f32 %v2098_v31, %v2098_v31  ;;  %v1994_v50 = vpop.f32.mrb[6].mxu0 }
 0x124   :  { %v2099_v51 = vadd.f32 %v1994_v50, %v1892_v61  ;;  %v967_v34 = vpop.f32.mrb[7].mxu0 }
 0x125   :  { %v2100_v60 = vadd.f32 %v967_v34, %v246_v63  ;;  %1102 = vrot.lane.b32.xlu1 %v2613_v33, %s2194_s2  ;;  %1104 = vrot.lane.b32.xlu0 %v2615_v48, %s2194_s2 }
 0x126   :  { %v2629_v41 = vmul.f32 %v2099_v51, %v2099_v51 }
 0x127   :  { %v2623_v35 = vmul.f32 %v2100_v60, %v2100_v60  ;;  %v1997_v38 = vpop.f32.mrb[8].mxu0 }
 0x128   :  { %v2101_v9 = vadd.f32 %v1997_v38, %v1895_v0  ;;  %v977_v11 = vpop.f32.mrb[9].mxu0 }
 0x129   :  { %v2102_v40 = vadd.f32 %v977_v11, %v256_v1  ;;  %1106 = vrot.lane.b32.xlu1 %v2621_v62, %s2194_s2  ;;  %1108 = vrot.lane.b32.xlu0 %v2623_v35, %s2194_s2 }
 0x12a   :  { %v2637_v43 = vmul.f32 %v2101_v9, %v2101_v9 }
 0x12b   :  { %v2631_v23 = vmul.f32 %v2102_v40, %v2102_v40  ;;  %v2000_v26 = vpop.f32.mrb[10].mxu0 }
 0x12c   :  { %v2103_v42 = vadd.f32 %v2000_v26, %v1932_v3  ;;  %v987_v36 = vpop.f32.mrb[11].mxu0 }
 0x12d   :  { %v2104_v39 = vadd.f32 %v987_v36, %v471_v4  ;;  %1110 = vrot.lane.b32.xlu1 %v2629_v41, %s2194_s2  ;;  %1112 = vrot.lane.b32.xlu0 %v2631_v23, %s2194_s2 }
 0x12e   :  { %v2645_v52 = vmul.f32 %v2103_v42, %v2103_v42 }
 0x12f   :  { %v2639_v44 = vmul.f32 %v2104_v39, %v2104_v39  ;;  %v2003_v45 = vpop.f32.mrb[12].mxu0 }
 0x130   :  { %v2105_v46 = vadd.f32 %v2003_v45, %v1935_v12  ;;  %v997_v47 = vpop.f32.mrb[13].mxu0 }
 0x131   :  { %v2106_v49 = vadd.f32 %v997_v47, %v481_v2  ;;  %1114 = vrot.lane.b32.xlu1 %v2637_v43, %s2194_s2  ;;  %1116 = vrot.lane.b32.xlu0 %v2639_v44, %s2194_s2 }
 0x132   :  { %v2653_v58 = vmul.f32 %v2105_v46, %v2105_v46 }
 0x133   :  { %v2647_v53 = vmul.f32 %v2106_v49, %v2106_v49  ;;  %v2006_v54 = vpop.f32.mrb[14].mxu0 }
 0x134   :  { %v2107_v55 = vadd.f32 %v2006_v54, %v1938_v7  ;;  %v1007_v56 = vpop.f32.mrb[15].mxu0 }
 0x135   :  { %v2108_v57 = vadd.f32 %v1007_v56, %v491_v13  ;;  %1118 = vrot.lane.b32.xlu1 %v2645_v52, %s2194_s2  ;;  %1120 = vrot.lane.b32.xlu0 %v2647_v53, %s2194_s2 }
 0x136   :  { %v1071_v3 = vmul.f32 %v2107_v55, %v2107_v55 }
 0x137   :  { %v2655_v59 = vmul.f32 %v2108_v57, %v2108_v57  ;;  %v2009_v61 = vpop.f32.mrb[16].mxu0 }
 0x138   :  { %v2109_v63 = vadd.f32 %v2009_v61, %v1941_v17  ;;  %v1017_v0 = vpop.f32.mrb[17].mxu0 }
 0x139   :  { %v2110_v1 = vadd.f32 %v1017_v0, %v2599_v18  ;;  %1122 = vrot.lane.b32.xlu1 %v2653_v58, %s2194_s2  ;;  %1124 = vrot.lane.b32.xlu0 %v2655_v59, %s2194_s2 }
 0x13a   :  { %v1073_v2 = vmul.f32 %v2109_v63, %v2109_v63 }
 0x13b   :  { %v1072_v4 = vmul.f32 %v2110_v1, %v2110_v1  ;;  %v2012_v5 = vpop.f32.mrb[18].mxu0 }
 0x13c   :  { %v2111_v6 = vadd.f32 %v2012_v5, %v1944_v21  ;;  %v1027_v10 = vpop.f32.mrb[19].mxu0 }
 0x13d   :  { %v2112_v12 = vadd.f32 %v1027_v10, %v511_v25  ;;  %1126 = vrot.lane.b32.xlu1 %v1071_v3, %s2194_s2  ;;  %1128 = vrot.lane.b32.xlu0 %v1072_v4, %s2194_s2 }
 0x13e   :  { %v1075_v13 = vmul.f32 %v2111_v6, %v2111_v6 }
 0x13f   :  { %v1074_v7 = vmul.f32 %v2112_v12, %v2112_v12 }
 0x141   :  { %1130 = vrot.lane.b32.xlu1 %v1073_v2, %s2194_s2  ;;  %1132 = vrot.lane.b32.xlu0 %v1074_v7, %s2194_s2 }
 0x145   :  { %1134 = vrot.lane.b32.xlu1 %v1075_v13, %s2194_s2 }
 0x18f   :  { %v1097_v8 = vpop.permute.xlu0 %1096 }
 0x190   :  { %v1156_v14 = vadd.f32 %v1097_v8, %v2601_v22 }
 0x192   :  { %2029 = vmatprep.mubr.msk.f32.mxu1 %vm1184_vm4, %v1156_v14 }
 0x193   :  { %v1099_v15 = vpop.permute.xlu0 %1098  ;;  %v1101_v16 = vpop.permute.xlu1 %1100 }
 0x194   :  { %v1157_v17 = vadd.f32 %v1099_v15, %v2605_v32  ;;  %v1158_v18 = vadd.f32 %v1101_v16, %v2607_v27 }
 0x196   :  { %2030 = vmatmul.mubr.msk.f32.vlgmr.msra.gmra.mrb[20].mxu1 %vm1184_vm4, %v1157_v17 }
 0x197   :  { %2032 = vmatprep.mubr.msk.f32.mxu1 %vm1184_vm4, %v1158_v18  ;;  %v1103_v19 = vpop.permute.xlu1 %1102  ;;  %v1105_v24 = vpop.permute.xlu0 %1104 }
 0x198   :  { %v1159_v20 = vadd.f32 %v1103_v19, %v2613_v33  ;;  %v1160_v28 = vadd.f32 %v1105_v24, %v2615_v48 }
 0x19a   :  { %2033 = vmatmul.mubr.msk.f32.gmra.mrb[22].mxu1 %vm1184_vm4, %v1159_v20 }
 0x19b   :  { %v1107_v22 = vpop.permute.xlu1 %1106  ;;  %2035 = vmatprep.mubr.msk.f32.mxu1 %vm1184_vm4, %v1160_v28  ;;  %v1109_v21 = vpop.permute.xlu0 %1108 }
 0x19c   :  { %v1161_v25 = vadd.f32 %v1107_v22, %v2621_v62  ;;  %v1162_v32 = vadd.f32 %v1109_v21, %v2623_v35 }
 0x19e   :  { %2036 = vmatmul.mubr.msk.f32.gmra.mrb[24].mxu1 %vm1184_vm4, %v1161_v25 }
 0x19f   :  { %v1111_v27 = vpop.permute.xlu1 %1110  ;;  %2038 = vmatprep.mubr.msk.f32.mxu1 %vm1184_vm4, %v1162_v32  ;;  %v1113_v29 = vpop.permute.xlu0 %1112 }
 0x1a0   :  { %v1163_v37 = vadd.f32 %v1111_v27, %v2629_v41  ;;  %v1164_v30 = vadd.f32 %v1113_v29, %v2631_v23 }
 0x1a2   :  { %2039 = vmatmul.mubr.msk.f32.gmra.mrb[26].mxu1 %vm1184_vm4, %v1163_v37 }
 0x1a3   :  { %v1115_v31 = vpop.permute.xlu1 %1114  ;;  %2041 = vmatprep.mubr.msk.f32.mxu1 %vm1184_vm4, %v1164_v30  ;;  %v1117_v33 = vpop.permute.xlu0 %1116 }
 0x1a4   :  { %v1165_v48 = vadd.f32 %v1115_v31, %v2637_v43  ;;  %v1166_v50 = vadd.f32 %v1117_v33, %v2639_v44 }
 0x1a6   :  { %2042 = vmatmul.mubr.msk.f32.gmra.mrb[28].mxu1 %vm1184_vm4, %v1165_v48 }
 0x1a7   :  { %v1119_v51 = vpop.permute.xlu1 %1118  ;;  %2044 = vmatprep.mubr.msk.f32.mxu1 %vm1184_vm4, %v1166_v50  ;;  %v1121_v34 = vpop.permute.xlu0 %1120 }
 0x1a8   :  { %v1167_v60 = vadd.f32 %v1119_v51, %v2645_v52  ;;  %v1168_v62 = vadd.f32 %v1121_v34, %v2647_v53 }
 0x1aa   :  { %2045 = vmatmul.mubr.msk.f32.gmra.mrb[30].mxu1 %vm1184_vm4, %v1167_v60 }
 0x1ab   :  { %v1123_v35 = vpop.permute.xlu1 %1122  ;;  %2047 = vmatprep.mubr.msk.f32.mxu1 %vm1184_vm4, %v1168_v62  ;;  %v1125_v38 = vpop.permute.xlu0 %1124 }
 0x1ac   :  { %v1169_v9 = vadd.f32 %v1123_v35, %v2653_v58  ;;  %v1170_v11 = vadd.f32 %v1125_v38, %v2655_v59 }
 0x1ae   :  { %2048 = vmatmul.mubr.msk.f32.gmra.mrb[32].mxu1 %vm1184_vm4, %v1169_v9 }
 0x1af   :  { %v1127_v40 = vpop.permute.xlu1 %1126  ;;  %2050 = vmatprep.mubr.msk.f32.mxu1 %vm1184_vm4, %v1170_v11  ;;  %v1129_v41 = vpop.permute.xlu0 %1128 }
 0x1b0   :  { %v1171_v23 = vadd.f32 %v1127_v40, %v1071_v3  ;;  %v1172_v26 = vadd.f32 %v1129_v41, %v1072_v4 }
 0x1b2   :  { %2051 = vmatmul.mubr.msk.f32.gmra.mrb[34].mxu1 %vm1184_vm4, %v1171_v23 }
 0x1b3   :  { %v1131_v42 = vpop.permute.xlu1 %1130  ;;  %2053 = vmatprep.mubr.msk.f32.mxu1 %vm1184_vm4, %v1172_v26  ;;  %v1133_v36 = vpop.permute.xlu0 %1132 }
 0x1b4   :  { %v1173_v39 = vadd.f32 %v1131_v42, %v1073_v2  ;;  %v1174_v43 = vadd.f32 %v1133_v36, %v1074_v7 }
 0x1b6   :  { %2054 = vmatmul.mubr.msk.f32.gmra.mrb[36].mxu1 %vm1184_vm4, %v1173_v39 }
 0x1b7   :  { %v1135_v44 = vpop.permute.xlu1 %1134  ;;  %2056 = vmatprep.mubr.msk.f32.mxu1 %vm1184_vm4, %v1174_v43 }
 0x1b8   :  { %v1175_v45 = vadd.f32 %v1135_v44, %v1075_v13 }
 0x1ba   :  { %2057 = vmatmul.mubr.msk.f32.gmra.mrb[38].mxu1 %vm1184_vm4, %v1175_v45 }
 0x269   :  { %v2031_v46 = vpop.f32.mrb[20].mxu1 }
 0x26a   :  { %v1411_v47 = vmax.f32 %v2031_v46, 1e-10  ;;  %v1311_v49 = vpop.f32.mrb[21].mxu1 }
 0x26b   :  { %v1410_v52 = vmax.f32 %v1311_v49, 1e-10 }
 0x26c   :  { %2154 = vlog2.f32 %v1411_v47 }
 0x26d   :  { %2156 = vlog2.f32 %v1410_v52  ;;  %v2034_v53 = vpop.f32.mrb[22].mxu1 }
 0x26e   :  { %v1413_v54 = vmax.f32 %v2034_v53, 1e-10  ;;  %v1321_v55 = vpop.f32.mrb[23].mxu1 }
 0x26f   :  { %v1412_v56 = vmax.f32 %v1321_v55, 1e-10 }
 0x270   :  { %2158 = vlog2.f32 %v1413_v54 }
 0x271   :  { %2160 = vlog2.f32 %v1412_v56  ;;  %v2037_v57 = vpop.f32.mrb[24].mxu1 }
 0x272   :  { %v1415_v58 = vmax.f32 %v2037_v57, 1e-10  ;;  %v1331_v59 = vpop.f32.mrb[25].mxu1 }
 0x273   :  { %v1414_v61 = vmax.f32 %v1331_v59, 1e-10 }
 0x274   :  { %2162 = vlog2.f32 %v1415_v58 }
 0x275   :  { %2164 = vlog2.f32 %v1414_v61  ;;  %v2040_v63 = vpop.f32.mrb[26].mxu1 }
 0x276   :  { %v2155_v0 = vpop.eup %2154  ;;  %v1417_v1 = vmax.f32 %v2040_v63, 1e-10  ;;  %v1341_v3 = vpop.f32.mrb[27].mxu1 }
 0x277   :  { %v2157_v4 = vpop.eup %2156  ;;  %v1416_v5 = vmax.f32 %v1341_v3, 1e-10  ;;  %v1433_v6 = vmul.f32 0.6931472, %v2155_v0 }
 0x278   :  { %2166 = vlog2.f32 %v1417_v1  ;;  %v1431_v10 = vmul.f32 0.6931472, %v2157_v4 }
 0x279   :  { %2168 = vlog2.f32 %v1416_v5  ;;  %v2043_v12 = vpop.f32.mrb[28].mxu1  ;;  %v2702_v2 = vmul.f32 0.4342945, %v1433_v6 }
 0x27a   :  { %v2159_v7 = vpop.eup %2158  ;;  %v1419_v13 = vmax.f32 %v2043_v12, 1e-10  ;;  %v1351_v8 = vpop.f32.mrb[29].mxu1  ;;  %v2704_v14 = vmul.f32 0.4342945, %v1431_v10 }
 0x27b   :  { %v2161_v15 = vpop.eup %2160  ;;  %v1418_v16 = vmax.f32 %v1351_v8, 1e-10  ;;  %v1493_v17 = vsel %vm109_vm0, %v2702_v2, -inf  ;;  %v1437_v18 = vmul.f32 0.6931472, %v2159_v7 }
 0x27c   :  { %2170 = vlog2.f32 %v1419_v13  ;;  %1494 = vmax.xlane.f32.xlu1 %v1493_v17  ;;  %v1490_v19 = vsel %vm109_vm0, %v2704_v14, -inf  ;;  %v1435_v24 = vmul.f32 0.6931472, %v2161_v15 }
 0x27d   :  { %2172 = vlog2.f32 %v1418_v16  ;;  %v2046_v20 = vpop.f32.mrb[30].mxu1  ;;  %1491 = vmax.xlane.f32.xlu0 %v1490_v19  ;;  %v2710_v28 = vmul.f32 0.4342945, %v1437_v18 }
 0x27e   :  { %v2163_v22 = vpop.eup %2162  ;;  %v1421_v21 = vmax.f32 %v2046_v20, 1e-10  ;;  %v1361_v25 = vpop.f32.mrb[31].mxu1  ;;  %v2714_v37 = vmul.f32 0.4342945, %v1435_v24 }
 0x27f   :  { %v2165_v32 = vpop.eup %2164  ;;  %v1420_v27 = vmax.f32 %v1361_v25, 1e-10  ;;  %v1499_v29 = vsel %vm109_vm0, %v2710_v28, -inf  ;;  %v1441_v31 = vmul.f32 0.6931472, %v2163_v22 }
 0x280   :  { %2174 = vlog2.f32 %v1421_v21  ;;  %v1439_v30 = vmul.f32 0.6931472, %v2165_v32  ;;  %v1496_v35 = vsel %vm109_vm0, %v2714_v37, -inf }
 0x281   :  { %2176 = vlog2.f32 %v1420_v27  ;;  %v2049_v33 = vpop.f32.mrb[32].mxu1  ;;  %1500 = vmax.xlane.f32.xlu0 %v1499_v29  ;;  %v2722_v40 = vmul.f32 0.4342945, %v1441_v31 }
 0x282   :  { %v2167_v48 = vpop.eup %2166  ;;  %v1423_v50 = vmax.f32 %v2049_v33, 1e-10  ;;  %v1371_v51 = vpop.f32.mrb[33].mxu1  ;;  %v2716_v34 = vmul.f32 0.4342945, %v1439_v30 }
 0x283   :  { %v2169_v60 = vpop.eup %2168  ;;  %v1422_v62 = vmax.f32 %v1371_v51, 1e-10  ;;  %v1445_v38 = vmul.f32 0.6931472, %v2167_v48  ;;  %v1505_v47 = vsel %vm109_vm0, %v2722_v40, -inf }
 0x284   :  { %2178 = vlog2.f32 %v1423_v50  ;;  %v1502_v9 = vsel %vm109_vm0, %v2716_v34, -inf  ;;  %v1443_v11 = vmul.f32 0.6931472, %v2169_v60 }
 0x285   :  { %2180 = vlog2.f32 %v1422_v62  ;;  %1503 = vmax.xlane.f32.xlu1 %v1502_v9  ;;  %v2052_v41 = vpop.f32.mrb[34].mxu1  ;;  %1497 = vmax.xlane.f32.xlu0 %v1496_v35  ;;  %v2726_v44 = vmul.f32 0.4342945, %v1445_v38 }
 0x286   :  { %v2171_v23 = vpop.eup %2170  ;;  %v1425_v26 = vmax.f32 %v2052_v41, 1e-10  ;;  %v1381_v42 = vpop.f32.mrb[35].mxu1  ;;  %v2724_v36 = vmul.f32 0.4342945, %v1443_v11 }
 0x287   :  { %v2173_v39 = vpop.eup %2172  ;;  %v1424_v43 = vmax.f32 %v1381_v42, 1e-10  ;;  %v1449_v45 = vmul.f32 0.6931472, %v2171_v23  ;;  %v1511_v59 = vsel %vm109_vm0, %v2726_v44, -inf }
 0x288   :  { %2182 = vlog2.f32 %v1425_v26  ;;  %v1508_v46 = vsel %vm109_vm0, %v2724_v36, -inf  ;;  %v1447_v49 = vmul.f32 0.6931472, %v2173_v39 }
 0x289   :  { %2184 = vlog2.f32 %v1424_v43  ;;  %1509 = vmax.xlane.f32.xlu1 %v1508_v46  ;;  %v2055_v52 = vpop.f32.mrb[36].mxu1  ;;  %1506 = vmax.xlane.f32.xlu0 %v1505_v47  ;;  %v2736_v61 = vmul.f32 0.4342945, %v1449_v45 }
 0x28a   :  { %v2175_v53 = vpop.eup %2174  ;;  %v1427_v54 = vmax.f32 %v2055_v52, 1e-10  ;;  %v1391_v55 = vpop.f32.mrb[37].mxu1  ;;  %v2732_v56 = vmul.f32 0.4342945, %v1447_v49 }
 0x28b   :  { %v2177_v57 = vpop.eup %2176  ;;  %v1426_v58 = vmax.f32 %v1391_v55, 1e-10  ;;  %v1453_v1 = vmul.f32 0.6931472, %v2175_v53  ;;  %v1517_v13 = vsel %vm109_vm0, %v2736_v61, -inf }
 0x28c   :  { %2186 = vlog2.f32 %v1427_v54  ;;  %v1514_v63 = vsel %vm109_vm0, %v2732_v56, -inf  ;;  %v1451_v0 = vmul.f32 0.6931472, %v2177_v57 }
 0x28d   :  { %2188 = vlog2.f32 %v1426_v58  ;;  %1515 = vmax.xlane.f32.xlu1 %v1514_v63  ;;  %1512 = vmax.xlane.f32.xlu0 %v1511_v59  ;;  %v2058_v3 = vpop.f32.mrb[38].mxu1  ;;  %v2746_v17 = vmul.f32 0.4342945, %v1453_v1 }
 0x28e   :  { %v2179_v4 = vpop.eup %2178  ;;  %v1429_v5 = vmax.f32 %v2058_v3, 1e-10  ;;  %v1401_v6 = vpop.f32.mrb[39].mxu1  ;;  %v2740_v10 = vmul.f32 0.4342945, %v1451_v0 }
 0x28f   :  { %v2181_v12 = vpop.eup %2180  ;;  %v1428_v7 = vmax.f32 %v1401_v6, 1e-10  ;;  %v1457_v8 = vmul.f32 0.6931472, %v2179_v4  ;;  %v1523_v21 = vsel %vm109_vm0, %v2746_v17, -inf }
 0x290   :  { %2190 = vlog2.f32 %v1429_v5  ;;  %v1520_v15 = vsel %vm109_vm0, %v2740_v10, -inf  ;;  %v1455_v16 = vmul.f32 0.6931472, %v2181_v12 }
 0x291   :  { %2192 = vlog2.f32 %v1428_v7  ;;  %1521 = vmax.xlane.f32.xlu1 %v1520_v15  ;;  %1518 = vmax.xlane.f32.xlu0 %v1517_v13  ;;  %v2750_v20 = vmul.f32 0.4342945, %v1457_v8 }
 0x292   :  { %v2183_v18 = vpop.eup %2182  ;;  %v2748_v19 = vmul.f32 0.4342945, %v1455_v16 }
 0x293   :  { %v2185_v24 = vpop.eup %2184  ;;  %v1461_v32 = vmul.f32 0.6931472, %v2183_v18  ;;  %v1529_v48 = vsel %vm109_vm0, %v2750_v20, -inf }
 0x294   :  { %v1526_v22 = vsel %vm109_vm0, %v2748_v19, -inf  ;;  %v1459_v25 = vmul.f32 0.6931472, %v2185_v24 }
 0x295   :  { %1527 = vmax.xlane.f32.xlu1 %v1526_v22  ;;  %1524 = vmax.xlane.f32.xlu0 %v1523_v21  ;;  %v2762_v51 = vmul.f32 0.4342945, %v1461_v32 }
 0x296   :  { %v2187_v27 = vpop.eup %2186  ;;  %v2756_v29 = vmul.f32 0.4342945, %v1459_v25 }
 0x297   :  { %v2189_v30 = vpop.eup %2188  ;;  %v1465_v31 = vmul.f32 0.6931472, %v2187_v27  ;;  %v1535_v11 = vsel %vm109_vm0, %v2762_v51, -inf }
 0x298   :  { %v1532_v33 = vsel %vm109_vm0, %v2756_v29, -inf  ;;  %v1463_v50 = vmul.f32 0.6931472, %v2189_v30 }
 0x299   :  { %1533 = vmax.xlane.f32.xlu1 %v1532_v33  ;;  %1530 = vmax.xlane.f32.xlu0 %v1529_v48  ;;  %v2766_v38 = vmul.f32 0.4342945, %v1465_v31 }
 0x29a   :  { %v2191_v60 = vpop.eup %2190  ;;  %v2764_v62 = vmul.f32 0.4342945, %v1463_v50 }
 0x29b   :  { %v2193_v35 = vpop.eup %2192  ;;  %v1469_v23 = vmul.f32 0.6931472, %v2191_v60  ;;  %v1541_v42 = vsel %vm109_vm0, %v2766_v38, -inf }
 0x29c   :  { %v1538_v9 = vsel %vm109_vm0, %v2764_v62, -inf  ;;  %v1467_v41 = vmul.f32 0.6931472, %v2193_v35 }
 0x29d   :  { %1539 = vmax.xlane.f32.xlu1 %v1538_v9  ;;  %1536 = vmax.xlane.f32.xlu0 %v1535_v11  ;;  %v2778_v43 = vmul.f32 0.4342945, %v1469_v23 }
 0x29e   :  { %v2772_v26 = vmul.f32 0.4342945, %v1467_v41 }
 0x29f   :  { %v1547_v45 = vsel %vm109_vm0, %v2778_v43, -inf }
 0x2a0   :  { %v1544_v39 = vsel %vm109_vm0, %v2772_v26, -inf }
 0x2a1   :  { %1542 = vmax.xlane.f32.xlu0 %v1541_v42  ;;  %1545 = vmax.xlane.f32.xlu1 %v1544_v39 }
 0x2a5   :  { %1548 = vmax.xlane.f32.xlu0 %v1547_v45 }
 0x309   :  { %v1495_v47 = vpop.xlane.xlu1 %1494 }
 0x30a   :  { %v1492_v46 = vpop.xlane.xlu0 %1491 }
 0x30e   :  { %v1501_v49 = vpop.xlane.xlu0 %1500 }
 0x312   :  { %v1504_v52 = vpop.xlane.xlu1 %1503  ;;  %v1498_v53 = vpop.xlane.xlu0 %1497 }
 0x313   :  { %v1550_v7 = vmax.f32 %v1492_v46, %v1504_v52 }
 0x316   :  { %v1510_v54 = vpop.xlane.xlu1 %1509  ;;  %v1507_v55 = vpop.xlane.xlu0 %1506 }
 0x317   :  { %v1551_v12 = vmax.f32 %v1495_v47, %v1507_v55  ;;  %v1552_v13 = vmax.f32 %v1498_v53, %v1510_v54 }
 0x31a   :  { %v1516_v57 = vpop.xlane.xlu1 %1515  ;;  %v1513_v58 = vpop.xlane.xlu0 %1512 }
 0x31b   :  { %v1553_v8 = vmax.f32 %v1501_v49, %v1513_v58  ;;  %v1554_v18 = vmax.f32 %v1550_v7, %v1516_v57 }
 0x31e   :  { %v1522_v59 = vpop.xlane.xlu1 %1521  ;;  %v1519_v63 = vpop.xlane.xlu0 %1518 }
 0x31f   :  { %v1555_v15 = vmax.f32 %v1551_v12, %v1519_v63  ;;  %v1556_v24 = vmax.f32 %v1552_v13, %v1522_v59 }
 0x322   :  { %v1528_v0 = vpop.xlane.xlu1 %1527  ;;  %v1525_v1 = vpop.xlane.xlu0 %1524 }
 0x323   :  { %v1557_v22 = vmax.f32 %v1553_v8, %v1525_v1  ;;  %v1558_v32 = vmax.f32 %v1554_v18, %v1528_v0 }
 0x326   :  { %v1534_v3 = vpop.xlane.xlu1 %1533  ;;  %v1531_v4 = vpop.xlane.xlu0 %1530 }
 0x327   :  { %v1559_v21 = vmax.f32 %v1555_v15, %v1531_v4  ;;  %v1560_v27 = vmax.f32 %v1556_v24, %v1534_v3 }
 0x32a   :  { %v1540_v5 = vpop.xlane.xlu1 %1539  ;;  %v1537_v6 = vpop.xlane.xlu0 %1536 }
 0x32b   :  { %v1561_v30 = vmax.f32 %v1557_v22, %v1537_v6  ;;  %v1562_v48 = vmax.f32 %v1558_v32, %v1540_v5 }
 0x32e   :  { %v1543_v16 = vpop.xlane.xlu0 %1542  ;;  %v1546_v25 = vpop.xlane.xlu1 %1545 }
 0x32f   :  { %v1563_v31 = vmax.f32 %v1559_v21, %v1543_v16  ;;  %v1564_v50 = vmax.f32 %v1560_v27, %v1546_v25 }
 0x331   :  { %v1566_v35 = vmax.f32 %v1562_v48, %v1563_v31 }
 0x332   :  { %v1549_v33 = vpop.xlane.xlu0 %1548 }
 0x333   :  { %v1565_v60 = vmax.f32 %v1561_v30, %v1549_v33 }
 0x335   :  { %v1567_v9 = vmax.f32 %v1564_v50, %v1565_v60 }
 0x337   :  { %v1568_v11 = vmax.f32 %v1566_v35, %v1567_v9 }
 0x339   :  { %v1569_v41 = vrot.slane %v1568_v11, 4 }
 0x33b   :  { %v1570_v23 = vmax.f32 %v1568_v11, %v1569_v41 }
 0x33d   :  { %v1571_v42 = vrot.slane %v1570_v23, 2 }
 0x33f   :  { %v1572_v39 = vmax.f32 %v1570_v23, %v1571_v42 }
 0x341   :  { %v1573_v45 = vrot.slane %v1572_v39, 1 }
 0x343   :  { %v1574_v46 = vmax.f32 %v1572_v39, %v1573_v45 }
 0x345   :  { %v1760_v47 = vadd.f32 -8.0, %v1574_v46 }
 0x347   :  { %v1576_v49 = vmax.f32 %v2704_v14, %v1760_v47  ;;  %v1577_v52 = vmax.f32 %v2702_v2, %v1760_v47  ;;  %v1578_v53 = vmax.f32 %v2714_v37, %v1760_v47  ;;  %v1579_v54 = vmax.f32 %v2710_v28, %v1760_v47 }
 0x348   :  { %v1580_v55 = vmax.f32 %v2716_v34, %v1760_v47  ;;  %v1581_v57 = vmax.f32 %v2722_v40, %v1760_v47  ;;  %v1582_v58 = vmax.f32 %v2724_v36, %v1760_v47  ;;  %v1583_v59 = vmax.f32 %v2726_v44, %v1760_v47 }
 0x349   :  { %v1584_v63 = vmax.f32 %v2732_v56, %v1760_v47  ;;  %v1585_v0 = vmax.f32 %v2736_v61, %v1760_v47  ;;  %v1586_v14 = vmax.f32 %v2740_v10, %v1760_v47  ;;  %v1587_v2 = vmax.f32 %v2746_v17, %v1760_v47 }
 0x34a   :  { %v1588_v37 = vmax.f32 %v2748_v19, %v1760_v47  ;;  %v1589_v28 = vmax.f32 %v2750_v20, %v1760_v47  ;;  %v1590_v34 = vmax.f32 %v2756_v29, %v1760_v47  ;;  %v1591_v40 = vmax.f32 %v2762_v51, %v1760_v47 }
 0x34b   :  { %v1592_v36 = vmax.f32 %v2764_v62, %v1760_v47  ;;  %v1593_v44 = vmax.f32 %v2766_v38, %v1760_v47  ;;  %v1594_v56 = vmax.f32 %v2772_v26, %v1760_v47  ;;  %v1595_v61 = vmax.f32 %v2778_v43, %v1760_v47 }
 0x34c   :  { %v1596_v1 = vadd.f32 4.0, %v1576_v49  ;;  %v1597_v10 = vadd.f32 4.0, %v1577_v52  ;;  %v1598_v3 = vadd.f32 4.0, %v1578_v53  ;;  %v1599_v17 = vadd.f32 4.0, %v1579_v54 }
 0x34d   :  { %v1600_v4 = vadd.f32 4.0, %v1580_v55  ;;  %v1601_v19 = vadd.f32 4.0, %v1581_v57  ;;  %v1602_v5 = vadd.f32 4.0, %v1582_v58  ;;  %v1603_v20 = vadd.f32 4.0, %v1583_v59 }
 0x34e   :  { %v1604_v6 = vadd.f32 4.0, %v1584_v63  ;;  %v1605_v29 = vadd.f32 4.0, %v1585_v0  ;;  %v1606_v12 = vadd.f32 4.0, %v1586_v14  ;;  %v1607_v51 = vadd.f32 4.0, %v1587_v2 }
 0x34f   :  { %v1608_v7 = vadd.f32 4.0, %v1588_v37  ;;  %v1609_v62 = vadd.f32 4.0, %v1589_v28  ;;  %v1610_v13 = vadd.f32 4.0, %v1590_v34  ;;  %v1611_v38 = vadd.f32 4.0, %v1591_v40 }
 0x350   :  { %v1612_v8 = vadd.f32 4.0, %v1592_v36  ;;  %v1613_v26 = vadd.f32 4.0, %v1593_v44  ;;  %v1614_v15 = vadd.f32 4.0, %v1594_v56  ;;  %v1615_v43 = vadd.f32 4.0, %v1595_v61 }
 0x351   :  { %v1616_v16 = vmul.f32 0.25, %v1596_v1  ;;  %v1617_v18 = vmul.f32 0.25, %v1597_v10  ;;  %v1618_v24 = vmul.f32 0.25, %v1598_v3  ;;  %v1619_v22 = vmul.f32 0.25, %v1599_v17 }
 0x352   :  { %v1620_v21 = vmul.f32 0.25, %v1600_v4  ;;  %v1621_v25 = vmul.f32 0.25, %v1601_v19  ;;  %v1622_v32 = vmul.f32 0.25, %v1602_v5  ;;  %v1623_v27 = vmul.f32 0.25, %v1603_v20 }
 0x353   :  { %v1624_v30 = vmul.f32 0.25, %v1604_v6  ;;  %v1625_v31 = vmul.f32 0.25, %v1605_v29  ;;  %v1626_v33 = vmul.f32 0.25, %v1606_v12  ;;  %v1627_v48 = vmul.f32 0.25, %v1607_v51  ;;  %1636 = vst.msk [vmem:[%s2885_s3] sm:$0xff] %vm109_vm0, %v1616_v16  ;;  %1637 = vst.msk [vmem:[%s2885_s3 + $0x8] sm:$0xff] %vm109_vm0, %v1617_v18 }
 0x354   :  { %1638 = vst.msk [vmem:[%s2885_s3 + $0x10] sm:$0xff] %vm109_vm0, %v1618_v24  ;;  %1639 = vst.msk [vmem:[%s2885_s3 + $0x18] sm:$0xff] %vm109_vm0, %v1619_v22  ;;  %v1628_v50 = vmul.f32 0.25, %v1608_v7  ;;  %v1629_v60 = vmul.f32 0.25, %v1609_v62  ;;  %v1630_v35 = vmul.f32 0.25, %v1610_v13  ;;  %v1631_v9 = vmul.f32 0.25, %v1611_v38 }
 0x355   :  { %1640 = vst.msk [vmem:[%s2885_s3 + $0x20] sm:$0xff] %vm109_vm0, %v1620_v21  ;;  %1641 = vst.msk [vmem:[%s2885_s3 + $0x28] sm:$0xff] %vm109_vm0, %v1621_v25  ;;  %v1632_v11 = vmul.f32 0.25, %v1612_v8  ;;  %v1633_v41 = vmul.f32 0.25, %v1613_v26  ;;  %v1634_v23 = vmul.f32 0.25, %v1614_v15  ;;  %v1635_v42 = vmul.f32 0.25, %v1615_v43 }
 0x356   :  { %1642 = vst.msk [vmem:[%s2885_s3 + $0x30] sm:$0xff] %vm109_vm0, %v1622_v32  ;;  %1643 = vst.msk [vmem:[%s2885_s3 + $0x38] sm:$0xff] %vm109_vm0, %v1623_v27 }
 0x357   :  { %1644 = vst.msk [vmem:[%s2885_s3 + $0x40] sm:$0xff] %vm109_vm0, %v1624_v30  ;;  %1645 = vst.msk [vmem:[%s2885_s3 + $0x48] sm:$0xff] %vm109_vm0, %v1625_v31 }
 0x358   :  { %1646 = vst.msk [vmem:[%s2885_s3 + $0x50] sm:$0xff] %vm109_vm0, %v1626_v33  ;;  %1647 = vst.msk [vmem:[%s2885_s3 + $0x58] sm:$0xff] %vm109_vm0, %v1627_v48 }
 0x359   :  { %1648 = vst.msk [vmem:[%s2885_s3 + $0x60] sm:$0xff] %vm109_vm0, %v1628_v50  ;;  %1649 = vst.msk [vmem:[%s2885_s3 + $0x68] sm:$0xff] %vm109_vm0, %v1629_v60 }
 0x35a   :  { %1650 = vst.msk [vmem:[%s2885_s3 + $0x70] sm:$0xff] %vm109_vm0, %v1630_v35  ;;  %1651 = vst.msk [vmem:[%s2885_s3 + $0x78] sm:$0xff] %vm109_vm0, %v1631_v9 }
 0x35b   :  { %1652 = vst.msk [vmem:[%s2885_s3 + $0x80] sm:$0xff] %vm109_vm0, %v1632_v11  ;;  %1653 = vst.msk [vmem:[%s2885_s3 + $0x88] sm:$0xff] %vm109_vm0, %v1633_v41 }
 0x35c   :  { %1654 = vst.msk [vmem:[%s2885_s3 + $0x90] sm:$0xff] %vm109_vm0, %v1634_v23  ;;  %1655 = vst.msk [vmem:[%s2885_s3 + $0x98] sm:$0xff] %vm109_vm0, %v1635_v42 }

// kernel: whisper_kmeans_forward.4
= control target key start
LH: loop header
LB: loop body
LE: loop exit
PB: predicated region body
PF: predicated region fallthrough
CT: control target
= control target key end

     0   :  { %vm66_vm0 = vcmask 1040384   ;;  %vm123_vm1 = vcmask 1046528   ;;  %vm166_vm2 = vcmask 130048   ;;  %vm577_vm3 = vcmask 1045504   ;;  %s4023_s1 = inlined_call_operand.vmem [shape: f32[48,32], index: 1, kind: input, shape index: {}]   ;;  %s4024_s0 = inlined_call_operand.vmem [shape: f32[2,80,16], index: 0, kind: input, shape index: {}]   ;;  %s4025_s3 = inlined_call_operand.vmem [shape: f32[96,32], index: 3, kind: input, shape index: {}]   ;;  %s4026_s2 = inlined_call_operand.vmem [shape: f32[1,32], index: 2, kind: input, shape index: {}]   ;;  %s4027_s5 = inlined_call_operand.vmem [shape: f32[80,160], index: 5, kind: input, shape index: {}]   ;;  %s4028_s4 = inlined_call_operand.vmem [shape: f32[1,32], index: 4, kind: input, shape index: {}]   ;;  %s4029_s6 = inlined_call_operand.vmem [shape: f32[80,32], index: 6, kind: input, shape index: {}]   ;;  %s4030_s7 = inlined_call_operand.vmem [shape: f32[80,32], index: 7, kind: output, shape index: {}]  }
   0x1   :  { %v115_v0 = vld [vmem:[%s4023_s1 + $0x10] sm:$0xff]  ;;  %v116_v1 = vld [vmem:[%s4023_s1 + $0x18] sm:$0xff]  ;;  %v26_v2 = vld [vmem:[%s4024_s0] sm:$0xff]  ;;  %vm1176_vm4 = vcmask 261120  }
   0x2   :  { %v2656_v3 = vpack.c.bf16 %v116_v1, %v115_v0  ;;  %v27_v4 = vld [vmem:[%s4024_s0 + $0x8] sm:$0xff]  ;;  %v67_v5 = vrot.slane %v26_v2, 7  ;;  %v28_v6 = vld [vmem:[%s4024_s0 + $0x10] sm:$0xff]  ;;  %v113_v7 = vld [vmem:[%s4023_s1] sm:$0xff] }
   0x3   :  { %v68_v8 = vrot.slane %v27_v4, 7  ;;  %v70_v9 = vrot.slane %v28_v6, 7  ;;  %v114_v10 = vld [vmem:[%s4023_s1 + $0x8] sm:$0xff]  ;;  %v29_v11 = vld [vmem:[%s4024_s0 + $0x18] sm:$0xff]  ;;  %v30_v12 = vld [vmem:[%s4024_s0 + $0x20] sm:$0xff] }
   0x4   :  { %2657 = vmatprep.subr.bf16.mxu0 %v2656_v3  ;;  %v2934_v13 = vsel %vm66_vm0, 0.0, %v67_v5  ;;  %v2660_v14 = vpack.c.bf16 %v114_v10, %v113_v7  ;;  %v72_v15 = vrot.slane %v29_v11, 7  ;;  %v74_v16 = vrot.slane %v30_v12, 7  ;;  %v31_v17 = vld [vmem:[%s4024_s0 + $0x28] sm:$0xff]  ;;  %v32_v18 = vld [vmem:[%s4024_s0 + $0x30] sm:$0xff]  ;;  %2722 = vmatprep.subr.bf16.mxu1 %v2656_v3  ;;  %v33_v26 = vld [vmem:[%s4024_s0 + $0x38] sm:$0xff] }
   0x5   :  { %2659 = vmatpush3.bf16.msra.mxu0 %v2656_v3  ;;  %v2943_v19 = vsel %vm66_vm0, %v67_v5, %v68_v8  ;;  %v124_v20 = vrot.slane %v2934_v13, 1  ;;  %v2947_v21 = vsel %vm66_vm0, %v68_v8, %v70_v9  ;;  %v76_v22 = vrot.slane %v31_v17, 7  ;;  %2723 = vmatpush3.bf16.msra.mxu1 %v2656_v3  ;;  %v34_v27 = vld [vmem:[%s4024_s0 + $0x40] sm:$0xff]  ;;  %v35_v32 = vld [vmem:[%s4024_s0 + $0x48] sm:$0xff]  ;;  %v36_v62 = vld [vmem:[%s4024_s0 + $0x50] sm:$0xff] }
   0x6   :  { %v125_v23 = vrot.slane %v2943_v19, 1  ;;  %v127_v24 = vrot.slane %v2947_v21, 1  ;;  %2661 = vmatprep.subr.bf16.mxu0 %v2660_v14  ;;  %v2952_v25 = vsel %vm66_vm0, %v70_v9, %v72_v15  ;;  %v2962_v29 = vsel %vm66_vm0, %v72_v15, %v74_v16  ;;  %v117_v37 = vld [vmem:[%s4023_s1 + $0x20] sm:$0xff]  ;;  %v118_v38 = vld [vmem:[%s4023_s1 + $0x28] sm:$0xff]  ;;  %v37_v63 = vld [vmem:[%s4024_s0 + $0x58] sm:$0xff] }
   0x7   :  { %v129_v28 = vrot.slane %v2952_v25, 1  ;;  %v2965_v30 = vsel %vm66_vm0, %v74_v16, %v76_v22  ;;  %v78_v31 = vrot.slane %v32_v18, 7  ;;  %v131_v35 = vrot.slane %v2962_v29, 1  ;;  %v38_v57 = vld [vmem:[%s4024_s0 + $0x60] sm:$0xff]  ;;  %v39_v60 = vld [vmem:[%s4024_s0 + $0x68] sm:$0xff]  ;;  %v40_v2 = vld [vmem:[%s4024_s0 + $0x70] sm:$0xff] }
   0x8   :  { %v126_v33 = vsel %vm123_vm1, %v124_v20, %v125_v23  ;;  %v128_v34 = vsel %vm123_vm1, %v125_v23, %v127_v24  ;;  %v133_v36 = vrot.slane %v2965_v30, 1  ;;  %v80_v41 = vrot.slane %v33_v26, 7  ;;  %v41_v6 = vld [vmem:[%s4024_s0 + $0x78] sm:$0xff]  ;;  %v42_v12 = vld [vmem:[%s4024_s0 + $0x80] sm:$0xff] }
   0x9   :  { %2444 = vmatprep.mubr.msk.f32.mxu0 %vm166_vm2, %v126_v33  ;;  %v130_v39 = vsel %vm123_vm1, %v127_v24, %v129_v28  ;;  %v2983_v40 = vsel %vm66_vm0, %v76_v22, %v78_v31  ;;  %v82_v42 = vrot.slane %v34_v27, 7  ;;  %v84_v43 = vrot.slane %v35_v32, 7 }
   0xa   :  { %2445 = vmatmul.mubr.msk.f32.vlgmr.msra.gmra.mrb[0].mxu0 %vm166_vm2, %v128_v34  ;;  %v132_v44 = vsel %vm123_vm1, %v129_v28, %v131_v35  ;;  %v135_v45 = vrot.slane %v2983_v40, 1  ;;  %v2990_v46 = vsel %vm66_vm0, %v78_v31, %v80_v41  ;;  %v2664_v47 = vpack.c.bf16 %v118_v38, %v117_v37  ;;  %v44_v28 = vld [vmem:[%s4024_s0 + $0x90] sm:$0xff]  ;;  %v45_v34 = vld [vmem:[%s4024_s0 + $0x98] sm:$0xff] }
   0xb   :  { %2663 = vmatpush3.bf16.msra.mxu0 %v2660_v14  ;;  %2447 = vmatprep.mubr.msk.f32.mxu0 %vm166_vm2, %v130_v39  ;;  %v134_v48 = vsel %vm123_vm1, %v131_v35, %v133_v36  ;;  %v137_v49 = vrot.slane %v2990_v46, 1  ;;  %v2995_v50 = vsel %vm66_vm0, %v80_v41, %v82_v42  ;;  %v2998_v51 = vsel %vm66_vm0, %v82_v42, %v84_v43  ;;  %v43_v14 = vld [vmem:[%s4024_s0 + $0x88] sm:$0xff] }
   0xc   :  { %2665 = vmatprep.subr.bf16.mxu0 %v2664_v47  ;;  %v136_v52 = vsel %vm123_vm1, %v133_v36, %v135_v45  ;;  %v139_v53 = vrot.slane %v2995_v50, 1  ;;  %v141_v55 = vrot.slane %v2998_v51, 1  ;;  %v3007_v56 = vsel %vm66_vm0, %v84_v43, 0.0 }
   0xd   :  { %v138_v54 = vsel %vm123_vm1, %v135_v45, %v137_v49  ;;  %v143_v59 = vrot.slane %v3007_v56, 1  ;;  %v89_v0 = vrot.slane %v38_v57, 7  ;;  %v91_v1 = vrot.slane %v39_v60, 7 }
   0xe   :  { %2448 = vmatmul.mubr.msk.f32.gmra.mrb[2].mxu0 %vm166_vm2, %v132_v44  ;;  %v140_v58 = vsel %vm123_vm1, %v137_v49, %v139_v53  ;;  %v142_v61 = vsel %vm123_vm1, %v139_v53, %v141_v55  ;;  %v86_v4 = vrot.slane %v36_v62, 7  ;;  %v87_v5 = vrot.slane %v37_v63, 7 }
   0xf   :  { %2450 = vmatprep.mubr.msk.f32.mxu0 %vm166_vm2, %v134_v48  ;;  %v144_v3 = vsel %vm123_vm1, %v141_v55, %v143_v59  ;;  %v93_v8 = vrot.slane %v40_v2, 7  ;;  %v3041_v10 = vsel %vm66_vm0, %v89_v0, %v91_v1  ;;  %v95_v11 = vrot.slane %v41_v6, 7 }
  0x10   :  { %v3036_v7 = vsel %vm66_vm0, %v87_v5, %v89_v0  ;;  %v3052_v15 = vsel %vm66_vm0, 0.0, %v86_v4  ;;  %v3055_v16 = vsel %vm66_vm0, %v86_v4, %v87_v5  ;;  %v150_v17 = vrot.slane %v3041_v10, 1 }
  0x11   :  { %v148_v9 = vrot.slane %v3036_v7, 1  ;;  %v145_v18 = vrot.slane %v3052_v15, 1  ;;  %v146_v20 = vrot.slane %v3055_v16, 1  ;;  %v3061_v22 = vsel %vm66_vm0, %v91_v1, %v93_v8 }
  0x12   :  { %2451 = vmatmul.mubr.msk.f32.gmra.mrb[4].mxu0 %vm166_vm2, %v136_v52  ;;  %v97_v23 = vrot.slane %v42_v12, 7  ;;  %v99_v24 = vrot.slane %v43_v14, 7  ;;  %v152_v26 = vrot.slane %v3061_v22, 1  ;;  %v3067_v27 = vsel %vm66_vm0, %v93_v8, %v95_v11 }
  0x13   :  { %2453 = vmatprep.mubr.msk.f32.mxu0 %vm166_vm2, %v138_v54  ;;  %v147_v31 = vsel %vm123_vm1, %v145_v18, %v146_v20  ;;  %v149_v32 = vsel %vm123_vm1, %v146_v20, %v148_v9  ;;  %v154_v33 = vrot.slane %v3067_v27, 1  ;;  %v151_v35 = vsel %vm123_vm1, %v148_v9, %v150_v17 }
  0x14   :  { %2459 = vmatprep.mubr.msk.f32.mxu1 %vm166_vm2, %v147_v31  ;;  %v3083_v36 = vsel %vm66_vm0, %v95_v11, %v97_v23  ;;  %v101_v37 = vrot.slane %v44_v28, 7  ;;  %v3090_v39 = vsel %vm66_vm0, %v97_v23, %v99_v24  ;;  %v103_v41 = vrot.slane %v45_v34, 7  ;;  %v1123_v34 = vld [vmem:[%s4025_s3 + $0x28] sm:$0xff] }
  0x15   :  { %2460 = vmatmul.mubr.msk.f32.vlgmr.msra.gmra.mrb[0].mxu1 %vm166_vm2, %v149_v32  ;;  %v156_v38 = vrot.slane %v3083_v36, 1  ;;  %v153_v42 = vsel %vm123_vm1, %v150_v17, %v152_v26  ;;  %v158_v43 = vrot.slane %v3090_v39, 1  ;;  %v155_v44 = vsel %vm123_vm1, %v152_v26, %v154_v33 }
  0x16   :  { %2454 = vmatmul.mubr.msk.f32.gmra.mrb[6].mxu0 %vm166_vm2, %v140_v58  ;;  %2462 = vmatprep.mubr.msk.f32.mxu1 %vm166_vm2, %v151_v35  ;;  %v3099_v45 = vsel %vm66_vm0, %v99_v24, %v101_v37  ;;  %v3106_v48 = vsel %vm66_vm0, %v101_v37, %v103_v41  ;;  %v3115_v54 = vsel %vm66_vm0, %v103_v41, 0.0  ;;  %v578_v60 = vrot.slane %v2934_v13, 2  ;;  %v1125_v37 = vld [vmem:[%s4025_s3 + $0x38] sm:$0xff]  ;;  %v1119_v41 = vld [vmem:[%s4025_s3 + $0x8] sm:$0xff] }
  0x17   :  { %2456 = vmatprep.mubr.msk.f32.mxu0 %vm166_vm2, %v142_v61  ;;  %v157_v49 = vsel %vm123_vm1, %v154_v33, %v156_v38  ;;  %v162_v52 = vrot.slane %v3106_v48, 1  ;;  %v159_v53 = vsel %vm123_vm1, %v156_v38, %v158_v43  ;;  %v164_v57 = vrot.slane %v3115_v54, 1  ;;  %v1122_v33 = vld [vmem:[%s4025_s3 + $0x20] sm:$0xff] }
  0x18   :  { %v579_v61 = vrot.slane %v2943_v19, 2  ;;  %v581_v62 = vrot.slane %v2947_v21, 2  ;;  %v583_v0 = vrot.slane %v2952_v25, 2  ;;  %v591_v4 = vrot.slane %v2990_v46, 2 }
  0x19   :  { %2463 = vmatmul.mubr.msk.f32.gmra.mrb[2].mxu1 %vm166_vm2, %v153_v42  ;;  %v165_v59 = vsel %vm123_vm1, %v162_v52, %v164_v57  ;;  %v595_v6 = vrot.slane %v2998_v51, 2  ;;  %v599_v8 = vrot.slane %v3052_v15, 2  ;;  %v600_v9 = vrot.slane %v3055_v16, 2  ;;  %v3258_v57 = vld [vmem:[%s4026_s2] ss:$0 sm:$0xff] }
  0x1a   :  { %2457 = vmatmul.mubr.msk.f32.gmra.mrb[8].mxu0 %vm166_vm2, %v144_v3  ;;  %2465 = vmatprep.mubr.msk.f32.mxu1 %vm166_vm2, %v155_v44  ;;  %v580_v63 = vsel %vm577_vm3, %v578_v60, %v579_v61  ;;  %v584_v1 = vsel %vm577_vm3, %v581_v62, %v583_v0  ;;  %v604_v12 = vrot.slane %v3041_v10, 2  ;;  %v610_v17 = vrot.slane %v3083_v36, 2 }
  0x1b   :  { %2478 = vmatprep.mubr.msk.f32.mxu0 %vm166_vm2, %v2934_v13  ;;  %v582_v13 = vsel %vm577_vm3, %v579_v61, %v581_v62  ;;  %v601_v14 = vsel %vm577_vm3, %v599_v8, %v600_v9  ;;  %v612_v18 = vrot.slane %v3090_v39, 2  ;;  %v616_v24 = vrot.slane %v3106_v48, 2 }
  0x1c   :  { %v618_v28 = vrot.slane %v3115_v54, 2  ;;  %v2668_v35 = vpack.c.bf16 %v1123_v34, %v1122_v33 }
  0x1d   :  { %2466 = vmatmul.mubr.msk.f32.gmra.mrb[4].mxu1 %vm166_vm2, %v157_v49  ;;  %v613_v26 = vsel %vm577_vm3, %v610_v17, %v612_v18 }
  0x1e   :  { %2479 = vmatmul.mubr.msk.f32.vlgmr.msra.gmra.mrb[0].mxu0 %vm166_vm2, %v2943_v19  ;;  %2468 = vmatprep.mubr.msk.f32.mxu1 %vm166_vm2, %v159_v53  ;;  %v585_v19 = vrot.slane %v2962_v29, 2  ;;  %v619_v32 = vsel %vm577_vm3, %v616_v24, %v618_v28 }
  0x1f   :  { %2667 = vmatpush3.bf16.msra.mxu0 %v2664_v47  ;;  %2481 = vmatprep.mubr.msk.f32.mxu0 %vm166_vm2, %v2947_v21  ;;  %v160_v47 = vrot.slane %v3099_v45, 1  ;;  %v587_v21 = vrot.slane %v2965_v30, 2 }
  0x20   :  { %v586_v2 = vsel %vm577_vm3, %v583_v0, %v585_v19  ;;  %2669 = vmatprep.subr.bf16.mxu1 %v2668_v35 }
  0x21   :  { %v161_v55 = vsel %vm123_vm1, %v158_v43, %v160_v47  ;;  %v163_v58 = vsel %vm123_vm1, %v160_v47, %v162_v52  ;;  %v588_v3 = vsel %vm577_vm3, %v585_v19, %v587_v21  ;;  %2671 = vmatpush3.bf16.msra.mxu1 %v2668_v35 }
  0x22   :  { %2482 = vmatmul.mubr.msk.f32.gmra.mrb[2].mxu0 %vm166_vm2, %v2952_v25  ;;  %2469 = vmatmul.mubr.msk.f32.gmra.mrb[6].mxu1 %vm166_vm2, %v161_v55  ;;  %v589_v25 = vrot.slane %v2983_v40, 2 }
  0x23   :  { %2484 = vmatprep.mubr.msk.f32.mxu0 %vm166_vm2, %v2962_v29  ;;  %2471 = vmatprep.mubr.msk.f32.mxu1 %vm166_vm2, %v163_v58 }
  0x24   :  { %v590_v29 = vsel %vm577_vm3, %v587_v21, %v589_v25  ;;  %v592_v5 = vsel %vm577_vm3, %v589_v25, %v591_v4 }
  0x26   :  { %2485 = vmatmul.mubr.msk.f32.gmra.mrb[4].mxu0 %vm166_vm2, %v2965_v30  ;;  %2472 = vmatmul.mubr.msk.f32.gmra.mrb[8].mxu1 %vm166_vm2, %v165_v59  ;;  %v593_v30 = vrot.slane %v2995_v50, 2 }
  0x27   :  { %2487 = vmatprep.mubr.msk.f32.mxu0 %vm166_vm2, %v2983_v40 }
  0x28   :  { %v594_v40 = vsel %vm577_vm3, %v591_v4, %v593_v30  ;;  %v596_v11 = vsel %vm577_vm3, %v593_v30, %v595_v6 }
  0x2a   :  { %2488 = vmatmul.mubr.msk.f32.gmra.mrb[6].mxu0 %vm166_vm2, %v2990_v46  ;;  %v597_v46 = vrot.slane %v3007_v56, 2  ;;  %v606_v56 = vrot.slane %v3061_v22, 2 }
  0x2b   :  { %2490 = vmatprep.mubr.msk.f32.mxu0 %vm166_vm2, %v2995_v50  ;;  %v602_v50 = vrot.slane %v3036_v7, 2 }
  0x2e   :  { %2491 = vmatmul.mubr.msk.f32.gmra.mrb[8].mxu0 %vm166_vm2, %v2998_v51  ;;  %v598_v51 = vsel %vm577_vm3, %v595_v6, %v597_v46 }
  0x2f   :  { %2493 = vmatprep.mubr.msk.f32.mxu0 %vm166_vm2, %v3052_v15  ;;  %v603_v15 = vsel %vm577_vm3, %v600_v9, %v602_v50 }
  0x32   :  { %2494 = vmatmul.mubr.msk.f32.gmra.mrb[10].mxu0 %vm166_vm2, %v3055_v16  ;;  %v608_v16 = vrot.slane %v3067_v27, 2 }
  0x33   :  { %2496 = vmatprep.mubr.msk.f32.mxu0 %vm166_vm2, %v3036_v7  ;;  %v605_v7 = vsel %vm577_vm3, %v602_v50, %v604_v12 }
  0x34   :  { %v609_v20 = vsel %vm577_vm3, %v606_v56, %v608_v16  ;;  %v611_v23 = vsel %vm577_vm3, %v608_v16, %v610_v17 }
  0x36   :  { %2497 = vmatmul.mubr.msk.f32.gmra.mrb[12].mxu0 %vm166_vm2, %v3041_v10  ;;  %v607_v10 = vsel %vm577_vm3, %v604_v12, %v606_v56 }
  0x37   :  { %2499 = vmatprep.mubr.msk.f32.mxu0 %vm166_vm2, %v3061_v22  ;;  %v614_v22 = vrot.slane %v3099_v45, 2 }
  0x39   :  { %v617_v31 = vsel %vm577_vm3, %v614_v22, %v616_v24 }
  0x3a   :  { %2500 = vmatmul.mubr.msk.f32.gmra.mrb[14].mxu0 %vm166_vm2, %v3067_v27  ;;  %v615_v27 = vsel %vm577_vm3, %v612_v18, %v614_v22 }
  0x3b   :  { %2502 = vmatprep.mubr.msk.f32.mxu0 %vm166_vm2, %v3083_v36  ;;  %v1124_v36 = vld [vmem:[%s4025_s3 + $0x30] sm:$0xff] }
  0x3c   :  { %v2672_v38 = vpack.c.bf16 %v1125_v37, %v1124_v36 }
  0x3e   :  { %2503 = vmatmul.mubr.msk.f32.gmra.mrb[16].mxu0 %vm166_vm2, %v3090_v39  ;;  %2673 = vmatprep.subr.bf16.mxu1 %v2672_v38  ;;  %v1118_v39 = vld [vmem:[%s4025_s3] sm:$0xff] }
  0x3f   :  { %2505 = vmatprep.mubr.msk.f32.mxu0 %vm166_vm2, %v3099_v45  ;;  %2675 = vmatpush3.bf16.msra.mxu1 %v2672_v38  ;;  %v3232_v42 = vpack.c.bf16 %v1119_v41, %v1118_v39  ;;  %v1120_v38 = vld [vmem:[%s4025_s3 + $0x10] sm:$0xff]  ;;  %v1121_v39 = vld [vmem:[%s4025_s3 + $0x18] sm:$0xff] }
  0x41   :  { %2677 = vmatprep.subr.bf16.mxu1 %v3232_v42 }
  0x42   :  { %2506 = vmatmul.mubr.msk.f32.gmra.mrb[18].mxu0 %vm166_vm2, %v3106_v48 }
  0x43   :  { %2512 = vmatprep.mubr.msk.f32.mxu0 %vm166_vm2, %v580_v63 }
  0x46   :  { %2513 = vmatmul.mubr.msk.f32.vlgmr.msra.gmra.mrb[0].mxu0 %vm166_vm2, %v582_v13 }
  0x47   :  { %2515 = vmatprep.mubr.msk.f32.mxu0 %vm166_vm2, %v584_v1 }
  0x4a   :  { %2516 = vmatmul.mubr.msk.f32.gmra.mrb[2].mxu0 %vm166_vm2, %v586_v2 }
  0x4b   :  { %2518 = vmatprep.mubr.msk.f32.mxu0 %vm166_vm2, %v588_v3 }
  0x4e   :  { %2519 = vmatmul.mubr.msk.f32.gmra.mrb[4].mxu0 %vm166_vm2, %v590_v29 }
  0x4f   :  { %2521 = vmatprep.mubr.msk.f32.mxu0 %vm166_vm2, %v592_v5 }
  0x52   :  { %2522 = vmatmul.mubr.msk.f32.gmra.mrb[6].mxu0 %vm166_vm2, %v594_v40 }
  0x53   :  { %2524 = vmatprep.mubr.msk.f32.mxu0 %vm166_vm2, %v596_v11 }
  0x56   :  { %2525 = vmatmul.mubr.msk.f32.gmra.mrb[8].mxu0 %vm166_vm2, %v598_v51 }
  0x57   :  { %2527 = vmatprep.mubr.msk.f32.mxu0 %vm166_vm2, %v601_v14 }
  0x5a   :  { %2528 = vmatmul.mubr.msk.f32.gmra.mrb[10].mxu0 %vm166_vm2, %v603_v15 }
  0x5b   :  { %2530 = vmatprep.mubr.msk.f32.mxu0 %vm166_vm2, %v605_v7 }
  0x5e   :  { %2531 = vmatmul.mubr.msk.f32.gmra.mrb[12].mxu0 %vm166_vm2, %v607_v10 }
  0x5f   :  { %2533 = vmatprep.mubr.msk.f32.mxu0 %vm166_vm2, %v609_v20 }
  0x62   :  { %2534 = vmatmul.mubr.msk.f32.gmra.mrb[14].mxu0 %vm166_vm2, %v611_v23 }
  0x63   :  { %2536 = vmatprep.mubr.msk.f32.mxu0 %vm166_vm2, %v613_v26 }
  0x66   :  { %2537 = vmatmul.mubr.msk.f32.gmra.mrb[16].mxu0 %vm166_vm2, %v615_v27 }
  0x67   :  { %2539 = vmatprep.mubr.msk.f32.mxu0 %vm166_vm2, %v617_v31 }
  0x6a   :  { %2540 = vmatmul.mubr.msk.f32.gmra.mrb[18].mxu0 %vm166_vm2, %v619_v32 }
  0xe8   :  { %v3235_v43 = vpop.f32.mrb[0].mxu1 }
  0xe9   :  { %v3237_v44 = vpop.f32.mrb[1].mxu1 }
  0xec   :  { %v3239_v45 = vpop.f32.mrb[2].mxu1 }
  0xed   :  { %v3241_v47 = vpop.f32.mrb[3].mxu1 }
  0xf0   :  { %v3243_v48 = vpop.f32.mrb[4].mxu1 }
  0xf1   :  { %v3245_v49 = vpop.f32.mrb[5].mxu1 }
  0xf5   :  { %v3247_v52 = vpop.f32.mrb[6].mxu1 }
  0xf6   :  { %v3249_v53 = vpop.f32.mrb[7].mxu1 }
  0xf9   :  { %v3251_v54 = vpop.f32.mrb[8].mxu1 }
  0xfa   :  { %v3253_v55 = vpop.f32.mrb[9].mxu1 }
 0x119   :  { %v2514_v58 = vpop.f32.mrb[0].mxu0 }
 0x11a   :  { %v3261_v59 = vadd.f32 %v2514_v58, %v3258_v57  ;;  %v726_v60 = vpop.f32.mrb[1].mxu0 }
 0x11b   :  { %v3264_v61 = vadd.f32 %v3258_v57, %v726_v60 }
 0x11c   :  { %v873_v62 = vmul.f32 %v3261_v59, %v3261_v59 }
 0x11d   :  { %v872_v63 = vmul.f32 %v3264_v61, %v3264_v61  ;;  %v2517_v0 = vpop.f32.mrb[2].mxu0 }
 0x11e   :  { %v893_v13 = vmul.f32 %v873_v62, %v3261_v59  ;;  %v3272_v19 = vadd.f32 %v2517_v0, %v3258_v57  ;;  %v736_v1 = vpop.f32.mrb[3].mxu0 }
 0x11f   :  { %v892_v21 = vmul.f32 %v872_v63, %v3264_v61  ;;  %v3276_v2 = vadd.f32 %v3258_v57, %v736_v1 }
 0x120   :  { %v913_v25 = vmul.f32 0.044715, %v893_v13  ;;  %v875_v3 = vmul.f32 %v3272_v19, %v3272_v19  ;;  %v1126_v13 = vld [vmem:[%s4025_s3 + $0x40] sm:$0xff] }
 0x121   :  { %v912_v4 = vmul.f32 0.044715, %v892_v21  ;;  %v874_v29 = vmul.f32 %v3276_v2, %v3276_v2  ;;  %v2520_v30 = vpop.f32.mrb[4].mxu0 }
 0x122   :  { %v933_v5 = vadd.f32 %v913_v25, %v3261_v59  ;;  %v895_v6 = vmul.f32 %v875_v3, %v3272_v19  ;;  %v3285_v40 = vadd.f32 %v2520_v30, %v3258_v57  ;;  %v746_v46 = vpop.f32.mrb[5].mxu0 }
 0x123   :  { %v932_v8 = vadd.f32 %v912_v4, %v3264_v61  ;;  %v894_v9 = vmul.f32 %v874_v29, %v3276_v2  ;;  %v3290_v11 = vadd.f32 %v3258_v57, %v746_v46  ;;  %v3333_v4 = vpack.c.bf16 %v1121_v39, %v1120_v38  ;;  %v1127_v29 = vld [vmem:[%s4025_s3 + $0x48] sm:$0xff] }
 0x124   :  { %v953_v50 = vmul.f32 0.7978846, %v933_v5  ;;  %v915_v51 = vmul.f32 0.044715, %v895_v6  ;;  %v877_v12 = vmul.f32 %v3285_v40, %v3285_v40 }
 0x125   :  { %v952_v14 = vmul.f32 0.7978846, %v932_v8  ;;  %v914_v56 = vmul.f32 0.044715, %v894_v9  ;;  %v876_v15 = vmul.f32 %v3290_v11, %v3290_v11  ;;  %v2523_v16 = vpop.f32.mrb[6].mxu0 }
 0x126   :  { %2805 = vtanh.f32 %v953_v50  ;;  %v935_v7 = vadd.f32 %v915_v51, %v3272_v19  ;;  %v897_v17 = vmul.f32 %v877_v12, %v3285_v40  ;;  %v3299_v10 = vadd.f32 %v2523_v16, %v3258_v57  ;;  %v756_v18 = vpop.f32.mrb[7].mxu0 }
 0x127   :  { %2807 = vtanh.f32 %v952_v14  ;;  %v934_v20 = vadd.f32 %v914_v56, %v3276_v2  ;;  %v896_v22 = vmul.f32 %v876_v15, %v3290_v11  ;;  %v3304_v23 = vadd.f32 %v3258_v57, %v756_v18 }
 0x128   :  { %v955_v24 = vmul.f32 0.7978846, %v935_v7  ;;  %v917_v26 = vmul.f32 0.044715, %v897_v17  ;;  %v879_v27 = vmul.f32 %v3299_v10, %v3299_v10  ;;  %v3347_v15 = vpack.c.bf16 %v1127_v29, %v1126_v13 }
 0x129   :  { %v954_v28 = vmul.f32 0.7978846, %v934_v20  ;;  %v916_v31 = vmul.f32 0.044715, %v896_v22  ;;  %v878_v32 = vmul.f32 %v3304_v23, %v3304_v23  ;;  %v2526_v33 = vpop.f32.mrb[8].mxu0 }
 0x12a   :  { %2809 = vtanh.f32 %v955_v24  ;;  %v937_v34 = vadd.f32 %v917_v26, %v3285_v40  ;;  %v899_v35 = vmul.f32 %v879_v27, %v3299_v10  ;;  %v3313_v36 = vadd.f32 %v2526_v33, %v3258_v57  ;;  %v766_v37 = vpop.f32.mrb[9].mxu0 }
 0x12b   :  { %2811 = vtanh.f32 %v954_v28  ;;  %v936_v41 = vadd.f32 %v916_v31, %v3290_v11  ;;  %v898_v58 = vmul.f32 %v878_v32, %v3304_v23  ;;  %v3324_v60 = vadd.f32 %v3258_v57, %v766_v37 }
 0x12c   :  { %v957_v62 = vmul.f32 0.7978846, %v937_v34  ;;  %v919_v63 = vmul.f32 0.044715, %v899_v35  ;;  %v881_v0 = vmul.f32 %v3313_v36, %v3313_v36 }
 0x12d   :  { %v956_v1 = vmul.f32 0.7978846, %v936_v41  ;;  %v918_v21 = vmul.f32 0.044715, %v898_v58  ;;  %v880_v25 = vmul.f32 %v3324_v60, %v3324_v60  ;;  %v2529_v3 = vpop.f32.mrb[10].mxu0 }
 0x12e   :  { %2813 = vtanh.f32 %v957_v62  ;;  %v939_v30 = vadd.f32 %v919_v63, %v3299_v10  ;;  %v901_v5 = vmul.f32 %v881_v0, %v3313_v36  ;;  %v2724_v6 = vadd.f32 %v2529_v3, %v3235_v43  ;;  %v776_v46 = vpop.f32.mrb[11].mxu0 }
 0x12f   :  { %2815 = vtanh.f32 %v956_v1  ;;  %v938_v8 = vadd.f32 %v918_v21, %v3304_v23  ;;  %v900_v9 = vmul.f32 %v880_v25, %v3324_v60  ;;  %v2725_v50 = vadd.f32 %v776_v46, %v3237_v44 }
 0x130   :  { %v2806_v51 = vpop.eup %2805  ;;  %v959_v12 = vmul.f32 0.7978846, %v939_v30  ;;  %v921_v14 = vmul.f32 0.044715, %v901_v5  ;;  %v3345_v56 = vadd.f32 %v2724_v6, %v3258_v57 }
 0x131   :  { %v2808_v16 = vpop.eup %2807  ;;  %v993_v7 = vadd.f32 1.0, %v2806_v51  ;;  %v958_v17 = vmul.f32 0.7978846, %v938_v8  ;;  %v920_v43 = vmul.f32 0.044715, %v900_v9  ;;  %v3350_v18 = vadd.f32 %v2725_v50, %v3258_v57  ;;  %v2532_v20 = vpop.f32.mrb[12].mxu0 }
 0x132   :  { %v992_v22 = vadd.f32 1.0, %v2808_v16  ;;  %2817 = vtanh.f32 %v959_v12  ;;  %v941_v44 = vadd.f32 %v921_v14, %v3313_v36  ;;  %v883_v24 = vmul.f32 %v3345_v56, %v3345_v56  ;;  %v786_v26 = vpop.f32.mrb[13].mxu0 }
 0x133   :  { %v1013_v27 = vmul.f32 0.5, %v993_v7  ;;  %2819 = vtanh.f32 %v958_v17  ;;  %v940_v28 = vadd.f32 %v920_v43, %v3324_v60  ;;  %v882_v31 = vmul.f32 %v3350_v18, %v3350_v18 }
 0x134   :  { %v2810_v32 = vpop.eup %2809  ;;  %v1012_v33 = vmul.f32 0.5, %v992_v22  ;;  %v961_v34 = vmul.f32 0.7978846, %v941_v44  ;;  %v903_v35 = vmul.f32 %v883_v24, %v3345_v56  ;;  %v2726_v37 = vadd.f32 %v2532_v20, %v3239_v45 }
 0x135   :  { %v2812_v38 = vpop.eup %2811  ;;  %v3361_v39 = vmul.f32 %v1013_v27, %v3261_v59  ;;  %v995_v41 = vadd.f32 1.0, %v2810_v32  ;;  %v960_v58 = vmul.f32 0.7978846, %v940_v28  ;;  %v902_v62 = vmul.f32 %v882_v31, %v3350_v18  ;;  %v2535_v63 = vpop.f32.mrb[14].mxu0 }
 0x136   :  { %v3365_v0 = vmul.f32 %v1012_v33, %v3264_v61  ;;  %v994_v13 = vadd.f32 1.0, %v2812_v38  ;;  %2821 = vtanh.f32 %v961_v34  ;;  %v923_v1 = vmul.f32 0.044715, %v903_v35  ;;  %v796_v21 = vpop.f32.mrb[15].mxu0 }
 0x137   :  { %v1073_v25 = vrot.slane %v3361_v39, 7  ;;  %v1015_v3 = vmul.f32 0.5, %v995_v41  ;;  %2823 = vtanh.f32 %v960_v58  ;;  %v922_v45 = vmul.f32 0.044715, %v902_v62 }
 0x138   :  { %v2814_v29 = vpop.eup %2813  ;;  %v1072_v59 = vrot.slane %v3365_v0, 7  ;;  %v1014_v30 = vmul.f32 0.5, %v994_v13  ;;  %v943_v5 = vadd.f32 %v923_v1, %v3345_v56  ;;  %v3371_v6 = vadd.f32 %v2726_v37, %v3258_v57 }
 0x139   :  { %v2816_v61 = vpop.eup %2815  ;;  %v3374_v46 = vmul.f32 %v1015_v3, %v3272_v19  ;;  %v997_v8 = vadd.f32 1.0, %v2814_v29  ;;  %v942_v9 = vadd.f32 %v922_v45, %v3350_v18  ;;  %v2727_v50 = vadd.f32 %v786_v26, %v3241_v47  ;;  %v2538_v51 = vpop.f32.mrb[16].mxu0 }
 0x13a   :  { %v3379_v12 = vmul.f32 %v1014_v30, %v3276_v2  ;;  %v996_v14 = vadd.f32 1.0, %v2816_v61  ;;  %v963_v16 = vmul.f32 0.7978846, %v943_v5  ;;  %v885_v7 = vmul.f32 %v3371_v6, %v3371_v6  ;;  %v806_v17 = vpop.f32.mrb[17].mxu0 }
 0x13b   :  { %v1077_v43 = vrot.slane %v3374_v46, 7  ;;  %v1017_v20 = vmul.f32 0.5, %v997_v8  ;;  %v962_v19 = vmul.f32 0.7978846, %v942_v9  ;;  %v3385_v22 = vadd.f32 %v2727_v50, %v3258_v57 }
 0x13c   :  { %v2818_v44 = vpop.eup %2817  ;;  %v1075_v47 = vrot.slane %v3379_v12, 7  ;;  %v1016_v24 = vmul.f32 0.5, %v996_v14  ;;  %2825 = vtanh.f32 %v963_v16  ;;  %v905_v2 = vmul.f32 %v885_v7, %v3371_v6 }
 0x13d   :  { %v2820_v26 = vpop.eup %2819  ;;  %v3390_v27 = vmul.f32 %v1017_v20, %v3285_v40  ;;  %v999_v28 = vadd.f32 1.0, %v2818_v44  ;;  %2827 = vtanh.f32 %v962_v19  ;;  %v884_v31 = vmul.f32 %v3385_v22, %v3385_v22  ;;  %v2541_v32 = vpop.f32.mrb[18].mxu0 }
 0x13e   :  { %v3399_v33 = vsel %vm66_vm0, %v1073_v25, %v1075_v47  ;;  %v3402_v34 = vmul.f32 %v1016_v24, %v3290_v11  ;;  %v998_v35 = vadd.f32 1.0, %v2820_v26  ;;  %v925_v37 = vmul.f32 0.044715, %v905_v2  ;;  %v816_v40 = vpop.f32.mrb[19].mxu0 }
 0x13f   :  { %v1081_v38 = vrot.slane %v3390_v27, 7  ;;  %v1019_v41 = vmul.f32 0.5, %v999_v28  ;;  %v904_v58 = vmul.f32 %v884_v31, %v3385_v22  ;;  %v2728_v62 = vadd.f32 %v2535_v63, %v3243_v48 }
 0x140   :  { %v2822_v13 = vpop.eup %2821  ;;  %v1079_v1 = vrot.slane %v3402_v34, 7  ;;  %v1018_v3 = vmul.f32 0.5, %v998_v35  ;;  %v945_v45 = vadd.f32 %v925_v37, %v3371_v6  ;;  %v2729_v29 = vadd.f32 %v796_v21, %v3245_v49 }
 0x141   :  { %v2824_v11 = vpop.eup %2823  ;;  %v3411_v30 = vmul.f32 %v1019_v41, %v3299_v10  ;;  %v1001_v5 = vadd.f32 1.0, %v2822_v13  ;;  %v924_v61 = vmul.f32 0.044715, %v904_v58  ;;  %v3414_v8 = vadd.f32 %v2728_v62, %v3258_v57 }
 0x142   :  { %v3417_v9 = vmul.f32 %v1018_v3, %v3304_v23  ;;  %v1000_v48 = vadd.f32 1.0, %v2824_v11  ;;  %v965_v63 = vmul.f32 0.7978846, %v945_v45  ;;  %v3420_v50 = vadd.f32 %v2729_v29, %v3258_v57 }
 0x143   :  { %v1085_v14 = vrot.slane %v3411_v30, 7  ;;  %v1021_v49 = vmul.f32 0.5, %v1001_v5  ;;  %v944_v21 = vadd.f32 %v924_v61, %v3385_v22  ;;  %v887_v10 = vmul.f32 %v3414_v8, %v3414_v8 }
 0x144   :  { %v1083_v16 = vrot.slane %v3417_v9, 7  ;;  %v1020_v7 = vmul.f32 0.5, %v1000_v48  ;;  %2829 = vtanh.f32 %v965_v63  ;;  %v886_v23 = vmul.f32 %v3420_v50, %v3420_v50 }
 0x145   :  { %v3430_v20 = vmul.f32 %v1021_v49, %v3313_v36  ;;  %v964_v19 = vmul.f32 0.7978846, %v944_v21  ;;  %v907_v44 = vmul.f32 %v887_v10, %v3414_v8  ;;  %v2730_v24 = vadd.f32 %v2538_v51, %v3247_v52 }
 0x146   :  { %v2826_v2 = vpop.eup %2825  ;;  %v3435_v26 = vmul.f32 %v1020_v7, %v3324_v60  ;;  %v906_v28 = vmul.f32 %v886_v23, %v3420_v50  ;;  %v2731_v31 = vadd.f32 %v806_v17, %v3249_v53  ;;  %v2732_v35 = vadd.f32 %v2541_v32, %v3251_v54 }
 0x147   :  { %v2828_v37 = vpop.eup %2827  ;;  %v1089_v41 = vrot.slane %v3430_v20, 7  ;;  %v1003_v36 = vadd.f32 1.0, %v2826_v2  ;;  %2831 = vtanh.f32 %v964_v19  ;;  %v927_v58 = vmul.f32 0.044715, %v907_v44 }
 0x148   :  { %v1087_v62 = vrot.slane %v3435_v26, 7  ;;  %v1002_v13 = vadd.f32 1.0, %v2828_v37  ;;  %v926_v52 = vmul.f32 0.044715, %v906_v28  ;;  %v3443_v51 = vadd.f32 %v2730_v24, %v3258_v57 }
 0x149   :  { %v1023_v60 = vmul.f32 0.5, %v1003_v36  ;;  %v947_v3 = vadd.f32 %v927_v58, %v3414_v8  ;;  %v3447_v53 = vadd.f32 %v2731_v31, %v3258_v57  ;;  %v3450_v54 = vadd.f32 %v2732_v35, %v3258_v57 }
 0x14a   :  { %v1022_v17 = vmul.f32 0.5, %v1002_v13  ;;  %v946_v32 = vadd.f32 %v926_v52, %v3420_v50  ;;  %v889_v45 = vmul.f32 %v3443_v51, %v3443_v51  ;;  %v2733_v29 = vadd.f32 %v816_v40, %v3253_v55 }
 0x14b   :  { %v3457_v11 = vmul.f32 %v1023_v60, %v3345_v56  ;;  %v967_v5 = vmul.f32 0.7978846, %v947_v3  ;;  %v888_v61 = vmul.f32 %v3447_v53, %v3447_v53  ;;  %v891_v48 = vmul.f32 %v3450_v54, %v3450_v54 }
 0x14c   :  { %v3464_v63 = vmul.f32 %v1022_v17, %v3350_v18  ;;  %v966_v49 = vmul.f32 0.7978846, %v946_v32  ;;  %v909_v21 = vmul.f32 %v889_v45, %v3443_v51  ;;  %v3468_v10 = vadd.f32 %v2733_v29, %v3258_v57 }
 0x14d   :  { %v1092_v55 = vrot.slane %v3457_v11, 7  ;;  %2833 = vtanh.f32 %v967_v5  ;;  %v908_v56 = vmul.f32 %v888_v61, %v3447_v53  ;;  %v911_v40 = vmul.f32 %v891_v48, %v3450_v54 }
 0x14e   :  { %v2830_v7 = vpop.eup %2829  ;;  %v1091_v23 = vrot.slane %v3464_v63, 7  ;;  %2835 = vtanh.f32 %v966_v49  ;;  %v929_v19 = vmul.f32 0.044715, %v909_v21  ;;  %v890_v18 = vmul.f32 %v3468_v10, %v3468_v10 }
 0x14f   :  { %v1005_v44 = vadd.f32 1.0, %v2830_v7  ;;  %v928_v24 = vmul.f32 0.044715, %v908_v56  ;;  %v931_v2 = vmul.f32 0.044715, %v911_v40  ;;  %v3481_v57 = vsel %vm66_vm0, %v1072_v59, %v1073_v25 }
 0x150   :  { %v949_v28 = vadd.f32 %v929_v19, %v3443_v51  ;;  %v910_v31 = vmul.f32 %v890_v18, %v3468_v10  ;;  %v3488_v35 = vsel %vm66_vm0, 0.0, %v1072_v59  ;;  %v1135_v37 = vrot.slane %v3481_v57, 1 }
 0x151   :  { %v2832_v36 = vpop.eup %2831  ;;  %v1025_v58 = vmul.f32 0.5, %v1005_v44  ;;  %v948_v39 = vadd.f32 %v928_v24, %v3447_v53  ;;  %v951_v13 = vadd.f32 %v931_v2, %v3450_v54  ;;  %v1134_v25 = vrot.slane %v3488_v35, 1 }
 0x152   :  { %v1004_v52 = vadd.f32 1.0, %v2832_v36  ;;  %v969_v60 = vmul.f32 0.7978846, %v949_v28  ;;  %v930_v3 = vmul.f32 0.044715, %v910_v31  ;;  %v1137_v17 = vrot.slane %v3399_v33, 1 }
 0x153   :  { %v3496_v0 = vmul.f32 %v1025_v58, %v3371_v6  ;;  %v968_v59 = vmul.f32 0.7978846, %v948_v39  ;;  %v971_v32 = vmul.f32 0.7978846, %v951_v13  ;;  %v1136_v45 = vsel %vm123_vm1, %v1134_v25, %v1135_v37 }
 0x154   :  { %v1024_v29 = vmul.f32 0.5, %v1004_v52  ;;  %2837 = vtanh.f32 %v969_v60  ;;  %v950_v5 = vadd.f32 %v930_v3, %v3468_v10  ;;  %2550 = vmatprep.mubr.msk.f32.mxu1 %vm1176_vm4, %v1136_v45  ;;  %v1138_v61 = vsel %vm123_vm1, %v1135_v37, %v1137_v17 }
 0x155   :  { %v1096_v48 = vrot.slane %v3496_v0, 7  ;;  %2839 = vtanh.f32 %v968_v59  ;;  %2551 = vmatmul.mubr.msk.f32.vlgmr.msra.gmra.mrb[10].mxu1 %vm1176_vm4, %v1138_v61  ;;  %v3509_v6 = vsel %vm66_vm0, %v1075_v47, %v1077_v43  ;;  %v3516_v49 = vsel %vm66_vm0, %v1077_v43, %v1079_v1 }
 0x156   :  { %v1044_v21 = vmul.f32 %v1024_v29, %v3385_v22  ;;  %2841 = vtanh.f32 %v971_v32  ;;  %v970_v56 = vmul.f32 0.7978846, %v950_v5  ;;  %v1139_v40 = vrot.slane %v3509_v6, 1  ;;  %2679 = vmatpush3.bf16.msra.mxu1 %v3232_v42 }
 0x157   :  { %v2834_v7 = vpop.eup %2833  ;;  %v1141_v12 = vrot.slane %v3516_v49, 1  ;;  %v3527_v46 = vsel %vm66_vm0, %v1079_v1, %v1081_v38  ;;  %v3534_v43 = vsel %vm66_vm0, %v1081_v38, %v1083_v16  ;;  %v3541_v42 = vsel %vm66_vm0, %v1083_v16, %v1085_v14  ;;  %2681 = vmatprep.subr.bf16.mxu1 %v3333_v4 }
 0x158   :  { %v2836_v22 = vpop.eup %2835  ;;  %v1094_v47 = vrot.slane %v1044_v21, 7  ;;  %v1007_v34 = vadd.f32 1.0, %v2834_v7  ;;  %2843 = vtanh.f32 %v970_v56  ;;  %v1140_v1 = vsel %vm123_vm1, %v1137_v17, %v1139_v40 }
 0x159   :  { %v1006_v19 = vadd.f32 1.0, %v2836_v22  ;;  %2553 = vmatprep.mubr.msk.f32.mxu1 %vm1176_vm4, %v1140_v1  ;;  %v1142_v27 = vsel %vm123_vm1, %v1139_v40, %v1141_v12  ;;  %v1143_v38 = vrot.slane %v3527_v46, 1  ;;  %v1145_v9 = vrot.slane %v3534_v43, 1 }
 0x15a   :  { %v1027_v18 = vmul.f32 0.5, %v1007_v34  ;;  %2554 = vmatmul.mubr.msk.f32.gmra.mrb[12].mxu1 %vm1176_vm4, %v1142_v27  ;;  %v1147_v16 = vrot.slane %v3541_v42, 1  ;;  %v3556_v44 = vsel %vm66_vm0, %v1085_v14, %v1087_v62  ;;  %v3563_v24 = vsel %vm66_vm0, %v1087_v62, %v1089_v41 }
 0x15b   :  { %v1026_v2 = vmul.f32 0.5, %v1006_v19  ;;  %v1144_v28 = vsel %vm123_vm1, %v1141_v12, %v1143_v38  ;;  %v1146_v31 = vsel %vm123_vm1, %v1143_v38, %v1145_v9  ;;  %v1149_v37 = vrot.slane %v3556_v44, 1  ;;  %2683 = vmatpush3.bf16.msra.mxu1 %v3333_v4 }
 0x15c   :  { %v1047_v30 = vmul.f32 %v1027_v18, %v3414_v8  ;;  %2556 = vmatprep.mubr.msk.f32.mxu1 %vm1176_vm4, %v1144_v28  ;;  %v1148_v14 = vsel %vm123_vm1, %v1145_v9, %v1147_v16  ;;  %v1151_v26 = vrot.slane %v3563_v24, 1  ;;  %v3576_v62 = vsel %vm66_vm0, %v1089_v41, 0.0  ;;  %2685 = vmatprep.subr.bf16.mxu1 %v3347_v15 }
 0x15d   :  { %v1046_v36 = vmul.f32 %v1026_v2, %v3420_v50  ;;  %v1150_v58 = vsel %vm123_vm1, %v1147_v16, %v1149_v37  ;;  %v1153_v4 = vrot.slane %v3576_v62, 1  ;;  %v3587_v8 = vsel %vm66_vm0, %v1091_v23, %v1092_v55 }
 0x15e   :  { %v2838_v39 = vpop.eup %2837  ;;  %v1100_v20 = vrot.slane %v1047_v30, 7  ;;  %2557 = vmatmul.mubr.msk.f32.gmra.mrb[14].mxu1 %vm1176_vm4, %v1146_v31  ;;  %v1152_v41 = vsel %vm123_vm1, %v1149_v37, %v1151_v26  ;;  %v3594_v50 = vsel %vm66_vm0, 0.0, %v1091_v23  ;;  %v1156_v13 = vrot.slane %v3587_v8, 1 }
 0x15f   :  { %v2840_v25 = vpop.eup %2839  ;;  %v1098_v52 = vrot.slane %v1046_v36, 7  ;;  %v1009_v60 = vadd.f32 1.0, %v2838_v39  ;;  %2559 = vmatprep.mubr.msk.f32.mxu1 %vm1176_vm4, %v1148_v14  ;;  %v1154_v3 = vsel %vm123_vm1, %v1151_v26, %v1153_v4  ;;  %v1155_v17 = vrot.slane %v3594_v50, 1 }
 0x160   :  { %v2842_v59 = vpop.eup %2841  ;;  %v1008_v32 = vadd.f32 1.0, %v2840_v25  ;;  %v3603_v63 = vsel %vm66_vm0, %v1092_v55, %v1094_v47  ;;  %v3608_v23 = vsel %vm66_vm0, %v1094_v47, %v1096_v48  ;;  %v1587_v45 = vrot.slane %v3488_v35, 2 }
 0x161   :  { %v1029_v29 = vmul.f32 0.5, %v1009_v60  ;;  %v1011_v5 = vadd.f32 1.0, %v2842_v59  ;;  %v1157_v61 = vsel %vm123_vm1, %v1155_v17, %v1156_v13  ;;  %v1158_v21 = vrot.slane %v3603_v63, 1 }
 0x162   :  { %v2844_v56 = vpop.eup %2843  ;;  %v1028_v40 = vmul.f32 0.5, %v1008_v32  ;;  %2560 = vmatmul.mubr.msk.f32.gmra.mrb[16].mxu1 %vm1176_vm4, %v1150_v58  ;;  %v1160_v11 = vrot.slane %v3608_v23, 1  ;;  %v3618_v55 = vsel %vm66_vm0, %v1096_v48, %v1098_v52  ;;  %v3621_v7 = vsel %vm66_vm0, %v1098_v52, %v1100_v20 }
 0x163   :  { %v1049_v12 = vmul.f32 %v1029_v29, %v3443_v51  ;;  %v1031_v22 = vmul.f32 0.5, %v1011_v5  ;;  %v1010_v47 = vadd.f32 1.0, %v2844_v56  ;;  %2562 = vmatprep.mubr.msk.f32.mxu1 %vm1176_vm4, %v1152_v41  ;;  %v1159_v34 = vsel %vm123_vm1, %v1156_v13, %v1158_v21 }
 0x164   :  { %v1048_v1 = vmul.f32 %v1028_v40, %v3447_v53  ;;  %v1161_v19 = vsel %vm123_vm1, %v1158_v21, %v1160_v11  ;;  %v1162_v0 = vrot.slane %v3618_v55, 1  ;;  %v1164_v48 = vrot.slane %v3621_v7, 1 }
 0x165   :  { %v1104_v27 = vrot.slane %v1049_v12, 7  ;;  %v1051_v38 = vmul.f32 %v1031_v22, %v3450_v54  ;;  %v1030_v9 = vmul.f32 0.5, %v1010_v47  ;;  %v1588_v51 = vrot.slane %v3481_v57, 2 }
 0x166   :  { %v1102_v18 = vrot.slane %v1048_v1, 7  ;;  %2563 = vmatmul.mubr.msk.f32.gmra.mrb[18].mxu1 %vm1176_vm4, %v1154_v3  ;;  %v1163_v16 = vsel %vm123_vm1, %v1160_v11, %v1162_v0  ;;  %v1165_v2 = vsel %vm123_vm1, %v1162_v0, %v1164_v48  ;;  %v1590_v53 = vrot.slane %v3399_v33, 2 }
 0x167   :  { %v1108_v28 = vrot.slane %v1051_v38, 7  ;;  %v1050_v31 = vmul.f32 %v1030_v9, %v3468_v10  ;;  %2565 = vmatprep.mubr.msk.f32.mxu1 %vm1176_vm4, %v1157_v61  ;;  %v3639_v37 = vsel %vm577_vm3, %v1587_v45, %v1588_v51  ;;  %v1592_v54 = vrot.slane %v3509_v6, 2 }
 0x168   :  { %v3643_v30 = vsel %vm66_vm0, %v1100_v20, %v1102_v18  ;;  %v3646_v14 = vsel %vm66_vm0, %v1102_v18, %v1104_v27  ;;  %v3649_v26 = vsel %vm577_vm3, %v1588_v51, %v1590_v53  ;;  %v1594_v36 = vrot.slane %v3516_v49, 2 }
 0x169   :  { %v1106_v58 = vrot.slane %v1050_v31, 7  ;;  %v1166_v10 = vrot.slane %v3643_v30, 1  ;;  %v1168_v4 = vrot.slane %v3646_v14, 1  ;;  %v1117_v39 = vsel %vm66_vm0, %v1108_v28, 0.0 }
 0x16a   :  { %2566 = vmatmul.mubr.msk.f32.gmra.mrb[20].mxu1 %vm1176_vm4, %v1159_v34  ;;  %v1174_v41 = vrot.slane %v1117_v39, 1  ;;  %v3657_v20 = vsel %vm577_vm3, %v1590_v53, %v1592_v54  ;;  %v3660_v13 = vsel %vm577_vm3, %v1592_v54, %v1594_v36  ;;  %v1596_v25 = vrot.slane %v3527_v46, 2 }
 0x16b   :  { %2568 = vmatprep.mubr.msk.f32.mxu1 %vm1176_vm4, %v1161_v19  ;;  %v1167_v52 = vsel %vm123_vm1, %v1164_v48, %v1166_v10  ;;  %v1169_v60 = vsel %vm123_vm1, %v1166_v10, %v1168_v4  ;;  %v3667_v3 = vsel %vm66_vm0, %v1104_v27, %v1106_v58  ;;  %v3670_v17 = vsel %vm66_vm0, %v1106_v58, %v1108_v28 }
 0x16c   :  { %v1170_v59 = vrot.slane %v3667_v3, 1  ;;  %v1172_v32 = vrot.slane %v3670_v17, 1  ;;  %v3675_v45 = vsel %vm577_vm3, %v1594_v36, %v1596_v25  ;;  %v1598_v29 = vrot.slane %v3534_v43, 2 }
 0x16d   :  { %v1600_v5 = vrot.slane %v3541_v42, 2  ;;  %v1602_v61 = vrot.slane %v3556_v44, 2  ;;  %v1604_v21 = vrot.slane %v3563_v24, 2  ;;  %v1606_v56 = vrot.slane %v3576_v62, 2 }
 0x16e   :  { %2569 = vmatmul.mubr.msk.f32.gmra.mrb[22].mxu1 %vm1176_vm4, %v1163_v16  ;;  %v1171_v40 = vsel %vm123_vm1, %v1168_v4, %v1170_v59  ;;  %v1173_v11 = vsel %vm123_vm1, %v1170_v59, %v1172_v32  ;;  %v1175_v12 = vsel %vm123_vm1, %v1172_v32, %v1174_v41  ;;  %v3687_v22 = vsel %vm577_vm3, %v1596_v25, %v1598_v29  ;;  %v1129_v59 = vld [vmem:[%s4025_s3 + $0x58] sm:$0xff] }
 0x16f   :  { %2571 = vmatprep.mubr.msk.f32.mxu1 %vm1176_vm4, %v1165_v2  ;;  %v1601_v47 = vsel %vm577_vm3, %v1598_v29, %v1600_v5  ;;  %v1603_v34 = vsel %vm577_vm3, %v1600_v5, %v1602_v61  ;;  %v1605_v1 = vsel %vm577_vm3, %v1602_v61, %v1604_v21  ;;  %v1607_v62 = vsel %vm577_vm3, %v1604_v21, %v1606_v56 }
 0x170   :  { %v1608_v19 = vrot.slane %v3594_v50, 2  ;;  %v1609_v0 = vrot.slane %v3587_v8, 2  ;;  %v1611_v48 = vrot.slane %v3603_v63, 2  ;;  %v1613_v27 = vrot.slane %v3608_v23, 2 }
 0x171   :  { %v1615_v38 = vrot.slane %v3618_v55, 2  ;;  %v1617_v9 = vrot.slane %v3621_v7, 2  ;;  %v1619_v51 = vrot.slane %v3643_v30, 2  ;;  %v1621_v18 = vrot.slane %v3646_v14, 2 }
 0x172   :  { %2572 = vmatmul.mubr.msk.f32.gmra.mrb[24].mxu1 %vm1176_vm4, %v1167_v52  ;;  %v1610_v16 = vsel %vm577_vm3, %v1608_v19, %v1609_v0  ;;  %v1612_v2 = vsel %vm577_vm3, %v1609_v0, %v1611_v48  ;;  %v1614_v53 = vsel %vm577_vm3, %v1611_v48, %v1613_v27  ;;  %v1623_v28 = vrot.slane %v3667_v3, 2 }
 0x173   :  { %2574 = vmatprep.mubr.msk.f32.mxu1 %vm1176_vm4, %v1169_v60  ;;  %v1616_v31 = vsel %vm577_vm3, %v1613_v27, %v1615_v38  ;;  %v1618_v54 = vsel %vm577_vm3, %v1615_v38, %v1617_v9  ;;  %v1620_v36 = vsel %vm577_vm3, %v1617_v9, %v1619_v51  ;;  %v1622_v58 = vsel %vm577_vm3, %v1619_v51, %v1621_v18  ;;  %v1128_v60 = vld [vmem:[%s4025_s3 + $0x50] sm:$0xff] }
 0x174   :  { %v1624_v10 = vsel %vm577_vm3, %v1621_v18, %v1623_v28  ;;  %v1625_v4 = vrot.slane %v3670_v17, 2  ;;  %v1627_v41 = vrot.slane %v1117_v39, 2  ;;  %v2688_v39 = vpack.c.bf16 %v1129_v59, %v1128_v60  ;;  %v1889_v60 = vld [vmem:[%s4027_s5 + $0x40] sm:$0xff]  ;;  %v1892_v59 = vld [vmem:[%s4027_s5 + $0x58] sm:$0xff] }
 0x176   :  { %2575 = vmatmul.mubr.msk.f32.gmra.mrb[26].mxu1 %vm1176_vm4, %v1171_v40  ;;  %v1626_v25 = vsel %vm577_vm3, %v1623_v28, %v1625_v4  ;;  %v1628_v52 = vsel %vm577_vm3, %v1625_v4, %v1627_v41  ;;  %v1885_v4 = vld [vmem:[%s4027_s5 + $0x20] sm:$0xff]  ;;  %v1888_v41 = vld [vmem:[%s4027_s5 + $0x38] sm:$0xff] }
 0x177   :  { %2577 = vmatprep.mubr.msk.f32.mxu1 %vm1176_vm4, %v1173_v11 }
 0x17a   :  { %2578 = vmatmul.mubr.msk.f32.gmra.mrb[28].mxu1 %vm1176_vm4, %v1175_v12 }
 0x17b   :  { %2588 = vmatprep.mubr.msk.f32.mxu1 %vm1176_vm4, %v3488_v35 }
 0x17e   :  { %2589 = vmatmul.mubr.msk.f32.vlgmr.msra.gmra.mrb[10].mxu1 %vm1176_vm4, %v3481_v57  ;;  %v3800_v57 = vld [vmem:[%s4028_s4] ss:$0 sm:$0xff] }
 0x17f   :  { %2591 = vmatprep.mubr.msk.f32.mxu1 %vm1176_vm4, %v3399_v33  ;;  %2687 = vmatpush3.bf16.msra.mxu1 %v3347_v15  ;;  %v2865_v15 = vmov 0.0|0.0   ;;  %v1882_v33 = vld [vmem:[%s4027_s5 + $0x8] sm:$0xff] }
 0x180   :  { %2689 = vmatprep.subr.bf16.mxu1 %v2688_v39  ;;  %2692 = vmatprep.subr.bf16.mxu0 %v2865_v15 }
 0x181   :  { %2292 = vmatprep.mubr.msk.f32.mxu0 %vm1176_vm4, %v1882_v33  ;;  %v1893_v33 = vld [vmem:[%s4027_s5 + $0x60] sm:$0xff] }
 0x182   :  { %2592 = vmatmul.mubr.msk.f32.gmra.mrb[12].mxu1 %vm1176_vm4, %v3509_v6 }
 0x183   :  { %2594 = vmatprep.mubr.msk.f32.mxu1 %vm1176_vm4, %v3516_v49  ;;  %2691 = vmatpush3.bf16.msra.mxu1 %v2688_v39  ;;  %v1891_v39 = vld [vmem:[%s4027_s5 + $0x50] sm:$0xff] }
 0x186   :  { %2595 = vmatmul.mubr.msk.f32.gmra.mrb[14].mxu1 %vm1176_vm4, %v3527_v46 }
 0x187   :  { %2597 = vmatprep.mubr.msk.f32.mxu1 %vm1176_vm4, %v3534_v43 }
 0x18a   :  { %2598 = vmatmul.mubr.msk.f32.gmra.mrb[16].mxu1 %vm1176_vm4, %v3541_v42 }
 0x18b   :  { %2600 = vmatprep.mubr.msk.f32.mxu1 %vm1176_vm4, %v3556_v44 }
 0x18e   :  { %2601 = vmatmul.mubr.msk.f32.gmra.mrb[18].mxu1 %vm1176_vm4, %v3563_v24 }
 0x18f   :  { %2603 = vmatprep.mubr.msk.f32.mxu1 %vm1176_vm4, %v3594_v50 }
 0x192   :  { %2604 = vmatmul.mubr.msk.f32.gmra.mrb[20].mxu1 %vm1176_vm4, %v3587_v8 }
 0x193   :  { %2606 = vmatprep.mubr.msk.f32.mxu1 %vm1176_vm4, %v3603_v63 }
 0x196   :  { %2607 = vmatmul.mubr.msk.f32.gmra.mrb[22].mxu1 %vm1176_vm4, %v3608_v23 }
 0x197   :  { %2609 = vmatprep.mubr.msk.f32.mxu1 %vm1176_vm4, %v3618_v55 }
 0x19a   :  { %2610 = vmatmul.mubr.msk.f32.gmra.mrb[24].mxu1 %vm1176_vm4, %v3621_v7 }
 0x19b   :  { %2612 = vmatprep.mubr.msk.f32.mxu1 %vm1176_vm4, %v3643_v30 }
 0x19e   :  { %2613 = vmatmul.mubr.msk.f32.gmra.mrb[26].mxu1 %vm1176_vm4, %v3646_v14 }
 0x19f   :  { %2615 = vmatprep.mubr.msk.f32.mxu1 %vm1176_vm4, %v3667_v3 }
 0x1a2   :  { %2616 = vmatmul.mubr.msk.f32.gmra.mrb[28].mxu1 %vm1176_vm4, %v3670_v17 }
 0x1a3   :  { %2626 = vmatprep.mubr.msk.f32.mxu1 %vm1176_vm4, %v3639_v37 }
 0x1a6   :  { %2627 = vmatmul.mubr.msk.f32.vlgmr.msra.gmra.mrb[10].mxu1 %vm1176_vm4, %v3649_v26 }
 0x1a7   :  { %2629 = vmatprep.mubr.msk.f32.mxu1 %vm1176_vm4, %v3657_v20 }
 0x1aa   :  { %2630 = vmatmul.mubr.msk.f32.gmra.mrb[12].mxu1 %vm1176_vm4, %v3660_v13 }
 0x1ab   :  { %2632 = vmatprep.mubr.msk.f32.mxu1 %vm1176_vm4, %v3675_v45 }
 0x1ae   :  { %2633 = vmatmul.mubr.msk.f32.gmra.mrb[14].mxu1 %vm1176_vm4, %v3687_v22 }
 0x1af   :  { %2635 = vmatprep.mubr.msk.f32.mxu1 %vm1176_vm4, %v1601_v47 }
 0x1b2   :  { %2636 = vmatmul.mubr.msk.f32.gmra.mrb[16].mxu1 %vm1176_vm4, %v1603_v34 }
 0x1b3   :  { %2638 = vmatprep.mubr.msk.f32.mxu1 %vm1176_vm4, %v1605_v1 }
 0x1b6   :  { %2639 = vmatmul.mubr.msk.f32.gmra.mrb[18].mxu1 %vm1176_vm4, %v1607_v62 }
 0x1b7   :  { %2641 = vmatprep.mubr.msk.f32.mxu1 %vm1176_vm4, %v1610_v16 }
 0x1ba   :  { %2642 = vmatmul.mubr.msk.f32.gmra.mrb[20].mxu1 %vm1176_vm4, %v1612_v2 }
 0x1bb   :  { %2644 = vmatprep.mubr.msk.f32.mxu1 %vm1176_vm4, %v1614_v53 }
 0x1be   :  { %2645 = vmatmul.mubr.msk.f32.gmra.mrb[22].mxu1 %vm1176_vm4, %v1616_v31 }
 0x1bf   :  { %2647 = vmatprep.mubr.msk.f32.mxu1 %vm1176_vm4, %v1618_v54  ;;  %v1881_v54 = vld [vmem:[%s4027_s5] sm:$0xff] }
 0x1c2   :  { %2648 = vmatmul.mubr.msk.f32.gmra.mrb[24].mxu1 %vm1176_vm4, %v1620_v36  ;;  %v1884_v36 = vld [vmem:[%s4027_s5 + $0x18] sm:$0xff] }
 0x1c3   :  { %2650 = vmatprep.mubr.msk.f32.mxu1 %vm1176_vm4, %v1622_v58  ;;  %v1883_v58 = vld [vmem:[%s4027_s5 + $0x10] sm:$0xff] }
 0x1c6   :  { %2651 = vmatmul.mubr.msk.f32.gmra.mrb[26].mxu1 %vm1176_vm4, %v1624_v10  ;;  %v1886_v10 = vld [vmem:[%s4027_s5 + $0x28] sm:$0xff] }
 0x1c7   :  { %2653 = vmatprep.mubr.msk.f32.mxu1 %vm1176_vm4, %v1626_v25  ;;  %v1887_v25 = vld [vmem:[%s4027_s5 + $0x30] sm:$0xff] }
 0x1ca   :  { %2654 = vmatmul.mubr.msk.f32.gmra.mrb[28].mxu1 %vm1176_vm4, %v1628_v52  ;;  %v1890_v52 = vld [vmem:[%s4027_s5 + $0x48] sm:$0xff] }
 0x279   :  { %v2628_v35 = vpop.f32.mrb[10].mxu1 }
 0x27a   :  { %v1862_v6 = vadd.f32 %v2628_v35, %v3800_v57  ;;  %v1735_v49 = vpop.f32.mrb[11].mxu1  ;;  %v1895_v35 = vld [vmem:[%s4027_s5 + $0x70] sm:$0xff] }
 0x27b   :  { %v1861_v46 = vadd.f32 %v3800_v57, %v1735_v49  ;;  %v1897_v49 = vld [vmem:[%s4027_s5 + $0x80] sm:$0xff] }
 0x27d   :  { %v2693_v43 = vpack.c.bf16 %v1862_v6, %v1861_v46  ;;  %v2631_v42 = vpop.f32.mrb[12].mxu1  ;;  %v1898_v6 = vld [vmem:[%s4027_s5 + $0x88] sm:$0xff]  ;;  %v1900_v46 = vld [vmem:[%s4027_s5 + $0x98] sm:$0xff] }
 0x27e   :  { %v1864_v44 = vadd.f32 %v2631_v42, %v3800_v57  ;;  %v1745_v24 = vpop.f32.mrb[13].mxu1 }
 0x27f   :  { %v1863_v8 = vadd.f32 %v3800_v57, %v1745_v24  ;;  %2694 = vmatpush1.bf16.msra.mxu0 %v2693_v43  ;;  %v1899_v43 = vld [vmem:[%s4027_s5 + $0x90] sm:$0xff] }
 0x280   :  { %2695 = vmatprep.subr.bf16.mxu0 %v2865_v15 }
 0x281   :  { %v2696_v50 = vpack.c.bf16 %v1864_v44, %v1863_v8  ;;  %v2634_v63 = vpop.f32.mrb[14].mxu1 }
 0x282   :  { %v1866_v23 = vadd.f32 %v2634_v63, %v3800_v57  ;;  %v1755_v55 = vpop.f32.mrb[15].mxu1 }
 0x283   :  { %v1865_v7 = vadd.f32 %v3800_v57, %v1755_v55  ;;  %2697 = vmatpush1.bf16.msra.mxu0 %v2696_v50 }
 0x284   :  { %2698 = vmatprep.subr.bf16.mxu0 %v2865_v15 }
 0x285   :  { %v2699_v37 = vpack.c.bf16 %v1866_v23, %v1865_v7  ;;  %v2637_v30 = vpop.f32.mrb[16].mxu1 }
 0x286   :  { %v1868_v14 = vadd.f32 %v2637_v30, %v3800_v57  ;;  %v1765_v26 = vpop.f32.mrb[17].mxu1 }
 0x287   :  { %v1867_v20 = vadd.f32 %v3800_v57, %v1765_v26  ;;  %2700 = vmatpush1.bf16.msra.mxu0 %v2699_v37 }
 0x288   :  { %2701 = vmatprep.subr.bf16.mxu0 %v2865_v15 }
 0x289   :  { %v2702_v13 = vpack.c.bf16 %v1868_v14, %v1867_v20  ;;  %v2640_v3 = vpop.f32.mrb[18].mxu1 }
 0x28a   :  { %v1870_v17 = vadd.f32 %v2640_v3, %v3800_v57  ;;  %v1775_v32 = vpop.f32.mrb[19].mxu1 }
 0x28b   :  { %v1869_v45 = vadd.f32 %v3800_v57, %v1775_v32  ;;  %2703 = vmatpush1.bf16.msra.mxu0 %v2702_v13 }
 0x28c   :  { %2704 = vmatprep.subr.bf16.mxu0 %v2865_v15 }
 0x28d   :  { %v2705_v29 = vpack.c.bf16 %v1870_v17, %v1869_v45  ;;  %v2643_v5 = vpop.f32.mrb[20].mxu1 }
 0x28e   :  { %v1872_v61 = vadd.f32 %v2643_v5, %v3800_v57  ;;  %v1785_v21 = vpop.f32.mrb[21].mxu1 }
 0x28f   :  { %v1871_v56 = vadd.f32 %v3800_v57, %v1785_v21  ;;  %2706 = vmatpush1.bf16.msra.mxu0 %v2705_v29 }
 0x290   :  { %2707 = vmatprep.subr.bf16.mxu0 %v2865_v15 }
 0x291   :  { %v2708_v40 = vpack.c.bf16 %v1872_v61, %v1871_v56  ;;  %v2646_v11 = vpop.f32.mrb[22].mxu1 }
 0x292   :  { %v1874_v12 = vadd.f32 %v2646_v11, %v3800_v57  ;;  %v1795_v22 = vpop.f32.mrb[23].mxu1 }
 0x293   :  { %v1873_v47 = vadd.f32 %v3800_v57, %v1795_v22  ;;  %2709 = vmatpush1.bf16.msra.mxu0 %v2708_v40 }
 0x294   :  { %2710 = vmatprep.subr.bf16.mxu0 %v2865_v15 }
 0x295   :  { %v2711_v34 = vpack.c.bf16 %v1874_v12, %v1873_v47  ;;  %v2649_v1 = vpop.f32.mrb[24].mxu1 }
 0x296   :  { %v1876_v62 = vadd.f32 %v2649_v1, %v3800_v57  ;;  %v1805_v19 = vpop.f32.mrb[25].mxu1 }
 0x297   :  { %v1875_v0 = vadd.f32 %v3800_v57, %v1805_v19  ;;  %2712 = vmatpush1.bf16.msra.mxu0 %v2711_v34 }
 0x298   :  { %2713 = vmatprep.subr.bf16.mxu0 %v2865_v15 }
 0x299   :  { %v2714_v48 = vpack.c.bf16 %v1876_v62, %v1875_v0  ;;  %v2652_v27 = vpop.f32.mrb[26].mxu1 }
 0x29a   :  { %v1878_v38 = vadd.f32 %v2652_v27, %v3800_v57  ;;  %v1815_v9 = vpop.f32.mrb[27].mxu1 }
 0x29b   :  { %v1877_v51 = vadd.f32 %v3800_v57, %v1815_v9  ;;  %2715 = vmatpush1.bf16.msra.mxu0 %v2714_v48 }
 0x29c   :  { %2716 = vmatprep.subr.bf16.mxu0 %v2865_v15 }
 0x29d   :  { %v2717_v18 = vpack.c.bf16 %v1878_v38, %v1877_v51  ;;  %v2655_v16 = vpop.f32.mrb[28].mxu1 }
 0x29e   :  { %v1880_v2 = vadd.f32 %v2655_v16, %v3800_v57  ;;  %v1825_v53 = vpop.f32.mrb[29].mxu1 }
 0x29f   :  { %v1879_v28 = vadd.f32 %v3800_v57, %v1825_v53  ;;  %2718 = vmatpush1.bf16.msra.mxu0 %v2717_v18  ;;  %v1896_v57 = vld [vmem:[%s4027_s5 + $0x78] sm:$0xff] }
 0x2a0   :  { %2719 = vmatprep.subr.bf16.mxu0 %v2865_v15  ;;  %v1894_v15 = vld [vmem:[%s4027_s5 + $0x68] sm:$0xff] }
 0x2a1   :  { %v2720_v31 = vpack.c.bf16 %v1880_v2, %v1879_v28  ;;  %v2136_v28 = vld [vmem:[%s4029_s6] sm:$0xff] }
 0x2a3   :  { %2721 = vmatpush1.bf16.msra.mxu0 %v2720_v31 }
 0x2a6   :  { %1996 = vmatmul.mubr.f32.vlgmr.msra.gmra.mrb[20].mxu0 %v1881_v54 }
 0x2a7   :  { %2293 = vmatprep.mubr.msk.f32.mxu0 %vm1176_vm4, %v1884_v36 }
 0x2aa   :  { %2001 = vmatmul.mubr.f32.gmra.mrb[22].mxu0 %v1883_v58 }
 0x2ab   :  { %2294 = vmatprep.mubr.msk.f32.mxu0 %vm1176_vm4, %v1886_v10 }
 0x2ae   :  { %2006 = vmatmul.mubr.f32.gmra.mrb[24].mxu0 %v1885_v4 }
 0x2af   :  { %2295 = vmatprep.mubr.msk.f32.mxu0 %vm1176_vm4, %v1888_v41 }
 0x2b2   :  { %2011 = vmatmul.mubr.f32.gmra.mrb[26].mxu0 %v1887_v25 }
 0x2b3   :  { %2296 = vmatprep.mubr.msk.f32.mxu0 %vm1176_vm4, %v1890_v52 }
 0x2b6   :  { %2016 = vmatmul.mubr.f32.gmra.mrb[28].mxu0 %v1889_v60 }
 0x2b7   :  { %2297 = vmatprep.mubr.msk.f32.mxu0 %vm1176_vm4, %v1892_v59 }
 0x2ba   :  { %2021 = vmatmul.mubr.f32.gmra.mrb[30].mxu0 %v1891_v39 }
 0x2bb   :  { %2298 = vmatprep.mubr.msk.f32.mxu0 %vm1176_vm4, %v1894_v15  ;;  %v2137_v15 = vld [vmem:[%s4029_s6 + $0x8] sm:$0xff] }
 0x2be   :  { %2026 = vmatmul.mubr.f32.gmra.mrb[32].mxu0 %v1893_v33 }
 0x2bf   :  { %2299 = vmatprep.mubr.msk.f32.mxu0 %vm1176_vm4, %v1896_v57 }
 0x2c2   :  { %2031 = vmatmul.mubr.f32.gmra.mrb[34].mxu0 %v1895_v35 }
 0x2c3   :  { %2300 = vmatprep.mubr.msk.f32.mxu0 %vm1176_vm4, %v1898_v6 }
 0x2c6   :  { %2036 = vmatmul.mubr.f32.gmra.mrb[36].mxu0 %v1897_v49 }
 0x2c7   :  { %2301 = vmatprep.mubr.msk.f32.mxu0 %vm1176_vm4, %v1900_v46 }
 0x2ca   :  { %2041 = vmatmul.mubr.f32.gmra.mrb[38].mxu0 %v1899_v43 }
 0x379   :  { %v1997_v42 = vpop.f32.mrb[20].mxu0 }
 0x37a   :  { %v2046_v44 = vmul.f32 %v1997_v42, %v1997_v42  ;;  %v1999_v24 = vpop.f32.mrb[21].mxu0 }
 0x37c   :  { %v2056_v8 = vmul.f32 %v2046_v44, %v1997_v42 }
 0x37d   :  { %v3897_v50 = vpop.f32.mrb[22].mxu0 }
 0x37e   :  { %v2066_v63 = vmul.f32 0.044715, %v2056_v8  ;;  %v2047_v23 = vmul.f32 %v3897_v50, %v3897_v50  ;;  %v2004_v55 = vpop.f32.mrb[23].mxu0 }
 0x380   :  { %v2076_v7 = vadd.f32 %v2066_v63, %v1997_v42  ;;  %v2057_v37 = vmul.f32 %v2047_v23, %v3897_v50  ;;  %v2138_v23 = vld [vmem:[%s4029_s6 + $0x10] sm:$0xff] }
 0x381   :  { %v3902_v30 = vpop.f32.mrb[24].mxu0 }
 0x382   :  { %v2086_v14 = vmul.f32 0.7978846, %v2076_v7  ;;  %v2067_v26 = vmul.f32 0.044715, %v2057_v37  ;;  %v2048_v20 = vmul.f32 %v3902_v30, %v3902_v30  ;;  %v2009_v13 = vpop.f32.mrb[25].mxu0 }
 0x384   :  { %2845 = vtanh.f32 %v2086_v14  ;;  %v2077_v3 = vadd.f32 %v2067_v26, %v3897_v50  ;;  %v2058_v17 = vmul.f32 %v2048_v20, %v3902_v30 }
 0x385   :  { %v3908_v32 = vpop.f32.mrb[26].mxu0 }
 0x386   :  { %v2087_v45 = vmul.f32 0.7978846, %v2077_v3  ;;  %v2068_v29 = vmul.f32 0.044715, %v2058_v17  ;;  %v2049_v5 = vmul.f32 %v3908_v32, %v3908_v32  ;;  %v2014_v61 = vpop.f32.mrb[27].mxu0 }
 0x388   :  { %2847 = vtanh.f32 %v2087_v45  ;;  %v2078_v21 = vadd.f32 %v2068_v29, %v3902_v30  ;;  %v2059_v56 = vmul.f32 %v2049_v5, %v3908_v32  ;;  %v2139_v5 = vld [vmem:[%s4029_s6 + $0x18] sm:$0xff] }
 0x389   :  { %v3914_v40 = vpop.f32.mrb[28].mxu0 }
 0x38a   :  { %v2088_v11 = vmul.f32 0.7978846, %v2078_v21  ;;  %v2069_v12 = vmul.f32 0.044715, %v2059_v56  ;;  %v2050_v22 = vmul.f32 %v3914_v40, %v3914_v40  ;;  %v2019_v47 = vpop.f32.mrb[29].mxu0 }
 0x38c   :  { %2849 = vtanh.f32 %v2088_v11  ;;  %v2079_v34 = vadd.f32 %v2069_v12, %v3908_v32  ;;  %v2060_v1 = vmul.f32 %v2050_v22, %v3914_v40 }
 0x38d   :  { %v3920_v62 = vpop.f32.mrb[30].mxu0 }
 0x38e   :  { %v2846_v19 = vpop.eup %2845  ;;  %v2089_v0 = vmul.f32 0.7978846, %v2079_v34  ;;  %v2070_v48 = vmul.f32 0.044715, %v2060_v1  ;;  %v2051_v27 = vmul.f32 %v3920_v62, %v3920_v62  ;;  %v2024_v38 = vpop.f32.mrb[31].mxu0 }
 0x38f   :  { %v2106_v9 = vadd.f32 1.0, %v2846_v19 }
 0x390   :  { %2851 = vtanh.f32 %v2089_v0  ;;  %v2080_v51 = vadd.f32 %v2070_v48, %v3914_v40  ;;  %v2061_v18 = vmul.f32 %v2051_v27, %v3920_v62  ;;  %v2140_v0 = vld [vmem:[%s4029_s6 + $0x20] sm:$0xff] }
 0x391   :  { %v2116_v16 = vmul.f32 0.5, %v2106_v9  ;;  %v3926_v2 = vpop.f32.mrb[32].mxu0 }
 0x392   :  { %v2848_v53 = vpop.eup %2847  ;;  %v2090_v31 = vmul.f32 0.7978846, %v2080_v51  ;;  %v2071_v54 = vmul.f32 0.044715, %v2061_v18  ;;  %v2052_v36 = vmul.f32 %v3926_v2, %v3926_v2  ;;  %v2029_v58 = vpop.f32.mrb[33].mxu0 }
 0x393   :  { %v2126_v10 = vmul.f32 %v2116_v16, %v1997_v42  ;;  %v2107_v4 = vadd.f32 1.0, %v2848_v53  ;;  %v2141_v53 = vld [vmem:[%s4029_s6 + $0x28] sm:$0xff] }
 0x394   :  { %2853 = vtanh.f32 %v2090_v31  ;;  %v2081_v41 = vadd.f32 %v2071_v54, %v3920_v62  ;;  %v2062_v25 = vmul.f32 %v2052_v36, %v3926_v2 }
 0x395   :  { %v2146_v52 = vadd.f32 %v2136_v28, %v2126_v10  ;;  %v2117_v60 = vmul.f32 0.5, %v2107_v4  ;;  %v3935_v59 = vpop.f32.mrb[34].mxu0  ;;  %v2142_v10 = vld [vmem:[%s4029_s6 + $0x30] sm:$0xff] }
 0x396   :  { %v2850_v39 = vpop.eup %2849  ;;  %v2091_v33 = vmul.f32 0.7978846, %v2081_v41  ;;  %v2072_v57 = vmul.f32 0.044715, %v2062_v25  ;;  %v2053_v35 = vmul.f32 %v3935_v59, %v3935_v59  ;;  %v2034_v6 = vpop.f32.mrb[35].mxu0 }
 0x397   :  { %2156 = vst.msk [vmem:[%s4030_s7] sm:$0xff] %vm1176_vm4, %v2146_v52  ;;  %v2127_v49 = vmul.f32 %v2117_v60, %v3897_v50  ;;  %v2108_v46 = vadd.f32 1.0, %v2850_v39  ;;  %v2143_v60 = vld [vmem:[%s4029_s6 + $0x38] sm:$0xff] }
 0x398   :  { %2855 = vtanh.f32 %v2091_v33  ;;  %v2082_v43 = vadd.f32 %v2072_v57, %v3926_v2  ;;  %v2063_v42 = vmul.f32 %v2053_v35, %v3935_v59 }
 0x399   :  { %v2147_v44 = vadd.f32 %v2137_v15, %v2127_v49  ;;  %v2118_v24 = vmul.f32 0.5, %v2108_v46  ;;  %v3949_v8 = vpop.f32.mrb[36].mxu0 }
 0x39a   :  { %v2852_v63 = vpop.eup %2851  ;;  %v2092_v55 = vmul.f32 0.7978846, %v2082_v43  ;;  %v2073_v7 = vmul.f32 0.044715, %v2063_v42  ;;  %v2054_v50 = vmul.f32 %v3949_v8, %v3949_v8  ;;  %v2039_v37 = vpop.f32.mrb[37].mxu0 }
 0x39b   :  { %2157 = vst.msk [vmem:[%s4030_s7 + $0x8] sm:$0xff] %vm1176_vm4, %v2147_v44  ;;  %v2128_v14 = vmul.f32 %v2118_v24, %v3902_v30  ;;  %v2109_v26 = vadd.f32 1.0, %v2852_v63 }
 0x39c   :  { %2857 = vtanh.f32 %v2092_v55  ;;  %v2083_v20 = vadd.f32 %v2073_v7, %v3935_v59  ;;  %v2064_v13 = vmul.f32 %v2054_v50, %v3949_v8 }
 0x39d   :  { %v2148_v3 = vadd.f32 %v2138_v23, %v2128_v14  ;;  %v2119_v17 = vmul.f32 0.5, %v2109_v26  ;;  %v2042_v45 = vpop.f32.mrb[38].mxu0 }
 0x39e   :  { %v2854_v29 = vpop.eup %2853  ;;  %v2093_v61 = vmul.f32 0.7978846, %v2083_v20  ;;  %v2074_v21 = vmul.f32 0.044715, %v2064_v13  ;;  %v2055_v56 = vmul.f32 %v2042_v45, %v2042_v45  ;;  %v2044_v11 = vpop.f32.mrb[39].mxu0 }
 0x39f   :  { %2158 = vst.msk [vmem:[%s4030_s7 + $0x10] sm:$0xff] %vm1176_vm4, %v2148_v3  ;;  %v2129_v30 = vmul.f32 %v2119_v17, %v3908_v32  ;;  %v2110_v12 = vadd.f32 1.0, %v2854_v29 }
 0x3a0   :  { %2859 = vtanh.f32 %v2093_v61  ;;  %v2084_v22 = vadd.f32 %v2074_v21, %v3949_v8  ;;  %v2065_v47 = vmul.f32 %v2055_v56, %v2042_v45 }
 0x3a1   :  { %v2149_v34 = vadd.f32 %v2139_v5, %v2129_v30  ;;  %v2120_v1 = vmul.f32 0.5, %v2110_v12 }
 0x3a2   :  { %v2856_v19 = vpop.eup %2855  ;;  %v2094_v48 = vmul.f32 0.7978846, %v2084_v22  ;;  %v2075_v27 = vmul.f32 0.044715, %v2065_v47 }
 0x3a3   :  { %2159 = vst.msk [vmem:[%s4030_s7 + $0x18] sm:$0xff] %vm1176_vm4, %v2149_v34  ;;  %v2130_v32 = vmul.f32 %v2120_v1, %v3914_v40  ;;  %v2111_v38 = vadd.f32 1.0, %v2856_v19 }
 0x3a4   :  { %2861 = vtanh.f32 %v2094_v48  ;;  %v2085_v9 = vadd.f32 %v2075_v27, %v2042_v45 }
 0x3a5   :  { %v2150_v51 = vadd.f32 %v2140_v0, %v2130_v32  ;;  %v2121_v18 = vmul.f32 0.5, %v2111_v38 }
 0x3a6   :  { %v2858_v16 = vpop.eup %2857  ;;  %v2095_v28 = vmul.f32 0.7978846, %v2085_v9 }
 0x3a7   :  { %2160 = vst.msk [vmem:[%s4030_s7 + $0x20] sm:$0xff] %vm1176_vm4, %v2150_v51  ;;  %v2131_v31 = vmul.f32 %v2121_v18, %v3920_v62  ;;  %v2112_v54 = vadd.f32 1.0, %v2858_v16 }
 0x3a8   :  { %2863 = vtanh.f32 %v2095_v28 }
 0x3a9   :  { %v2151_v40 = vadd.f32 %v2141_v53, %v2131_v31  ;;  %v2122_v36 = vmul.f32 0.5, %v2112_v54 }
 0x3aa   :  { %v2860_v58 = vpop.eup %2859 }
 0x3ab   :  { %2161 = vst.msk [vmem:[%s4030_s7 + $0x28] sm:$0xff] %vm1176_vm4, %v2151_v40  ;;  %v2132_v4 = vmul.f32 %v2122_v36, %v3926_v2  ;;  %v2113_v41 = vadd.f32 1.0, %v2860_v58  ;;  %v2144_v2 = vld [vmem:[%s4029_s6 + $0x40] sm:$0xff] }
 0x3ad   :  { %v2152_v25 = vadd.f32 %v2142_v10, %v2132_v4  ;;  %v2123_v52 = vmul.f32 0.5, %v2113_v41 }
 0x3ae   :  { %v2862_v62 = vpop.eup %2861 }
 0x3af   :  { %2162 = vst.msk [vmem:[%s4030_s7 + $0x30] sm:$0xff] %vm1176_vm4, %v2152_v25  ;;  %v2133_v39 = vmul.f32 %v2123_v52, %v3935_v59  ;;  %v2114_v15 = vadd.f32 1.0, %v2862_v62  ;;  %v2145_v59 = vld [vmem:[%s4029_s6 + $0x48] sm:$0xff] }
 0x3b1   :  { %v2153_v33 = vadd.f32 %v2143_v60, %v2133_v39  ;;  %v2124_v57 = vmul.f32 0.5, %v2114_v15 }
 0x3b2   :  { %v2864_v35 = vpop.eup %2863 }
 0x3b3   :  { %2163 = vst.msk [vmem:[%s4030_s7 + $0x38] sm:$0xff] %vm1176_vm4, %v2153_v33  ;;  %v2134_v6 = vmul.f32 %v2124_v57, %v3949_v8  ;;  %v2115_v49 = vadd.f32 1.0, %v2864_v35 }
 0x3b5   :  { %v2154_v46 = vadd.f32 %v2144_v2, %v2134_v6  ;;  %v2125_v43 = vmul.f32 0.5, %v2115_v49 }
 0x3b7   :  { %2164 = vst.msk [vmem:[%s4030_s7 + $0x40] sm:$0xff] %vm1176_vm4, %v2154_v46  ;;  %v2135_v42 = vmul.f32 %v2125_v43, %v2042_v45 }
 0x3b9   :  { %v2155_v44 = vadd.f32 %v2145_v59, %v2135_v42 }
 0x3bb   :  { %2165 = vst.msk [vmem:[%s4030_s7 + $0x48] sm:$0xff] %vm1176_vm4, %v2155_v44 }

// kernel: whisper_kmeans_forward.5
= control target key start
LH: loop header
LB: loop body
LE: loop exit
PB: predicated region body
PF: predicated region fallthrough
CT: control target
= control target key end

     0   :  { %s9370_s0 = inlined_call_operand.vmem [shape: f32[80,32], index: 0, kind: input, shape index: {}]   ;;  %s9371_s1 = inlined_call_operand.vmem [shape: f32[80,80], index: 1, kind: input, shape index: {}]   ;;  %s9372_s2 = inlined_call_operand.vmem [shape: f32[2,1,32], index: 2, kind: input, shape index: {}]   ;;  %s9373_s3 = inlined_call_operand.vmem [shape: f32[2,1,32], index: 3, kind: input, shape index: {}]   ;;  %s9374_s4 = inlined_call_operand.vmem [shape: f32[2,32,96], index: 4, kind: input, shape index: {}]   ;;  %s9375_s5 = inlined_call_operand.vmem [shape: f32[2,1,96], index: 5, kind: input, shape index: {}]   ;;  %s9376_s6 = inlined_call_operand.vmem [shape: f32[2,32,32], index: 6, kind: input, shape index: {}]   ;;  %s9377_s7 = inlined_call_operand.vmem [shape: f32[2,1,32], index: 7, kind: input, shape index: {}]   ;;  %s9378_s8 = inlined_call_operand.vmem [shape: f32[2,1,32], index: 8, kind: input, shape index: {}]   ;;  %s9379_s9 = inlined_call_operand.vmem [shape: f32[2,1,32], index: 9, kind: input, shape index: {}]   ;;  %s9380_s10 = inlined_call_operand.vmem [shape: f32[2,32,128], index: 10, kind: input, shape index: {}]   ;;  %s9381_s11 = inlined_call_operand.vmem [shape: f32[2,1,128], index: 11, kind: input, shape index: {}]   ;;  %s9382_s12 = inlined_call_operand.vmem [shape: f32[2,128,32], index: 12, kind: input, shape index: {}]   ;;  %s9383_s13 = inlined_call_operand.vmem [shape: f32[2,1,32], index: 13, kind: input, shape index: {}]   ;;  %s9384_s14 = inlined_call_operand.vmem [shape: f32[1,32], index: 14, kind: input, shape index: {}]   ;;  %s9385_s15 = inlined_call_operand.vmem [shape: f32[1,32], index: 15, kind: input, shape index: {}]   ;;  %s9386_s16 = inlined_call_operand.vmem [shape: f32[128,80], index: 16, kind: input, shape index: {}]   ;;  %s9387_s17 = inlined_call_operand.vmem [shape: f32[32,8], index: 17, kind: input, shape index: {}]   ;;  %s9388_s18 = inlined_call_operand.vmem [shape: f32[8,32], index: 18, kind: input, shape index: {}]   ;;  %s9389_s19 = inlined_call_operand.vmem [shape: s32[128,1], index: 19, kind: output, shape index: {0}]   ;;  %s9390_s20 = inlined_call_operand.vmem [shape: f32[128,32], index: 20, kind: output, shape index: {1}]  }
   0x1   :  { %9409 = sst [smem:[#allocation13_spill]] %s9370_s0 }
   0x2   :  { %9410 = sst [smem:[#allocation14_spill]] %s9371_s1  ;;  %s7175_s1 = smov 0  }
   0x3   :  { %9411 = sst [smem:[#allocation15_spill]] %s9372_s2 }
   0x4   :  { %9412 = sst [smem:[#allocation16_spill]] %s9373_s3 }
   0x5   :  { %9413 = sst [smem:[#allocation17_spill]] %s9374_s4 }
   0x6   :  { %9414 = sst [smem:[#allocation18_spill]] %s9376_s6 }
   0x7   :  { %9415 = sst [smem:[#allocation19_spill]] %s9384_s14 }
   0x8   :  { %9416 = sst [smem:[#allocation20_spill]] %s9385_s15 }
   0x9   :  { %9417 = sst [smem:[#allocation21_spill]] %s9388_s18 }
   0xa   :  { %9418 = sst [smem:[#allocation22_spill]] %s9389_s19 }
   0xb   :  { %9419 = sst [smem:[#allocation23_spill]] %s9390_s20 }
   0xc LB: > { %9420 = sst [smem:[#allocation3_spill]] %s7064_s1  ;;  %s7181_s22 = sadd.s32 4294967295, %s7064_s1   ;;  %s7064_s1 = sphi %s7175_s1, %s31_s1  }
   0xd   : > { %p5299_p0 = scmp.ge.s32.totalorder %s7064_s1, 1  ;;  %p649_p1 = scmp.lt.s32.totalorder %s7064_s1, 3 }
   0xf   : > { %p650_p2 = pnand %p5299_p0, %p649_p1 }
  0x11   : > { %653 = sbr.rel (%p650_p2) target bundleno = 4091 (0xffb), region = 96 }
  0x18   : > { %p741_p3 = scmp.lt.s32.totalorder %s7181_s22, 1  ;;  %s9423_s1 = sld [smem:[#allocation17_spill]] }
  0x19   : > { %s9424_s6 = sld [smem:[#allocation18_spill]]  ;;  %p5308_p4 = scmp.ne.s32.totalorder %s7181_s22, 0 }
  0x1a   : > { %s7187_s23 = scalar_select %p741_p3, %s7181_s22, 1 }
  0x1b   : > { %788 = sbr.rel (%p5308_p4) target bundleno = 39 (0x27), region = 100  ;;  %s9425_s24 = sld [smem:[#allocation13_spill]] (!%p5308_p4)  ;;  %vm799_vm0 = vcmask (!%p5308_p4), 261120  }
  0x1c   : > { %s5540_s29 = sshll.u32 %s7187_s23, 5  ;;  %s765_s4 = scalar_lea.vmem %s9378_s8, %s7187_s23 }
  0x1d   : > { %s768_s21 = scalar_lea.vmem %s9379_s9, %s7187_s23  ;;  %s7227_s2 = scalar_lea.vmem %s9380_s10, %s5540_s29 }
  0x1e   : > { %s7205_s20 = scalar_lea.vmem %s9423_s1, %s5540_s29  ;;  %s5543_s14 = sshll.u32 %s7187_s23, 7 }
  0x1f   : > { %s7210_s15 = scalar_lea.vmem %s9424_s6, %s5540_s29  ;;  %s776_s6 = scalar_lea.vmem %s9381_s11, %s7187_s23 }
  0x20   : > { %s7237_s26 = scalar_lea.vmem %s9382_s12, %s5543_s14  ;;  %s784_s30 = scalar_lea.vmem %s9383_s13, %s7187_s23 }
  0x21   : > { %v789_v0 = vld [vmem:[%s9425_s24] sm:$0xff] (!%p5308_p4)  ;;  %v790_v1 = vld [vmem:[%s9425_s24 + $0x8] sm:$0xff] (!%p5308_p4)  ;;  %v791_v2 = vld [vmem:[%s9425_s24 + $0x10] sm:$0xff] (!%p5308_p4) }
  0x22   : > { %800 = vst.msk [vmem:[#allocation2] sm:$0xff] %vm799_vm0, %v789_v0  ;;  %801 = vst.msk [vmem:[#allocation2 + $0x8] sm:$0xff] %vm799_vm0, %v790_v1  ;;  %v792_v3 = vld [vmem:[%s9425_s24 + $0x18] sm:$0xff]  ;;  %v793_v4 = vld [vmem:[%s9425_s24 + $0x20] sm:$0xff] }
  0x23   : > { %802 = vst.msk [vmem:[#allocation2 + $0x10] sm:$0xff] %vm799_vm0, %v791_v2  ;;  %v794_v5 = vld [vmem:[%s9425_s24 + $0x28] sm:$0xff]  ;;  %803 = vst.msk [vmem:[#allocation2 + $0x18] sm:$0xff] %vm799_vm0, %v792_v3  ;;  %v795_v6 = vld [vmem:[%s9425_s24 + $0x30] sm:$0xff] }
  0x24   : > { %804 = vst.msk [vmem:[#allocation2 + $0x20] sm:$0xff] %vm799_vm0, %v793_v4  ;;  %805 = vst.msk [vmem:[#allocation2 + $0x28] sm:$0xff] %vm799_vm0, %v794_v5  ;;  %v796_v7 = vld [vmem:[%s9425_s24 + $0x38] sm:$0xff]  ;;  %v797_v8 = vld [vmem:[%s9425_s24 + $0x40] sm:$0xff] }
  0x25   : > { %806 = vst.msk [vmem:[#allocation2 + $0x30] sm:$0xff] %vm799_vm0, %v795_v6  ;;  %807 = vst.msk [vmem:[#allocation2 + $0x38] sm:$0xff] %vm799_vm0, %v796_v7  ;;  %v798_v9 = vld [vmem:[%s9425_s24 + $0x48] sm:$0xff] }
  0x26   : > { %808 = vst.msk [vmem:[#allocation2 + $0x40] sm:$0xff] %vm799_vm0, %v797_v8  ;;  %809 = vst.msk [vmem:[#allocation2 + $0x48] sm:$0xff] %vm799_vm0, %v798_v9 }
  0x27 PF: > { %vm822_vm1 = vcmask 261120   ;;  %s9426_s29 = sld [smem:[#allocation15_spill]]  ;;  %s9428_s3 = sld [smem:[#allocation16_spill]]  ;;  %vm1384_vm13 = vcmask 654336  }
  0x28   : > { %s9431_s28 = scalar_lea.vmem %s9375_s5, %s7187_s23  ;;  %s7068_s0 = smov 64   ;;  %vm7449_vm12 = vmpackc.low %vm822_vm1, %vm822_vm1 }
  0x29   : > { %s9441_s18 = sld [smem:[#allocation14_spill]]  ;;  %s9451_s19 = scalar_lea.vmem %s9377_s7, %s7187_s23 }
  0x2a   : > { %v812_v11 = vld [vmem:[#allocation2 + $0x10] sm:$0xff]  ;;  %v813_v15 = vld [vmem:[#allocation2 + $0x18] sm:$0xff]  ;;  %p5471_p5 = scmp.ne.s32.totalorder %s7181_s22, 1 }
  0x2b   : > { %v829_v14 = vsel %vm822_vm1, %v812_v11, 0.0  ;;  %v832_v17 = vsel %vm822_vm1, %v813_v15, 0.0  ;;  %v814_v18 = vld [vmem:[#allocation2 + $0x20] sm:$0xff]  ;;  %v815_v19 = vld [vmem:[#allocation2 + $0x28] sm:$0xff]  ;;  %vm4513_vm14 = vcmask (!%p5471_p5), 64512  }
  0x2c   : > { %830 = vadd.xlane.f32.xlu1 %v829_v14  ;;  %v835_v20 = vsel %vm822_vm1, %v814_v18, 0.0  ;;  %v838_v21 = vsel %vm822_vm1, %v815_v19, 0.0  ;;  %v816_v22 = vld [vmem:[#allocation2 + $0x30] sm:$0xff]  ;;  %v817_v23 = vld [vmem:[#allocation2 + $0x38] sm:$0xff] }
  0x2d   : > { %v841_v24 = vsel %vm822_vm1, %v816_v22, 0.0  ;;  %v844_v25 = vsel %vm822_vm1, %v817_v23, 0.0  ;;  %v818_v26 = vld [vmem:[#allocation2 + $0x40] sm:$0xff]  ;;  %v819_v27 = vld [vmem:[#allocation2 + $0x48] sm:$0xff]  ;;  %s9427_s1 = scalar_lea.vmem %s9426_s29, %s7187_s23  ;;  %s9429_s14 = scalar_lea.vmem %s9428_s3, %s7187_s23 }
  0x2e   : > { %v810_v10 = vld [vmem:[#allocation2] sm:$0xff]  ;;  %v811_v12 = vld [vmem:[#allocation2 + $0x8] sm:$0xff]  ;;  %v847_v28 = vsel %vm822_vm1, %v818_v26, 0.0  ;;  %v850_v29 = vsel %vm822_vm1, %v819_v27, 0.0  ;;  %s9452_s3 = sld [smem:[#allocation19_spill]] (!%p5471_p5) }
  0x2f   : > { %v823_v13 = vsel %vm822_vm1, %v810_v10, 0.0  ;;  %v826_v16 = vsel %vm822_vm1, %v811_v12, 0.0 }
  0x30   : > { %824 = vadd.xlane.f32.xlu0 %v823_v13  ;;  %833 = vadd.xlane.f32.xlu1 %v832_v17  ;;  %v987_v17 = vld [vmem:[%s7205_s20 + $0x8] sm:$0xff] }
  0x34   : > { %827 = vadd.xlane.f32.xlu0 %v826_v16  ;;  %839 = vadd.xlane.f32.xlu1 %v838_v21  ;;  %v986_v16 = vld [vmem:[%s7205_s20] sm:$0xff] }
  0x38   : > { %836 = vadd.xlane.f32.xlu0 %v835_v20  ;;  %845 = vadd.xlane.f32.xlu1 %v844_v25  ;;  %v989_v20 = vld [vmem:[%s7205_s20 + $0x18] sm:$0xff] }
  0x3c   : > { %842 = vadd.xlane.f32.xlu0 %v841_v24  ;;  %851 = vadd.xlane.f32.xlu1 %v850_v29 }
  0x40   : > { %848 = vadd.xlane.f32.xlu0 %v847_v28 }
  0xb9   : > { %v831_v31 = vpop.xlane.xlu1 %830 }
  0xba   : > { %v856_v33 = vmul.f32 0.03125, %v831_v31 }
  0xbc   : > { %v7296_v35 = vsub.f32 %v812_v11, %v856_v33 }
  0xbd   : > { %v825_v30 = vpop.xlane.xlu0 %824  ;;  %v834_v37 = vpop.xlane.xlu1 %833 }
  0xbe   : > { %v854_v32 = vmul.f32 0.03125, %v825_v30  ;;  %v857_v39 = vmul.f32 0.03125, %v834_v37  ;;  %v876_v41 = vmul.f32 %v7296_v35, %v7296_v35 }
  0xc0   : > { %v7294_v34 = vsub.f32 %v810_v10, %v854_v32  ;;  %v7304_v43 = vsub.f32 %v813_v15, %v857_v39  ;;  %v890_v47 = vsel %vm822_vm1, %v876_v41, 0.0 }
  0xc1   : > { %v828_v36 = vpop.xlane.xlu0 %827  ;;  %v840_v46 = vpop.xlane.xlu1 %839 }
  0xc2   : > { %v855_v38 = vmul.f32 0.03125, %v828_v36  ;;  %v874_v40 = vmul.f32 %v7294_v34, %v7294_v34  ;;  %v859_v49 = vmul.f32 0.03125, %v840_v46  ;;  %v877_v51 = vmul.f32 %v7304_v43, %v7304_v43 }
  0xc4   : > { %v7302_v42 = vsub.f32 %v811_v12, %v855_v38  ;;  %v884_v44 = vsel %vm822_vm1, %v874_v40, 0.0  ;;  %v7314_v53 = vsub.f32 %v815_v19, %v859_v49  ;;  %v893_v57 = vsel %vm822_vm1, %v877_v51, 0.0  ;;  %v988_v19 = vld [vmem:[%s7205_s20 + $0x10] sm:$0xff]  ;;  %s7067_s20 = smov 96  }
  0xc5   : > { %885 = vadd.xlane.f32.xlu0 %v884_v44  ;;  %v837_v45 = vpop.xlane.xlu0 %836  ;;  %v846_v56 = vpop.xlane.xlu1 %845  ;;  %v6337_v21 = vpack.c.bf16 %v989_v20, %v988_v19 }
  0xc6   : > { %v858_v48 = vmul.f32 0.03125, %v837_v45  ;;  %v875_v50 = vmul.f32 %v7302_v42, %v7302_v42  ;;  %v861_v59 = vmul.f32 0.03125, %v846_v56  ;;  %v879_v61 = vmul.f32 %v7314_v53, %v7314_v53  ;;  %v5310_v56 = vld [vmem:[%s9429_s14] ss:$0 sm:$0xff]  ;;  %s9456_s14 = sld [smem:[#allocation22_spill]] (!%p5471_p5) }
  0xc8   : > { %v7312_v52 = vsub.f32 %v814_v18, %v858_v48  ;;  %v887_v54 = vsel %vm822_vm1, %v875_v50, 0.0  ;;  %v7324_v63 = vsub.f32 %v817_v23, %v861_v59  ;;  %v899_v3 = vsel %vm822_vm1, %v879_v61, 0.0  ;;  %v5309_v48 = vld [vmem:[%s9427_s1] ss:$0 sm:$0xff] }
  0xc9   : > { %891 = vadd.xlane.f32.xlu0 %v890_v47  ;;  %888 = vadd.xlane.f32.xlu1 %v887_v54  ;;  %v843_v55 = vpop.xlane.xlu0 %842  ;;  %v852_v2 = vpop.xlane.xlu1 %851  ;;  %v6333_v18 = vpack.c.bf16 %v987_v17, %v986_v16 }
  0xca   : > { %v860_v58 = vmul.f32 0.03125, %v843_v55  ;;  %v878_v60 = vmul.f32 %v7312_v52, %v7312_v52  ;;  %v863_v5 = vmul.f32 0.03125, %v852_v2  ;;  %v881_v7 = vmul.f32 %v7324_v63, %v7324_v63 }
  0xcb   : > { %6334 = vmatprep.subr.bf16.mxu0 %v6333_v18 }
  0xcc   : > { %v7322_v62 = vsub.f32 %v816_v22, %v860_v58  ;;  %v896_v0 = vsel %vm822_vm1, %v878_v60, 0.0  ;;  %v7334_v9 = vsub.f32 %v819_v27, %v863_v5  ;;  %v905_v11 = vsel %vm822_vm1, %v881_v7, 0.0  ;;  %6336 = vmatpush3.bf16.msra.mxu0 %v6333_v18 }
  0xcd   : > { %894 = vadd.xlane.f32.xlu1 %v893_v57  ;;  %897 = vadd.xlane.f32.xlu0 %v896_v0  ;;  %v849_v1 = vpop.xlane.xlu0 %848 }
  0xce   : > { %v862_v4 = vmul.f32 0.03125, %v849_v1  ;;  %v880_v6 = vmul.f32 %v7322_v62, %v7322_v62  ;;  %v883_v13 = vmul.f32 %v7334_v9, %v7334_v9  ;;  %6338 = vmatprep.subr.bf16.mxu0 %v6337_v21 }
  0xd0   : > { %v7332_v8 = vsub.f32 %v818_v26, %v862_v4  ;;  %v902_v10 = vsel %vm822_vm1, %v880_v6, 0.0  ;;  %v911_v15 = vsel %vm822_vm1, %v883_v13, 0.0  ;;  %6340 = vmatpush3.bf16.msra.mxu0 %v6337_v21 }
  0xd1   : > { %900 = vadd.xlane.f32.xlu1 %v899_v3  ;;  %903 = vadd.xlane.f32.xlu0 %v902_v10 }
  0xd2   : > { %v882_v12 = vmul.f32 %v7332_v8, %v7332_v8 }
  0xd4   : > { %v908_v14 = vsel %vm822_vm1, %v882_v12, 0.0 }
  0xd5   : > { %906 = vadd.xlane.f32.xlu1 %v905_v11  ;;  %909 = vadd.xlane.f32.xlu0 %v908_v14 }
  0xd9   : > { %912 = vadd.xlane.f32.xlu1 %v911_v15 }
 0x152   : > { %v886_v22 = vpop.xlane.xlu0 %885 }
 0x153   : > { %v914_v23 = vmul.f32 0.03125, %v886_v22 }
 0x155   : > { %v924_v24 = vadd.f32 1e-05, %v914_v23 }
 0x156   : > { %v889_v25 = vpop.xlane.xlu1 %888  ;;  %v892_v26 = vpop.xlane.xlu0 %891 }
 0x157   : > { %6808 = vrsqrt.f32 %v924_v24  ;;  %v915_v27 = vmul.f32 0.03125, %v889_v25  ;;  %v916_v28 = vmul.f32 0.03125, %v892_v26 }
 0x159   : > { %v925_v29 = vadd.f32 1e-05, %v915_v27  ;;  %v926_v30 = vadd.f32 1e-05, %v916_v28 }
 0x15a   : > { %v895_v31 = vpop.xlane.xlu1 %894  ;;  %v898_v32 = vpop.xlane.xlu0 %897 }
 0x15b   : > { %6810 = vrsqrt.f32 %v925_v29  ;;  %v917_v33 = vmul.f32 0.03125, %v895_v31  ;;  %v918_v36 = vmul.f32 0.03125, %v898_v32 }
 0x15c   : > { %6812 = vrsqrt.f32 %v926_v30 }
 0x15d   : > { %v927_v37 = vadd.f32 1e-05, %v917_v33  ;;  %v928_v38 = vadd.f32 1e-05, %v918_v36 }
 0x15e   : > { %v901_v39 = vpop.xlane.xlu1 %900  ;;  %v904_v40 = vpop.xlane.xlu0 %903 }
 0x15f   : > { %6814 = vrsqrt.f32 %v927_v37  ;;  %v919_v41 = vmul.f32 0.03125, %v901_v39  ;;  %v920_v44 = vmul.f32 0.03125, %v904_v40 }
 0x160   : > { %6816 = vrsqrt.f32 %v928_v38  ;;  %v7066_v38 = vmov 0.0  }
 0x161   : > { %v6809_v45 = vpop.eup %6808  ;;  %v929_v46 = vadd.f32 1e-05, %v919_v41  ;;  %v930_v47 = vadd.f32 1e-05, %v920_v44 }
 0x162   : > { %v907_v49 = vpop.xlane.xlu1 %906  ;;  %v910_v50 = vpop.xlane.xlu0 %909  ;;  %v944_v51 = vmul.f32 %v6809_v45, %v7294_v34 }
 0x163   : > { %6818 = vrsqrt.f32 %v929_v46  ;;  %v921_v54 = vmul.f32 0.03125, %v907_v49  ;;  %v922_v55 = vmul.f32 0.03125, %v910_v50 }
 0x164   : > { %6820 = vrsqrt.f32 %v930_v47  ;;  %v960_v57 = vmul.f32 %v5309_v48, %v944_v51 }
 0x165   : > { %v6811_v58 = vpop.eup %6810  ;;  %v931_v59 = vadd.f32 1e-05, %v921_v54  ;;  %v932_v60 = vadd.f32 1e-05, %v922_v55 }
 0x166   : > { %v6813_v61 = vpop.eup %6812  ;;  %v913_v0 = vpop.xlane.xlu1 %912  ;;  %v976_v1 = vadd.f32 %v5310_v56, %v960_v57  ;;  %v945_v2 = vmul.f32 %v6811_v58, %v7302_v42 }
 0x167   : > { %6822 = vrsqrt.f32 %v931_v59  ;;  %v923_v34 = vmul.f32 0.03125, %v913_v0  ;;  %v946_v3 = vmul.f32 %v6813_v61, %v7296_v35 }
 0x168   : > { %6824 = vrsqrt.f32 %v932_v60  ;;  %5843 = vmatprep.mubr.msk.f32.mxu0 %vm822_vm1, %v976_v1  ;;  %v961_v4 = vmul.f32 %v5309_v48, %v945_v2 }
 0x169   : > { %v6815_v5 = vpop.eup %6814  ;;  %v933_v6 = vadd.f32 1e-05, %v923_v34  ;;  %v962_v7 = vmul.f32 %v5309_v48, %v946_v3 }
 0x16a   : > { %v6817_v10 = vpop.eup %6816  ;;  %v977_v11 = vadd.f32 %v5310_v56, %v961_v4  ;;  %v947_v12 = vmul.f32 %v6815_v5, %v7304_v43 }
 0x16b   : > { %6826 = vrsqrt.f32 %v933_v6  ;;  %v978_v13 = vadd.f32 %v5310_v56, %v962_v7  ;;  %v948_v14 = vmul.f32 %v6817_v10, %v7312_v52 }
 0x16c   : > { %5844 = vmatmul.mubr.msk.f32.vlgmr.msra.gmra.mrb[0].mxu0 %vm822_vm1, %v977_v11  ;;  %v963_v42 = vmul.f32 %v5309_v48, %v947_v12 }
 0x16d   : > { %v6819_v15 = vpop.eup %6818  ;;  %5846 = vmatprep.mubr.msk.f32.mxu0 %vm822_vm1, %v978_v13  ;;  %v964_v35 = vmul.f32 %v5309_v48, %v948_v14 }
 0x16e   : > { %v6821_v16 = vpop.eup %6820  ;;  %v979_v17 = vadd.f32 %v5310_v56, %v963_v42  ;;  %v949_v18 = vmul.f32 %v6819_v15, %v7314_v53 }
 0x16f   : > { %v980_v19 = vadd.f32 %v5310_v56, %v964_v35  ;;  %v950_v20 = vmul.f32 %v6821_v16, %v7322_v62 }
 0x170   : > { %5847 = vmatmul.mubr.msk.f32.gmra.mrb[2].mxu0 %vm822_vm1, %v979_v17  ;;  %v965_v43 = vmul.f32 %v5309_v48, %v949_v18 }
 0x171   : > { %v6823_v21 = vpop.eup %6822  ;;  %5849 = vmatprep.mubr.msk.f32.mxu0 %vm822_vm1, %v980_v19  ;;  %v966_v52 = vmul.f32 %v5309_v48, %v950_v20 }
 0x172   : > { %v6825_v22 = vpop.eup %6824  ;;  %v981_v23 = vadd.f32 %v5310_v56, %v965_v43  ;;  %v951_v24 = vmul.f32 %v6823_v21, %v7324_v63 }
 0x173   : > { %v982_v25 = vadd.f32 %v5310_v56, %v966_v52  ;;  %v952_v26 = vmul.f32 %v6825_v22, %v7332_v8  ;;  %v1152_v8 = vlaneseq }
 0x174   : > { %5850 = vmatmul.mubr.msk.f32.gmra.mrb[4].mxu0 %vm822_vm1, %v981_v23  ;;  %v967_v53 = vmul.f32 %v5309_v48, %v951_v24 }
 0x175   : > { %v6827_v27 = vpop.eup %6826  ;;  %5852 = vmatprep.mubr.msk.f32.mxu0 %vm822_vm1, %v982_v25  ;;  %v968_v62 = vmul.f32 %v5309_v48, %v952_v26  ;;  %v7378_v32 = vand.u32 127, %v1152_v8 }
 0x176   : > { %v983_v28 = vadd.f32 %v5310_v56, %v967_v53  ;;  %v953_v29 = vmul.f32 %v6827_v27, %v7334_v9  ;;  %v5311_v9 = vld [vmem:[%s9431_s28] ss:$0 sm:$0xff] }
 0x177   : > { %v984_v30 = vadd.f32 %v5310_v56, %v968_v62  ;;  %9430 = vst [vmem:[#allocation4_spill] sm:$0xff] %v7378_v32  ;;  %vm1509_vm2 = vcmp.ge.s32.totalorder %v7378_v32, 8  ;;  %vm1510_vm3 = vcmp.lt.s32.totalorder %v7378_v32, 16  ;;  %vm1155_vm4 = vcmp.lt.s32.totalorder %v7378_v32, 8 }
 0x178   : > { %5853 = vmatmul.mubr.msk.f32.gmra.mrb[6].mxu0 %vm822_vm1, %v983_v28  ;;  %v969_v31 = vmul.f32 %v5309_v48, %v953_v29  ;;  %vm1511_vm5 = vmand %vm1509_vm2, %vm1510_vm3  ;;  %v7390_v39 = vsel %vm1155_vm4, 1.0, %v7066_v38  ;;  %vm2183_vm6 = vcmp.ge.s32.totalorder %v7378_v32, 16  ;;  %vm2184_vm7 = vcmp.lt.s32.totalorder %v7378_v32, 24 }
 0x179   : > { %5855 = vmatprep.mubr.msk.f32.mxu0 %vm822_vm1, %v984_v30  ;;  %v7392_v40 = vsel %vm1511_vm5, 1.0, %v7066_v38  ;;  %vm2682_vm8 = vcmp.ge.s32.totalorder %v7378_v32, 24  ;;  %vm2683_vm9 = vcmp.lt.s32.totalorder %v7378_v32, 32  ;;  %vm2185_vm10 = vmand %vm2183_vm6, %vm2184_vm7 }
 0x17a   : > { %v985_v63 = vadd.f32 %v5310_v56, %v969_v31  ;;  %v6698_v5 = vpack.i.bf16 %v7390_v39, %v7392_v40  ;;  %vm2684_vm11 = vmand %vm2682_vm8, %vm2683_vm9  ;;  %v7438_v7 = vsel %vm2185_vm10, 1.0, %v7066_v38 }
 0x17b   : > { %v7440_v10 = vsel %vm2684_vm11, 1.0, %v7066_v38 }
 0x17c   : > { %5856 = vmatmul.mubr.msk.f32.gmra.mrb[8].mxu0 %vm822_vm1, %v985_v63  ;;  %v6703_v11 = vpack.i.bf16 %v7440_v10, %v7438_v7 }
 0x23f   : > { %v5845_v33 = vpop.f32.mrb[0].mxu0 }
 0x240   : > { %v7388_v36 = vadd.f32 %v5845_v33, %v5311_v9  ;;  %v1093_v37 = vpop.f32.mrb[1].mxu0 }
 0x241   : > { %v7394_v41 = vadd.f32 %v5311_v9, %v1093_v37 }
 0x243   : > { %v5848_v44 = vpop.f32.mrb[2].mxu0  ;;  %v6673_v45 = vpack.i.bf16 %v7388_v36, %v7394_v41  ;;  %v1159_v46 = vmul.f32 %v7390_v39, %v7394_v41  ;;  %v1514_v47 = vmul.f32 %v7392_v40, %v7394_v41 }
 0x244   : > { %v7402_v48 = vadd.f32 %v5848_v44, %v5311_v9  ;;  %v1103_v49 = vpop.f32.mrb[3].mxu0 }
 0x245   : > { %v7404_v50 = vadd.f32 %v5311_v9, %v1103_v49  ;;  %6674 = vrot.lane.b32.xlu0 %v6673_v45, %s7067_s20  ;;  %5878 = vmatprep.mubr.msk.f32.mxu1 %vm822_vm1, %v1159_v46 }
 0x246   : > { %5913 = vmatprep.mubr.msk.f32.mxu0 %vm822_vm1, %v1514_v47 }
 0x247   : > { %v5851_v51 = vpop.f32.mrb[4].mxu0  ;;  %v6678_v54 = vpack.i.bf16 %v7402_v48, %v7404_v50 }
 0x248   : > { %v7411_v55 = vadd.f32 %v5851_v51, %v5311_v9  ;;  %v1113_v56 = vpop.f32.mrb[5].mxu0 }
 0x249   : > { %v7413_v57 = vadd.f32 %v5311_v9, %v1113_v56  ;;  %6679 = vrot.lane.b32.xlu1 %v6678_v54, %s7067_s20 }
 0x24b   : > { %v5854_v58 = vpop.f32.mrb[6].mxu0  ;;  %v6683_v59 = vpack.i.bf16 %v7411_v55, %v7413_v57 }
 0x24c   : > { %v7418_v60 = vadd.f32 %v5854_v58, %v5311_v9  ;;  %v1123_v61 = vpop.f32.mrb[7].mxu0 }
 0x24d   : > { %v7420_v0 = vadd.f32 %v5311_v9, %v1123_v61  ;;  %6684 = vrot.lane.b32.xlu1 %v6683_v59, %s7067_s20 }
 0x24f   : > { %v5857_v1 = vpop.f32.mrb[8].mxu0  ;;  %v6688_v2 = vpack.i.bf16 %v7418_v60, %v7420_v0 }
 0x250   : > { %v7429_v34 = vadd.f32 %v5857_v1, %v5311_v9  ;;  %v1133_v3 = vpop.f32.mrb[9].mxu0 }
 0x251   : > { %v7431_v4 = vadd.f32 %v5311_v9, %v1133_v3  ;;  %6689 = vrot.lane.b32.xlu1 %v6688_v2, %s7067_s20 }
 0x253   : > { %v6693_v6 = vpack.i.bf16 %v7429_v34, %v7431_v4 }
 0x255   : > { %6699 = vrot.lane.b32.xlu1 %v6698_v5, %s7068_s0  ;;  %6694 = vrot.lane.b32.xlu0 %v6693_v6, %s7067_s20 }
 0x259   : > { %6704 = vrot.lane.b32.xlu1 %v6703_v11, %s7068_s0 }
 0x2b7   : > { %v6675_v12 = vpop.permute.xlu0 %6674 }
 0x2b8   : > { %v6677_v13 = vunpack.i.h.bf16 %v6675_v12  ;;  %v6676_v14 = vunpack.i.l.bf16 %v6675_v12 }
 0x2ba   : > { %v7453_v15 = vpack.c.bf16 %v6677_v13, %v6676_v14 }
 0x2bb   : > { %v6680_v35 = vpop.permute.xlu1 %6679 }
 0x2bc   : > { %v6682_v16 = vunpack.i.h.bf16 %v6680_v35  ;;  %v6681_v17 = vunpack.i.l.bf16 %v6680_v35  ;;  %6343 = vmatprep.subr.msk.bf16.mxu1 %vm7449_vm12, %v7453_v15  ;;  %6373 = vmatprep.subr.msk.bf16.mxu0 %vm7449_vm12, %v7453_v15 }
 0x2bd   : > { %6346 = vmatpush3.bf16.xpose.msk.msra.mxu1 %vm7449_vm12, %v7453_v15  ;;  %6376 = vmatpush3.bf16.xpose.msk.msra.mxu0 %vm7449_vm12, %v7453_v15 }
 0x2be   : > { %v7467_v18 = vpack.c.bf16 %v6682_v16, %v6681_v17 }
 0x2bf   : > { %v6685_v19 = vpop.permute.xlu1 %6684 }
 0x2c0   : > { %v6687_v20 = vunpack.i.h.bf16 %v6685_v19  ;;  %v6686_v43 = vunpack.i.l.bf16 %v6685_v19  ;;  %6349 = vmatprep.subr.msk.bf16.mxu1 %vm7449_vm12, %v7467_v18  ;;  %6379 = vmatprep.subr.msk.bf16.mxu0 %vm7449_vm12, %v7467_v18 }
 0x2c2   : > { %v7475_v52 = vpack.c.bf16 %v6687_v20, %v6686_v43 }
 0x2c3   : > { %v6690_v21 = vpop.permute.xlu1 %6689 }
 0x2c4   : > { %v6692_v22 = vunpack.i.h.bf16 %v6690_v21  ;;  %v6691_v23 = vunpack.i.l.bf16 %v6690_v21 }
 0x2c5   : > { %6352 = vmatpush3.bf16.xpose.msk.msra.mxu1 %vm7449_vm12, %v7467_v18  ;;  %6382 = vmatpush3.bf16.xpose.msk.msra.mxu0 %vm7449_vm12, %v7467_v18 }
 0x2c6   : > { %6355 = vmatprep.subr.msk.bf16.mxu1 %vm7449_vm12, %v7475_v52  ;;  %6385 = vmatprep.subr.msk.bf16.mxu0 %vm7449_vm12, %v7475_v52  ;;  %v7497_v62 = vpack.c.bf16 %v6692_v22, %v6691_v23 }
 0x2c7   : > { %v6700_v24 = vpop.permute.xlu1 %6699  ;;  %v6695_v30 = vpop.permute.xlu0 %6694 }
 0x2c8   : > { %v7489_v25 = vunpack.i.l.bf16 %v6700_v24  ;;  %v7501_v29 = vunpack.i.h.bf16 %v6700_v24  ;;  %v6697_v38 = vunpack.i.h.bf16 %v6695_v30  ;;  %v6696_v44 = vunpack.i.l.bf16 %v6695_v30 }
 0x2ca   : > { %v1803_v26 = vmul.f32 %v7489_v25, %v7394_v41  ;;  %v1804_v53 = vmul.f32 %v7489_v25, %v7388_v36  ;;  %v1805_v27 = vmul.f32 %v7489_v25, %v7404_v50  ;;  %v1806_v28 = vmul.f32 %v7489_v25, %v7402_v48 }
 0x2cb   : > { %v1807_v63 = vmul.f32 %v7489_v25, %v7413_v57  ;;  %v1808_v8 = vmul.f32 %v7489_v25, %v7411_v55  ;;  %v1809_v33 = vmul.f32 %v7489_v25, %v7420_v0  ;;  %v1810_v37 = vmul.f32 %v7489_v25, %v7418_v60  ;;  %v6705_v49 = vpop.permute.xlu1 %6704 }
 0x2cc   : > { %v6708_v31 = vpack.i.bf16 %v1804_v53, %v1803_v26  ;;  %v6713_v9 = vpack.i.bf16 %v1806_v28, %v1805_v27  ;;  %v1501_v46 = vmul.f32 %v7501_v29, %v7404_v50  ;;  %v1502_v47 = vmul.f32 %v7501_v29, %v7402_v48 }
 0x2cd   : > { %6358 = vmatpush3.bf16.xpose.msk.msra.mxu1 %vm7449_vm12, %v7475_v52  ;;  %6388 = vmatpush3.bf16.xpose.msk.msra.mxu0 %vm7449_vm12, %v7475_v52  ;;  %v6718_v45 = vpack.i.bf16 %v1808_v8, %v1807_v63  ;;  %v6723_v51 = vpack.i.bf16 %v1810_v37, %v1809_v33  ;;  %v1499_v54 = vmul.f32 %v7501_v29, %v7394_v41  ;;  %v7537_v59 = vunpack.i.l.bf16 %v6705_v49 }
 0x2ce   : > { %6709 = vrot.lane.b32.xlu1 %v6708_v31, %s7068_s0  ;;  %6361 = vmatprep.subr.msk.bf16.mxu1 %vm7449_vm12, %v7497_v62  ;;  %v1500_v56 = vmul.f32 %v7501_v29, %v7388_v36  ;;  %v7534_v58 = vpack.c.bf16 %v6697_v38, %v6696_v44  ;;  %v6733_v61 = vpack.i.bf16 %v1502_v47, %v1501_v46  ;;  %v7561_v11 = vunpack.i.h.bf16 %v6705_v49 }
 0x2cf   : > { %6714 = vrot.lane.b32.xlu0 %v6713_v9, %s7068_s0  ;;  %6391 = vmatprep.subr.msk.bf16.mxu0 %vm7449_vm12, %v7497_v62  ;;  %v1505_v1 = vmul.f32 %v7501_v29, %v7420_v0  ;;  %v1506_v2 = vmul.f32 %v7501_v29, %v7418_v60  ;;  %v1503_v5 = vmul.f32 %v7501_v29, %v7413_v57 }
 0x2d0   : > { %v6728_v3 = vpack.i.bf16 %v1500_v56, %v1499_v54  ;;  %v1504_v6 = vmul.f32 %v7501_v29, %v7411_v55  ;;  %v2477_v13 = vmul.f32 %v7537_v59, %v7394_v41  ;;  %v2478_v14 = vmul.f32 %v7537_v59, %v7388_v36 }
 0x2d1   : > { %v6743_v12 = vpack.i.bf16 %v1506_v2, %v1505_v1  ;;  %v2479_v16 = vmul.f32 %v7537_v59, %v7404_v50  ;;  %v2480_v17 = vmul.f32 %v7537_v59, %v7402_v48  ;;  %v2976_v20 = vmul.f32 %v7561_v11, %v7394_v41 }
 0x2d2   : > { %6719 = vrot.lane.b32.xlu1 %v6718_v45, %s7068_s0  ;;  %v6738_v35 = vpack.i.bf16 %v1504_v6, %v1503_v5  ;;  %v6748_v19 = vpack.i.bf16 %v2478_v14, %v2477_v13  ;;  %v2977_v43 = vmul.f32 %v7561_v11, %v7388_v36  ;;  %v2481_v22 = vmul.f32 %v7537_v59, %v7413_v57 }
 0x2d3   : > { %6724 = vrot.lane.b32.xlu0 %v6723_v51, %s7068_s0  ;;  %v6753_v21 = vpack.i.bf16 %v2480_v17, %v2479_v16  ;;  %v2482_v23 = vmul.f32 %v7537_v59, %v7411_v55  ;;  %v2978_v26 = vmul.f32 %v7561_v11, %v7404_v50  ;;  %v2979_v53 = vmul.f32 %v7561_v11, %v7402_v48 }
 0x2d4   : > { %v6758_v24 = vpack.i.bf16 %v2977_v43, %v2976_v20  ;;  %v2483_v28 = vmul.f32 %v7537_v59, %v7420_v0  ;;  %v2484_v30 = vmul.f32 %v7537_v59, %v7418_v60  ;;  %v1160_v31 = vmul.f32 %v7390_v39, %v7388_v36 }
 0x2d5   : > { %6364 = vmatpush3.bf16.xpose.msk.msra.mxu1 %vm7449_vm12, %v7497_v62  ;;  %6394 = vmatpush3.bf16.xpose.msk.msra.mxu0 %vm7449_vm12, %v7497_v62  ;;  %v6763_v27 = vpack.i.bf16 %v2482_v23, %v2481_v22  ;;  %v1515_v63 = vmul.f32 %v7392_v40, %v7388_v36  ;;  %v1161_v8 = vmul.f32 %v7390_v39, %v7404_v50 }
 0x2d6   : > { %6734 = vrot.lane.b32.xlu1 %v6733_v61, %s7068_s0  ;;  %6367 = vmatprep.subr.msk.bf16.mxu1 %vm7449_vm12, %v7534_v58  ;;  %v1516_v9 = vmul.f32 %v7392_v40, %v7404_v50  ;;  %v6768_v33 = vpack.i.bf16 %v2979_v53, %v2978_v26  ;;  %v1811_v37 = vmul.f32 %v7489_v25, %v7431_v4 }
 0x2d7   : > { %6729 = vrot.lane.b32.xlu0 %v6728_v3, %s7068_s0  ;;  %6397 = vmatprep.subr.msk.bf16.mxu0 %vm7449_vm12, %v7534_v58  ;;  %v1812_v38 = vmul.f32 %v7489_v25, %v7429_v34  ;;  %v6773_v44 = vpack.i.bf16 %v2484_v30, %v2483_v28  ;;  %v2980_v45 = vmul.f32 %v7561_v11, %v7413_v57 }
 0x2d8   : > { %v2981_v46 = vmul.f32 %v7561_v11, %v7411_v55  ;;  %v1162_v25 = vmul.f32 %v7390_v39, %v7402_v48  ;;  %v1517_v47 = vmul.f32 %v7392_v40, %v7402_v48  ;;  %v1163_v49 = vmul.f32 %v7390_v39, %v7413_v57 }
 0x2d9   : > { %v1518_v51 = vmul.f32 %v7392_v40, %v7413_v57  ;;  %v6783_v54 = vpack.i.bf16 %v1812_v38, %v1811_v37  ;;  %v1507_v61 = vmul.f32 %v7501_v29, %v7431_v4  ;;  %v1508_v1 = vmul.f32 %v7501_v29, %v7429_v34 }
 0x2da   : > { %6744 = vrot.lane.b32.xlu1 %v6743_v12, %s7068_s0  ;;  %v6778_v56 = vpack.i.bf16 %v2981_v46, %v2980_v45  ;;  %v1164_v2 = vmul.f32 %v7390_v39, %v7411_v55  ;;  %v1519_v3 = vmul.f32 %v7392_v40, %v7411_v55  ;;  %v1165_v5 = vmul.f32 %v7390_v39, %v7420_v0 }
 0x2db   : > { %6739 = vrot.lane.b32.xlu0 %v6738_v35, %s7068_s0  ;;  %v1520_v6 = vmul.f32 %v7392_v40, %v7420_v0  ;;  %v6788_v29 = vpack.i.bf16 %v1508_v1, %v1507_v61  ;;  %v1166_v12 = vmul.f32 %v7390_v39, %v7418_v60  ;;  %v1521_v13 = vmul.f32 %v7392_v40, %v7418_v60 }
 0x2dc   : > { %v1167_v14 = vmul.f32 %v7390_v39, %v7431_v4  ;;  %v1522_v35 = vmul.f32 %v7392_v40, %v7431_v4  ;;  %v1168_v16 = vmul.f32 %v7390_v39, %v7429_v34  ;;  %v1523_v17 = vmul.f32 %v7392_v40, %v7429_v34 }
 0x2dd   : > { %6370 = vmatpush3.bf16.xpose.msk.msra.mxu1 %vm7449_vm12, %v7534_v58  ;;  %6400 = vmatpush3.bf16.xpose.msk.msra.mxu0 %vm7449_vm12, %v7534_v58  ;;  %v2189_v39 = vmul.f32 %v7438_v7, %v7388_v36  ;;  %v2190_v40 = vmul.f32 %v7438_v7, %v7404_v50  ;;  %v2191_v20 = vmul.f32 %v7438_v7, %v7402_v48 }
 0x2de   : > { %6749 = vrot.lane.b32.xlu1 %v6748_v19, %s7068_s0  ;;  %6443 = vmatprep.subr.msk.bf16.mxu0 %vm7449_vm12, %v7453_v15  ;;  %v2188_v19 = vmul.f32 %v7438_v7, %v7394_v41  ;;  %v2192_v43 = vmul.f32 %v7438_v7, %v7413_v57  ;;  %v2195_v22 = vmul.f32 %v7438_v7, %v7418_v60 }
 0x2df   : > { %6754 = vrot.lane.b32.xlu0 %v6753_v21, %s7068_s0  ;;  %v2193_v21 = vmul.f32 %v7438_v7, %v7411_v55  ;;  %v2196_v23 = vmul.f32 %v7438_v7, %v7431_v4  ;;  %v2696_v30 = vmul.f32 %v7440_v10, %v7429_v34 }
 0x2e2   : > { %6759 = vrot.lane.b32.xlu1 %v6758_v24, %s7068_s0  ;;  %v2197_v24 = vmul.f32 %v7438_v7, %v7429_v34 }
 0x2e3   : > { %6764 = vrot.lane.b32.xlu0 %v6763_v27, %s7068_s0 }
 0x2e4   : > { %5879 = vmatmul.mubr.msk.f32.vlgmr.msra.gmra.mrb[0].mxu1 %vm822_vm1, %v1160_v31  ;;  %5914 = vmatmul.mubr.msk.f32.vlgmr.msra.gmra.mrb[10].mxu0 %vm822_vm1, %v1515_v63 }
 0x2e5   : > { %5881 = vmatprep.mubr.msk.f32.mxu1 %vm822_vm1, %v1161_v8  ;;  %5916 = vmatprep.mubr.msk.f32.mxu0 %vm822_vm1, %v1516_v9 }
 0x2e6   : > { %6446 = vmatpush3.bf16.xpose.msk.msra.mxu0 %vm7449_vm12, %v7453_v15  ;;  %6769 = vrot.lane.b32.xlu1 %v6768_v33, %s7068_s0 }
 0x2e7   : > { %6774 = vrot.lane.b32.xlu0 %v6773_v44, %s7068_s0  ;;  %6449 = vmatprep.subr.msk.bf16.mxu0 %vm7449_vm12, %v7467_v18 }
 0x2e8   : > { %5882 = vmatmul.mubr.msk.f32.gmra.mrb[2].mxu1 %vm822_vm1, %v1162_v25  ;;  %5917 = vmatmul.mubr.msk.f32.gmra.mrb[12].mxu0 %vm822_vm1, %v1517_v47 }
 0x2e9   : > { %5884 = vmatprep.mubr.msk.f32.mxu1 %vm822_vm1, %v1163_v49  ;;  %5919 = vmatprep.mubr.msk.f32.mxu0 %vm822_vm1, %v1518_v51 }
 0x2ea   : > { %6784 = vrot.lane.b32.xlu1 %v6783_v54, %s7068_s0 }
 0x2eb   : > { %6779 = vrot.lane.b32.xlu0 %v6778_v56, %s7068_s0 }
 0x2ec   : > { %5885 = vmatmul.mubr.msk.f32.gmra.mrb[4].mxu1 %vm822_vm1, %v1164_v2  ;;  %5920 = vmatmul.mubr.msk.f32.gmra.mrb[14].mxu0 %vm822_vm1, %v1519_v3 }
 0x2ed   : > { %5887 = vmatprep.mubr.msk.f32.mxu1 %vm822_vm1, %v1165_v5  ;;  %5922 = vmatprep.mubr.msk.f32.mxu0 %vm822_vm1, %v1520_v6 }
 0x2ee   : > { %6452 = vmatpush3.bf16.xpose.msk.msra.mxu0 %vm7449_vm12, %v7467_v18 }
 0x2ef   : > { %6789 = vrot.lane.b32.xlu0 %v6788_v29, %s7068_s0  ;;  %6455 = vmatprep.subr.msk.bf16.mxu0 %vm7449_vm12, %v7475_v52 }
 0x2f0   : > { %5888 = vmatmul.mubr.msk.f32.gmra.mrb[6].mxu1 %vm822_vm1, %v1166_v12  ;;  %5923 = vmatmul.mubr.msk.f32.gmra.mrb[16].mxu0 %vm822_vm1, %v1521_v13 }
 0x2f1   : > { %5890 = vmatprep.mubr.msk.f32.mxu1 %vm822_vm1, %v1167_v14  ;;  %5925 = vmatprep.mubr.msk.f32.mxu0 %vm822_vm1, %v1522_v35 }
 0x2f4   : > { %5891 = vmatmul.mubr.msk.f32.gmra.mrb[8].mxu1 %vm822_vm1, %v1168_v16  ;;  %5926 = vmatmul.mubr.msk.f32.gmra.mrb[18].mxu0 %vm822_vm1, %v1523_v17 }
 0x2f5   : > { %6018 = vmatprep.mubr.msk.f32.mxu0 %vm822_vm1, %v2188_v19 }
 0x2f6   : > { %6458 = vmatpush3.bf16.xpose.msk.msra.mxu0 %vm7449_vm12, %v7475_v52 }
 0x2f7   : > { %6461 = vmatprep.subr.msk.bf16.mxu0 %vm7449_vm12, %v7497_v62 }
 0x2fe   : > { %6464 = vmatpush3.bf16.xpose.msk.msra.mxu0 %vm7449_vm12, %v7497_v62 }
 0x2ff   : > { %6467 = vmatprep.subr.msk.bf16.mxu0 %vm7449_vm12, %v7534_v58 }
 0x306   : > { %6470 = vmatpush3.bf16.xpose.msk.msra.mxu0 %vm7449_vm12, %v7534_v58 }
 0x307   : > { %6493 = vmatprep.subr.msk.bf16.mxu0 %vm7449_vm12, %v7453_v15 }
 0x30d   : > { %6019 = vmatmul.mubr.msk.f32.vlgmr.msra.gmra.mrb[20].mxu0 %vm822_vm1, %v2189_v39 }
 0x30e   : > { %6021 = vmatprep.mubr.msk.f32.mxu0 %vm822_vm1, %v2190_v40  ;;  %6496 = vmatpush3.bf16.xpose.msk.msra.mxu0 %vm7449_vm12, %v7453_v15  ;;  %v2194_v15 = vmul.f32 %v7438_v7, %v7420_v0  ;;  %v2689_v7 = vmul.f32 %v7440_v10, %v7404_v50  ;;  %v2693_v50 = vmul.f32 %v7440_v10, %v7420_v0 }
 0x30f   : > { %6499 = vmatprep.subr.msk.bf16.mxu0 %vm7449_vm12, %v7467_v18 }
 0x311   : > { %6022 = vmatmul.mubr.msk.f32.gmra.mrb[22].mxu0 %vm822_vm1, %v2191_v20 }
 0x312   : > { %6024 = vmatprep.mubr.msk.f32.mxu0 %vm822_vm1, %v2192_v43 }
 0x315   : > { %6025 = vmatmul.mubr.msk.f32.gmra.mrb[24].mxu0 %vm822_vm1, %v2193_v21 }
 0x316   : > { %6027 = vmatprep.mubr.msk.f32.mxu0 %vm822_vm1, %v2194_v15  ;;  %6502 = vmatpush3.bf16.xpose.msk.msra.mxu0 %vm7449_vm12, %v7467_v18  ;;  %v2687_v18 = vmul.f32 %v7440_v10, %v7394_v41  ;;  %v2688_v41 = vmul.f32 %v7440_v10, %v7388_v36  ;;  %v2692_v36 = vmul.f32 %v7440_v10, %v7411_v55 }
 0x317   : > { %6505 = vmatprep.subr.msk.bf16.mxu0 %vm7449_vm12, %v7475_v52 }
 0x319   : > { %6028 = vmatmul.mubr.msk.f32.gmra.mrb[26].mxu0 %vm822_vm1, %v2195_v22 }
 0x31a   : > { %6030 = vmatprep.mubr.msk.f32.mxu0 %vm822_vm1, %v2196_v23  ;;  %v7822_v23 = vld [vmem:[%s9441_s18 + $0x8] sm:$0xff] }
 0x31d   : > { %6031 = vmatmul.mubr.msk.f32.gmra.mrb[28].mxu0 %vm822_vm1, %v2197_v24  ;;  %v7827_v24 = vld [vmem:[%s9441_s18] sm:$0xff] }
 0x31e   : > { %6508 = vmatpush3.bf16.xpose.msk.msra.mxu0 %vm7449_vm12, %v7475_v52  ;;  %6088 = vmatprep.mubr.msk.f32.mxu0 %vm822_vm1, %v2687_v18  ;;  %v2690_v52 = vmul.f32 %v7440_v10, %v7402_v48  ;;  %v2694_v48 = vmul.f32 %v7440_v10, %v7418_v60 }
 0x31f   : > { %6511 = vmatprep.subr.msk.bf16.mxu0 %vm7449_vm12, %v7497_v62 }
 0x326   : > { %6514 = vmatpush3.bf16.xpose.msk.msra.mxu0 %vm7449_vm12, %v7497_v62  ;;  %v2691_v62 = vmul.f32 %v7440_v10, %v7413_v57  ;;  %v2695_v57 = vmul.f32 %v7440_v10, %v7431_v4 }
 0x327   : > { %6517 = vmatprep.subr.msk.bf16.mxu0 %vm7449_vm12, %v7534_v58 }
 0x32e   : > { %6520 = vmatpush3.bf16.xpose.msk.msra.mxu0 %vm7449_vm12, %v7534_v58 }
 0x335   : > { %6089 = vmatmul.mubr.msk.f32.vlgmr.msra.gmra.mrb[30].mxu0 %vm822_vm1, %v2688_v41 }
 0x336   : > { %6091 = vmatprep.mubr.msk.f32.mxu0 %vm822_vm1, %v2689_v7 }
 0x339   : > { %6092 = vmatmul.mubr.msk.f32.gmra.mrb[32].mxu0 %vm822_vm1, %v2690_v52 }
 0x33a   : > { %6094 = vmatprep.mubr.msk.f32.mxu0 %vm822_vm1, %v2691_v62 }
 0x33d   : > { %6095 = vmatmul.mubr.msk.f32.gmra.mrb[34].mxu0 %vm822_vm1, %v2692_v36 }
 0x33e   : > { %6097 = vmatprep.mubr.msk.f32.mxu0 %vm822_vm1, %v2693_v50 }
 0x340   : > { %v6710_v42 = vpop.permute.xlu1 %6709 }
 0x341   : > { %v6712_v58 = vunpack.i.h.bf16 %v6710_v42  ;;  %v6711_v26 = vunpack.i.l.bf16 %v6710_v42  ;;  %v6715_v53 = vpop.permute.xlu0 %6714  ;;  %6098 = vmatmul.mubr.msk.f32.gmra.mrb[36].mxu0 %vm822_vm1, %v2694_v48 }
 0x342   : > { %v6717_v55 = vunpack.i.h.bf16 %v6715_v53  ;;  %v6716_v27 = vunpack.i.l.bf16 %v6715_v53  ;;  %6100 = vmatprep.mubr.msk.f32.mxu0 %vm822_vm1, %v2695_v57 }
 0x343   : > { %v6401_v28 = vpack.c.bf16 %v6712_v58, %v6711_v26 }
 0x344   : > { %v6720_v31 = vpop.permute.xlu1 %6719  ;;  %v6405_v33 = vpack.c.bf16 %v6717_v55, %v6716_v27 }
 0x345   : > { %v6722_v63 = vunpack.i.h.bf16 %v6720_v31  ;;  %v6721_v8 = vunpack.i.l.bf16 %v6720_v31  ;;  %v6725_v9 = vpop.permute.xlu0 %6724  ;;  %6101 = vmatmul.mubr.msk.f32.gmra.mrb[38].mxu0 %vm822_vm1, %v2696_v30  ;;  %6402 = vmatprep.subr.bf16.mxu1 %v6401_v28 }
 0x346   : > { %6404 = vmatpush3.bf16.msra.mxu1 %v6401_v28  ;;  %v6727_v44 = vunpack.i.h.bf16 %v6725_v9  ;;  %v6726_v45 = vunpack.i.l.bf16 %v6725_v9 }
 0x347   : > { %6406 = vmatprep.subr.bf16.mxu1 %v6405_v33  ;;  %v6409_v38 = vpack.c.bf16 %v6722_v63, %v6721_v8  ;;  %v7848_v63 = vld [vmem:[%s9441_s18 + $0x18] sm:$0xff]  ;;  %v7853_v8 = vld [vmem:[%s9441_s18 + $0x10] sm:$0xff] }
 0x348   : > { %v7790_v37 = vpop.permute.xlu1 %6734  ;;  %v6413_v47 = vpack.c.bf16 %v6727_v44, %v6726_v45 }
 0x349   : > { %v6730_v46 = vpop.permute.xlu0 %6729 }
 0x34a   : > { %6408 = vmatpush3.bf16.msra.mxu1 %v6405_v33  ;;  %v6732_v14 = vunpack.i.h.bf16 %v6730_v46  ;;  %v6731_v35 = vunpack.i.l.bf16 %v6730_v46 }
 0x34b   : > { %6410 = vmatprep.subr.bf16.mxu1 %v6409_v38 }
 0x34c   : > { %v7792_v25 = vpop.permute.xlu1 %6744  ;;  %v7814_v21 = vpack.c.bf16 %v6732_v14, %v6731_v35 }
 0x34d   : > { %v7794_v10 = vpop.permute.xlu0 %6739 }
 0x34e   : > { %6412 = vmatpush3.bf16.msra.mxu1 %v6409_v38 }
 0x34f   : > { %6414 = vmatprep.subr.bf16.mxu1 %v6413_v47 }
 0x350   : > { %v7796_v49 = vpop.permute.xlu1 %6749 }
 0x351   : > { %9434 = vst [vmem:[#allocation5_spill] sm:$0xff] %v7796_v49  ;;  %v7798_v51 = vpop.permute.xlu0 %6754 }
 0x352   : > { %9435 = vst [vmem:[#allocation6_spill] sm:$0xff] %v7798_v51  ;;  %6416 = vmatpush3.bf16.msra.mxu1 %v6413_v47 }
 0x354   : > { %v6760_v54 = vpop.permute.xlu1 %6759 }
 0x355   : > { %v6762_v56 = vunpack.i.h.bf16 %v6760_v54  ;;  %v6761_v61 = vunpack.i.l.bf16 %v6760_v54  ;;  %v7800_v1 = vpop.permute.xlu0 %6764 }
 0x356   : > { %9436 = vst [vmem:[#allocation7_spill] sm:$0xff] %v7800_v1 }
 0x357   : > { %v7802_v2 = vpack.c.bf16 %v6762_v56, %v6761_v61 }
 0x358   : > { %v6770_v3 = vpop.permute.xlu1 %6769 }
 0x359   : > { %9437 = vst [vmem:[#allocation8_spill] sm:$0xff] %v7802_v2  ;;  %v6772_v5 = vunpack.i.h.bf16 %v6770_v3  ;;  %v6771_v6 = vunpack.i.l.bf16 %v6770_v3  ;;  %v7804_v29 = vpop.permute.xlu0 %6774  ;;  %6522 = vmatprep.subr.bf16.mxu0 %v7802_v2  ;;  %v7868_v3 = vld [vmem:[%s9441_s18 + $0x20] sm:$0xff] }
 0x35a   : > { %9438 = vst [vmem:[#allocation9_spill] sm:$0xff] %v7804_v29  ;;  %6524 = vmatpush3.bf16.msra.mxu0 %v7802_v2 }
 0x35b   : > { %v7808_v12 = vpack.c.bf16 %v6772_v5, %v6771_v6 }
 0x35c   : > { %v6785_v13 = vpop.permute.xlu1 %6784 }
 0x35d   : > { %9439 = vst [vmem:[#allocation10_spill] sm:$0xff] %v7808_v12  ;;  %v6787_v16 = vunpack.i.h.bf16 %v6785_v13  ;;  %v6786_v17 = vunpack.i.l.bf16 %v6785_v13  ;;  %v6780_v19 = vpop.permute.xlu0 %6779  ;;  %6526 = vmatprep.subr.bf16.mxu0 %v7808_v12 }
 0x35e   : > { %v6782_v39 = vunpack.i.h.bf16 %v6780_v19  ;;  %v6781_v40 = vunpack.i.l.bf16 %v6780_v19  ;;  %6528 = vmatpush3.bf16.msra.mxu0 %v7808_v12 }
 0x35f   : > { %v6417_v20 = vpack.c.bf16 %v6787_v16, %v6786_v17 }
 0x360   : > { %v7812_v43 = vpack.c.bf16 %v6782_v39, %v6781_v40 }
 0x361   : > { %6418 = vmatprep.subr.bf16.mxu1 %v6417_v20 }
 0x362   : > { %9440 = vst [vmem:[#allocation11_spill] sm:$0xff] %v7812_v43  ;;  %6530 = vmatprep.subr.bf16.mxu0 %v7812_v43  ;;  %6420 = vmatpush3.bf16.msra.mxu1 %v6417_v20 }
 0x363   : > { %6532 = vmatpush3.bf16.msra.mxu0 %v7812_v43  ;;  %6422 = vmatprep.subr.bf16.mxu1 %v7814_v21 }
 0x3b7   : > { %v5880_v15 = vpop.f32.mrb[0].mxu1  ;;  %v5915_v22 = vpop.f32.mrb[10].mxu0 }
 0x3b8   : > { %v1365_v18 = vmul.f32 0.35355338, %v5880_v15  ;;  %v1670_v41 = vmul.f32 0.35355338, %v5915_v22  ;;  %v1315_v7 = vpop.f32.mrb[1].mxu1  ;;  %v1620_v52 = vpop.f32.mrb[11].mxu0 }
 0x3b9   : > { %v1364_v62 = vmul.f32 0.35355338, %v1315_v7  ;;  %v1669_v36 = vmul.f32 0.35355338, %v1620_v52 }
 0x3ba   : > { %v7830_v50 = vadd.f32 %v1670_v41, %v7822_v23  ;;  %v7836_v53 = vadd.f32 %v1365_v18, %v7822_v23 }
 0x3bb   : > { %v5883_v48 = vpop.f32.mrb[2].mxu1  ;;  %v5918_v42 = vpop.f32.mrb[12].mxu0  ;;  %v7833_v57 = vadd.f32 %v1669_v36, %v7827_v24  ;;  %v7839_v55 = vadd.f32 %v1364_v62, %v7827_v24 }
 0x3bc   : > { %v1325_v58 = vpop.f32.mrb[3].mxu1  ;;  %v1630_v26 = vpop.f32.mrb[13].mxu0  ;;  %v1672_v27 = vmul.f32 0.35355338, %v5918_v42  ;;  %v1692_v30 = vsel %vm1384_vm13, %v7830_v50, -inf  ;;  %v1388_v46 = vsel %vm1384_vm13, %v7836_v53, -inf }
 0x3bd   : > { %v1366_v28 = vmul.f32 0.35355338, %v1325_v58  ;;  %v1689_v31 = vsel %vm1384_vm13, %v7833_v57, -inf  ;;  %1693 = vmax.xlane.f32.xlu0 %v1692_v30  ;;  %v1367_v38 = vmul.f32 0.35355338, %v5883_v48  ;;  %v1385_v54 = vsel %vm1384_vm13, %v7839_v55, -inf }
 0x3be   : > { %1690 = vmax.xlane.f32.xlu1 %v1689_v31  ;;  %v7860_v56 = vadd.f32 %v1672_v27, %v7848_v63  ;;  %v1671_v13 = vmul.f32 0.35355338, %v1630_v26  ;;  %v7893_v42 = vld [vmem:[%s9441_s18 + $0x28] sm:$0xff]  ;;  %v7898_v58 = vld [vmem:[%s9441_s18 + $0x30] sm:$0xff] }
 0x3bf   : > { %v5886_v9 = vpop.f32.mrb[4].mxu1  ;;  %v5921_v33 = vpop.f32.mrb[14].mxu0  ;;  %v7863_v61 = vadd.f32 %v1366_v28, %v7853_v8  ;;  %v7871_v16 = vadd.f32 %v1367_v38, %v7848_v63 }
 0x3c0   : > { %v1335_v44 = vpop.f32.mrb[5].mxu1  ;;  %v1640_v45 = vpop.f32.mrb[15].mxu0  ;;  %v1698_v19 = vsel %vm1384_vm13, %v7860_v56, -inf  ;;  %v1674_v22 = vmul.f32 0.35355338, %v5921_v33  ;;  %v7881_v7 = vadd.f32 %v1671_v13, %v7853_v8 }
 0x3c1   : > { %v1673_v47 = vmul.f32 0.35355338, %v1640_v45  ;;  %1389 = vmax.xlane.f32.xlu0 %v1388_v46  ;;  %v1368_v17 = vmul.f32 0.35355338, %v1335_v44  ;;  %v1391_v39 = vsel %vm1384_vm13, %v7863_v61, -inf  ;;  %v1394_v62 = vsel %vm1384_vm13, %v7871_v16, -inf }
 0x3c2   : > { %1386 = vmax.xlane.f32.xlu1 %v1385_v54  ;;  %v1369_v26 = vmul.f32 0.35355338, %v5886_v9  ;;  %v1695_v27 = vsel %vm1384_vm13, %v7881_v7, -inf  ;;  %v7905_v31 = vadd.f32 %v1674_v22, %v7893_v42  ;;  %v7923_v54 = vld [vmem:[%s9441_s18 + $0x38] sm:$0xff] }
 0x3c3   : > { %v5889_v5 = vpop.f32.mrb[6].mxu1  ;;  %v5924_v6 = vpop.f32.mrb[16].mxu0  ;;  %v7878_v40 = vadd.f32 %v1673_v47, %v7868_v3  ;;  %v7888_v48 = vadd.f32 %v1368_v17, %v7868_v3 }
 0x3c4   : > { %v1345_v14 = vpop.f32.mrb[7].mxu1  ;;  %v1650_v35 = vpop.f32.mrb[17].mxu0  ;;  %v1676_v38 = vmul.f32 0.35355338, %v5924_v6  ;;  %v7911_v44 = vadd.f32 %v1369_v26, %v7893_v42  ;;  %v1704_v45 = vsel %vm1384_vm13, %v7905_v31, -inf  ;;  %v7928_v6 = vld [vmem:[%s9441_s18 + $0x40] sm:$0xff] }
 0x3c5   : > { %1699 = vmax.xlane.f32.xlu0 %v1698_v19  ;;  %v1675_v52 = vmul.f32 0.35355338, %v1650_v35  ;;  %v1701_v36 = vsel %vm1384_vm13, %v7878_v40, -inf  ;;  %v1370_v28 = vmul.f32 0.35355338, %v1345_v14  ;;  %v1397_v30 = vsel %vm1384_vm13, %v7888_v48, -inf }
 0x3c6   : > { %1392 = vmax.xlane.f32.xlu1 %v1391_v39  ;;  %v1371_v13 = vmul.f32 0.35355338, %v5889_v5  ;;  %v1400_v14 = vsel %vm1384_vm13, %v7911_v44, -inf  ;;  %v7935_v17 = vadd.f32 %v1676_v38, %v7923_v54 }
 0x3c7   : > { %v5892_v20 = vpop.f32.mrb[8].mxu1  ;;  %v5927_v15 = vpop.f32.mrb[18].mxu0  ;;  %v7908_v33 = vadd.f32 %v1675_v52, %v7898_v58  ;;  %v7918_v47 = vadd.f32 %v1370_v28, %v7898_v58  ;;  %v7950_v52 = vld [vmem:[%s9441_s18 + $0x48] sm:$0xff] }
 0x3c8   : > { %v1355_v18 = vpop.f32.mrb[9].mxu1  ;;  %v1660_v41 = vpop.f32.mrb[19].mxu0  ;;  %v1678_v39 = vmul.f32 0.35355338, %v5927_v15  ;;  %v1710_v22 = vsel %vm1384_vm13, %v7935_v17, -inf }
 0x3c9   : > { %1395 = vmax.xlane.f32.xlu0 %v1394_v62  ;;  %v1677_v9 = vmul.f32 0.35355338, %v1660_v41  ;;  %v1707_v46 = vsel %vm1384_vm13, %v7908_v33, -inf  ;;  %v1403_v35 = vsel %vm1384_vm13, %v7918_v47, -inf  ;;  %v7945_v41 = vadd.f32 %v1371_v13, %v7923_v54 }
 0x3ca   : > { %1702 = vmax.xlane.f32.xlu1 %v1701_v36  ;;  %v1373_v62 = vmul.f32 0.35355338, %v5892_v20  ;;  %v7955_v36 = vadd.f32 %v1678_v39, %v7950_v52  ;;  %v2485_v20 = vmul.f32 %v7537_v59, %v7431_v4 }
 0x3cb   : > { %v7938_v19 = vadd.f32 %v1677_v9, %v7928_v6  ;;  %v1406_v15 = vsel %vm1384_vm13, %v7945_v41, -inf }
 0x3cc   : > { %v7960_v38 = vadd.f32 %v1373_v62, %v7950_v52 }
 0x3cd   : > { %1696 = vmax.xlane.f32.xlu0 %v1695_v27  ;;  %v1713_v5 = vsel %vm1384_vm13, %v7938_v19, -inf  ;;  %v1372_v27 = vmul.f32 0.35355338, %v1355_v18  ;;  %v2486_v18 = vmul.f32 %v7537_v59, %v7429_v34 }
 0x3ce   : > { %1398 = vmax.xlane.f32.xlu1 %v1397_v30  ;;  %v1716_v30 = vsel %vm1384_vm13, %v7955_v36, -inf  ;;  %v1412_v13 = vsel %vm1384_vm13, %v7960_v38, -inf }
 0x3cf   : > { %v6793_v62 = vpack.i.bf16 %v2486_v18, %v2485_v20 }
 0x3d1   : > { %1705 = vmax.xlane.f32.xlu0 %v1704_v45 }
 0x3d2   : > { %1708 = vmax.xlane.f32.xlu1 %v1707_v46 }
 0x3d5   : > { %1401 = vmax.xlane.f32.xlu0 %v1400_v14  ;;  %v7967_v14 = vadd.f32 %v1372_v27, %v7928_v6 }
 0x3d6   : > { %1404 = vmax.xlane.f32.xlu1 %v1403_v35 }
 0x3d9   : > { %1711 = vmax.xlane.f32.xlu0 %v1710_v22 }
 0x3da   : > { %1714 = vmax.xlane.f32.xlu1 %v1713_v5  ;;  %v1409_v5 = vsel %vm1384_vm13, %v7967_v14, -inf }
 0x3dd   : > { %1407 = vmax.xlane.f32.xlu0 %v1406_v15 }
 0x3e0   : > { %v6020_v26 = vpop.f32.mrb[20].mxu0 }
 0x3e1   : > { %v2294_v28 = vpop.f32.mrb[21].mxu0  ;;  %1717 = vmax.xlane.f32.xlu0 %v1716_v30  ;;  %v2344_v45 = vmul.f32 0.35355338, %v6020_v26 }
 0x3e2   : > { %v2343_v39 = vmul.f32 0.35355338, %v2294_v28 }
 0x3e3   : > { %v7974_v15 = vadd.f32 %v2344_v45, %v7822_v23 }
 0x3e4   : > { %v6023_v9 = vpop.f32.mrb[22].mxu0 }
 0x3e5   : > { %v2304_v46 = vpop.f32.mrb[23].mxu0  ;;  %1413 = vmax.xlane.f32.xlu0 %v1412_v13  ;;  %v2346_v27 = vmul.f32 0.35355338, %v6023_v9  ;;  %v2366_v59 = vsel %vm1384_vm13, %v7974_v15, -inf  ;;  %v7980_v13 = vadd.f32 %v2343_v39, %v7827_v24 }
 0x3e7   : > { %v2363_v20 = vsel %vm1384_vm13, %v7980_v13, -inf  ;;  %v7985_v45 = vadd.f32 %v2346_v27, %v7848_v63 }
 0x3e8   : > { %v6026_v35 = vpop.f32.mrb[24].mxu0 }
 0x3e9   : > { %v2314_v22 = vpop.f32.mrb[25].mxu0  ;;  %1410 = vmax.xlane.f32.xlu0 %v1409_v5  ;;  %v2348_v32 = vmul.f32 0.35355338, %v6026_v35  ;;  %v2372_v9 = vsel %vm1384_vm13, %v7985_v45, -inf }
 0x3ea   : > { %v2347_v18 = vmul.f32 0.35355338, %v2314_v22 }
 0x3eb   : > { %6794 = vrot.lane.b32.xlu1 %v6793_v62, %s7068_s0  ;;  %v7990_v5 = vadd.f32 %v2348_v32, %v7893_v42 }
 0x3ec   : > { %v6029_v26 = vpop.f32.mrb[26].mxu0  ;;  %v7995_v62 = vadd.f32 %v2347_v18, %v7868_v3 }
 0x3ed   : > { %v2324_v30 = vpop.f32.mrb[27].mxu0  ;;  %2367 = vmax.xlane.f32.xlu0 %v2366_v59  ;;  %v2350_v39 = vmul.f32 0.35355338, %v6029_v26  ;;  %v2378_v35 = vsel %vm1384_vm13, %v7990_v5, -inf }
 0x3ee   : > { %v2349_v59 = vmul.f32 0.35355338, %v2324_v30  ;;  %v2375_v27 = vsel %vm1384_vm13, %v7995_v62, -inf }
 0x3ef   : > { %v8000_v22 = vadd.f32 %v2350_v39, %v7923_v54 }
 0x3f0   : > { %v6032_v28 = vpop.f32.mrb[28].mxu0  ;;  %v8005_v26 = vadd.f32 %v2349_v59, %v7898_v58 }
 0x3f1   : > { %v2334_v43 = vpop.f32.mrb[29].mxu0  ;;  %2364 = vmax.xlane.f32.xlu0 %v2363_v20  ;;  %v2352_v20 = vmul.f32 0.35355338, %v6032_v28  ;;  %v2384_v32 = vsel %vm1384_vm13, %v8000_v22, -inf }
 0x3f2   : > { %v2381_v18 = vsel %vm1384_vm13, %v8005_v26, -inf }
 0x3f3   : > { %v8010_v30 = vadd.f32 %v2352_v20, %v7950_v52 }
 0x3f5   : > { %2373 = vmax.xlane.f32.xlu0 %v2372_v9  ;;  %v2345_v9 = vmul.f32 0.35355338, %v2304_v46  ;;  %v2390_v28 = vsel %vm1384_vm13, %v8010_v30, -inf }
 0x3f7   : > { %v8015_v59 = vadd.f32 %v2345_v9, %v7853_v8 }
 0x3f9   : > { %2379 = vmax.xlane.f32.xlu0 %v2378_v35 }
 0x3fd   : > { %2376 = vmax.xlane.f32.xlu0 %v2375_v27  ;;  %v2351_v27 = vmul.f32 0.35355338, %v2334_v43 }
 0x3ff   : > { %v8028_v43 = vadd.f32 %v2351_v27, %v7928_v6 }
 0x401   : > { %2385 = vmax.xlane.f32.xlu0 %v2384_v32 }
 0x405   : > { %2382 = vmax.xlane.f32.xlu0 %v2381_v18 }
 0x408   : > { %v6090_v35 = vpop.f32.mrb[30].mxu0 }
 0x409   : > { %v2843_v39 = vmul.f32 0.35355338, %v6090_v35  ;;  %v2793_v12 = vpop.f32.mrb[31].mxu0  ;;  %2391 = vmax.xlane.f32.xlu0 %v2390_v28 }
 0x40a   : > { %v2842_v2 = vmul.f32 0.35355338, %v2793_v12  ;;  %v2369_v12 = vsel %vm1384_vm13, %v8015_v59, -inf }
 0x40b   : > { %v8018_v32 = vadd.f32 %v2843_v39, %v7822_v23 }
 0x40c   : > { %v6093_v29 = vpop.f32.mrb[32].mxu0  ;;  %v8023_v18 = vadd.f32 %v2842_v2, %v7827_v24  ;;  %v2387_v2 = vsel %vm1384_vm13, %v8028_v43, -inf }
 0x40d   : > { %v2845_v20 = vmul.f32 0.35355338, %v6093_v29  ;;  %v2803_v1 = vpop.f32.mrb[33].mxu0  ;;  %v2865_v46 = vsel %vm1384_vm13, %v8018_v32, -inf }
 0x40e   : > { %2866 = vmax.xlane.f32.xlu0 %v2865_v46  ;;  %v2844_v23 = vmul.f32 0.35355338, %v2803_v1  ;;  %v2862_v29 = vsel %vm1384_vm13, %v8023_v18, -inf }
 0x40f   : > { %2370 = vmax.xlane.f32.xlu1 %v2369_v12  ;;  %v8033_v39 = vadd.f32 %v2845_v20, %v7848_v63 }
 0x410   : > { %v6096_v9 = vpop.f32.mrb[34].mxu0  ;;  %v8043_v51 = vadd.f32 %v2844_v23, %v7853_v8 }
 0x411   : > { %v2813_v35 = vpop.f32.mrb[35].mxu0  ;;  %v2847_v46 = vmul.f32 0.35355338, %v6096_v9  ;;  %v2871_v1 = vsel %vm1384_vm13, %v8033_v39, -inf }
 0x412   : > { %v2846_v28 = vmul.f32 0.35355338, %v2813_v35  ;;  %2863 = vmax.xlane.f32.xlu0 %v2862_v29  ;;  %v2868_v9 = vsel %vm1384_vm13, %v8043_v51, -inf }
 0x413   : > { %2388 = vmax.xlane.f32.xlu1 %v2387_v2  ;;  %v8053_v2 = vadd.f32 %v2847_v46, %v7893_v42 }
 0x414   : > { %v6099_v24 = vpop.f32.mrb[36].mxu0  ;;  %v8038_v27 = vadd.f32 %v2846_v28, %v7868_v3 }
 0x415   : > { %v2823_v12 = vpop.f32.mrb[37].mxu0  ;;  %v2849_v3 = vmul.f32 0.35355338, %v6099_v24 }
 0x416   : > { %v2848_v63 = vmul.f32 0.35355338, %v2823_v12  ;;  %2872 = vmax.xlane.f32.xlu0 %v2871_v1  ;;  %v2874_v20 = vsel %vm1384_vm13, %v8038_v27, -inf }
 0x417   : > { %2875 = vmax.xlane.f32.xlu1 %v2874_v20  ;;  %v8063_v24 = vadd.f32 %v2849_v3, %v7923_v54  ;;  %v8074_v20 = vpop.permute.xlu0 %6789 }
 0x418   : > { %v6102_v35 = vpop.f32.mrb[38].mxu0  ;;  %v8048_v29 = vadd.f32 %v2848_v63, %v7898_v58  ;;  %v2877_v58 = vsel %vm1384_vm13, %v8053_v2, -inf  ;;  %9442 = vst [vmem:[#allocation12_spill] sm:$0xff] %v8074_v20 }
 0x419   : > { %v2833_v28 = vpop.f32.mrb[39].mxu0  ;;  %v2851_v1 = vmul.f32 0.35355338, %v6102_v35  ;;  %v2883_v46 = vsel %vm1384_vm13, %v8063_v24, -inf }
 0x41a   : > { %v2850_v8 = vmul.f32 0.35355338, %v2833_v28  ;;  %2869 = vmax.xlane.f32.xlu0 %v2868_v9  ;;  %v2880_v23 = vsel %vm1384_vm13, %v8048_v29, -inf }
 0x41b   : > { %2881 = vmax.xlane.f32.xlu1 %v2880_v23  ;;  %v8070_v63 = vadd.f32 %v2851_v1, %v7950_v52 }
 0x41c   : > { %v8058_v12 = vadd.f32 %v2850_v8, %v7928_v6 }
 0x41d   : > { %v2889_v6 = vsel %vm1384_vm13, %v8070_v63, -inf }
 0x41e   : > { %2878 = vmax.xlane.f32.xlu0 %v2877_v58  ;;  %v2886_v42 = vsel %vm1384_vm13, %v8058_v12, -inf }
 0x41f   : > { %2887 = vmax.xlane.f32.xlu1 %v2886_v42 }
 0x422   : > { %2884 = vmax.xlane.f32.xlu0 %v2883_v46 }
 0x426   : > { %2890 = vmax.xlane.f32.xlu0 %v2889_v6 }
 0x44a   : > { %v1694_v54 = vpop.xlane.xlu0 %1693 }
 0x44b   : > { %v1691_v35 = vpop.xlane.xlu1 %1690  ;;  %v1720_v3 = vsub.f32 %v7830_v50, %v1694_v54 }
 0x44c   : > { %v1719_v28 = vsub.f32 %v7833_v57, %v1691_v35 }
 0x44d   : > { %v1731_v9 = vmul.f32 1.442695, %v1720_v3 }
 0x44e   : > { %v1729_v8 = vmul.f32 1.442695, %v1719_v28  ;;  %v1390_v23 = vpop.xlane.xlu0 %1389 }
 0x44f   : > { %v1387_v58 = vpop.xlane.xlu1 %1386  ;;  %6828 = vpow2.f32 %v1731_v9  ;;  %v1416_v52 = vsub.f32 %v7836_v53, %v1390_v23 }
 0x450   : > { %v1415_v1 = vsub.f32 %v7839_v55, %v1387_v58  ;;  %6830 = vpow2.f32 %v1729_v8 }
 0x451   : > { %v1427_v42 = vmul.f32 1.442695, %v1416_v52 }
 0x452   : > { %v1425_v46 = vmul.f32 1.442695, %v1415_v1  ;;  %v1700_v6 = vpop.xlane.xlu0 %1699 }
 0x453   : > { %v1393_v49 = vpop.xlane.xlu1 %1392  ;;  %6832 = vpow2.f32 %v1427_v42  ;;  %v1722_v20 = vsub.f32 %v7860_v56, %v1700_v6 }
 0x454   : > { %6834 = vpow2.f32 %v1425_v46  ;;  %v1417_v53 = vsub.f32 %v7863_v61, %v1393_v49 }
 0x455   : > { %v1735_v50 = vmul.f32 1.442695, %v1722_v20 }
 0x456   : > { %v1396_v57 = vpop.xlane.xlu0 %1395 }
 0x457   : > { %v1703_v54 = vpop.xlane.xlu1 %1702  ;;  %v1418_v35 = vsub.f32 %v7871_v16, %v1396_v57  ;;  %6836 = vpow2.f32 %v1735_v50  ;;  %v1429_v16 = vmul.f32 1.442695, %v1417_v53 }
 0x458   : > { %v1723_v58 = vsub.f32 %v7878_v40, %v1703_v54 }
 0x459   : > { %v8082_v3 = vpop.eup %6828  ;;  %v1431_v55 = vmul.f32 1.442695, %v1418_v35 }
 0x45a   : > { %v1697_v28 = vpop.xlane.xlu0 %1696  ;;  %v1752_v8 = vsel %vm1384_vm13, %v8082_v3, 0.0  ;;  %v8087_v23 = vpop.eup %6830  ;;  %v1737_v6 = vmul.f32 1.442695, %v1723_v58 }
 0x45b   : > { %v1399_v9 = vpop.xlane.xlu1 %1398  ;;  %6838 = vpow2.f32 %v1431_v55  ;;  %v1721_v56 = vsub.f32 %v7881_v7, %v1697_v28  ;;  %1753 = vadd.xlane.f32.xlu0 %v1752_v8  ;;  %v1749_v42 = vsel %vm1384_vm13, %v8087_v23, 0.0 }
 0x45c   : > { %v1419_v40 = vsub.f32 %v7888_v48, %v1399_v9 }
 0x45d   : > { %v8090_v20 = vpop.eup %6832  ;;  %v1733_v52 = vmul.f32 1.442695, %v1721_v56 }
 0x45e   : > { %v1706_v1 = vpop.xlane.xlu0 %1705  ;;  %v1448_v61 = vsel %vm1384_vm13, %v8090_v20, 0.0  ;;  %v8097_v46 = vpop.eup %6834 }
 0x45f   : > { %v1709_v49 = vpop.xlane.xlu1 %1708  ;;  %6840 = vpow2.f32 %v1733_v52  ;;  %v1724_v7 = vsub.f32 %v7905_v31, %v1706_v1  ;;  %1449 = vadd.xlane.f32.xlu1 %v1448_v61  ;;  %1750 = vadd.xlane.f32.xlu0 %v1749_v42  ;;  %v1445_v54 = vsel %vm1384_vm13, %v8097_v46, 0.0  ;;  %v1433_v31 = vmul.f32 1.442695, %v1419_v40 }
 0x460   : > { %6842 = vpow2.f32 %v1429_v16  ;;  %v1725_v8 = vsub.f32 %v7908_v33, %v1709_v49 }
 0x461   : > { %v1739_v50 = vmul.f32 1.442695, %v1724_v7  ;;  %v8103_v35 = vpop.eup %6836 }
 0x462   : > { %v1402_v57 = vpop.xlane.xlu0 %1401  ;;  %v1758_v16 = vsel %vm1384_vm13, %v8103_v35, 0.0  ;;  %v1741_v52 = vmul.f32 1.442695, %v1725_v8 }
 0x463   : > { %6844 = vpow2.f32 %v1739_v50  ;;  %v1420_v53 = vsub.f32 %v7911_v44, %v1402_v57  ;;  %1446 = vadd.xlane.f32.xlu0 %v1445_v54  ;;  %v1405_v55 = vpop.xlane.xlu1 %1404 }
 0x464   : > { %6846 = vpow2.f32 %v1737_v6  ;;  %v1421_v1 = vsub.f32 %v7918_v47, %v1405_v55 }
 0x465   : > { %v8106_v28 = vpop.eup %6838  ;;  %v1435_v56 = vmul.f32 1.442695, %v1420_v53 }
 0x466   : > { %v1712_v48 = vpop.xlane.xlu0 %1711  ;;  %v1454_v9 = vsel %vm1384_vm13, %v8106_v28, 0.0  ;;  %v1437_v40 = vmul.f32 1.442695, %v1421_v1 }
 0x467   : > { %6848 = vpow2.f32 %v1435_v56  ;;  %v1726_v58 = vsub.f32 %v7935_v17, %v1712_v48  ;;  %1455 = vadd.xlane.f32.xlu1 %v1454_v9  ;;  %1759 = vadd.xlane.f32.xlu0 %v1758_v16  ;;  %v1715_v49 = vpop.xlane.xlu1 %1714 }
 0x468   : > { %6850 = vpow2.f32 %v1433_v31  ;;  %v1727_v50 = vsub.f32 %v7938_v19, %v1715_v49 }
 0x469   : > { %v8114_v44 = vpop.eup %6840  ;;  %v1743_v33 = vmul.f32 1.442695, %v1726_v58 }
 0x46a   : > { %v1408_v61 = vpop.xlane.xlu0 %1407  ;;  %v1755_v42 = vsel %vm1384_vm13, %v8114_v44, 0.0  ;;  %v8119_v7 = vpop.eup %6842  ;;  %v1745_v8 = vmul.f32 1.442695, %v1727_v50 }
 0x46b   : > { %6852 = vpow2.f32 %v1743_v33  ;;  %v1422_v6 = vsub.f32 %v7945_v41, %v1408_v61  ;;  %1756 = vadd.xlane.f32.xlu0 %v1755_v42  ;;  %v1451_v53 = vsel %vm1384_vm13, %v8119_v7, 0.0 }
 0x46c   : > { %6854 = vpow2.f32 %v1741_v52 }
 0x46d   : > { %v8122_v17 = vpop.eup %6844  ;;  %v1439_v57 = vmul.f32 1.442695, %v1422_v6 }
 0x46e   : > { %v1718_v47 = vpop.xlane.xlu0 %1717  ;;  %v1764_v54 = vsel %vm1384_vm13, %v8122_v17, 0.0  ;;  %v8129_v55 = vpop.eup %6846 }
 0x46f   : > { %6856 = vpow2.f32 %v1439_v57  ;;  %v1728_v41 = vsub.f32 %v7955_v36, %v1718_v47  ;;  %1765 = vadd.xlane.f32.xlu1 %v1764_v54  ;;  %1452 = vadd.xlane.f32.xlu0 %v1451_v53  ;;  %v1761_v9 = vsel %vm1384_vm13, %v8129_v55, 0.0 }
 0x470   : > { %6858 = vpow2.f32 %v1437_v40 }
 0x471   : > { %v8132_v31 = vpop.eup %6848  ;;  %v1747_v19 = vmul.f32 1.442695, %v1728_v41 }
 0x472   : > { %v1414_v56 = vpop.xlane.xlu0 %1413  ;;  %v1460_v48 = vsel %vm1384_vm13, %v8132_v31, 0.0  ;;  %v8138_v16 = vpop.eup %6850 }
 0x473   : > { %6860 = vpow2.f32 %v1747_v19  ;;  %v1424_v58 = vsub.f32 %v7960_v38, %v1414_v56  ;;  %1461 = vadd.xlane.f32.xlu1 %v1460_v48  ;;  %1762 = vadd.xlane.f32.xlu0 %v1761_v9  ;;  %v1457_v49 = vsel %vm1384_vm13, %v8138_v16, 0.0 }
 0x474   : > { %6862 = vpow2.f32 %v1745_v8 }
 0x475   : > { %v8141_v36 = vpop.eup %6852  ;;  %v1443_v52 = vmul.f32 1.442695, %v1424_v58 }
 0x476   : > { %v1411_v1 = vpop.xlane.xlu0 %1410  ;;  %v1770_v33 = vsel %vm1384_vm13, %v8141_v36, 0.0  ;;  %v8147_v61 = vpop.eup %6854 }
 0x477   : > { %6864 = vpow2.f32 %v1443_v52  ;;  %v1423_v42 = vsub.f32 %v7967_v14, %v1411_v1  ;;  %1771 = vadd.xlane.f32.xlu1 %v1770_v33  ;;  %1458 = vadd.xlane.f32.xlu0 %v1457_v49  ;;  %v1767_v57 = vsel %vm1384_vm13, %v8147_v61, 0.0 }
 0x479   : > { %v8150_v38 = vpop.eup %6856  ;;  %v1441_v6 = vmul.f32 1.442695, %v1423_v42 }
 0x47a   : > { %v2368_v40 = vpop.xlane.xlu0 %2367  ;;  %v1466_v50 = vsel %vm1384_vm13, %v8150_v38, 0.0  ;;  %v8156_v47 = vpop.eup %6858 }
 0x47b   : > { %6866 = vpow2.f32 %v1441_v6  ;;  %v2394_v54 = vsub.f32 %v7974_v15, %v2368_v40  ;;  %1467 = vadd.xlane.f32.xlu1 %v1466_v50  ;;  %1768 = vadd.xlane.f32.xlu0 %v1767_v57  ;;  %v1463_v19 = vsel %vm1384_vm13, %v8156_v47, 0.0 }
 0x47d   : > { %v8159_v14 = vpop.eup %6860  ;;  %v2405_v53 = vmul.f32 1.442695, %v2394_v54 }
 0x47e   : > { %v2365_v41 = vpop.xlane.xlu0 %2364  ;;  %v1776_v8 = vsel %vm1384_vm13, %v8159_v14, 0.0  ;;  %v8165_v56 = vpop.eup %6862 }
 0x47f   : > { %6868 = vpow2.f32 %v2405_v53  ;;  %v2393_v48 = vsub.f32 %v7980_v13, %v2365_v41  ;;  %1777 = vadd.xlane.f32.xlu1 %v1776_v8  ;;  %1464 = vadd.xlane.f32.xlu0 %v1463_v19  ;;  %v1773_v1 = vsel %vm1384_vm13, %v8165_v56, 0.0 }
 0x481   : > { %v8168_v15 = vpop.eup %6864  ;;  %v2403_v9 = vmul.f32 1.442695, %v2393_v48 }
 0x482   : > { %v2374_v58 = vpop.xlane.xlu0 %2373  ;;  %v1472_v52 = vsel %vm1384_vm13, %v8168_v15, 0.0 }
 0x483   : > { %6870 = vpow2.f32 %v2403_v9  ;;  %v2396_v33 = vsub.f32 %v7985_v45, %v2374_v58  ;;  %1473 = vadd.xlane.f32.xlu1 %v1472_v52  ;;  %1774 = vadd.xlane.f32.xlu0 %v1773_v1 }
 0x485   : > { %v8175_v49 = vpop.eup %6866  ;;  %v2409_v13 = vmul.f32 1.442695, %v2396_v33  ;;  %v8193_v33 = vpop.permute.xlu1 %6794 }
 0x486   : > { %v2380_v42 = vpop.xlane.xlu0 %2379  ;;  %v1469_v6 = vsel %vm1384_vm13, %v8175_v49, 0.0 }
 0x487   : > { %6872 = vpow2.f32 %v2409_v13  ;;  %1470 = vadd.xlane.f32.xlu0 %v1469_v6  ;;  %v2398_v13 = vsub.f32 %v7990_v5, %v2380_v42 }
 0x489   : > { %v8179_v40 = vpop.eup %6868 }
 0x48a   : > { %v2377_v50 = vpop.xlane.xlu0 %2376  ;;  %v2426_v57 = vsel %vm1384_vm13, %v8179_v40, 0.0 }
 0x48b   : > { %2427 = vadd.xlane.f32.xlu1 %v2426_v57 }
 0x48d   : > { %v8183_v54 = vpop.eup %6870 }
 0x48e   : > { %v2386_v45 = vpop.xlane.xlu0 %2385  ;;  %v2423_v53 = vsel %vm1384_vm13, %v8183_v54, 0.0 }
 0x48f   : > { %v2400_v41 = vsub.f32 %v8000_v22, %v2386_v45  ;;  %2424 = vadd.xlane.f32.xlu0 %v2423_v53  ;;  %v2397_v53 = vsub.f32 %v7995_v62, %v2377_v50 }
 0x491   : > { %v8188_v8 = vpop.eup %6872  ;;  %v2417_v19 = vmul.f32 1.442695, %v2400_v41  ;;  %v2413_v41 = vmul.f32 1.442695, %v2398_v13 }
 0x492   : > { %v2383_v48 = vpop.xlane.xlu0 %2382  ;;  %v2432_v9 = vsel %vm1384_vm13, %v8188_v8, 0.0 }
 0x493   : > { %6874 = vpow2.f32 %v2417_v19  ;;  %v2399_v58 = vsub.f32 %v8005_v26, %v2383_v48  ;;  %2433 = vadd.xlane.f32.xlu1 %v2432_v9 }
 0x495   : > { %v2415_v52 = vmul.f32 1.442695, %v2399_v58 }
 0x496   : > { %v2392_v1 = vpop.xlane.xlu0 %2391 }
 0x497   : > { %6876 = vpow2.f32 %v2415_v52  ;;  %v2402_v52 = vsub.f32 %v8010_v30, %v2392_v1 }
 0x49b   : > { %v2867_v22 = vpop.xlane.xlu0 %2866 }
 0x49c   : > { %v2371_v6 = vpop.xlane.xlu1 %2370  ;;  %v2893_v19 = vsub.f32 %v8018_v32, %v2867_v22 }
 0x49d   : > { %v2395_v57 = vsub.f32 %v8015_v59, %v2371_v6  ;;  %v8197_v45 = vpop.eup %6874  ;;  %v2411_v59 = vmul.f32 1.442695, %v2397_v53 }
 0x49e   : > { %v2444_v9 = vsel %vm1384_vm13, %v8197_v45, 0.0  ;;  %v2904_v62 = vmul.f32 1.442695, %v2893_v19 }
 0x49f   : > { %v2407_v26 = vmul.f32 1.442695, %v2395_v57  ;;  %v2864_v48 = vpop.xlane.xlu0 %2863  ;;  %2445 = vadd.xlane.f32.xlu1 %v2444_v9  ;;  %v2421_v57 = vmul.f32 1.442695, %v2402_v52 }
 0x4a0   : > { %v2389_v58 = vpop.xlane.xlu1 %2388 }
 0x4a1   : > { %6878 = vpow2.f32 %v2407_v26  ;;  %v2401_v5 = vsub.f32 %v8028_v43, %v2389_v58  ;;  %v8204_v42 = vpop.eup %6876  ;;  %v2892_v43 = vsub.f32 %v8023_v18, %v2864_v48 }
 0x4a2   : > { %6880 = vpow2.f32 %v2413_v41  ;;  %v2441_v32 = vsel %vm1384_vm13, %v8204_v42, 0.0 }
 0x4a3   : > { %v2419_v50 = vmul.f32 1.442695, %v2401_v5  ;;  %v2873_v13 = vpop.xlane.xlu0 %2872  ;;  %2442 = vadd.xlane.f32.xlu1 %v2441_v32  ;;  %v2902_v19 = vmul.f32 1.442695, %v2892_v43 }
 0x4a4   : > { %v2895_v22 = vsub.f32 %v8033_v39, %v2873_v13  ;;  %v2876_v6 = vpop.xlane.xlu1 %2875 }
 0x4a5   : > { %6882 = vpow2.f32 %v2419_v50  ;;  %v2896_v48 = vsub.f32 %v8038_v27, %v2876_v6 }
 0x4a6   : > { %6884 = vpow2.f32 %v2411_v59  ;;  %v2908_v53 = vmul.f32 1.442695, %v2895_v22 }
 0x4a7   : > { %6886 = vpow2.f32 %v2904_v62  ;;  %v2870_v26 = vpop.xlane.xlu0 %2869  ;;  %v2910_v27 = vmul.f32 1.442695, %v2896_v48 }
 0x4a8   : > { %v2882_v30 = vpop.xlane.xlu1 %2881  ;;  %6888 = vpow2.f32 %v2421_v57  ;;  %v2894_v1 = vsub.f32 %v8043_v51, %v2870_v26 }
 0x4a9   : > { %6890 = vpow2.f32 %v2908_v53  ;;  %v2898_v39 = vsub.f32 %v8048_v29, %v2882_v30 }
 0x4aa   : > { %v2906_v52 = vmul.f32 1.442695, %v2894_v1  ;;  %6892 = vpow2.f32 %v2902_v19 }
 0x4ab   : > { %v8212_v41 = vpop.eup %6878  ;;  %v2879_v9 = vpop.xlane.xlu0 %2878  ;;  %v2914_v50 = vmul.f32 1.442695, %v2898_v39 }
 0x4ac   : > { %v2897_v58 = vsub.f32 %v8053_v2, %v2879_v9  ;;  %v2888_v5 = vpop.xlane.xlu1 %2887  ;;  %v2429_v59 = vsel %vm1384_vm13, %v8212_v41, 0.0  ;;  %v8218_v18 = vpop.eup %6880 }
 0x4ad   : > { %2430 = vadd.xlane.f32.xlu0 %v2429_v59  ;;  %v2900_v29 = vsub.f32 %v8058_v12, %v2888_v5  ;;  %v2438_v2 = vsel %vm1384_vm13, %v8218_v18, 0.0 }
 0x4ae   : > { %v2912_v51 = vmul.f32 1.442695, %v2897_v58 }
 0x4af   : > { %v8221_v62 = vpop.eup %6882  ;;  %v2918_v6 = vmul.f32 1.442695, %v2900_v29 }
 0x4b0   : > { %v8224_v13 = vpop.eup %6884  ;;  %6894 = vpow2.f32 %v2912_v51  ;;  %v2447_v32 = vsel %vm1384_vm13, %v8221_v62, 0.0 }
 0x4b1   : > { %v8230_v22 = vpop.eup %6886  ;;  %2439 = vadd.xlane.f32.xlu0 %v2438_v2  ;;  %2448 = vadd.xlane.f32.xlu1 %v2447_v32  ;;  %6896 = vpow2.f32 %v2906_v52  ;;  %v2435_v12 = vsel %vm1384_vm13, %v8224_v13, 0.0  ;;  %v2984_v2 = vmul.f32 %v7561_v11, %v7431_v4  ;;  %v2985_v32 = vmul.f32 %v7561_v11, %v7429_v34 }
 0x4b2   : > { %6898 = vpow2.f32 %v2914_v50  ;;  %v8232_v57 = vpop.eup %6888  ;;  %v2925_v43 = vsel %vm1384_vm13, %v8230_v22, 0.0 }
 0x4b3   : > { %v8238_v53 = vpop.eup %6890  ;;  %6900 = vpow2.f32 %v2910_v27  ;;  %v2450_v26 = vsel %vm1384_vm13, %v8232_v57, 0.0  ;;  %v6803_v27 = vpack.i.bf16 %v2985_v32, %v2984_v2  ;;  %v6737_v2 = vunpack.i.h.bf16 %v7790_v37 }
 0x4b4   : > { %6902 = vpow2.f32 %v2918_v6  ;;  %v2931_v30 = vsel %vm1384_vm13, %v8238_v53, 0.0  ;;  %v8244_v1 = vpop.eup %6892  ;;  %v2982_v6 = vmul.f32 %v7561_v11, %v7420_v0 }
 0x4b5   : > { %2436 = vadd.xlane.f32.xlu0 %v2435_v12  ;;  %2926 = vadd.xlane.f32.xlu1 %v2925_v43  ;;  %v2922_v9 = vsel %vm1384_vm13, %v8244_v1, 0.0  ;;  %v2983_v12 = vmul.f32 %v7561_v11, %v7418_v60 }
 0x4b7   : > { %v6798_v43 = vpack.i.bf16 %v2983_v12, %v2982_v6 }
 0x4b9   : > { %2451 = vadd.xlane.f32.xlu0 %v2450_v26  ;;  %2932 = vadd.xlane.f32.xlu1 %v2931_v30  ;;  %v2885_v26 = vpop.xlane.xlu0 %2884 }
 0x4ba   : > { %v8246_v19 = vpop.eup %6894  ;;  %v2899_v30 = vsub.f32 %v8063_v24, %v2885_v26 }
 0x4bb   : > { %v8248_v39 = vpop.eup %6896  ;;  %v2937_v58 = vsel %vm1384_vm13, %v8246_v19, 0.0 }
 0x4bc   : > { %v8254_v5 = vpop.eup %6898  ;;  %v2928_v48 = vsel %vm1384_vm13, %v8248_v39, 0.0  ;;  %v2916_v4 = vmul.f32 1.442695, %v2899_v30 }
 0x4bd   : > { %2923 = vadd.xlane.f32.xlu0 %v2922_v9  ;;  %2938 = vadd.xlane.f32.xlu1 %v2937_v58  ;;  %v8256_v59 = vpop.eup %6900  ;;  %v2940_v52 = vsel %vm1384_vm13, %v8254_v5, 0.0  ;;  %v2891_v9 = vpop.xlane.xlu0 %2890 }
 0x4be   : > { %v8262_v51 = vpop.eup %6902  ;;  %v2934_v50 = vsel %vm1384_vm13, %v8256_v59, 0.0  ;;  %v2901_v58 = vsub.f32 %v8070_v63, %v2891_v9  ;;  %6904 = vpow2.f32 %v2916_v4  ;;  %v6736_v63 = vunpack.i.l.bf16 %v7790_v37 }
 0x4bf   : > { %v2946_v29 = vsel %vm1384_vm13, %v8262_v51, 0.0  ;;  %v6742_v37 = vunpack.i.h.bf16 %v7794_v10  ;;  %v6741_v9 = vunpack.i.l.bf16 %v7794_v10 }
 0x4c0   : > { %v6425_v30 = vpack.c.bf16 %v6737_v2, %v6736_v63  ;;  %v9443_v2 = vld [vmem:[#allocation12_spill] sm:$0xff] }
 0x4c1   : > { %2929 = vadd.xlane.f32.xlu0 %v2928_v48  ;;  %2941 = vadd.xlane.f32.xlu1 %v2940_v52  ;;  %v2920_v48 = vmul.f32 1.442695, %v2901_v58  ;;  %v6792_v63 = vunpack.i.h.bf16 %v9443_v2 }
 0x4c5   : > { %2935 = vadd.xlane.f32.xlu0 %v2934_v50  ;;  %2947 = vadd.xlane.f32.xlu1 %v2946_v29 }
 0x4c8   : > { %v8284_v50 = vpop.eup %6904 }
 0x4c9   : > { %v2943_v6 = vsel %vm1384_vm13, %v8284_v50, 0.0 }
 0x4d6   : > { %6804 = vrot.lane.b32.xlu1 %v6803_v27, %s7068_s0 }
 0x4db   : > { %6799 = vrot.lane.b32.xlu0 %v6798_v43, %s7068_s0  ;;  %s9457_s0 = sld [smem:[#allocation23_spill]] (!%p5471_p5) }
 0x4e8   : > { %v1754_v34 = vpop.xlane.xlu0 %1753 }
 0x4e9   : > { %6906 = vrcp.f32 %v1754_v34 }
 0x4ec   : > { %v1751_v52 = vpop.xlane.xlu0 %1750  ;;  %v8282_v0 = vpop.xlane.xlu1 %1449 }
 0x4ed   : > { %6908 = vrcp.f32 %v1751_v52  ;;  %v6429_v52 = vpack.c.bf16 %v6742_v37, %v6741_v9 }
 0x4ee   : > { %6910 = vpow2.f32 %v2920_v48 }
 0x4f0   : > { %v8280_v60 = vpop.xlane.xlu0 %1446 }
 0x4f3   : > { %v6907_v29 = vpop.eup %6906 }
 0x4f4   : > { %v1760_v11 = vpop.xlane.xlu0 %1759  ;;  %v8288_v32 = vpop.xlane.xlu1 %1455  ;;  %v1790_v26 = vmul.f32 %v6907_v29, %v8082_v3  ;;  %v6747_v3 = vunpack.i.h.bf16 %v7792_v25 }
 0x4f5   : > { %6912 = vrcp.f32 %v1760_v11 }
 0x4f7   : > { %v6909_v24 = vpop.eup %6908 }
 0x4f8   : > { %v1757_v27 = vpop.xlane.xlu0 %1756  ;;  %v8292_v12 = vpop.eup %6910  ;;  %v1789_v43 = vmul.f32 %v6909_v24, %v8087_v23  ;;  %v6746_v23 = vunpack.i.l.bf16 %v7792_v25 }
 0x4f9   : > { %6914 = vrcp.f32 %v1757_v27  ;;  %v2949_v34 = vsel %vm1384_vm13, %v8292_v12, 0.0 }
 0x4fa   : > { %2944 = vadd.xlane.f32.xlu0 %v2943_v6  ;;  %5948 = vmatprep.mubr.msk.f32.mxu1 %vm1384_vm13, %v1789_v43  ;;  %v6433_v24 = vpack.c.bf16 %v6747_v3, %v6746_v23 }
 0x4fb   : > { %5949 = vmatmul.mubr.msk.f32.vlgmr.msra.gmra.mrb[10].mxu1 %vm1384_vm13, %v1790_v26  ;;  %v9444_v26 = vld [vmem:[#allocation5_spill] sm:$0xff] }
 0x4fc   : > { %v1766_v4 = vpop.xlane.xlu1 %1765  ;;  %v1453_v58 = vpop.xlane.xlu0 %1452  ;;  %6424 = vmatpush3.bf16.msra.mxu1 %v7814_v21  ;;  %v6791_v21 = vunpack.i.l.bf16 %v9443_v2  ;;  %v6751_v37 = vunpack.i.l.bf16 %v9444_v26 }
 0x4fd   : > { %6426 = vmatprep.subr.bf16.mxu1 %v6425_v30  ;;  %6916 = vrcp.f32 %v1766_v4 }
 0x4fe   : > { %2950 = vadd.xlane.f32.xlu0 %v2949_v34  ;;  %v6437_v4 = vpack.c.bf16 %v6792_v63, %v6791_v21 }
 0x4ff   : > { %v6913_v10 = vpop.eup %6912 }
 0x500   : > { %v1462_v48 = vpop.xlane.xlu1 %1461  ;;  %v1763_v11 = vpop.xlane.xlu0 %1762  ;;  %6428 = vmatpush3.bf16.msra.mxu1 %v6425_v30  ;;  %v1792_v25 = vmul.f32 %v6913_v10, %v8103_v35  ;;  %v6752_v30 = vunpack.i.h.bf16 %v9444_v26 }
 0x501   : > { %6430 = vmatprep.subr.bf16.mxu1 %v6429_v52  ;;  %6918 = vrcp.f32 %v1763_v11 }
 0x502   : > { %v6471_v23 = vpack.c.bf16 %v6752_v30, %v6751_v37 }
 0x503   : > { %v6915_v29 = vpop.eup %6914 }
 0x504   : > { %v1772_v27 = vpop.xlane.xlu1 %1771  ;;  %v1459_v6 = vpop.xlane.xlu0 %1458  ;;  %v1791_v43 = vmul.f32 %v6915_v29, %v8114_v44  ;;  %6432 = vmatpush3.bf16.msra.mxu1 %v6429_v52 }
 0x505   : > { %6434 = vmatprep.subr.bf16.mxu1 %v6433_v24  ;;  %6920 = vrcp.f32 %v1772_v27 }
 0x506   : > { %5951 = vmatprep.mubr.msk.f32.mxu1 %vm1384_vm13, %v1791_v43 }
 0x507   : > { %5952 = vmatmul.mubr.msk.f32.gmra.mrb[12].mxu1 %vm1384_vm13, %v1792_v25  ;;  %v6917_v44 = vpop.eup %6916  ;;  %v9445_v25 = vld [vmem:[#allocation6_spill] sm:$0xff] }
 0x508   : > { %v1468_v9 = vpop.xlane.xlu1 %1467  ;;  %v1769_v34 = vpop.xlane.xlu0 %1768  ;;  %6436 = vmatpush3.bf16.msra.mxu1 %v6433_v24  ;;  %v1794_v10 = vmul.f32 %v6917_v44, %v8122_v17  ;;  %v6757_v26 = vunpack.i.h.bf16 %v9445_v25 }
 0x509   : > { %6438 = vmatprep.subr.bf16.mxu1 %v6437_v4  ;;  %6922 = vrcp.f32 %v1769_v34 }
 0x50a   : > { %6924 = vrcp.f32 %v8280_v60 }
 0x50b   : > { %v6919_v3 = vpop.eup %6918 }
 0x50c   : > { %v1465_v35 = vpop.xlane.xlu0 %1464  ;;  %6440 = vmatpush3.bf16.msra.mxu1 %v6437_v4  ;;  %v1793_v52 = vmul.f32 %v6919_v3, %v8129_v55  ;;  %v1778_v11 = vpop.xlane.xlu1 %1777 }
 0x50d   : > { %6472 = vmatprep.subr.bf16.mxu1 %v6471_v23  ;;  %6926 = vrcp.f32 %v1778_v11 }
 0x50e   : > { %5954 = vmatprep.mubr.msk.f32.mxu1 %vm1384_vm13, %v1793_v52  ;;  %v9447_v52 = vld [vmem:[#allocation9_spill] sm:$0xff] }
 0x50f   : > { %5955 = vmatmul.mubr.msk.f32.gmra.mrb[14].mxu1 %vm1384_vm13, %v1794_v10  ;;  %v6921_v24 = vpop.eup %6920  ;;  %v6777_v11 = vunpack.i.h.bf16 %v9447_v52  ;;  %v6776_v10 = vunpack.i.l.bf16 %v9447_v52 }
 0x510   : > { %v1775_v29 = vpop.xlane.xlu0 %1774  ;;  %v1796_v55 = vmul.f32 %v6921_v24, %v8141_v36 }
 0x511   : > { %6928 = vrcp.f32 %v1775_v29 }
 0x512   : > { %6930 = vrcp.f32 %v8282_v0 }
 0x513   : > { %v6923_v2 = vpop.eup %6922  ;;  %6932 = vrcp.f32 %v1453_v58 }
 0x514   : > { %v1795_v63 = vmul.f32 %v6923_v2, %v8147_v61  ;;  %6934 = vrcp.f32 %v8288_v32  ;;  %v6925_v17 = vpop.eup %6924  ;;  %v1471_v58 = vpop.xlane.xlu0 %1470  ;;  %v6756_v32 = vunpack.i.l.bf16 %v9445_v25 }
 0x515   : > { %6936 = vrcp.f32 %v1459_v6  ;;  %v1485_v36 = vmul.f32 %v6925_v17, %v8097_v46  ;;  %v9446_v46 = vld [vmem:[#allocation7_spill] sm:$0xff] }
 0x516   : > { %5957 = vmatprep.mubr.msk.f32.mxu1 %vm1384_vm13, %v1795_v63  ;;  %6938 = vrcp.f32 %v1462_v48  ;;  %v1474_v48 = vpop.xlane.xlu1 %1473  ;;  %v6767_v4 = vunpack.i.h.bf16 %v9446_v46  ;;  %v6766_v34 = vunpack.i.l.bf16 %v9446_v46  ;;  %v6475_v44 = vpack.c.bf16 %v6757_v26, %v6756_v32  ;;  %v9450_v26 = vld [vmem:[#allocation11_spill] sm:$0xff] }
 0x517   : > { %5958 = vmatmul.mubr.msk.f32.gmra.mrb[16].mxu1 %vm1384_vm13, %v1796_v55  ;;  %v6927_v60 = vpop.eup %6926  ;;  %6940 = vrcp.f32 %v1465_v35  ;;  %v6796_v63 = vunpack.i.l.bf16 %v8193_v33  ;;  %v6483_v55 = vpack.c.bf16 %v6777_v11, %v6776_v10 }
 0x518   : > { %v1798_v0 = vmul.f32 %v6927_v60, %v8159_v14  ;;  %6942 = vrcp.f32 %v1468_v9  ;;  %v6479_v29 = vpack.c.bf16 %v6767_v4, %v6766_v34 }
 0x519   : > { %6944 = vrcp.f32 %v1471_v58 }
 0x51a   : > { %6946 = vrcp.f32 %v1474_v48  ;;  %v2428_v9 = vpop.xlane.xlu1 %2427 }
 0x51b   : > { %v6929_v21 = vpop.eup %6928 }
 0x51c   : > { %v1797_v27 = vmul.f32 %v6929_v21, %v8165_v56  ;;  %v6931_v61 = vpop.eup %6930  ;;  %v2425_v6 = vpop.xlane.xlu0 %2424 }
 0x51d   : > { %v6933_v43 = vpop.eup %6932  ;;  %v1486_v56 = vmul.f32 %v6931_v61, %v8090_v20  ;;  %6948 = vrcp.f32 %v2425_v6 }
 0x51e   : > { %5960 = vmatprep.mubr.msk.f32.mxu1 %vm1384_vm13, %v1797_v27  ;;  %v6935_v14 = vpop.eup %6934  ;;  %v1487_v30 = vmul.f32 %v6933_v43, %v8119_v7  ;;  %6950 = vrcp.f32 %v2428_v9  ;;  %v9449_v43 = vld [vmem:[#allocation10_spill] sm:$0xff] }
 0x51f   : > { %5961 = vmatmul.mubr.msk.f32.gmra.mrb[18].mxu1 %vm1384_vm13, %v1798_v0  ;;  %v6937_v37 = vpop.eup %6936  ;;  %v1488_v20 = vmul.f32 %v6935_v14, %v8106_v28 }
 0x520   : > { %5983 = vmatprep.mubr.msk.f32.mxu1 %vm1384_vm13, %v1485_v36  ;;  %v6939_v3 = vpop.eup %6938  ;;  %v1489_v7 = vmul.f32 %v6937_v37, %v8138_v16  ;;  %v6797_v16 = vunpack.i.h.bf16 %v8193_v33  ;;  %v2434_v21 = vpop.xlane.xlu1 %2433 }
 0x521   : > { %v6941_v35 = vpop.eup %6940  ;;  %6952 = vrcp.f32 %v2434_v21 }
 0x522   : > { %v6943_v24 = vpop.eup %6942  ;;  %v1491_v28 = vmul.f32 %v6941_v35, %v8156_v47  ;;  %v6487_v47 = vpack.c.bf16 %v6797_v16, %v6796_v63 }
 0x523   : > { %5984 = vmatmul.mubr.msk.f32.vlgmr.msra.gmra.mrb[10].mxu1 %vm1384_vm13, %v1486_v56  ;;  %v6945_v2 = vpop.eup %6944  ;;  %v1492_v17 = vmul.f32 %v6943_v24, %v8150_v38 }
 0x524   : > { %6474 = vmatpush3.bf16.msra.mxu1 %v6471_v23  ;;  %5986 = vmatprep.mubr.msk.f32.mxu1 %vm1384_vm13, %v1487_v30  ;;  %v1490_v23 = vmul.f32 %v6939_v3, %v8132_v31  ;;  %v6947_v60 = vpop.eup %6946  ;;  %v1493_v31 = vmul.f32 %v6945_v2, %v8175_v49  ;;  %v9448_v49 = vld [vmem:[#allocation8_spill] sm:$0xff] }
 0x525   : > { %6476 = vmatprep.subr.bf16.mxu1 %v6475_v44  ;;  %v1494_v33 = vmul.f32 %v6947_v60, %v8168_v15 }
 0x527   : > { %5987 = vmatmul.mubr.msk.f32.gmra.mrb[12].mxu1 %vm1384_vm13, %v1488_v20  ;;  %v6949_v27 = vpop.eup %6948 }
 0x528   : > { %6478 = vmatpush3.bf16.msra.mxu1 %v6475_v44  ;;  %5989 = vmatprep.mubr.msk.f32.mxu1 %vm1384_vm13, %v1489_v7  ;;  %v6951_v0 = vpop.eup %6950  ;;  %v2463_v58 = vmul.f32 %v6949_v27, %v8183_v54 }
 0x529   : > { %6480 = vmatprep.subr.bf16.mxu1 %v6479_v29  ;;  %v2464_v38 = vmul.f32 %v6951_v0, %v8179_v40 }
 0x52b   : > { %5990 = vmatmul.mubr.msk.f32.gmra.mrb[14].mxu1 %vm1384_vm13, %v1490_v23  ;;  %v6953_v56 = vpop.eup %6952 }
 0x52c   : > { %6482 = vmatpush3.bf16.msra.mxu1 %v6479_v29  ;;  %5992 = vmatprep.mubr.msk.f32.mxu1 %vm1384_vm13, %v1491_v28  ;;  %v2446_v61 = vpop.xlane.xlu1 %2445  ;;  %v2466_v37 = vmul.f32 %v6953_v56, %v8188_v8 }
 0x52d   : > { %6484 = vmatprep.subr.bf16.mxu1 %v6483_v55 }
 0x52f   : > { %5993 = vmatmul.mubr.msk.f32.gmra.mrb[16].mxu1 %vm1384_vm13, %v1492_v17 }
 0x530   : > { %6486 = vmatpush3.bf16.msra.mxu1 %v6483_v55  ;;  %5995 = vmatprep.mubr.msk.f32.mxu1 %vm1384_vm13, %v1493_v31  ;;  %v2443_v36 = vpop.xlane.xlu1 %2442 }
 0x531   : > { %6488 = vmatprep.subr.bf16.mxu1 %v6487_v47 }
 0x533   : > { %5996 = vmatmul.mubr.msk.f32.gmra.mrb[18].mxu1 %vm1384_vm13, %v1494_v33 }
 0x534   : > { %6490 = vmatpush3.bf16.msra.mxu1 %v6487_v47  ;;  %6053 = vmatprep.mubr.msk.f32.mxu1 %vm1384_vm13, %v2463_v58 }
 0x535   : > { %6617 = vmatprep.subr.bf16.mxu1 %v9448_v49 }
 0x537   : > { %6054 = vmatmul.mubr.msk.f32.vlgmr.msra.gmra.mrb[10].mxu1 %vm1384_vm13, %v2464_v38 }
 0x538   : > { %6622 = vmatpush3.bf16.msra.mxu1 %v9448_v49 }
 0x539   : > { %6618 = vmatprep.subr.bf16.mxu1 %v9449_v43 }
 0x53a   : > { %v2431_v15 = vpop.xlane.xlu0 %2430 }
 0x53b   : > { %6954 = vrcp.f32 %v2431_v15  ;;  %v3181_v15 = vld [vmem:[%s7210_s15] sm:$0xff] }
 0x53c   : > { %6623 = vmatpush3.bf16.msra.mxu1 %v9449_v43  ;;  %6956 = vrcp.f32 %v2443_v36  ;;  %v3182_v43 = vld [vmem:[%s7210_s15 + $0x8] sm:$0xff] }
 0x53d   : > { %6619 = vmatprep.subr.bf16.mxu1 %v9450_v26 }
 0x53e   : > { %v2449_v54 = vpop.xlane.xlu1 %2448  ;;  %v2440_v25 = vpop.xlane.xlu0 %2439 }
 0x53f   : > { %6958 = vrcp.f32 %v2440_v25  ;;  %v3183_v25 = vld [vmem:[%s7210_s15 + $0x10] sm:$0xff] }
 0x540   : > { %6624 = vmatpush3.bf16.msra.mxu1 %v9450_v26  ;;  %v3184_v26 = vld [vmem:[%s7210_s15 + $0x18] sm:$0xff] }
 0x542   : > { %v2927_v40 = vpop.xlane.xlu1 %2926  ;;  %v2437_v32 = vpop.xlane.xlu0 %2436 }
 0x543   : > { %6960 = vrcp.f32 %v2437_v32 }
 0x544   : > { %6962 = vrcp.f32 %v2446_v61 }
 0x545   : > { %v6955_v48 = vpop.eup %6954  ;;  %6964 = vrcp.f32 %v2449_v54  ;;  %v6541_v54 = vpack.c.bf16 %v3182_v43, %v3181_v15 }
 0x546   : > { %v2933_v14 = vpop.xlane.xlu1 %2932  ;;  %v2452_v6 = vpop.xlane.xlu0 %2451  ;;  %v2465_v30 = vmul.f32 %v6955_v48, %v8212_v41 }
 0x547   : > { %6966 = vrcp.f32 %v2452_v6  ;;  %v6957_v34 = vpop.eup %6956 }
 0x548   : > { %6056 = vmatprep.mubr.msk.f32.mxu1 %vm1384_vm13, %v2465_v30  ;;  %v2469_v35 = vmul.f32 %v6957_v34, %v8204_v42 }
 0x549   : > { %6057 = vmatmul.mubr.msk.f32.gmra.mrb[12].mxu1 %vm1384_vm13, %v2466_v37  ;;  %v6959_v44 = vpop.eup %6958 }
 0x54a   : > { %v2939_v46 = vpop.xlane.xlu1 %2938  ;;  %v2924_v4 = vpop.xlane.xlu0 %2923  ;;  %v2468_v7 = vmul.f32 %v6959_v44, %v8218_v18 }
 0x54b   : > { %6968 = vrcp.f32 %v2924_v4 }
 0x54d   : > { %v6961_v9 = vpop.eup %6960 }
 0x54e   : > { %v2942_v20 = vpop.xlane.xlu1 %2941  ;;  %v2930_v3 = vpop.xlane.xlu0 %2929  ;;  %v2467_v41 = vmul.f32 %v6961_v9, %v8224_v13 }
 0x54f   : > { %6970 = vrcp.f32 %v2942_v20  ;;  %v6963_v8 = vpop.eup %6962 }
 0x550   : > { %6059 = vmatprep.mubr.msk.f32.mxu1 %vm1384_vm13, %v2467_v41  ;;  %v6965_v52 = vpop.eup %6964  ;;  %6972 = vrcp.f32 %v2927_v40  ;;  %v2470_v29 = vmul.f32 %v6963_v8, %v8197_v45  ;;  %v6545_v40 = vpack.c.bf16 %v3184_v26, %v3183_v25 }
 0x551   : > { %6060 = vmatmul.mubr.msk.f32.gmra.mrb[14].mxu1 %vm1384_vm13, %v2468_v7  ;;  %v6967_v23 = vpop.eup %6966  ;;  %6974 = vrcp.f32 %v2930_v3  ;;  %v2471_v13 = vmul.f32 %v6965_v52, %v8221_v62 }
 0x552   : > { %v2948_v11 = vpop.xlane.xlu1 %2947  ;;  %v2936_v10 = vpop.xlane.xlu0 %2935  ;;  %6062 = vmatprep.mubr.msk.f32.mxu1 %vm1384_vm13, %v2469_v35  ;;  %6976 = vrcp.f32 %v2933_v14  ;;  %v2472_v45 = vmul.f32 %v6967_v23, %v8232_v57 }
 0x553   : > { %6978 = vrcp.f32 %v2936_v10  ;;  %v5456_v10 = vld [vmem:[%s9451_s19] ss:$0 sm:$0xff]  ;;  %s9455_s19 = sld [smem:[#allocation21_spill]] (!%p5471_p5) }
 0x554   : > { %6980 = vrcp.f32 %v2939_v46 }
 0x555   : > { %v6969_v18 = vpop.eup %6968  ;;  %6063 = vmatmul.mubr.msk.f32.gmra.mrb[16].mxu1 %vm1384_vm13, %v2470_v29  ;;  %6982 = vrcp.f32 %v2948_v11  ;;  %v7028_v29 = vld [vmem:[#allocation2 + $0x8] sm:$0xff] }
 0x556   : > { %v6805_v24 = vpop.permute.xlu1 %6804  ;;  %v6800_v28 = vpop.permute.xlu0 %6799  ;;  %6065 = vmatprep.mubr.msk.f32.mxu1 %vm1384_vm13, %v2471_v13  ;;  %v2962_v55 = vmul.f32 %v6969_v18, %v8244_v1  ;;  %v7029_v18 = vld [vmem:[#allocation2] sm:$0xff] }
 0x557   : > { %v6807_v42 = vunpack.i.h.bf16 %v6805_v24  ;;  %v6806_v2 = vunpack.i.l.bf16 %v6805_v24  ;;  %v6802_v16 = vunpack.i.h.bf16 %v6800_v28  ;;  %v6801_v63 = vunpack.i.l.bf16 %v6800_v28 }
 0x558   : > { %6123 = vmatprep.mubr.msk.f32.mxu0 %vm1384_vm13, %v2962_v55 }
 0x559   : > { %v6971_v17 = vpop.eup %6970  ;;  %v6533_v60 = vpack.c.bf16 %v6802_v16, %v6801_v63  ;;  %6066 = vmatmul.mubr.msk.f32.gmra.mrb[18].mxu1 %vm1384_vm13, %v2472_v45  ;;  %v6537_v21 = vpack.c.bf16 %v6807_v42, %v6806_v2  ;;  %v7030_v16 = vld [vmem:[#allocation2 + $0x18] sm:$0xff] }
 0x55a   : > { %v2968_v62 = vmul.f32 %v6971_v17, %v8254_v5  ;;  %v6973_v1 = vpop.eup %6972  ;;  %v7031_v17 = vld [vmem:[#allocation2 + $0x10] sm:$0xff] }
 0x55b   : > { %6534 = vmatprep.subr.bf16.mxu0 %v6533_v60  ;;  %6620 = vmatprep.subr.bf16.mxu1 %v6533_v60  ;;  %v6975_v57 = vpop.eup %6974  ;;  %v2963_v31 = vmul.f32 %v6973_v1, %v8230_v22 }
 0x55c   : > { %6536 = vmatpush3.bf16.msra.mxu0 %v6533_v60  ;;  %6625 = vmatpush3.bf16.msra.mxu1 %v6533_v60  ;;  %v6977_v27 = vpop.eup %6976  ;;  %v2964_v47 = vmul.f32 %v6975_v57, %v8248_v39 }
 0x55d   : > { %6132 = vmatprep.mubr.msk.f32.mxu1 %vm1384_vm13, %v2968_v62  ;;  %6538 = vmatprep.subr.bf16.mxu0 %v6537_v21  ;;  %v6979_v5 = vpop.eup %6978  ;;  %v2965_v33 = vmul.f32 %v6977_v27, %v8238_v53 }
 0x55e   : > { %6621 = vmatprep.subr.bf16.mxu1 %v6537_v21  ;;  %v6981_v0 = vpop.eup %6980  ;;  %v2966_v61 = vmul.f32 %v6979_v5, %v8256_v59 }
 0x55f   : > { %v2967_v58 = vmul.f32 %v6981_v0, %v8246_v19  ;;  %v6983_v53 = vpop.eup %6982  ;;  %v7033_v0 = vld [vmem:[#allocation2 + $0x20] sm:$0xff] }
 0x560   : > { %6540 = vmatpush3.bf16.msra.mxu0 %v6537_v21  ;;  %6626 = vmatpush3.bf16.msra.mxu1 %v6537_v21  ;;  %v2970_v49 = vmul.f32 %v6983_v53, %v8262_v51 }
 0x561   : > { %6542 = vmatprep.subr.bf16.mxu1 %v6541_v54 }
 0x563   : > { %6124 = vmatmul.mubr.msk.f32.vlgmr.msra.gmra.mrb[40].mxu0 %vm1384_vm13, %v2963_v31  ;;  %v7032_v31 = vld [vmem:[#allocation2 + $0x28] sm:$0xff] }
 0x564   : > { %6126 = vmatprep.mubr.msk.f32.mxu0 %vm1384_vm13, %v2964_v47 }
 0x567   : > { %6127 = vmatmul.mubr.msk.f32.gmra.mrb[42].mxu0 %vm1384_vm13, %v2965_v33 }
 0x568   : > { %6129 = vmatprep.mubr.msk.f32.mxu0 %vm1384_vm13, %v2966_v61 }
 0x56b   : > { %6130 = vmatmul.mubr.msk.f32.gmra.mrb[44].mxu0 %vm1384_vm13, %v2967_v58 }
 0x587   : > { %v2945_v22 = vpop.xlane.xlu0 %2944 }
 0x588   : > { %6984 = vrcp.f32 %v2945_v22 }
 0x58b   : > { %v2951_v39 = vpop.xlane.xlu0 %2950 }
 0x58c   : > { %6986 = vrcp.f32 %v2951_v39 }
 0x592   : > { %v6985_v38 = vpop.eup %6984 }
 0x593   : > { %v2969_v59 = vmul.f32 %v6985_v38, %v8284_v50 }
 0x595   : > { %6133 = vmatmul.mubr.msk.f32.vlgmr.msra.gmra.mrb[16].mxu1 %vm1384_vm13, %v2969_v59  ;;  %v7034_v59 = vld [vmem:[#allocation2 + $0x38] sm:$0xff] }
 0x596   : > { %v6987_v19 = vpop.eup %6986  ;;  %6135 = vmatprep.mubr.msk.f32.mxu1 %vm1384_vm13, %v2970_v49  ;;  %6544 = vmatpush3.bf16.msra.mxu1 %v6541_v54 }
 0x597   : > { %v2971_v36 = vmul.f32 %v6987_v19, %v8292_v12  ;;  %6546 = vmatprep.subr.bf16.mxu1 %v6545_v40 }
 0x599   : > { %6136 = vmatmul.mubr.msk.f32.gmra.mrb[18].mxu1 %vm1384_vm13, %v2971_v36  ;;  %v7035_v36 = vld [vmem:[#allocation2 + $0x30] sm:$0xff] }
 0x59a   : > { %6548 = vmatpush3.bf16.msra.mxu1 %v6545_v40 }
 0x60a   : > { %v6055_v51 = vpop.f32.mrb[10].mxu1 }
 0x60b   : > { %v2623_v50 = vpop.f32.mrb[11].mxu1 }
 0x61c   : > { %v6058_v32 = vpop.f32.mrb[12].mxu1 }
 0x61d   : > { %v2633_v56 = vpop.f32.mrb[13].mxu1 }
 0x624   : > { %v6061_v48 = vpop.f32.mrb[14].mxu1 }
 0x625   : > { %v2643_v14 = vpop.f32.mrb[15].mxu1 }
 0x636   : > { %v6125_v6 = vpop.f32.mrb[40].mxu0 }
 0x637   : > { %v6627_v12 = vadd.f32 %v6125_v6, %v6055_v51  ;;  %v3122_v30 = vpop.f32.mrb[41].mxu0  ;;  %v7036_v51 = vld [vmem:[#allocation2 + $0x40] sm:$0xff] }
 0x638   : > { %v6628_v37 = vadd.f32 %v3122_v30, %v2623_v50 }
 0x63a   : > { %v6128_v46 = vpop.f32.mrb[42].mxu0  ;;  %6146 = vmatprep.mubr.msk.f32.mxu1 %vm822_vm1, %v6628_v37 }
 0x63b   : > { %v6629_v4 = vadd.f32 %v6128_v46, %v6058_v32  ;;  %v3132_v34 = vpop.f32.mrb[43].mxu0  ;;  %6147 = vmatmul.mubr.msk.f32.vlgmr.msra.gmra.mrb[20].mxu1 %vm822_vm1, %v6627_v12  ;;  %v7037_v32 = vld [vmem:[#allocation2 + $0x48] sm:$0xff] }
 0x63c   : > { %v6630_v44 = vadd.f32 %v3132_v34, %v2633_v56 }
 0x63e   : > { %v6131_v9 = vpop.f32.mrb[44].mxu0  ;;  %6149 = vmatprep.mubr.msk.f32.mxu1 %vm822_vm1, %v6630_v44 }
 0x63f   : > { %v6631_v20 = vadd.f32 %v6131_v9, %v6061_v48  ;;  %v3142_v3 = vpop.f32.mrb[45].mxu0  ;;  %6150 = vmatmul.mubr.msk.f32.gmra.mrb[22].mxu1 %vm822_vm1, %v6629_v4 }
 0x640   : > { %v6632_v41 = vadd.f32 %v3142_v3, %v2643_v14 }
 0x642   : > { %6152 = vmatprep.mubr.msk.f32.mxu1 %vm822_vm1, %v6632_v41 }
 0x643   : > { %6153 = vmatmul.mubr.msk.f32.gmra.mrb[24].mxu1 %vm822_vm1, %v6631_v20 }
 0x668   : > { %v6134_v7 = vpop.f32.mrb[16].mxu1 }
 0x669   : > { %v3152_v8 = vpop.f32.mrb[17].mxu1 }
 0x66a   : > { %6155 = vmatprep.mubr.msk.f32.mxu1 %vm822_vm1, %v3152_v8 }
 0x66b   : > { %6156 = vmatmul.mubr.msk.f32.gmra.mrb[26].mxu1 %vm822_vm1, %v6134_v7 }
 0x66c   : > { %v6137_v35 = vpop.f32.mrb[18].mxu1 }
 0x66d   : > { %v3162_v52 = vpop.f32.mrb[19].mxu1 }
 0x66e   : > { %6158 = vmatprep.mubr.msk.f32.mxu1 %vm822_vm1, %v3162_v52 }
 0x66f   : > { %6159 = vmatmul.mubr.msk.f32.gmra.mrb[28].mxu1 %vm822_vm1, %v6137_v35 }
 0x70e   : > { %v6148_v11 = vpop.f32.mrb[20].mxu1 }
 0x70f   : > { %v3331_v23 = vadd.f32 %v7028_v29, %v6148_v11  ;;  %v3281_v13 = vpop.f32.mrb[21].mxu1 }
 0x710   : > { %v3330_v24 = vadd.f32 %v7029_v18, %v3281_v13 }
 0x711   : > { %v8421_v28 = vadd.f32 %v5456_v10, %v3331_v23 }
 0x712   : > { %v8423_v42 = vadd.f32 %v5456_v10, %v3330_v24  ;;  %v6151_v2 = vpop.f32.mrb[22].mxu1 }
 0x713   : > { %v3333_v63 = vadd.f32 %v7030_v16, %v6151_v2  ;;  %v3291_v55 = vpop.f32.mrb[23].mxu1  ;;  %v3362_v45 = vsel %vm822_vm1, %v8421_v28, 0.0 }
 0x714   : > { %v3332_v60 = vadd.f32 %v7031_v17, %v3291_v55  ;;  %3363 = vadd.xlane.f32.xlu0 %v3362_v45  ;;  %v3359_v62 = vsel %vm822_vm1, %v8423_v42, 0.0 }
 0x715   : > { %v8429_v21 = vadd.f32 %v5456_v10, %v3333_v63  ;;  %3360 = vadd.xlane.f32.xlu1 %v3359_v62 }
 0x716   : > { %v6154_v1 = vpop.f32.mrb[24].mxu1  ;;  %v8431_v57 = vadd.f32 %v5456_v10, %v3332_v60 }
 0x717   : > { %v3335_v27 = vadd.f32 %v7032_v31, %v6154_v1  ;;  %v3301_v47 = vpop.f32.mrb[25].mxu1  ;;  %v3368_v5 = vsel %vm822_vm1, %v8429_v21, 0.0 }
 0x718   : > { %3369 = vadd.xlane.f32.xlu0 %v3368_v5  ;;  %v3334_v61 = vadd.f32 %v7033_v0, %v3301_v47  ;;  %v3365_v58 = vsel %vm822_vm1, %v8431_v57, 0.0  ;;  %v3522_v47 = vld [vmem:[%s7227_s2 + $0x8] sm:$0xff]  ;;  %v3523_v0 = vld [vmem:[%s7227_s2 + $0x10] sm:$0xff] }
 0x719   : > { %v8435_v33 = vadd.f32 %v5456_v10, %v3335_v27  ;;  %v3521_v27 = vld [vmem:[%s7227_s2] sm:$0xff] }
 0x71a   : > { %v8439_v22 = vadd.f32 %v5456_v10, %v3334_v61  ;;  %v6549_v5 = vpack.c.bf16 %v3522_v47, %v3521_v27  ;;  %v3524_v61 = vld [vmem:[%s7227_s2 + $0x18] sm:$0xff]  ;;  %v8539_v27 = vld [vmem:[%s768_s21] ss:$0 sm:$0xff] }
 0x71b   : > { %v3374_v39 = vsel %vm822_vm1, %v8435_v33, 0.0 }
 0x71c   : > { %3366 = vadd.xlane.f32.xlu0 %v3365_v58  ;;  %v3371_v53 = vsel %vm822_vm1, %v8439_v22, 0.0  ;;  %v6553_v58 = vpack.c.bf16 %v3524_v61, %v3523_v0  ;;  %6550 = vmatprep.subr.bf16.mxu0 %v6549_v5 }
 0x71d   : > { %6552 = vmatpush3.bf16.msra.mxu0 %v6549_v5 }
 0x71e   : > { %6554 = vmatprep.subr.bf16.mxu0 %v6553_v58 }
 0x720   : > { %3375 = vadd.xlane.f32.xlu0 %v3374_v39 }
 0x721   : > { %6556 = vmatpush3.bf16.msra.mxu0 %v6553_v58 }
 0x724   : > { %3372 = vadd.xlane.f32.xlu0 %v3371_v53 }
 0x73e   : > { %v6157_v38 = vpop.f32.mrb[26].mxu1 }
 0x73f   : > { %v3337_v49 = vadd.f32 %v7034_v59, %v6157_v38  ;;  %v3311_v19 = vpop.f32.mrb[27].mxu1 }
 0x740   : > { %v3336_v15 = vadd.f32 %v7035_v36, %v3311_v19 }
 0x741   : > { %v8445_v43 = vadd.f32 %v5456_v10, %v3337_v49 }
 0x742   : > { %v6160_v54 = vpop.f32.mrb[28].mxu1  ;;  %v8447_v25 = vadd.f32 %v5456_v10, %v3336_v15 }
 0x743   : > { %v3321_v26 = vpop.f32.mrb[29].mxu1  ;;  %v3380_v40 = vsel %vm822_vm1, %v8445_v43, 0.0  ;;  %v3339_v56 = vadd.f32 %v7037_v32, %v6160_v54 }
 0x744   : > { %v3338_v50 = vadd.f32 %v7036_v51, %v3321_v26  ;;  %3381 = vadd.xlane.f32.xlu0 %v3380_v40  ;;  %v3377_v14 = vsel %vm822_vm1, %v8447_v25, 0.0 }
 0x745   : > { %v8455_v6 = vadd.f32 %v5456_v10, %v3339_v56 }
 0x746   : > { %v8451_v48 = vadd.f32 %v5456_v10, %v3338_v50 }
 0x747   : > { %v3386_v30 = vsel %vm822_vm1, %v8455_v6, 0.0 }
 0x748   : > { %3378 = vadd.xlane.f32.xlu0 %v3377_v14  ;;  %v3383_v12 = vsel %vm822_vm1, %v8451_v48, 0.0 }
 0x74c   : > { %3384 = vadd.xlane.f32.xlu0 %v3383_v12 }
 0x750   : > { %3387 = vadd.xlane.f32.xlu0 %v3386_v30 }
 0x7a1   : > { %v3364_v37 = vpop.xlane.xlu0 %3363 }
 0x7a2   : > { %v3390_v46 = vmul.f32 0.03125, %v3364_v37  ;;  %v3361_v4 = vpop.xlane.xlu1 %3360 }
 0x7a3   : > { %v3389_v34 = vmul.f32 0.03125, %v3361_v4 }
 0x7a4   : > { %v8462_v44 = vsub.f32 %v8421_v28, %v3390_v46 }
 0x7a5   : > { %v8465_v9 = vsub.f32 %v8423_v42, %v3389_v34  ;;  %v3370_v20 = vpop.xlane.xlu0 %3369 }
 0x7a6   : > { %v3392_v3 = vmul.f32 0.03125, %v3370_v20  ;;  %v3410_v41 = vmul.f32 %v8462_v44, %v8462_v44 }
 0x7a7   : > { %v3409_v7 = vmul.f32 %v8465_v9, %v8465_v9 }
 0x7a8   : > { %v8472_v8 = vsub.f32 %v8429_v21, %v3392_v3  ;;  %v3422_v35 = vsel %vm822_vm1, %v3410_v41, 0.0 }
 0x7a9   : > { %v3367_v52 = vpop.xlane.xlu0 %3366  ;;  %3423 = vadd.xlane.f32.xlu0 %v3422_v35  ;;  %v3419_v11 = vsel %vm822_vm1, %v3409_v7, 0.0 }
 0x7aa   : > { %v3391_v10 = vmul.f32 0.03125, %v3367_v52  ;;  %3420 = vadd.xlane.f32.xlu1 %v3419_v11  ;;  %v3412_v29 = vmul.f32 %v8472_v8, %v8472_v8 }
 0x7ac   : > { %v8479_v23 = vsub.f32 %v8431_v57, %v3391_v10  ;;  %v3428_v13 = vsel %vm822_vm1, %v3412_v29, 0.0 }
 0x7ad   : > { %v3376_v18 = vpop.xlane.xlu0 %3375  ;;  %3429 = vadd.xlane.f32.xlu0 %v3428_v13 }
 0x7ae   : > { %v3394_v24 = vmul.f32 0.03125, %v3376_v18  ;;  %v3411_v2 = vmul.f32 %v8479_v23, %v8479_v23 }
 0x7b0   : > { %v8485_v16 = vsub.f32 %v8435_v33, %v3394_v24  ;;  %v3425_v63 = vsel %vm822_vm1, %v3411_v2, 0.0 }
 0x7b1   : > { %3426 = vadd.xlane.f32.xlu1 %v3425_v63  ;;  %v3373_v55 = vpop.xlane.xlu0 %3372  ;;  %v8530_v63 = vld [vmem:[%s765_s4] ss:$0 sm:$0xff]  ;;  %s9453_s4 = sld [smem:[#allocation20_spill]] (!%p5471_p5) }
 0x7b2   : > { %v3393_v45 = vmul.f32 0.03125, %v3373_v55  ;;  %v3414_v17 = vmul.f32 %v8485_v16, %v8485_v16 }
 0x7b4   : > { %v8491_v60 = vsub.f32 %v8439_v22, %v3393_v45  ;;  %v3434_v62 = vsel %vm822_vm1, %v3414_v17, 0.0 }
 0x7b5   : > { %3435 = vadd.xlane.f32.xlu0 %v3434_v62 }
 0x7b6   : > { %v3413_v1 = vmul.f32 %v8491_v60, %v8491_v60 }
 0x7b8   : > { %v3431_v31 = vsel %vm822_vm1, %v3413_v1, 0.0 }
 0x7b9   : > { %3432 = vadd.xlane.f32.xlu1 %v3431_v31 }
 0x7d1   : > { %v3382_v39 = vpop.xlane.xlu0 %3381 }
 0x7d2   : > { %v3396_v53 = vmul.f32 0.03125, %v3382_v39 }
 0x7d4   : > { %v8502_v38 = vsub.f32 %v8445_v43, %v3396_v53 }
 0x7d5   : > { %v3379_v59 = vpop.xlane.xlu0 %3378 }
 0x7d6   : > { %v3395_v49 = vmul.f32 0.03125, %v3379_v59  ;;  %v3416_v19 = vmul.f32 %v8502_v38, %v8502_v38 }
 0x7d8   : > { %v8507_v36 = vsub.f32 %v8447_v25, %v3395_v49  ;;  %v3440_v15 = vsel %vm822_vm1, %v3416_v19, 0.0 }
 0x7d9   : > { %3441 = vadd.xlane.f32.xlu0 %v3440_v15  ;;  %v3385_v54 = vpop.xlane.xlu0 %3384 }
 0x7da   : > { %v3397_v26 = vmul.f32 0.03125, %v3385_v54  ;;  %v3415_v40 = vmul.f32 %v8507_v36, %v8507_v36 }
 0x7dc   : > { %v8513_v51 = vsub.f32 %v8451_v48, %v3397_v26  ;;  %v3437_v50 = vsel %vm822_vm1, %v3415_v40, 0.0 }
 0x7dd   : > { %3438 = vadd.xlane.f32.xlu1 %v3437_v50  ;;  %v3388_v32 = vpop.xlane.xlu0 %3387 }
 0x7de   : > { %v3398_v56 = vmul.f32 0.03125, %v3388_v32  ;;  %v3417_v14 = vmul.f32 %v8513_v51, %v8513_v51 }
 0x7e0   : > { %v8519_v12 = vsub.f32 %v8455_v6, %v3398_v56  ;;  %v3443_v30 = vsel %vm822_vm1, %v3417_v14, 0.0 }
 0x7e1   : > { %3444 = vadd.xlane.f32.xlu1 %v3443_v30 }
 0x7e2   : > { %v3418_v37 = vmul.f32 %v8519_v12, %v8519_v12 }
 0x7e4   : > { %v3446_v46 = vsel %vm822_vm1, %v3418_v37, 0.0 }
 0x7e5   : > { %3447 = vadd.xlane.f32.xlu0 %v3446_v46 }
 0x836   : > { %v3424_v4 = vpop.xlane.xlu0 %3423 }
 0x837   : > { %v3450_v34 = vmul.f32 0.03125, %v3424_v4  ;;  %v3421_v20 = vpop.xlane.xlu1 %3420 }
 0x838   : > { %v3449_v3 = vmul.f32 0.03125, %v3421_v20 }
 0x839   : > { %v3460_v41 = vadd.f32 1e-05, %v3450_v34 }
 0x83a   : > { %v3459_v7 = vadd.f32 1e-05, %v3449_v3  ;;  %v3430_v35 = vpop.xlane.xlu0 %3429 }
 0x83b   : > { %6988 = vrsqrt.f32 %v3460_v41  ;;  %v3452_v52 = vmul.f32 0.03125, %v3430_v35 }
 0x83c   : > { %6990 = vrsqrt.f32 %v3459_v7 }
 0x83d   : > { %v3462_v11 = vadd.f32 1e-05, %v3452_v52 }
 0x83e   : > { %v3427_v10 = vpop.xlane.xlu1 %3426 }
 0x83f   : > { %6992 = vrsqrt.f32 %v3462_v11  ;;  %v3451_v29 = vmul.f32 0.03125, %v3427_v10 }
 0x841   : > { %v3461_v13 = vadd.f32 1e-05, %v3451_v29 }
 0x842   : > { %v3436_v18 = vpop.xlane.xlu0 %3435 }
 0x843   : > { %6994 = vrsqrt.f32 %v3461_v13  ;;  %v3454_v24 = vmul.f32 0.03125, %v3436_v18 }
 0x845   : > { %v6989_v2 = vpop.eup %6988  ;;  %v3464_v55 = vadd.f32 1e-05, %v3454_v24 }
 0x846   : > { %v6991_v45 = vpop.eup %6990  ;;  %v3480_v17 = vmul.f32 %v6989_v2, %v8462_v44  ;;  %v3433_v62 = vpop.xlane.xlu1 %3432 }
 0x847   : > { %6996 = vrsqrt.f32 %v3464_v55  ;;  %v3453_v1 = vmul.f32 0.03125, %v3433_v62  ;;  %v3479_v31 = vmul.f32 %v6991_v45, %v8465_v9 }
 0x848   : > { %v3496_v47 = vmul.f32 %v8530_v63, %v3480_v17 }
 0x849   : > { %v6993_v5 = vpop.eup %6992  ;;  %v3463_v0 = vadd.f32 1e-05, %v3453_v1  ;;  %v3495_v61 = vmul.f32 %v8530_v63, %v3479_v31  ;;  %v3767_v1 = vld [vmem:[%s7237_s26] sm:$0xff]  ;;  %v3768_v31 = vld [vmem:[%s7237_s26 + $0x8] sm:$0xff] }
 0x84a   : > { %v3482_v58 = vmul.f32 %v6993_v5, %v8472_v8  ;;  %v3512_v39 = vadd.f32 %v8539_v27, %v3496_v47  ;;  %v6557_v47 = vpack.c.bf16 %v3768_v31, %v3767_v1  ;;  %v3769_v5 = vld [vmem:[%s7237_s26 + $0x10] sm:$0xff] }
 0x84b   : > { %6998 = vrsqrt.f32 %v3463_v0  ;;  %v3511_v44 = vadd.f32 %v8539_v27, %v3495_v61 }
 0x84c   : > { %v3498_v59 = vmul.f32 %v8530_v63, %v3482_v58  ;;  %6558 = vmatprep.subr.bf16.mxu1 %v6557_v47  ;;  %v3774_v58 = vld [vmem:[%s7237_s26 + $0x38] sm:$0xff] }
 0x84d   : > { %v6995_v9 = vpop.eup %6994  ;;  %6169 = vmatprep.mubr.msk.f32.mxu0 %vm822_vm1, %v3511_v44  ;;  %6560 = vmatpush3.bf16.msra.mxu1 %v6557_v47  ;;  %v3773_v44 = vld [vmem:[%s7237_s26 + $0x30] sm:$0xff] }
 0x84e   : > { %6170 = vmatmul.mubr.msk.f32.vlgmr.msra.gmra.mrb[46].mxu0 %vm822_vm1, %v3512_v39  ;;  %v3481_v53 = vmul.f32 %v6995_v9, %v8479_v23  ;;  %v3514_v54 = vadd.f32 %v8539_v27, %v3498_v59  ;;  %v6569_v39 = vpack.c.bf16 %v3774_v58, %v3773_v44  ;;  %v3775_v9 = vld [vmem:[%s7237_s26 + $0x40] sm:$0xff] }
 0x850   : > { %v3497_v49 = vmul.f32 %v8530_v63, %v3481_v53  ;;  %v3776_v53 = vld [vmem:[%s7237_s26 + $0x48] sm:$0xff] }
 0x851   : > { %v6997_v19 = vpop.eup %6996  ;;  %v6573_v59 = vpack.c.bf16 %v3776_v53, %v3775_v9 }
 0x852   : > { %v3513_v15 = vadd.f32 %v8539_v27, %v3497_v49  ;;  %v3484_v8 = vmul.f32 %v6997_v19, %v8485_v16  ;;  %v3777_v49 = vld [vmem:[%s7237_s26 + $0x50] sm:$0xff]  ;;  %v3778_v19 = vld [vmem:[%s7237_s26 + $0x58] sm:$0xff] }
 0x854   : > { %6172 = vmatprep.mubr.msk.f32.mxu0 %vm822_vm1, %v3513_v15  ;;  %v3500_v23 = vmul.f32 %v8530_v63, %v3484_v8  ;;  %v6577_v15 = vpack.c.bf16 %v3778_v19, %v3777_v49  ;;  %v3780_v8 = vld [vmem:[%s7237_s26 + $0x68] sm:$0xff] }
 0x855   : > { %v6999_v26 = vpop.eup %6998  ;;  %6173 = vmatmul.mubr.msk.f32.gmra.mrb[48].mxu0 %vm822_vm1, %v3514_v54  ;;  %v3779_v54 = vld [vmem:[%s7237_s26 + $0x60] sm:$0xff] }
 0x856   : > { %v3483_v40 = vmul.f32 %v6999_v26, %v8491_v60  ;;  %v3516_v56 = vadd.f32 %v8539_v27, %v3500_v23  ;;  %v6581_v26 = vpack.c.bf16 %v3780_v8, %v3779_v54  ;;  %v3782_v23 = vld [vmem:[%s7237_s26 + $0x78] sm:$0xff] }
 0x858   : > { %v3499_v50 = vmul.f32 %v8530_v63, %v3483_v40  ;;  %v3781_v40 = vld [vmem:[%s7237_s26 + $0x70] sm:$0xff] }
 0x85a   : > { %v3515_v32 = vadd.f32 %v8539_v27, %v3499_v50  ;;  %v6585_v50 = vpack.c.bf16 %v3782_v23, %v3781_v40 }
 0x85c   : > { %6175 = vmatprep.mubr.msk.f32.mxu0 %vm822_vm1, %v3515_v32  ;;  %v8600_v32 = vld [vmem:[%s776_s6] ss:$0 sm:$0xff] }
 0x85d   : > { %6176 = vmatmul.mubr.msk.f32.gmra.mrb[50].mxu0 %vm822_vm1, %v3516_v56 }
 0x866   : > { %v3442_v16 = vpop.xlane.xlu0 %3441 }
 0x867   : > { %v3456_v14 = vmul.f32 0.03125, %v3442_v16 }
 0x869   : > { %v3466_v30 = vadd.f32 1e-05, %v3456_v14 }
 0x86a   : > { %v3439_v37 = vpop.xlane.xlu1 %3438 }
 0x86b   : > { %7000 = vrsqrt.f32 %v3466_v30  ;;  %v3455_v46 = vmul.f32 0.03125, %v3439_v37 }
 0x86d   : > { %v3465_v4 = vadd.f32 1e-05, %v3455_v46 }
 0x86e   : > { %v3445_v60 = vpop.xlane.xlu1 %3444 }
 0x86f   : > { %7002 = vrsqrt.f32 %v3465_v4  ;;  %v3457_v34 = vmul.f32 0.03125, %v3445_v60 }
 0x871   : > { %v3467_v20 = vadd.f32 1e-05, %v3457_v34 }
 0x872   : > { %v3448_v3 = vpop.xlane.xlu0 %3447 }
 0x873   : > { %7004 = vrsqrt.f32 %v3467_v20  ;;  %v3458_v41 = vmul.f32 0.03125, %v3448_v3 }
 0x875   : > { %v7001_v7 = vpop.eup %7000  ;;  %v3468_v35 = vadd.f32 1e-05, %v3458_v41 }
 0x876   : > { %v3486_v52 = vmul.f32 %v7001_v7, %v8502_v38 }
 0x877   : > { %7006 = vrsqrt.f32 %v3468_v35 }
 0x878   : > { %v3502_v29 = vmul.f32 %v8530_v63, %v3486_v52 }
 0x879   : > { %v7003_v11 = vpop.eup %7002 }
 0x87a   : > { %v3485_v10 = vmul.f32 %v7003_v11, %v8507_v36  ;;  %v3518_v55 = vadd.f32 %v8539_v27, %v3502_v29 }
 0x87c   : > { %v3501_v13 = vmul.f32 %v8530_v63, %v3485_v10 }
 0x87d   : > { %v7005_v18 = vpop.eup %7004 }
 0x87e   : > { %v3517_v24 = vadd.f32 %v8539_v27, %v3501_v13  ;;  %v3487_v2 = vmul.f32 %v7005_v18, %v8513_v51 }
 0x880   : > { %6178 = vmatprep.mubr.msk.f32.mxu0 %vm822_vm1, %v3517_v24  ;;  %v3503_v38 = vmul.f32 %v8530_v63, %v3487_v2 }
 0x881   : > { %v7007_v36 = vpop.eup %7006  ;;  %6179 = vmatmul.mubr.msk.f32.gmra.mrb[52].mxu0 %vm822_vm1, %v3518_v55 }
 0x882   : > { %v3519_v45 = vadd.f32 %v8539_v27, %v3503_v38  ;;  %v3488_v17 = vmul.f32 %v7007_v36, %v8519_v12  ;;  %v3770_v12 = vld [vmem:[%s7237_s26 + $0x18] sm:$0xff] }
 0x883   : > { %v6561_v0 = vpack.c.bf16 %v3770_v12, %v3769_v5 }
 0x884   : > { %6181 = vmatprep.mubr.msk.f32.mxu0 %vm822_vm1, %v3519_v45  ;;  %v3504_v51 = vmul.f32 %v8530_v63, %v3488_v17  ;;  %v3771_v63 = vld [vmem:[%s7237_s26 + $0x20] sm:$0xff] }
 0x885   : > { %6562 = vmatprep.subr.bf16.mxu1 %v6561_v0 }
 0x886   : > { %v3520_v62 = vadd.f32 %v8539_v27, %v3504_v51  ;;  %6564 = vmatpush3.bf16.msra.mxu1 %v6561_v0  ;;  %v3772_v27 = vld [vmem:[%s7237_s26 + $0x28] sm:$0xff] }
 0x887   : > { %v6565_v61 = vpack.c.bf16 %v3772_v27, %v3771_v63 }
 0x888   : > { %6182 = vmatmul.mubr.msk.f32.gmra.mrb[54].mxu0 %vm822_vm1, %v3520_v62 }
 0x889   : > { %6566 = vmatprep.subr.bf16.mxu1 %v6565_v61 }
 0x88a   : > { %6568 = vmatpush3.bf16.msra.mxu1 %v6565_v61 }
 0x88b   : > { %6570 = vmatprep.subr.bf16.mxu1 %v6569_v39 }
 0x88e   : > { %6572 = vmatpush3.bf16.msra.mxu1 %v6569_v39 }
 0x88f   : > { %6574 = vmatprep.subr.bf16.mxu1 %v6573_v59 }
 0x892   : > { %6576 = vmatpush3.bf16.msra.mxu1 %v6573_v59 }
 0x893   : > { %6578 = vmatprep.subr.bf16.mxu1 %v6577_v15 }
 0x896   : > { %6580 = vmatpush3.bf16.msra.mxu1 %v6577_v15 }
 0x897   : > { %6582 = vmatprep.subr.bf16.mxu1 %v6581_v26 }
 0x89a   : > { %6584 = vmatpush3.bf16.msra.mxu1 %v6581_v26 }
 0x89b   : > { %6586 = vmatprep.subr.bf16.mxu1 %v6585_v50 }
 0x89e   : > { %6588 = vmatpush3.bf16.msra.mxu1 %v6585_v50 }
 0x921   : > { %v6171_v56 = vpop.f32.mrb[46].mxu0 }
 0x922   : > { %v3634_v16 = vadd.f32 %v6171_v56, %v8600_v32  ;;  %v3628_v14 = vpop.f32.mrb[47].mxu0 }
 0x923   : > { %v3629_v30 = vadd.f32 %v8600_v32, %v3628_v14 }
 0x924   : > { %v3678_v37 = vmul.f32 %v3634_v16, %v3634_v16 }
 0x925   : > { %v3677_v46 = vmul.f32 %v3629_v30, %v3629_v30 }
 0x926   : > { %v3688_v4 = vmul.f32 %v3678_v37, %v3634_v16 }
 0x927   : > { %v3687_v60 = vmul.f32 %v3677_v46, %v3629_v30 }
 0x928   : > { %v3698_v34 = vmul.f32 0.044715, %v3688_v4  ;;  %v6174_v20 = vpop.f32.mrb[48].mxu0 }
 0x929   : > { %v3697_v3 = vmul.f32 0.044715, %v3687_v60  ;;  %v3644_v41 = vadd.f32 %v6174_v20, %v8600_v32  ;;  %v3638_v7 = vpop.f32.mrb[49].mxu0 }
 0x92a   : > { %v3708_v35 = vadd.f32 %v3698_v34, %v3634_v16  ;;  %v3639_v52 = vadd.f32 %v8600_v32, %v3638_v7 }
 0x92b   : > { %v3707_v11 = vadd.f32 %v3697_v3, %v3629_v30  ;;  %v3680_v10 = vmul.f32 %v3644_v41, %v3644_v41 }
 0x92c   : > { %v3718_v29 = vmul.f32 0.7978846, %v3708_v35  ;;  %v3679_v13 = vmul.f32 %v3639_v52, %v3639_v52 }
 0x92d   : > { %v3717_v18 = vmul.f32 0.7978846, %v3707_v11  ;;  %v3690_v24 = vmul.f32 %v3680_v10, %v3644_v41 }
 0x92e   : > { %7008 = vtanh.f32 %v3718_v29  ;;  %v3689_v2 = vmul.f32 %v3679_v13, %v3639_v52 }
 0x92f   : > { %v3700_v55 = vmul.f32 0.044715, %v3690_v24  ;;  %7010 = vtanh.f32 %v3717_v18 }
 0x930   : > { %v3699_v38 = vmul.f32 0.044715, %v3689_v2  ;;  %v6177_v36 = vpop.f32.mrb[50].mxu0 }
 0x931   : > { %v3710_v45 = vadd.f32 %v3700_v55, %v3644_v41  ;;  %v3654_v17 = vadd.f32 %v6177_v36, %v8600_v32  ;;  %v3648_v51 = vpop.f32.mrb[51].mxu0 }
 0x932   : > { %v3709_v62 = vadd.f32 %v3699_v38, %v3639_v52  ;;  %v3649_v1 = vadd.f32 %v8600_v32, %v3648_v51 }
 0x933   : > { %v3720_v31 = vmul.f32 0.7978846, %v3710_v45  ;;  %v3682_v47 = vmul.f32 %v3654_v17, %v3654_v17 }
 0x934   : > { %v3719_v5 = vmul.f32 0.7978846, %v3709_v62  ;;  %v3681_v12 = vmul.f32 %v3649_v1, %v3649_v1 }
 0x935   : > { %v3692_v0 = vmul.f32 %v3682_v47, %v3654_v17  ;;  %7012 = vtanh.f32 %v3720_v31 }
 0x936   : > { %v3691_v63 = vmul.f32 %v3681_v12, %v3649_v1  ;;  %7014 = vtanh.f32 %v3719_v5 }
 0x937   : > { %v3702_v27 = vmul.f32 0.044715, %v3692_v0 }
 0x938   : > { %v7009_v61 = vpop.eup %7008  ;;  %v3701_v44 = vmul.f32 0.044715, %v3691_v63 }
 0x939   : > { %v7011_v58 = vpop.eup %7010  ;;  %v3738_v39 = vadd.f32 1.0, %v7009_v61  ;;  %v3712_v9 = vadd.f32 %v3702_v27, %v3654_v17 }
 0x93a   : > { %v3711_v53 = vadd.f32 %v3701_v44, %v3649_v1  ;;  %v3737_v59 = vadd.f32 1.0, %v7011_v58 }
 0x93b   : > { %v3748_v49 = vmul.f32 0.5, %v3738_v39  ;;  %v3722_v19 = vmul.f32 0.7978846, %v3712_v9 }
 0x93c   : > { %v3721_v15 = vmul.f32 0.7978846, %v3711_v53  ;;  %v3747_v54 = vmul.f32 0.5, %v3737_v59 }
 0x93d   : > { %7016 = vtanh.f32 %v3722_v19  ;;  %v3758_v40 = vmul.f32 %v3748_v49, %v3634_v16 }
 0x93e   : > { %v3757_v8 = vmul.f32 %v3747_v54, %v3629_v30  ;;  %7018 = vtanh.f32 %v3721_v15 }
 0x93f   : > { %v7013_v26 = vpop.eup %7012 }
 0x940   : > { %v7015_v23 = vpop.eup %7014  ;;  %6216 = vmatprep.mubr.f32.mxu1 %v3757_v8  ;;  %v3740_v50 = vadd.f32 1.0, %v7013_v26 }
 0x941   : > { %6217 = vmatmul.mubr.f32.vlgmr.msra.gmra.mrb[30].mxu1 %v3758_v40  ;;  %v3739_v56 = vadd.f32 1.0, %v7015_v23 }
 0x942   : > { %v3750_v14 = vmul.f32 0.5, %v3740_v50 }
 0x943   : > { %v3749_v37 = vmul.f32 0.5, %v3739_v56 }
 0x944   : > { %v3760_v4 = vmul.f32 %v3750_v14, %v3644_v41 }
 0x945   : > { %v3759_v46 = vmul.f32 %v3749_v37, %v3639_v52 }
 0x947   : > { %v7017_v60 = vpop.eup %7016  ;;  %6219 = vmatprep.mubr.f32.mxu1 %v3759_v46 }
 0x948   : > { %v7019_v34 = vpop.eup %7018  ;;  %6220 = vmatmul.mubr.f32.gmra.mrb[32].mxu1 %v3760_v4  ;;  %v3742_v20 = vadd.f32 1.0, %v7017_v60  ;;  %v5470_v4 = vld [vmem:[%s784_s30] ss:$0 sm:$0xff] }
 0x949   : > { %v3741_v3 = vadd.f32 1.0, %v7019_v34 }
 0x94a   : > { %v3752_v7 = vmul.f32 0.5, %v3742_v20 }
 0x94b   : > { %v3751_v30 = vmul.f32 0.5, %v3741_v3 }
 0x94c   : > { %v3762_v11 = vmul.f32 %v3752_v7, %v3654_v17 }
 0x94d   : > { %v3761_v35 = vmul.f32 %v3751_v30, %v3649_v1 }
 0x94f   : > { %6222 = vmatprep.mubr.f32.mxu1 %v3761_v35 }
 0x950   : > { %6223 = vmatmul.mubr.f32.gmra.mrb[34].mxu1 %v3762_v11 }
 0x954   : > { %v6180_v16 = vpop.f32.mrb[52].mxu0 }
 0x955   : > { %v3664_v10 = vadd.f32 %v6180_v16, %v8600_v32  ;;  %v3658_v29 = vpop.f32.mrb[53].mxu0 }
 0x956   : > { %v3659_v13 = vadd.f32 %v8600_v32, %v3658_v29 }
 0x957   : > { %v3684_v52 = vmul.f32 %v3664_v10, %v3664_v10 }
 0x958   : > { %v3683_v41 = vmul.f32 %v3659_v13, %v3659_v13 }
 0x959   : > { %v3694_v18 = vmul.f32 %v3684_v52, %v3664_v10 }
 0x95a   : > { %v3693_v24 = vmul.f32 %v3683_v41, %v3659_v13 }
 0x95b   : > { %v3704_v2 = vmul.f32 0.044715, %v3694_v18  ;;  %v6183_v55 = vpop.f32.mrb[54].mxu0 }
 0x95c   : > { %v3703_v38 = vmul.f32 0.044715, %v3693_v24  ;;  %v3674_v36 = vadd.f32 %v6183_v55, %v8600_v32  ;;  %v3668_v45 = vpop.f32.mrb[55].mxu0 }
 0x95d   : > { %v3714_v51 = vadd.f32 %v3704_v2, %v3664_v10  ;;  %v3669_v17 = vadd.f32 %v8600_v32, %v3668_v45 }
 0x95e   : > { %v3713_v62 = vadd.f32 %v3703_v38, %v3659_v13  ;;  %v3686_v1 = vmul.f32 %v3674_v36, %v3674_v36 }
 0x95f   : > { %v3724_v31 = vmul.f32 0.7978846, %v3714_v51  ;;  %v3685_v47 = vmul.f32 %v3669_v17, %v3669_v17 }
 0x960   : > { %v3723_v5 = vmul.f32 0.7978846, %v3713_v62  ;;  %v3696_v12 = vmul.f32 %v3686_v1, %v3674_v36 }
 0x961   : > { %v3695_v0 = vmul.f32 %v3685_v47, %v3669_v17  ;;  %7020 = vtanh.f32 %v3724_v31 }
 0x962   : > { %v3706_v63 = vmul.f32 0.044715, %v3696_v12  ;;  %7022 = vtanh.f32 %v3723_v5 }
 0x963   : > { %v3705_v27 = vmul.f32 0.044715, %v3695_v0 }
 0x964   : > { %v3716_v61 = vadd.f32 %v3706_v63, %v3674_v36 }
 0x965   : > { %v3715_v44 = vadd.f32 %v3705_v27, %v3669_v17 }
 0x966   : > { %v3726_v58 = vmul.f32 0.7978846, %v3716_v61 }
 0x967   : > { %v3725_v39 = vmul.f32 0.7978846, %v3715_v44 }
 0x968   : > { %7024 = vtanh.f32 %v3726_v58 }
 0x969   : > { %7026 = vtanh.f32 %v3725_v39 }
 0x96b   : > { %v7021_v9 = vpop.eup %7020 }
 0x96c   : > { %v7023_v53 = vpop.eup %7022  ;;  %v3744_v32 = vadd.f32 1.0, %v7021_v9 }
 0x96d   : > { %v3743_v59 = vadd.f32 1.0, %v7023_v53 }
 0x96e   : > { %v3754_v49 = vmul.f32 0.5, %v3744_v32 }
 0x96f   : > { %v3753_v19 = vmul.f32 0.5, %v3743_v59 }
 0x970   : > { %v3764_v8 = vmul.f32 %v3754_v49, %v3664_v10 }
 0x971   : > { %v3763_v15 = vmul.f32 %v3753_v19, %v3659_v13 }
 0x972   : > { %v7025_v54 = vpop.eup %7024 }
 0x973   : > { %v7027_v26 = vpop.eup %7026  ;;  %6225 = vmatprep.mubr.f32.mxu1 %v3763_v15  ;;  %v3746_v40 = vadd.f32 1.0, %v7025_v54 }
 0x974   : > { %6226 = vmatmul.mubr.f32.gmra.mrb[36].mxu1 %v3764_v8  ;;  %v3745_v23 = vadd.f32 1.0, %v7027_v26 }
 0x975   : > { %v3756_v50 = vmul.f32 0.5, %v3746_v40 }
 0x976   : > { %v3755_v56 = vmul.f32 0.5, %v3745_v23 }
 0x977   : > { %v3766_v37 = vmul.f32 %v3756_v50, %v3674_v36 }
 0x978   : > { %v3765_v14 = vmul.f32 %v3755_v56, %v3669_v17 }
 0x97a   : > { %6228 = vmatprep.mubr.f32.mxu1 %v3765_v14 }
 0x97b   : > { %6229 = vmatmul.mubr.f32.gmra.mrb[38].mxu1 %v3766_v37 }
 0xa14   : > { %v6218_v46 = vpop.f32.mrb[30].mxu1 }
 0xa15   : > { %v3899_v60 = vadd.f32 %v6218_v46, %v8421_v28  ;;  %v3849_v34 = vpop.f32.mrb[31].mxu1 }
 0xa16   : > { %v3898_v20 = vadd.f32 %v3849_v34, %v8423_v42 }
 0xa17   : > { %v8619_v3 = vadd.f32 %v5470_v4, %v3899_v60 }
 0xa18   : > { %v3915_v7 = vadd.f32 %v5470_v4, %v3898_v20 }
 0xa19   : > { %3926 = vst.msk [vmem:[#allocation2 + $0x8] sm:$0xff] %vm822_vm1, %v8619_v3 }
 0xa1a   : > { %3925 = vst.msk [vmem:[#allocation2] sm:$0xff] %vm822_vm1, %v3915_v7 }
 0xa1b   : > { %v6221_v30 = vpop.f32.mrb[32].mxu1 }
 0xa1c   : > { %v3901_v35 = vadd.f32 %v6221_v30, %v8429_v21  ;;  %v3859_v11 = vpop.f32.mrb[33].mxu1 }
 0xa1d   : > { %v3900_v16 = vadd.f32 %v3859_v11, %v8431_v57 }
 0xa1e   : > { %v8626_v10 = vadd.f32 %v5470_v4, %v3901_v35 }
 0xa1f   : > { %v3917_v28 = vadd.f32 %v5470_v4, %v3900_v16 }
 0xa20   : > { %3928 = vst.msk [vmem:[#allocation2 + $0x18] sm:$0xff] %vm822_vm1, %v8626_v10  ;;  %v3950_v17 = vsel (!%p5471_p5), %vm822_vm1, %v8626_v10, 0.0 }
 0xa21   : > { %3927 = vst.msk [vmem:[#allocation2 + $0x10] sm:$0xff] %vm822_vm1, %v3917_v28 }
 0xa23   : > { %v6224_v42 = vpop.f32.mrb[34].mxu1 }
 0xa24   : > { %v3903_v29 = vadd.f32 %v6224_v42, %v8435_v33  ;;  %v3869_v13 = vpop.f32.mrb[35].mxu1 }
 0xa25   : > { %v3902_v52 = vadd.f32 %v3869_v13, %v8439_v22 }
 0xa26   : > { %v8633_v41 = vadd.f32 %v5470_v4, %v3903_v29 }
 0xa27   : > { %v8635_v21 = vadd.f32 %v5470_v4, %v3902_v52 }
 0xa28   : > { %3930 = vst.msk [vmem:[#allocation2 + $0x28] sm:$0xff] %vm822_vm1, %v8633_v41  ;;  %v3956_v1 = vsel (!%p5471_p5), %vm822_vm1, %v8633_v41, 0.0 }
 0xa29   : > { %3929 = vst.msk [vmem:[#allocation2 + $0x20] sm:$0xff] %vm822_vm1, %v8635_v21  ;;  %v3953_v62 = vsel (!%p5471_p5), %vm822_vm1, %v8635_v21, 0.0 }
 0xa47   : > { %v6227_v57 = vpop.f32.mrb[36].mxu1 }
 0xa48   : > { %v3905_v18 = vadd.f32 %v6227_v57, %v8445_v43  ;;  %v3879_v24 = vpop.f32.mrb[37].mxu1 }
 0xa49   : > { %v3904_v2 = vadd.f32 %v3879_v24, %v8447_v25  ;;  %v3941_v25 = vsel (!%p5471_p5), %vm822_vm1, %v3915_v7, 0.0 }
 0xa4a   : > { %v8643_v33 = vadd.f32 %v5470_v4, %v3905_v18  ;;  %3942 = vadd.xlane.f32.xlu0 (!%p5471_p5), %v3941_v25 }
 0xa4b   : > { %v8645_v55 = vadd.f32 %v5470_v4, %v3904_v2 }
 0xa4c   : > { %3932 = vst.msk [vmem:[#allocation2 + $0x38] sm:$0xff] %vm822_vm1, %v8643_v33  ;;  %v3962_v47 = vsel (!%p5471_p5), %vm822_vm1, %v8643_v33, 0.0 }
 0xa4d   : > { %3931 = vst.msk [vmem:[#allocation2 + $0x30] sm:$0xff] %vm822_vm1, %v8645_v55  ;;  %v3959_v31 = vsel (!%p5471_p5), %vm822_vm1, %v8645_v55, 0.0 }
 0xa4e   : > { %v6230_v22 = vpop.f32.mrb[38].mxu1  ;;  %3938 = sbr.rel (%p5471_p5) target bundleno = 4091 (0xffb), region = 104 }
 0xa4f   : > { %v3907_v38 = vadd.f32 %v6230_v22, %v8455_v6  ;;  %v3889_v36 = vpop.f32.mrb[39].mxu1  ;;  %v3947_v6 = vsel (!%p5471_p5), %vm822_vm1, %v3917_v28, 0.0 }
 0xa50   : > { %v3906_v45 = vadd.f32 %v3889_v36, %v8451_v48  ;;  %3948 = vadd.xlane.f32.xlu1 (!%p5471_p5), %v3947_v6  ;;  %v3944_v48 = vsel (!%p5471_p5), %vm822_vm1, %v8619_v3, 0.0  ;;  %v4103_v36 = vld [vmem:[%s9386_s16] sm:$0xff] (!%p5471_p5) }
 0xa51   : > { %v8653_v43 = vadd.f32 %v5470_v4, %v3907_v38  ;;  %3945 = vadd.xlane.f32.xlu0 (!%p5471_p5), %v3944_v48  ;;  %6251 = vmatprep.mubr.msk.f32.mxu0 (!%p5471_p5), %vm1384_vm13, %v4103_v36 }
 0xa52   : > { %v8655_v51 = vadd.f32 %v5470_v4, %v3906_v45  ;;  %v4312_v45 = vld [vmem:[%s9387_s17] sm:$0xff] (!%p5471_p5) }
 0xa53   : > { %3934 = vst.msk [vmem:[#allocation2 + $0x48] sm:$0xff] %vm822_vm1, %v8653_v43  ;;  %v3968_v12 = vsel (!%p5471_p5), %vm822_vm1, %v8653_v43, 0.0  ;;  %v4509_v6 = vmul.f32 (!%p5471_p5), %v4312_v45, %v4312_v45 }
 0xa54   : > { %3933 = vst.msk [vmem:[#allocation2 + $0x40] sm:$0xff] %vm822_vm1, %v8655_v51  ;;  %3951 = vadd.xlane.f32.xlu1 (!%p5471_p5), %v3950_v17  ;;  %v3965_v5 = vsel (!%p5471_p5), %vm822_vm1, %v8655_v51, 0.0  ;;  %v4315_v17 = vld [vmem:[%s9387_s17 + $0x18] sm:$0xff] (!%p5471_p5) }
 0xa55   : > { %3954 = vadd.xlane.f32.xlu0 %v3953_v62 }
 0xa58   : > { %3957 = vadd.xlane.f32.xlu1 %v3956_v1  ;;  %v4512_v1 = vmul.f32 %v4315_v17, %v4315_v17 }
 0xa59   : > { %3960 = vadd.xlane.f32.xlu0 %v3959_v31  ;;  %v4514_v31 = vsel %vm4513_vm14, %v4509_v6, 0.0 }
 0xa5c   : > { %3963 = vadd.xlane.f32.xlu1 %v3962_v47 }
 0xa5d   : > { %3966 = vadd.xlane.f32.xlu0 %v3965_v5 }
 0xa60   : > { %3969 = vadd.xlane.f32.xlu1 %v3968_v12 }
 0xad7   : > { %v3943_v0 = vpop.xlane.xlu0 %3942 }
 0xad8   : > { %v3971_v27 = vmul.f32 0.03125, %v3943_v0 }
 0xada   : > { %v8680_v44 = vsub.f32 %v3915_v7, %v3971_v27 }
 0xadc   : > { %v3991_v59 = vmul.f32 %v8680_v44, %v8680_v44 }
 0xadd   : > { %v3949_v63 = vpop.xlane.xlu1 %3948 }
 0xade   : > { %v3973_v61 = vmul.f32 0.03125, %v3949_v63  ;;  %v3946_v39 = vpop.xlane.xlu0 %3945  ;;  %v4001_v54 = vsel %vm822_vm1, %v3991_v59, 0.0  ;;  %v4519_v63 = vsel %vm4513_vm14, %v4512_v1, 0.0 }
 0xadf   : > { %v3972_v53 = vmul.f32 0.03125, %v3946_v39  ;;  %4002 = vadd.xlane.f32.xlu0 %v4001_v54 }
 0xae0   : > { %v8682_v58 = vsub.f32 %v3917_v28, %v3973_v61 }
 0xae1   : > { %v3952_v9 = vpop.xlane.xlu1 %3951  ;;  %v8689_v19 = vsub.f32 %v8619_v3, %v3972_v53 }
 0xae2   : > { %v3974_v32 = vmul.f32 0.03125, %v3952_v9  ;;  %v3993_v49 = vmul.f32 %v8682_v58, %v8682_v58  ;;  %v3955_v8 = vpop.xlane.xlu0 %3954 }
 0xae3   : > { %v3975_v23 = vmul.f32 0.03125, %v3955_v8  ;;  %v3992_v56 = vmul.f32 %v8689_v19, %v8689_v19 }
 0xae4   : > { %v8692_v15 = vsub.f32 %v8626_v10, %v3974_v32  ;;  %v4007_v40 = vsel %vm822_vm1, %v3993_v49, 0.0 }
 0xae5   : > { %v3958_v26 = vpop.xlane.xlu1 %3957  ;;  %v8701_v37 = vsub.f32 %v8635_v21, %v3975_v23  ;;  %v4004_v4 = vsel %vm822_vm1, %v3992_v56, 0.0  ;;  %4008 = vadd.xlane.f32.xlu0 %v4007_v40 }
 0xae6   : > { %v3976_v50 = vmul.f32 0.03125, %v3958_v26  ;;  %v3994_v14 = vmul.f32 %v8692_v15, %v8692_v15  ;;  %4005 = vadd.xlane.f32.xlu1 %v4004_v4  ;;  %v3961_v60 = vpop.xlane.xlu0 %3960 }
 0xae7   : > { %v3977_v3 = vmul.f32 0.03125, %v3961_v60  ;;  %v3995_v30 = vmul.f32 %v8701_v37, %v8701_v37 }
 0xae8   : > { %v8704_v46 = vsub.f32 %v8633_v41, %v3976_v50  ;;  %v4010_v20 = vsel %vm822_vm1, %v3994_v14, 0.0 }
 0xae9   : > { %v3964_v34 = vpop.xlane.xlu1 %3963  ;;  %v8713_v11 = vsub.f32 %v8645_v55, %v3977_v3  ;;  %v4013_v10 = vsel %vm822_vm1, %v3995_v30, 0.0 }
 0xaea   : > { %v3978_v7 = vmul.f32 0.03125, %v3964_v34  ;;  %v3996_v35 = vmul.f32 %v8704_v46, %v8704_v46  ;;  %4011 = vadd.xlane.f32.xlu1 %v4010_v20  ;;  %4014 = vadd.xlane.f32.xlu0 %v4013_v10  ;;  %v3967_v28 = vpop.xlane.xlu0 %3966 }
 0xaeb   : > { %v3979_v13 = vmul.f32 0.03125, %v3967_v28  ;;  %v3997_v41 = vmul.f32 %v8713_v11, %v8713_v11 }
 0xaec   : > { %v8716_v16 = vsub.f32 %v8643_v33, %v3978_v7  ;;  %v4016_v29 = vsel %vm822_vm1, %v3996_v35, 0.0 }
 0xaed   : > { %v3970_v42 = vpop.xlane.xlu1 %3969  ;;  %v8725_v57 = vsub.f32 %v8655_v51, %v3979_v13  ;;  %v4019_v24 = vsel %vm822_vm1, %v3997_v41, 0.0  ;;  %v4314_v51 = vld [vmem:[%s9387_s17 + $0x10] sm:$0xff] }
 0xaee   : > { %v3980_v52 = vmul.f32 0.03125, %v3970_v42  ;;  %v3998_v21 = vmul.f32 %v8716_v16, %v8716_v16  ;;  %4017 = vadd.xlane.f32.xlu1 %v4016_v29  ;;  %4020 = vadd.xlane.f32.xlu0 %v4019_v24  ;;  %v4511_v62 = vmul.f32 %v4314_v51, %v4314_v51  ;;  %v8758_v5 = vpack.c.bf16 %v4315_v17, %v4314_v51 }
 0xaef   : > { %v3999_v33 = vmul.f32 %v8725_v57, %v8725_v57 }
 0xaf0   : > { %v8728_v18 = vsub.f32 %v8653_v43, %v3980_v52  ;;  %v4022_v2 = vsel %vm822_vm1, %v3998_v21, 0.0  ;;  %v4313_v43 = vld [vmem:[%s9387_s17 + $0x8] sm:$0xff]  ;;  %v4517_v12 = vsel %vm4513_vm14, %v4511_v62, 0.0  ;;  %v5472_v52 = vld [vmem:[%s9452_s3] ss:$0 sm:$0xff] }
 0xaf1   : > { %v4025_v22 = vsel %vm822_vm1, %v3999_v33, 0.0  ;;  %v8751_v25 = vpack.c.bf16 %v4313_v43, %v4312_v45  ;;  %v4510_v48 = vmul.f32 %v4313_v43, %v4313_v43 }
 0xaf2   : > { %v4000_v55 = vmul.f32 %v8728_v18, %v8728_v18  ;;  %4023 = vadd.xlane.f32.xlu1 %v4022_v2  ;;  %4026 = vadd.xlane.f32.xlu0 %v4025_v22 }
 0xaf3   : > { %v4515_v47 = vsel %vm4513_vm14, %v4510_v48, 0.0  ;;  %6657 = vmatprep.subr.bf16.mxu1 %v8751_v25 }
 0xaf4   : > { %v4028_v38 = vsel %vm822_vm1, %v4000_v55, 0.0  ;;  %v4516_v0 = vadd.f32 %v4515_v47, %v4514_v31  ;;  %6659 = vmatpush3.bf16.msra.mxu1 %v8751_v25 }
 0xaf5   : > { %6658 = vmatprep.subr.bf16.mxu1 %v8758_v5 }
 0xaf6   : > { %4029 = vadd.xlane.f32.xlu1 %v4028_v38  ;;  %v4518_v27 = vadd.f32 %v4517_v12, %v4516_v0 }
 0xaf8   : > { %v8765_v61 = vadd.f32 %v4519_v63, %v4518_v27  ;;  %6660 = vmatpush3.bf16.msra.mxu1 %v8758_v5 }
 0xb6c   : > { %v4003_v39 = vpop.xlane.xlu0 %4002 }
 0xb6d   : > { %v4031_v9 = vmul.f32 0.03125, %v4003_v39 }
 0xb6f   : > { %v4041_v53 = vadd.f32 1e-05, %v4031_v9 }
 0xb71   : > { %7038 = vrsqrt.f32 %v4041_v53 }
 0xb72   : > { %v4009_v59 = vpop.xlane.xlu0 %4008 }
 0xb73   : > { %v4006_v32 = vpop.xlane.xlu1 %4005  ;;  %v4033_v54 = vmul.f32 0.03125, %v4009_v59 }
 0xb74   : > { %v4032_v49 = vmul.f32 0.03125, %v4006_v32 }
 0xb75   : > { %v4043_v26 = vadd.f32 1e-05, %v4033_v54 }
 0xb76   : > { %v4042_v8 = vadd.f32 1e-05, %v4032_v49 }
 0xb77   : > { %v4012_v40 = vpop.xlane.xlu1 %4011  ;;  %v4015_v23 = vpop.xlane.xlu0 %4014 }
 0xb78   : > { %7040 = vrsqrt.f32 %v4042_v8  ;;  %v4034_v50 = vmul.f32 0.03125, %v4012_v40  ;;  %v4035_v56 = vmul.f32 0.03125, %v4015_v23 }
 0xb79   : > { %7042 = vrsqrt.f32 %v4043_v26 }
 0xb7a   : > { %v4044_v14 = vadd.f32 1e-05, %v4034_v50  ;;  %v4045_v4 = vadd.f32 1e-05, %v4035_v56 }
 0xb7b   : > { %v4018_v60 = vpop.xlane.xlu1 %4017  ;;  %v4021_v34 = vpop.xlane.xlu0 %4020 }
 0xb7c   : > { %7044 = vrsqrt.f32 %v4044_v14  ;;  %v4036_v20 = vmul.f32 0.03125, %v4018_v60  ;;  %v4037_v3 = vmul.f32 0.03125, %v4021_v34  ;;  %v7039_v7 = vpop.eup %7038 }
 0xb7d   : > { %7046 = vrsqrt.f32 %v4045_v4  ;;  %v4061_v42 = vmul.f32 %v7039_v7, %v8680_v44  ;;  %v5473_v44 = vld [vmem:[%s9453_s4] ss:$0 sm:$0xff] }
 0xb7e   : > { %v4046_v30 = vadd.f32 1e-05, %v4036_v20  ;;  %v4047_v35 = vadd.f32 1e-05, %v4037_v3  ;;  %v4105_v3 = vld [vmem:[%s9386_s16 + $0x10] sm:$0xff]  ;;  %v4107_v7 = vld [vmem:[%s9386_s16 + $0x20] sm:$0xff] }
 0xb7f   : > { %v4024_v10 = vpop.xlane.xlu1 %4023  ;;  %v4027_v28 = vpop.xlane.xlu0 %4026  ;;  %v4077_v22 = vmul.f32 %v5472_v52, %v4061_v42  ;;  %v4114_v42 = vld [vmem:[%s9386_s16 + $0x58] sm:$0xff] }
 0xb80   : > { %7048 = vrsqrt.f32 %v4046_v30  ;;  %v4038_v29 = vmul.f32 0.03125, %v4024_v10  ;;  %v4039_v13 = vmul.f32 0.03125, %v4027_v28  ;;  %v4108_v30 = vld [vmem:[%s9386_s16 + $0x28] sm:$0xff]  ;;  %v4111_v10 = vld [vmem:[%s9386_s16 + $0x40] sm:$0xff]  ;;  %v4113_v28 = vld [vmem:[%s9386_s16 + $0x50] sm:$0xff] }
 0xb81   : > { %7050 = vrsqrt.f32 %v4047_v35  ;;  %v4093_v48 = vadd.f32 %v5473_v44, %v4077_v22  ;;  %v4110_v35 = vld [vmem:[%s9386_s16 + $0x38] sm:$0xff] }
 0xb82   : > { %v7041_v41 = vpop.eup %7040  ;;  %v4048_v21 = vadd.f32 1e-05, %v4038_v29  ;;  %v4049_v24 = vadd.f32 1e-05, %v4039_v13  ;;  %v4115_v29 = vld [vmem:[%s9386_s16 + $0x60] sm:$0xff]  ;;  %v4116_v13 = vld [vmem:[%s9386_s16 + $0x68] sm:$0xff] }
 0xb83   : > { %v7043_v2 = vpop.eup %7042  ;;  %v4030_v33 = vpop.xlane.xlu1 %4029  ;;  %v4062_v55 = vmul.f32 %v7041_v41, %v8689_v19  ;;  %v4118_v41 = vld [vmem:[%s9386_s16 + $0x78] sm:$0xff] }
 0xb84   : > { %7052 = vrsqrt.f32 %v4048_v21  ;;  %v4040_v38 = vmul.f32 0.03125, %v4030_v33  ;;  %v4063_v36 = vmul.f32 %v7043_v2, %v8682_v58 }
 0xb85   : > { %7054 = vrsqrt.f32 %v4049_v24  ;;  %v4078_v45 = vmul.f32 %v5472_v52, %v4062_v55 }
 0xb86   : > { %v7045_v43 = vpop.eup %7044  ;;  %v4050_v51 = vadd.f32 1e-05, %v4040_v38  ;;  %v4079_v1 = vmul.f32 %v5472_v52, %v4063_v36 }
 0xb87   : > { %v7047_v6 = vpop.eup %7046  ;;  %v4094_v17 = vadd.f32 %v5473_v44, %v4078_v45  ;;  %v4064_v62 = vmul.f32 %v7045_v43, %v8692_v15 }
 0xb88   : > { %7056 = vrsqrt.f32 %v4050_v51  ;;  %v4065_v19 = vmul.f32 %v7047_v6, %v8701_v37  ;;  %v4095_v63 = vadd.f32 %v5473_v44, %v4079_v1  ;;  %v4521_v1 = vrot.slane %v8765_v61, 4 }
 0xb89   : > { %v6589_v31 = vpack.c.bf16 %v4094_v17, %v4093_v48  ;;  %v4080_v47 = vmul.f32 %v5472_v52, %v4064_v62 }
 0xb8a   : > { %v7049_v12 = vpop.eup %7048  ;;  %v4081_v39 = vmul.f32 %v5472_v52, %v4065_v19  ;;  %v4522_v19 = vadd.f32 %v4521_v1, %v8765_v61 }
 0xb8b   : > { %v7051_v0 = vpop.eup %7050  ;;  %6590 = vmatprep.subr.bf16.mxu0 %v6589_v31  ;;  %v4096_v58 = vadd.f32 %v5473_v44, %v4080_v47  ;;  %v4066_v27 = vmul.f32 %v7049_v12, %v8704_v46 }
 0xb8c   : > { %6592 = vmatpush3.bf16.msra.mxu0 %v6589_v31  ;;  %v4067_v9 = vmul.f32 %v7051_v0, %v8713_v11  ;;  %v4097_v49 = vadd.f32 %v5473_v44, %v4081_v39  ;;  %v4523_v31 = vrot.slane %v4522_v19, 2 }
 0xb8d   : > { %v6593_v53 = vpack.c.bf16 %v4096_v58, %v4095_v63  ;;  %v4082_v32 = vmul.f32 %v5472_v52, %v4066_v27 }
 0xb8e   : > { %v7053_v15 = vpop.eup %7052  ;;  %v4083_v8 = vmul.f32 %v5472_v52, %v4067_v9  ;;  %v4524_v47 = vadd.f32 %v4523_v31, %v4522_v19 }
 0xb8f   : > { %v7055_v59 = vpop.eup %7054  ;;  %6594 = vmatprep.subr.bf16.mxu0 %v6593_v53  ;;  %v4098_v37 = vadd.f32 %v5473_v44, %v4082_v32  ;;  %v4068_v54 = vmul.f32 %v7053_v15, %v8716_v16 }
 0xb90   : > { %6596 = vmatpush3.bf16.msra.mxu0 %v6593_v53  ;;  %v4069_v26 = vmul.f32 %v7055_v59, %v8725_v57  ;;  %v4099_v50 = vadd.f32 %v5473_v44, %v4083_v8  ;;  %v4104_v57 = vld [vmem:[%s9386_s16 + $0x8] sm:$0xff]  ;;  %v4525_v12 = vrot.slane %v4524_v47, 1 }
 0xb91   : > { %v6597_v40 = vpack.c.bf16 %v4098_v37, %v4097_v49  ;;  %v4084_v23 = vmul.f32 %v5472_v52, %v4068_v54 }
 0xb92   : > { %v7057_v46 = vpop.eup %7056  ;;  %v4085_v14 = vmul.f32 %v5472_v52, %v4069_v26  ;;  %v8866_v0 = vadd.f32 %v4525_v12, %v4524_v47 }
 0xb93   : > { %6598 = vmatprep.subr.bf16.mxu0 %v6597_v40  ;;  %v4100_v56 = vadd.f32 %v5473_v44, %v4084_v23  ;;  %v4070_v11 = vmul.f32 %v7057_v46, %v8728_v18  ;;  %v4106_v18 = vld [vmem:[%s9386_s16 + $0x18] sm:$0xff] }
 0xb94   : > { %6600 = vmatpush3.bf16.msra.mxu0 %v6597_v40  ;;  %v4101_v34 = vadd.f32 %v5473_v44, %v4085_v14 }
 0xb95   : > { %v6601_v4 = vpack.c.bf16 %v4100_v56, %v4099_v50  ;;  %v4086_v60 = vmul.f32 %v5472_v52, %v4070_v11  ;;  %v4117_v52 = vld [vmem:[%s9386_s16 + $0x70] sm:$0xff] }
 0xb97   : > { %6602 = vmatprep.subr.bf16.mxu0 %v6601_v4  ;;  %v4102_v20 = vadd.f32 %v5473_v44, %v4086_v60 }
 0xb98   : > { %6604 = vmatpush3.bf16.msra.mxu0 %v6601_v4 }
 0xb99   : > { %v6605_v16 = vpack.c.bf16 %v4102_v20, %v4101_v34 }
 0xb9b   : > { %6606 = vmatprep.subr.bf16.mxu0 %v6605_v16 }
 0xb9c   : > { %6608 = vmatpush3.bf16.msra.mxu0 %v6605_v16 }
 0xb9d   : > { %6610 = vmatprep.subr.bf16.mxu0 %v8751_v25 }
 0xb9f   : > { %6252 = vmatmul.mubr.msk.f32.vlgmr.msra.gmra.mrb[0].mxu0 %vm1384_vm13, %v4104_v57 }
 0xba0   : > { %6254 = vmatprep.mubr.msk.f32.mxu0 %vm1384_vm13, %v4105_v3  ;;  %6612 = vmatpush3.bf16.msra.mxu0 %v8751_v25  ;;  %v4109_v25 = vld [vmem:[%s9386_s16 + $0x30] sm:$0xff] }
 0xba1   : > { %6614 = vmatprep.subr.bf16.mxu0 %v8758_v5 }
 0xba3   : > { %6255 = vmatmul.mubr.msk.f32.gmra.mrb[2].mxu0 %vm1384_vm13, %v4106_v18 }
 0xba4   : > { %6257 = vmatprep.mubr.msk.f32.mxu0 %vm1384_vm13, %v4107_v7  ;;  %6616 = vmatpush3.bf16.msra.mxu0 %v8758_v5  ;;  %v4112_v5 = vld [vmem:[%s9386_s16 + $0x48] sm:$0xff] }
 0xba7   : > { %6258 = vmatmul.mubr.msk.f32.gmra.mrb[4].mxu0 %vm1384_vm13, %v4108_v30 }
 0xba8   : > { %6260 = vmatprep.mubr.msk.f32.mxu0 %vm1384_vm13, %v4109_v25 }
 0xbab   : > { %6261 = vmatmul.mubr.msk.f32.gmra.mrb[6].mxu0 %vm1384_vm13, %v4110_v35 }
 0xbac   : > { %6263 = vmatprep.mubr.msk.f32.mxu0 %vm1384_vm13, %v4111_v10 }
 0xbaf   : > { %6264 = vmatmul.mubr.msk.f32.gmra.mrb[8].mxu0 %vm1384_vm13, %v4112_v5 }
 0xbb0   : > { %6266 = vmatprep.mubr.msk.f32.mxu0 %vm1384_vm13, %v4113_v28 }
 0xbb3   : > { %6267 = vmatmul.mubr.msk.f32.gmra.mrb[10].mxu0 %vm1384_vm13, %v4114_v42 }
 0xbb4   : > { %6269 = vmatprep.mubr.msk.f32.mxu0 %vm1384_vm13, %v4115_v29 }
 0xbb7   : > { %6270 = vmatmul.mubr.msk.f32.gmra.mrb[12].mxu0 %vm1384_vm13, %v4116_v13 }
 0xbb8   : > { %6272 = vmatprep.mubr.msk.f32.mxu0 %vm1384_vm13, %v4117_v52 }
 0xbbb   : > { %6273 = vmatmul.mubr.msk.f32.gmra.mrb[14].mxu0 %vm1384_vm13, %v4118_v41 }
 0xc72   : > { %v6253_v21 = vpop.f32.mrb[0].mxu0 }
 0xc73   : > { %v4233_v24 = vpop.f32.mrb[1].mxu0 }
 0xc74   : > { %6283 = vmatprep.mubr.msk.f32.mxu0 %vm822_vm1, %v4233_v24 }
 0xc75   : > { %6284 = vmatmul.mubr.msk.f32.vlgmr.msra.gmra.mrb[16].mxu0 %vm822_vm1, %v6253_v21 }
 0xc76   : > { %v6256_v2 = vpop.f32.mrb[2].mxu0 }
 0xc77   : > { %v4243_v33 = vpop.f32.mrb[3].mxu0 }
 0xc78   : > { %6286 = vmatprep.mubr.msk.f32.mxu0 %vm822_vm1, %v4243_v33 }
 0xc79   : > { %6287 = vmatmul.mubr.msk.f32.gmra.mrb[18].mxu0 %vm822_vm1, %v6256_v2 }
 0xc7a   : > { %v6259_v55 = vpop.f32.mrb[4].mxu0 }
 0xc7b   : > { %v4253_v22 = vpop.f32.mrb[5].mxu0 }
 0xc7c   : > { %6289 = vmatprep.mubr.msk.f32.mxu1 %vm822_vm1, %v4253_v22 }
 0xc7d   : > { %6290 = vmatmul.mubr.msk.f32.vlgmr.msra.gmra.mrb[0].mxu1 %vm822_vm1, %v6259_v55 }
 0xc7e   : > { %v6262_v38 = vpop.f32.mrb[6].mxu0 }
 0xc7f   : > { %v4263_v44 = vpop.f32.mrb[7].mxu0 }
 0xc80   : > { %6292 = vmatprep.mubr.msk.f32.mxu1 %vm822_vm1, %v4263_v44 }
 0xc81   : > { %6293 = vmatmul.mubr.msk.f32.gmra.mrb[2].mxu1 %vm822_vm1, %v6262_v38 }
 0xc82   : > { %v6265_v36 = vpop.f32.mrb[8].mxu0 }
 0xc83   : > { %v4273_v45 = vpop.f32.mrb[9].mxu0 }
 0xc84   : > { %6295 = vmatprep.mubr.msk.f32.mxu1 %vm822_vm1, %v4273_v45 }
 0xc85   : > { %6296 = vmatmul.mubr.msk.f32.gmra.mrb[4].mxu1 %vm822_vm1, %v6265_v36 }
 0xc86   : > { %v6268_v43 = vpop.f32.mrb[10].mxu0 }
 0xc87   : > { %v4283_v51 = vpop.f32.mrb[11].mxu0 }
 0xc88   : > { %6298 = vmatprep.mubr.msk.f32.mxu1 %vm822_vm1, %v4283_v51 }
 0xc89   : > { %6299 = vmatmul.mubr.msk.f32.gmra.mrb[6].mxu1 %vm822_vm1, %v6268_v43 }
 0xc8a   : > { %v6271_v6 = vpop.f32.mrb[12].mxu0 }
 0xc8b   : > { %v4293_v48 = vpop.f32.mrb[13].mxu0 }
 0xc8c   : > { %6301 = vmatprep.mubr.msk.f32.mxu1 %vm822_vm1, %v4293_v48 }
 0xc8d   : > { %6302 = vmatmul.mubr.msk.f32.gmra.mrb[8].mxu1 %vm822_vm1, %v6271_v6 }
 0xc8e   : > { %v6274_v17 = vpop.f32.mrb[14].mxu0 }
 0xc8f   : > { %v4303_v62 = vpop.f32.mrb[15].mxu0 }
 0xc90   : > { %6304 = vmatprep.mubr.msk.f32.mxu1 %vm822_vm1, %v4303_v62 }
 0xc91   : > { %6305 = vmatmul.mubr.msk.f32.gmra.mrb[10].mxu1 %vm822_vm1, %v6274_v17 }
 0xd48   : > { %v6285_v63 = vpop.f32.mrb[16].mxu0 }
 0xd49   : > { %v4528_v58 = vmul.f32 2.0, %v6285_v63  ;;  %v4430_v27 = vpop.f32.mrb[17].mxu0 }
 0xd4a   : > { %v4527_v39 = vmul.f32 2.0, %v4430_v27 }
 0xd4b   : > { %v8869_v9 = vsub.f32 %v4528_v58, %v8866_v0 }
 0xd4c   : > { %v6288_v53 = vpop.f32.mrb[18].mxu0  ;;  %v8872_v32 = vsub.f32 %v4527_v39, %v8866_v0  ;;  %v9454_v39 = vld [vmem:[#allocation4_spill] sm:$0xff] }
 0xd4d   : > { %v4530_v15 = vmul.f32 2.0, %v6288_v53  ;;  %v4440_v59 = vpop.f32.mrb[19].mxu0  ;;  %v4562_v61 = vsel %vm4513_vm14, %v8869_v9, -inf }
 0xd4e   : > { %v4529_v49 = vmul.f32 2.0, %v4440_v59  ;;  %4563 = vmax.xlane.f32.xlu1 %v4562_v61  ;;  %v4559_v37 = vsel %vm4513_vm14, %v8872_v32, -inf }
 0xd4f   : > { %4560 = vmax.xlane.f32.xlu0 %v4559_v37  ;;  %v8879_v54 = vsub.f32 %v4530_v15, %v8866_v0 }
 0xd50   : > { %v8882_v8 = vsub.f32 %v4529_v49, %v8866_v0  ;;  %v6291_v26 = vpop.f32.mrb[0].mxu1 }
 0xd51   : > { %v4532_v40 = vmul.f32 2.0, %v6291_v26  ;;  %v4450_v23 = vpop.f32.mrb[1].mxu1  ;;  %v4568_v46 = vsel %vm4513_vm14, %v8879_v54, -inf }
 0xd52   : > { %v4531_v50 = vmul.f32 2.0, %v4450_v23  ;;  %4569 = vmax.xlane.f32.xlu1 %v4568_v46  ;;  %v4565_v56 = vsel %vm4513_vm14, %v8882_v8, -inf }
 0xd53   : > { %4566 = vmax.xlane.f32.xlu0 %v4565_v56  ;;  %v8889_v11 = vsub.f32 %v4532_v40, %v8866_v0 }
 0xd54   : > { %v6294_v14 = vpop.f32.mrb[2].mxu1  ;;  %v8892_v4 = vsub.f32 %v4531_v50, %v8866_v0 }
 0xd55   : > { %v4534_v60 = vmul.f32 2.0, %v6294_v14  ;;  %v4460_v34 = vpop.f32.mrb[3].mxu1  ;;  %v4574_v20 = vsel %vm4513_vm14, %v8889_v11, -inf }
 0xd56   : > { %v4533_v16 = vmul.f32 2.0, %v4460_v34  ;;  %4575 = vmax.xlane.f32.xlu1 %v4574_v20  ;;  %v4571_v57 = vsel %vm4513_vm14, %v8892_v4, -inf }
 0xd57   : > { %4572 = vmax.xlane.f32.xlu0 %v4571_v57  ;;  %v8899_v3 = vsub.f32 %v4534_v60, %v8866_v0 }
 0xd58   : > { %v6297_v18 = vpop.f32.mrb[4].mxu1  ;;  %v8902_v7 = vsub.f32 %v4533_v16, %v8866_v0 }
 0xd59   : > { %v4536_v30 = vmul.f32 2.0, %v6297_v18  ;;  %v4470_v25 = vpop.f32.mrb[5].mxu1  ;;  %v4580_v35 = vsel %vm4513_vm14, %v8899_v3, -inf }
 0xd5a   : > { %v4535_v10 = vmul.f32 2.0, %v4470_v25  ;;  %4581 = vmax.xlane.f32.xlu1 %v4580_v35  ;;  %v4577_v5 = vsel %vm4513_vm14, %v8902_v7, -inf }
 0xd5b   : > { %4578 = vmax.xlane.f32.xlu0 %v4577_v5  ;;  %v8909_v28 = vsub.f32 %v4536_v30, %v8866_v0 }
 0xd5c   : > { %v6300_v42 = vpop.f32.mrb[6].mxu1  ;;  %v8912_v29 = vsub.f32 %v4535_v10, %v8866_v0 }
 0xd5d   : > { %v4538_v13 = vmul.f32 2.0, %v6300_v42  ;;  %v4480_v52 = vpop.f32.mrb[7].mxu1  ;;  %v4586_v41 = vsel %vm4513_vm14, %v8909_v28, -inf }
 0xd5e   : > { %v4537_v21 = vmul.f32 2.0, %v4480_v52  ;;  %4587 = vmax.xlane.f32.xlu1 %v4586_v41  ;;  %v4583_v24 = vsel %vm4513_vm14, %v8912_v29, -inf }
 0xd5f   : > { %4584 = vmax.xlane.f32.xlu0 %v4583_v24  ;;  %v8919_v2 = vsub.f32 %v4538_v13, %v8866_v0 }
 0xd60   : > { %v6303_v33 = vpop.f32.mrb[8].mxu1  ;;  %v8922_v55 = vsub.f32 %v4537_v21, %v8866_v0 }
 0xd61   : > { %v4540_v22 = vmul.f32 2.0, %v6303_v33  ;;  %v4490_v38 = vpop.f32.mrb[9].mxu1  ;;  %v4592_v44 = vsel %vm4513_vm14, %v8919_v2, -inf }
 0xd62   : > { %v4539_v36 = vmul.f32 2.0, %v4490_v38  ;;  %4593 = vmax.xlane.f32.xlu1 %v4592_v44  ;;  %v4589_v45 = vsel %vm4513_vm14, %v8922_v55, -inf }
 0xd63   : > { %4590 = vmax.xlane.f32.xlu0 %v4589_v45  ;;  %v8929_v43 = vsub.f32 %v4540_v22, %v8866_v0 }
 0xd64   : > { %v6306_v51 = vpop.f32.mrb[10].mxu1  ;;  %v8932_v6 = vsub.f32 %v4539_v36, %v8866_v0 }
 0xd65   : > { %v4542_v48 = vmul.f32 2.0, %v6306_v51  ;;  %v4500_v17 = vpop.f32.mrb[11].mxu1  ;;  %v4598_v62 = vsel %vm4513_vm14, %v8929_v43, -inf }
 0xd66   : > { %v4541_v1 = vmul.f32 2.0, %v4500_v17  ;;  %4599 = vmax.xlane.f32.xlu1 %v4598_v62  ;;  %v4595_v19 = vsel %vm4513_vm14, %v8932_v6, -inf }
 0xd67   : > { %4596 = vmax.xlane.f32.xlu0 %v4595_v19  ;;  %v8939_v31 = vsub.f32 %v4542_v48, %v8866_v0 }
 0xd68   : > { %v8942_v47 = vsub.f32 %v4541_v1, %v8866_v0 }
 0xd69   : > { %v4604_v12 = vsel %vm4513_vm14, %v8939_v31, -inf }
 0xd6a   : > { %4605 = vmax.xlane.f32.xlu1 %v4604_v12  ;;  %v4601_v63 = vsel %vm4513_vm14, %v8942_v47, -inf }
 0xd6b   : > { %4602 = vmax.xlane.f32.xlu0 %v4601_v63 }
 0xddb   : > { %v4564_v58 = vpop.xlane.xlu1 %4563 }
 0xddc   : > { %vm4608_vm15 = vcmp.ge.f32.partialorder %v8869_v9, %v4564_v58  ;;  %v4561_v27 = vpop.xlane.xlu0 %4560 }
 0xddd   : > { %v4624_v53 = vsel %vm4608_vm15, %v9454_v39, 8  ;;  %vm4607_vm0 = vcmp.ge.f32.partialorder %v8872_v32, %v4561_v27 }
 0xdde   : > { %v8952_v15 = vsel %vm4513_vm14, %v4624_v53, 2147483647  ;;  %v4623_v0 = vsel %vm4607_vm0, %v9454_v39, 8 }
 0xddf   : > { %v8956_v59 = vsel %vm4513_vm14, %v4623_v0, 2147483647  ;;  %v4570_v61 = vpop.xlane.xlu1 %4569  ;;  %v4656_v49 = vshra.s32 %v8952_v15, 16 }
 0xde0   : > { %vm4610_vm2 = vcmp.ge.f32.partialorder %v8879_v54, %v4570_v61  ;;  %v4567_v37 = vpop.xlane.xlu0 %4566  ;;  %v4641_v9 = vshra.s32 %v8956_v59, 16 }
 0xde1   : > { %v4626_v26 = vsel %vm4610_vm2, %v9454_v39, 8  ;;  %vm4609_vm3 = vcmp.ge.f32.partialorder %v8882_v8, %v4567_v37  ;;  %v8963_v32 = vcvt.s32.f32 %v4656_v49 }
 0xde2   : > { %v8966_v40 = vsel %vm4513_vm14, %v4626_v26, 2147483647  ;;  %v4625_v23 = vsel %vm4609_vm3, %v9454_v39, 8  ;;  %v8969_v46 = vcvt.s32.f32 %v4641_v9 }
 0xde3   : > { %v8972_v50 = vsel %vm4513_vm14, %v4625_v23, 2147483647  ;;  %4659 = vmin.xlane.f32.xlu1 %v8963_v32  ;;  %v4576_v54 = vpop.xlane.xlu1 %4575  ;;  %v4686_v56 = vshra.s32 %v8966_v40, 16 }
 0xde4   : > { %vm4612_vm4 = vcmp.ge.f32.partialorder %v8889_v11, %v4576_v54  ;;  %4644 = vmin.xlane.f32.xlu0 %v8969_v46  ;;  %v4573_v8 = vpop.xlane.xlu0 %4572  ;;  %v4671_v14 = vshra.s32 %v8972_v50, 16 }
 0xde5   : > { %v4628_v60 = vsel %vm4612_vm4, %v9454_v39, 8  ;;  %vm4611_vm5 = vcmp.ge.f32.partialorder %v8892_v4, %v4573_v8  ;;  %v8981_v34 = vcvt.s32.f32 %v4686_v56 }
 0xde6   : > { %v8984_v20 = vsel %vm4513_vm14, %v4628_v60, 2147483647  ;;  %v4627_v16 = vsel %vm4611_vm5, %v9454_v39, 8  ;;  %v8987_v57 = vcvt.s32.f32 %v4671_v14 }
 0xde7   : > { %v8990_v11 = vsel %vm4513_vm14, %v4627_v16, 2147483647  ;;  %4689 = vmin.xlane.f32.xlu1 %v8981_v34  ;;  %v4582_v18 = vpop.xlane.xlu1 %4581  ;;  %v4716_v30 = vshra.s32 %v8984_v20, 16 }
 0xde8   : > { %vm4614_vm6 = vcmp.ge.f32.partialorder %v8899_v3, %v4582_v18  ;;  %4674 = vmin.xlane.f32.xlu0 %v8987_v57  ;;  %v4579_v4 = vpop.xlane.xlu0 %4578  ;;  %v4701_v25 = vshra.s32 %v8990_v11, 16 }
 0xde9   : > { %v4630_v35 = vsel %vm4614_vm6, %v9454_v39, 8  ;;  %vm4613_vm7 = vcmp.ge.f32.partialorder %v8902_v7, %v4579_v4  ;;  %v8999_v10 = vcvt.s32.f32 %v4716_v30  ;;  %v4944_v30 = vld [vmem:[%s9455_s19] sm:$0xff]  ;;  %v4655_v4 = vand.u32 65535, %v8952_v15 }
 0xdea   : > { %v9002_v5 = vsel %vm4513_vm14, %v4630_v35, 2147483647  ;;  %v4629_v42 = vsel %vm4613_vm7, %v9454_v39, 8  ;;  %v9005_v13 = vcvt.s32.f32 %v4701_v25  ;;  %6307 = vmatprep.subr.mxu1 %v4944_v30  ;;  %v4640_v25 = vand.u32 65535, %v8956_v59 }
 0xdeb   : > { %v9008_v3 = vsel %vm4513_vm14, %v4629_v42, 2147483647  ;;  %4719 = vmin.xlane.f32.xlu1 %v8999_v10  ;;  %v4588_v52 = vpop.xlane.xlu1 %4587  ;;  %v4746_v41 = vshra.s32 %v9002_v5, 16  ;;  %6308 = vmatpush3.msra.mxu1 %v4944_v30  ;;  %v4685_v35 = vand.u32 65535, %v8966_v40  ;;  %v4715_v59 = vand.u32 65535, %v8984_v20 }
 0xdec   : > { %vm4616_vm8 = vcmp.ge.f32.partialorder %v8909_v28, %v4588_v52  ;;  %4704 = vmin.xlane.f32.xlu0 %v9005_v13  ;;  %v4585_v7 = vpop.xlane.xlu0 %4584  ;;  %v4731_v21 = vshra.s32 %v9008_v3, 16  ;;  %v4657_v52 = vcvt.s32.f32 %v4655_v4  ;;  %v4745_v20 = vand.u32 65535, %v9002_v5 }
 0xded   : > { %v4632_v24 = vsel %vm4616_vm8, %v9454_v39, 8  ;;  %vm4615_vm9 = vcmp.ge.f32.partialorder %v8912_v29, %v4585_v7  ;;  %v9017_v33 = vcvt.s32.f32 %v4746_v41  ;;  %v4670_v41 = vand.u32 65535, %v8972_v50 }
 0xdee   : > { %v9020_v22 = vsel %vm4513_vm14, %v4632_v24, 2147483647  ;;  %v4631_v38 = vsel %vm4615_vm9, %v9454_v39, 8  ;;  %v9023_v44 = vcvt.s32.f32 %v4731_v21  ;;  %v4642_v21 = vcvt.s32.f32 %v4640_v25 }
 0xdef   : > { %v9026_v28 = vsel %vm4513_vm14, %v4631_v38, 2147483647  ;;  %4749 = vmin.xlane.f32.xlu1 %v9017_v33  ;;  %v4594_v36 = vpop.xlane.xlu1 %4593  ;;  %v4776_v45 = vshra.s32 %v9020_v22, 16  ;;  %v4687_v38 = vcvt.s32.f32 %v4685_v35  ;;  %v4700_v50 = vand.u32 65535, %v8990_v11 }
 0xdf0   : > { %vm4618_vm10 = vcmp.ge.f32.partialorder %v8919_v2, %v4594_v36  ;;  %4734 = vmin.xlane.f32.xlu0 %v9023_v44  ;;  %v4591_v29 = vpop.xlane.xlu0 %4590  ;;  %v4761_v51 = vshra.s32 %v9026_v28, 16  ;;  %v4730_v11 = vand.u32 65535, %v9008_v3  ;;  %v4775_v5 = vand.u32 65535, %v9020_v22 }
 0xdf1   : > { %v4634_v48 = vsel %vm4618_vm10, %v9454_v39, 8  ;;  %vm4617_vm11 = vcmp.ge.f32.partialorder %v8922_v55, %v4591_v29  ;;  %v9035_v17 = vcvt.s32.f32 %v4776_v45  ;;  %v4760_v3 = vand.u32 65535, %v9026_v28 }
 0xdf2   : > { %v9038_v62 = vsel %vm4513_vm14, %v4634_v48, 2147483647  ;;  %v4633_v1 = vsel %vm4617_vm11, %v9454_v39, 8  ;;  %v9041_v19 = vcvt.s32.f32 %v4761_v51  ;;  %v4717_v51 = vcvt.s32.f32 %v4715_v59 }
 0xdf3   : > { %v9044_v2 = vsel %vm4513_vm14, %v4633_v1, 2147483647  ;;  %4779 = vmin.xlane.f32.xlu1 %v9035_v17  ;;  %v4600_v12 = vpop.xlane.xlu1 %4599  ;;  %v4806_v63 = vshra.s32 %v9038_v62, 16  ;;  %v4805_v22 = vand.u32 65535, %v9038_v62 }
 0xdf4   : > { %vm4620_vm12 = vcmp.ge.f32.partialorder %v8929_v43, %v4600_v12  ;;  %4764 = vmin.xlane.f32.xlu0 %v9041_v19  ;;  %v4597_v55 = vpop.xlane.xlu0 %4596  ;;  %v4791_v58 = vshra.s32 %v9044_v2, 16  ;;  %v4790_v28 = vand.u32 65535, %v9044_v2 }
 0xdf5   : > { %v4636_v27 = vsel %vm4620_vm12, %v9454_v39, 8  ;;  %vm4619_vm13 = vcmp.ge.f32.partialorder %v8932_v6, %v4597_v55  ;;  %v9053_v53 = vcvt.s32.f32 %v4806_v63  ;;  %v4747_v63 = vcvt.s32.f32 %v4745_v20 }
 0xdf6   : > { %v9056_v0 = vsel %vm4513_vm14, %v4636_v27, 2147483647  ;;  %v4635_v61 = vsel %vm4619_vm13, %v9454_v39, 8  ;;  %v9059_v49 = vcvt.s32.f32 %v4791_v58 }
 0xdf7   : > { %v9062_v43 = vsel %vm4513_vm14, %v4635_v61, 2147483647  ;;  %4809 = vmin.xlane.f32.xlu1 %v9053_v53  ;;  %v4606_v37 = vpop.xlane.xlu1 %4605  ;;  %v4836_v9 = vshra.s32 %v9056_v0, 16  ;;  %v4777_v61 = vcvt.s32.f32 %v4775_v5  ;;  %v4835_v62 = vand.u32 65535, %v9056_v0 }
 0xdf8   : > { %vm4622_vm15 = vcmp.ge.f32.partialorder %v8939_v31, %v4606_v37  ;;  %4794 = vmin.xlane.f32.xlu0 %v9059_v49  ;;  %v4603_v6 = vpop.xlane.xlu0 %4602  ;;  %v4821_v26 = vshra.s32 %v9062_v43, 16  ;;  %v4820_v2 = vand.u32 65535, %v9062_v43 }
 0xdf9   : > { %v4638_v23 = vsel %vm4622_vm15, %v9454_v39, 8  ;;  %vm4621_vm0 = vcmp.ge.f32.partialorder %v8942_v47, %v4603_v6  ;;  %v9071_v54 = vcvt.s32.f32 %v4836_v9 }
 0xdfa   : > { %v9074_v56 = vsel %vm4513_vm14, %v4638_v23, 2147483647  ;;  %v4637_v8 = vsel %vm4621_vm0, %v9454_v39, 8  ;;  %v9077_v14 = vcvt.s32.f32 %v4821_v26  ;;  %v4807_v26 = vcvt.s32.f32 %v4805_v22 }
 0xdfb   : > { %v9080_v31 = vsel %vm4513_vm14, %v4637_v8, 2147483647  ;;  %4839 = vmin.xlane.f32.xlu1 %v9071_v54  ;;  %v4866_v60 = vshra.s32 %v9074_v56, 16  ;;  %v4865_v0 = vand.u32 65535, %v9074_v56 }
 0xdfc   : > { %4824 = vmin.xlane.f32.xlu0 %v9077_v14  ;;  %v4851_v47 = vshra.s32 %v9080_v31, 16  ;;  %v4850_v43 = vand.u32 65535, %v9080_v31 }
 0xdfd   : > { %v9086_v16 = vcvt.s32.f32 %v4866_v60  ;;  %v4867_v56 = vcvt.s32.f32 %v4865_v0 }
 0xdfe   : > { %v9088_v18 = vcvt.s32.f32 %v4851_v47  ;;  %v4837_v47 = vcvt.s32.f32 %v4835_v62  ;;  %v4852_v31 = vcvt.s32.f32 %v4850_v43 }
 0xdff   : > { %4869 = vmin.xlane.f32.xlu1 %v9086_v16 }
 0xe00   : > { %4854 = vmin.xlane.f32.xlu0 %v9088_v18 }
 0xe70   : > { %v9098_v42 = vpop.xlane.xlu1 %4659 }
 0xe71   : > { %v9101_v7 = vpop.xlane.xlu0 %4644  ;;  %vm4661_vm2 = vcmp.eq.f32.partialorder %v8963_v32, %v9098_v42  ;;  %v4672_v32 = vcvt.s32.f32 %v4670_v41 }
 0xe72   : > { %v4662_v24 = vsel %vm4661_vm2, %v4657_v52, inf  ;;  %vm4646_vm3 = vcmp.eq.f32.partialorder %v8969_v46, %v9101_v7  ;;  %v4651_v41 = vcvt.f32.s32 %v9101_v7 }
 0xe73   : > { %4663 = vmin.xlane.f32.xlu1 %v4662_v24  ;;  %v4647_v15 = vsel %vm4646_vm3, %v4642_v21, inf }
 0xe74   : > { %v9108_v40 = vpop.xlane.xlu1 %4689  ;;  %4648 = vmin.xlane.f32.xlu0 %v4647_v15 }
 0xe75   : > { %v9111_v36 = vpop.xlane.xlu0 %4674  ;;  %vm4691_vm4 = vcmp.eq.f32.partialorder %v8981_v34, %v9108_v40  ;;  %v4702_v34 = vcvt.s32.f32 %v4700_v50  ;;  %v4696_v15 = vcvt.f32.s32 %v9108_v40  ;;  %v4652_v50 = vshll.u32 %v4651_v41, 16 }
 0xe76   : > { %v4692_v45 = vsel %vm4691_vm4, %v4687_v38, inf  ;;  %vm4676_vm5 = vcmp.eq.f32.partialorder %v8987_v57, %v9111_v36  ;;  %vm4879_vm4 = vcmask 7168  }
 0xe77   : > { %4693 = vmin.xlane.f32.xlu1 %v4692_v45  ;;  %v4677_v46 = vsel %vm4676_vm5, %v4672_v32, inf  ;;  %v4697_v20 = vshll.u32 %v4696_v15, 16 }
 0xe78   : > { %v9118_v29 = vpop.xlane.xlu1 %4719  ;;  %4678 = vmin.xlane.f32.xlu0 %v4677_v46 }
 0xe79   : > { %v9121_v48 = vpop.xlane.xlu0 %4704  ;;  %vm4721_vm6 = vcmp.eq.f32.partialorder %v8999_v10, %v9118_v29  ;;  %v4732_v10 = vcvt.s32.f32 %v4730_v11 }
 0xe7a   : > { %v4722_v1 = vsel %vm4721_vm6, %v4717_v51, inf  ;;  %vm4706_vm7 = vcmp.eq.f32.partialorder %v9005_v13, %v9121_v48  ;;  %v4726_v51 = vcvt.f32.s32 %v9118_v29 }
 0xe7b   : > { %4723 = vmin.xlane.f32.xlu1 %v4722_v1  ;;  %v4707_v57 = vsel %vm4706_vm7, %v4702_v34, inf  ;;  %v7069_v34 = vmov 0.0  }
 0xe7c   : > { %v9128_v12 = vpop.xlane.xlu1 %4749  ;;  %4708 = vmin.xlane.f32.xlu0 %v4707_v57 }
 0xe7d   : > { %v9131_v55 = vpop.xlane.xlu0 %4734  ;;  %vm4751_vm8 = vcmp.eq.f32.partialorder %v9017_v33, %v9128_v12  ;;  %v4762_v33 = vcvt.s32.f32 %v4760_v3  ;;  %v4727_v3 = vshll.u32 %v4726_v51, 16 }
 0xe7e   : > { %v4752_v58 = vsel %vm4751_vm8, %v4747_v63, inf  ;;  %vm4736_vm9 = vcmp.eq.f32.partialorder %v9023_v44, %v9131_v55  ;;  %v4741_v22 = vcvt.f32.s32 %v9131_v55 }
 0xe7f   : > { %4753 = vmin.xlane.f32.xlu1 %v4752_v58  ;;  %v4737_v13 = vsel %vm4736_vm9, %v4732_v10, inf }
 0xe80   : > { %v9138_v27 = vpop.xlane.xlu1 %4779  ;;  %4738 = vmin.xlane.f32.xlu0 %v4737_v13 }
 0xe81   : > { %v9141_v37 = vpop.xlane.xlu0 %4764  ;;  %vm4781_vm10 = vcmp.eq.f32.partialorder %v9035_v17, %v9138_v27  ;;  %v4792_v17 = vcvt.s32.f32 %v4790_v28  ;;  %v4786_v55 = vcvt.f32.s32 %v9138_v27 }
 0xe82   : > { %v4782_v9 = vsel %vm4781_vm10, %v4777_v61, inf  ;;  %vm4766_vm11 = vcmp.eq.f32.partialorder %v9041_v19, %v9141_v37 }
 0xe83   : > { %4783 = vmin.xlane.f32.xlu1 %v4782_v9  ;;  %v4767_v44 = vsel %vm4766_vm11, %v4762_v33, inf }
 0xe84   : > { %v9148_v6 = vpop.xlane.xlu1 %4809  ;;  %4768 = vmin.xlane.f32.xlu0 %v4767_v44 }
 0xe85   : > { %v9151_v23 = vpop.xlane.xlu0 %4794  ;;  %vm4811_vm12 = vcmp.eq.f32.partialorder %v9053_v53, %v9148_v6  ;;  %v4822_v53 = vcvt.s32.f32 %v4820_v2 }
 0xe86   : > { %v4812_v8 = vsel %vm4811_vm12, %v4807_v26, inf  ;;  %vm4796_vm13 = vcmp.eq.f32.partialorder %v9059_v49, %v9151_v23 }
 0xe87   : > { %4813 = vmin.xlane.f32.xlu1 %v4812_v8  ;;  %v4797_v19 = vsel %vm4796_vm13, %v4792_v17, inf  ;;  %v4742_v17 = vshll.u32 %v4741_v22, 16  ;;  %v4771_v8 = vcvt.f32.s32 %v9141_v37  ;;  %v4816_v37 = vcvt.f32.s32 %v9148_v6 }
 0xe88   : > { %v9158_v60 = vpop.xlane.xlu1 %4839  ;;  %4798 = vmin.xlane.f32.xlu0 %v4797_v19 }
 0xe89   : > { %v9161_v30 = vpop.xlane.xlu0 %4824  ;;  %vm4841_vm15 = vcmp.eq.f32.partialorder %v9071_v54, %v9158_v60  ;;  %v4817_v15 = vshll.u32 %v4816_v37, 16 }
 0xe8a   : > { %v4842_v4 = vsel %vm4841_vm15, %v4837_v47, inf  ;;  %vm4826_vm0 = vcmp.eq.f32.partialorder %v9077_v14, %v9161_v30  ;;  %v4666_v14 = vcvt.f32.s32 %v9098_v42 }
 0xe8b   : > { %4843 = vmin.xlane.f32.xlu1 %v4842_v4  ;;  %v4827_v49 = vsel %vm4826_vm0, %v4822_v53, inf  ;;  %v4787_v4 = vshll.u32 %v4786_v55, 16 }
 0xe8c   : > { %v9167_v25 = vpop.xlane.xlu1 %4869  ;;  %4828 = vmin.xlane.f32.xlu0 %v4827_v49  ;;  %v4667_v24 = vshll.u32 %v4666_v14, 16 }
 0xe8d   : > { %v9169_v35 = vpop.xlane.xlu0 %4854  ;;  %vm4871_vm2 = vcmp.eq.f32.partialorder %v9086_v16, %v9167_v25  ;;  %v4681_v16 = vcvt.f32.s32 %v9111_v36  ;;  %v4711_v36 = vcvt.f32.s32 %v9121_v48  ;;  %v4756_v48 = vcvt.f32.s32 %v9128_v12 }
 0xe8e   : > { %v4872_v52 = vsel %vm4871_vm2, %v4867_v56, inf  ;;  %vm4856_vm3 = vcmp.eq.f32.partialorder %v9088_v18, %v9169_v35 }
 0xe8f   : > { %4873 = vmin.xlane.f32.xlu1 %v4872_v52  ;;  %v4857_v54 = vsel %vm4856_vm3, %v4852_v31, inf  ;;  %v4682_v40 = vshll.u32 %v4681_v16, 16  ;;  %v4712_v13 = vshll.u32 %v4711_v36, 16  ;;  %v4757_v62 = vshll.u32 %v4756_v48, 16 }
 0xe90   : > { %4858 = vmin.xlane.f32.xlu0 %v4857_v54  ;;  %v4772_v31 = vshll.u32 %v4771_v8, 16  ;;  %v4801_v52 = vcvt.f32.s32 %v9151_v23  ;;  %v4846_v23 = vcvt.f32.s32 %v9158_v60  ;;  %v4831_v16 = vcvt.f32.s32 %v9161_v30 }
 0xe91   : > { %v4876_v30 = vcvt.f32.s32 %v9167_v25  ;;  %v4861_v36 = vcvt.f32.s32 %v9169_v35 }
 0xe92   : > { %v4847_v51 = vshll.u32 %v4846_v23, 16 }
 0xe93   : > { %v4862_v48 = vshll.u32 %v4861_v36, 16 }
 0xf00   : > { %v4664_v21 = vpop.xlane.xlu1 %4663 }
 0xf01   : > { %v4665_v59 = vcvt.f32.s32 %v4664_v21  ;;  %v4649_v38 = vpop.xlane.xlu0 %4648 }
 0xf02   : > { %v4650_v32 = vcvt.f32.s32 %v4649_v38 }
 0xf03   : > { %v4668_v45 = vadd.s32 %v4667_v24, %v4665_v59 }
 0xf04   : > { %v4653_v18 = vadd.s32 %v4652_v50, %v4650_v32  ;;  %v4694_v46 = vpop.xlane.xlu1 %4693  ;;  %v4802_v50 = vshll.u32 %v4801_v52, 16 }
 0xf05   : > { %4881 = vst.msk [vmem:[%s9456_s14 + $0x8] sm:$0xff] %vm4879_vm4, %v4668_v45  ;;  %vm4897_vm5 = vcmp.eq.s32.totalorder %v9454_v39, %v4668_v45  ;;  %v4695_v42 = vcvt.f32.s32 %v4694_v46  ;;  %v4679_v7 = vpop.xlane.xlu0 %4678 }
 0xf06   : > { %4880 = vst.msk [vmem:[%s9456_s14] sm:$0xff] %vm4879_vm4, %v4653_v18  ;;  %v4680_v11 = vcvt.f32.s32 %v4679_v7  ;;  %vm4896_vm6 = vcmp.eq.s32.totalorder %v9454_v39, %v4653_v18  ;;  %v5507_v57 = vsel %vm4897_vm5, 1.0, %v7069_v34 }
 0xf07   : > { %v4698_v29 = vadd.s32 %v4697_v20, %v4695_v42  ;;  %v5506_v1 = vsel %vm4896_vm6, 1.0, %v7069_v34 }
 0xf08   : > { %v4683_v5 = vadd.s32 %v4682_v40, %v4680_v11  ;;  %v4724_v63 = vpop.xlane.xlu1 %4723  ;;  %6309 = vmatprep.mubr.msk.f32.mxu1 %vm4513_vm14, %v5506_v1  ;;  %v4832_v40 = vshll.u32 %v4831_v16, 16 }
 0xf09   : > { %4883 = vst.msk [vmem:[%s9456_s14 + $0x18] sm:$0xff] %vm4879_vm4, %v4698_v29  ;;  %v4725_v10 = vcvt.f32.s32 %v4724_v63  ;;  %6310 = vmatmul.mubr.msk.f32.vlgmr.msra.gmra.mrb[12].mxu1 %vm4513_vm14, %v5507_v57  ;;  %v4709_v58 = vpop.xlane.xlu0 %4708  ;;  %vm4899_vm7 = vcmp.eq.s32.totalorder %v9454_v39, %v4698_v29  ;;  %v4877_v63 = vshll.u32 %v4876_v30, 16 }
 0xf0a   : > { %4882 = vst.msk [vmem:[%s9456_s14 + $0x10] sm:$0xff] %vm4879_vm4, %v4683_v5  ;;  %v4710_v12 = vcvt.f32.s32 %v4709_v58  ;;  %vm4898_vm8 = vcmp.eq.s32.totalorder %v9454_v39, %v4683_v5  ;;  %v5509_v44 = vsel %vm4899_vm7, 1.0, %v7069_v34 }
 0xf0b   : > { %v4728_v61 = vadd.s32 %v4727_v3, %v4725_v10  ;;  %v5508_v28 = vsel %vm4898_vm8, 1.0, %v7069_v34 }
 0xf0c   : > { %v4713_v33 = vadd.s32 %v4712_v13, %v4710_v12  ;;  %v4754_v9 = vpop.xlane.xlu1 %4753  ;;  %6312 = vmatprep.mubr.msk.f32.mxu1 %vm4513_vm14, %v5508_v28 }
 0xf0d   : > { %4885 = vst.msk [vmem:[%s9456_s14 + $0x28] sm:$0xff] %vm4879_vm4, %v4728_v61  ;;  %v4755_v26 = vcvt.f32.s32 %v4754_v9  ;;  %6313 = vmatmul.mubr.msk.f32.gmra.mrb[14].mxu1 %vm4513_vm14, %v5509_v44  ;;  %v4739_v2 = vpop.xlane.xlu0 %4738  ;;  %vm4901_vm9 = vcmp.eq.s32.totalorder %v9454_v39, %v4728_v61 }
 0xf0e   : > { %4884 = vst.msk [vmem:[%s9456_s14 + $0x20] sm:$0xff] %vm4879_vm4, %v4713_v33  ;;  %v4740_v27 = vcvt.f32.s32 %v4739_v2  ;;  %vm4900_vm10 = vcmp.eq.s32.totalorder %v9454_v39, %v4713_v33  ;;  %v5511_v53 = vsel %vm4901_vm9, 1.0, %v7069_v34 }
 0xf0f   : > { %v4758_v19 = vadd.s32 %v4757_v62, %v4755_v26  ;;  %v5510_v0 = vsel %vm4900_vm10, 1.0, %v7069_v34 }
 0xf10   : > { %v4743_v47 = vadd.s32 %v4742_v17, %v4740_v27  ;;  %v4784_v43 = vpop.xlane.xlu1 %4783  ;;  %6315 = vmatprep.mubr.msk.f32.mxu1 %vm4513_vm14, %v5510_v0 }
 0xf11   : > { %4887 = vst.msk [vmem:[%s9456_s14 + $0x38] sm:$0xff] %vm4879_vm4, %v4758_v19  ;;  %v4785_v49 = vcvt.f32.s32 %v4784_v43  ;;  %6316 = vmatmul.mubr.msk.f32.gmra.mrb[16].mxu1 %vm4513_vm14, %v5511_v53  ;;  %v4769_v56 = vpop.xlane.xlu0 %4768  ;;  %vm4903_vm11 = vcmp.eq.s32.totalorder %v9454_v39, %v4758_v19 }
 0xf12   : > { %4886 = vst.msk [vmem:[%s9456_s14 + $0x30] sm:$0xff] %vm4879_vm4, %v4743_v47  ;;  %v4770_v6 = vcvt.f32.s32 %v4769_v56  ;;  %vm4902_vm12 = vcmp.eq.s32.totalorder %v9454_v39, %v4743_v47  ;;  %v5513_v24 = vsel %vm4903_vm11, 1.0, %v7069_v34 }
 0xf13   : > { %v4788_v54 = vadd.s32 %v4787_v4, %v4785_v49  ;;  %v5512_v14 = vsel %vm4902_vm12, 1.0, %v7069_v34 }
 0xf14   : > { %v4773_v41 = vadd.s32 %v4772_v31, %v4770_v6  ;;  %v4814_v21 = vpop.xlane.xlu1 %4813  ;;  %6318 = vmatprep.mubr.msk.f32.mxu1 %vm4513_vm14, %v5512_v14 }
 0xf15   : > { %4889 = vst.msk [vmem:[%s9456_s14 + $0x48] sm:$0xff] %vm4879_vm4, %v4788_v54  ;;  %v4815_v59 = vcvt.f32.s32 %v4814_v21  ;;  %6319 = vmatmul.mubr.msk.f32.gmra.mrb[18].mxu1 %vm4513_vm14, %v5513_v24  ;;  %v4799_v38 = vpop.xlane.xlu0 %4798  ;;  %vm4905_vm13 = vcmp.eq.s32.totalorder %v9454_v39, %v4788_v54 }
 0xf16   : > { %4888 = vst.msk [vmem:[%s9456_s14 + $0x40] sm:$0xff] %vm4879_vm4, %v4773_v41  ;;  %v4800_v60 = vcvt.f32.s32 %v4799_v38  ;;  %vm4904_vm15 = vcmp.eq.s32.totalorder %v9454_v39, %v4773_v41  ;;  %v5515_v20 = vsel %vm4905_vm13, 1.0, %v7069_v34 }
 0xf17   : > { %v4818_v32 = vadd.s32 %v4817_v15, %v4815_v59  ;;  %v5514_v45 = vsel %vm4904_vm15, 1.0, %v7069_v34 }
 0xf18   : > { %v4803_v18 = vadd.s32 %v4802_v50, %v4800_v60  ;;  %v4844_v46 = vpop.xlane.xlu1 %4843  ;;  %6321 = vmatprep.mubr.msk.f32.mxu1 %vm4513_vm14, %v5514_v45 }
 0xf19   : > { %4891 = vst.msk [vmem:[%s9456_s14 + $0x58] sm:$0xff] %vm4879_vm4, %v4818_v32  ;;  %v4845_v42 = vcvt.f32.s32 %v4844_v46  ;;  %6322 = vmatmul.mubr.msk.f32.gmra.mrb[20].mxu1 %vm4513_vm14, %v5515_v20  ;;  %v4829_v7 = vpop.xlane.xlu0 %4828  ;;  %vm4907_vm0 = vcmp.eq.s32.totalorder %v9454_v39, %v4818_v32 }
 0xf1a   : > { %4890 = vst.msk [vmem:[%s9456_s14 + $0x50] sm:$0xff] %vm4879_vm4, %v4803_v18  ;;  %v4830_v25 = vcvt.f32.s32 %v4829_v7  ;;  %vm4906_vm2 = vcmp.eq.s32.totalorder %v9454_v39, %v4803_v18  ;;  %v5517_v5 = vsel %vm4907_vm0, 1.0, %v7069_v34 }
 0xf1b   : > { %v4848_v11 = vadd.s32 %v4847_v51, %v4845_v42  ;;  %v5516_v29 = vsel %vm4906_vm2, 1.0, %v7069_v34 }
 0xf1c   : > { %v4833_v1 = vadd.s32 %v4832_v40, %v4830_v25  ;;  %v4874_v57 = vpop.xlane.xlu1 %4873  ;;  %6324 = vmatprep.mubr.msk.f32.mxu1 %vm4513_vm14, %v5516_v29 }
 0xf1d   : > { %4893 = vst.msk [vmem:[%s9456_s14 + $0x68] sm:$0xff] %vm4879_vm4, %v4848_v11  ;;  %v4875_v35 = vcvt.f32.s32 %v4874_v57  ;;  %6325 = vmatmul.mubr.msk.f32.gmra.mrb[22].mxu1 %vm4513_vm14, %v5517_v5  ;;  %v4859_v3 = vpop.xlane.xlu0 %4858  ;;  %vm4909_vm3 = vcmp.eq.s32.totalorder %v9454_v39, %v4848_v11 }
 0xf1e   : > { %4892 = vst.msk [vmem:[%s9456_s14 + $0x60] sm:$0xff] %vm4879_vm4, %v4833_v1  ;;  %v4860_v10 = vcvt.f32.s32 %v4859_v3  ;;  %vm4908_vm5 = vcmp.eq.s32.totalorder %v9454_v39, %v4833_v1  ;;  %v5519_v12 = vsel %vm4909_vm3, 1.0, %v7069_v34 }
 0xf1f   : > { %v4878_v58 = vadd.s32 %v4877_v63, %v4875_v35  ;;  %v5518_v13 = vsel %vm4908_vm5, 1.0, %v7069_v34 }
 0xf20   : > { %v4863_v22 = vadd.s32 %v4862_v48, %v4860_v10  ;;  %6327 = vmatprep.mubr.msk.f32.mxu1 %vm4513_vm14, %v5518_v13 }
 0xf21   : > { %4895 = vst.msk [vmem:[%s9456_s14 + $0x78] sm:$0xff] %vm4879_vm4, %v4878_v58  ;;  %vm4911_vm6 = vcmp.eq.s32.totalorder %v9454_v39, %v4878_v58  ;;  %6328 = vmatmul.mubr.msk.f32.gmra.mrb[24].mxu1 %vm4513_vm14, %v5519_v12 }
 0xf22   : > { %4894 = vst.msk [vmem:[%s9456_s14 + $0x70] sm:$0xff] %vm4879_vm4, %v4863_v22  ;;  %vm4910_vm7 = vcmp.eq.s32.totalorder %v9454_v39, %v4863_v22  ;;  %v5521_v28 = vsel %vm4911_vm6, 1.0, %v7069_v34 }
 0xf23   : > { %v5520_v61 = vsel %vm4910_vm7, 1.0, %v7069_v34 }
 0xf24   : > { %6330 = vmatprep.mubr.msk.f32.mxu1 %vm4513_vm14, %v5520_v61 }
 0xf25   : > { %6331 = vmatmul.mubr.msk.f32.gmra.mrb[26].mxu1 %vm4513_vm14, %v5521_v28 }
 0xfdc   : > { %v6311_v33 = vpop.f32.mrb[12].mxu1 }
 0xfdd   : > { %5139 = vst.msk [vmem:[%s9457_s0 + $0x8] sm:$0xff] %vm822_vm1, %v6311_v33  ;;  %v5059_v9 = vpop.f32.mrb[13].mxu1 }
 0xfde   : > { %5138 = vst.msk [vmem:[%s9457_s0] sm:$0xff] %vm822_vm1, %v5059_v9 }
 0xfe0   : > { %v6314_v39 = vpop.f32.mrb[14].mxu1 }
 0xfe1   : > { %5141 = vst.msk [vmem:[%s9457_s0 + $0x18] sm:$0xff] %vm822_vm1, %v6314_v39  ;;  %v5069_v34 = vpop.f32.mrb[15].mxu1 }
 0xfe2   : > { %5140 = vst.msk [vmem:[%s9457_s0 + $0x10] sm:$0xff] %vm822_vm1, %v5069_v34 }
 0xfe4   : > { %v6317_v44 = vpop.f32.mrb[16].mxu1 }
 0xfe5   : > { %5143 = vst.msk [vmem:[%s9457_s0 + $0x28] sm:$0xff] %vm822_vm1, %v6317_v44  ;;  %v5079_v62 = vpop.f32.mrb[17].mxu1 }
 0xfe6   : > { %5142 = vst.msk [vmem:[%s9457_s0 + $0x20] sm:$0xff] %vm822_vm1, %v5079_v62 }
 0xfe8   : > { %v6320_v55 = vpop.f32.mrb[18].mxu1 }
 0xfe9   : > { %5145 = vst.msk [vmem:[%s9457_s0 + $0x38] sm:$0xff] %vm822_vm1, %v6320_v55  ;;  %v5089_v26 = vpop.f32.mrb[19].mxu1 }
 0xfea   : > { %5144 = vst.msk [vmem:[%s9457_s0 + $0x30] sm:$0xff] %vm822_vm1, %v5089_v26 }
 0xfec   : > { %v6323_v2 = vpop.f32.mrb[20].mxu1 }
 0xfed   : > { %5147 = vst.msk [vmem:[%s9457_s0 + $0x48] sm:$0xff] %vm822_vm1, %v6323_v2  ;;  %v5099_v17 = vpop.f32.mrb[21].mxu1 }
 0xfee   : > { %5146 = vst.msk [vmem:[%s9457_s0 + $0x40] sm:$0xff] %vm822_vm1, %v5099_v17 }
 0xff0   : > { %v6326_v8 = vpop.f32.mrb[22].mxu1 }
 0xff1   : > { %5149 = vst.msk [vmem:[%s9457_s0 + $0x58] sm:$0xff] %vm822_vm1, %v6326_v8  ;;  %v5109_v27 = vpop.f32.mrb[23].mxu1 }
 0xff2   : > { %5148 = vst.msk [vmem:[%s9457_s0 + $0x50] sm:$0xff] %vm822_vm1, %v5109_v27 }
 0xff4   : > { %v6329_v19 = vpop.f32.mrb[24].mxu1 }
 0xff5   : > { %5151 = vst.msk [vmem:[%s9457_s0 + $0x68] sm:$0xff] %vm822_vm1, %v6329_v19  ;;  %v5119_v0 = vpop.f32.mrb[25].mxu1 }
 0xff6   : > { %5150 = vst.msk [vmem:[%s9457_s0 + $0x60] sm:$0xff] %vm822_vm1, %v5119_v0 }
 0xff8   : > { %v6332_v47 = vpop.f32.mrb[26].mxu1 }
 0xff9   : > { %5153 = vst.msk [vmem:[%s9457_s0 + $0x78] sm:$0xff] %vm822_vm1, %v6332_v47  ;;  %v5129_v43 = vpop.f32.mrb[27].mxu1 }
 0xffa   : > { %5152 = vst.msk [vmem:[%s9457_s0 + $0x70] sm:$0xff] %vm822_vm1, %v5129_v43 }
 0xffb PF: > { %s9458_s20 = sld [smem:[#allocation3_spill]] }
0x1001   : > { %s31_s1 = sadd.s32 1, %s9458_s20  }
0x1002   : > { %p28_p6 = scmp.ge.s32.totalorder %s31_s1, 4  }
0x1004   :  { %30 = sbr.rel (!%p28_p6) target bundleno = 12 (0xc), region = 171 }

</bundles_post_ra>
